<compile_context>
chip_gen: v7x
topology: tpu7x:2x2x1
jax: 0.10.0
libtpu: 0.0.40
codegen_flags: <defaults>
</compile_context>

<pallas_src>
import functools

import jax
import jax.numpy as jnp
from jax.experimental import pallas as pl
from jax.experimental.pallas import tpu as pltpu


def ffn_kernel(gamma_ref, beta_ref,                        # SMEM scalars
               x_ref, w1_ref, b1_ref, w2_ref, b2_ref,      # VMEM inputs
               o_ref,                                       # VMEM output
               acc_ref,                                     # VMEM scratch (tm, D) f32
               *, hidden_dim, matmul_dtype):
    k = pl.program_id(1)
    nk = pl.num_programs(1)

    @pl.when(k == 0)
    def _init():
        acc_ref[...] = jnp.zeros_like(acc_ref)

    x = x_ref[...]                                          # (tm, D) f32
    xm = x.astype(matmul_dtype)

    # fc1 column-block + bias + ReLU (f32 accumulation on the MXU).
    h = jnp.dot(xm, w1_ref[...], preferred_element_type=jnp.float32)
    h = jnp.maximum(h + b1_ref[...], 0.0)                   # (tm, th) f32

    # fc2 row-block, accumulated over the H axis.
    acc_ref[...] += jnp.dot(h.astype(matmul_dtype), w2_ref[...],
                            preferred_element_type=jnp.float32)

    @pl.when(k == nk - 1)
    def _epilogue():
        y = acc_ref[...] + b2_ref[...] + x                  # residual add, f32

        # Norm: mean + unbiased variance (torch.var default) over the last dim,
        # computed from two independent reductions (sum, sum of squares).
        d = jnp.float32(hidden_dim)
        s = jnp.sum(y, axis=-1, keepdims=True)
        ss = jnp.sum(y * y, axis=-1, keepdims=True)
        mu = s / d
        var = jnp.maximum(ss - s * mu, 0.0) / jnp.float32(hidden_dim - 1)
        y_norm = (y - mu) * jax.lax.rsqrt(var + 1e-8)

        o_ref[...] = (gamma_ref[0] * y_norm + beta_ref[0]).astype(o_ref.dtype)


def _pick_tile_h(H, tile_h):
    """Largest multiple of 128 that divides H and is <= tile_h (else full H)."""
    if H <= tile_h:
        return H
    start = (tile_h // 128) * 128
    for cand in range(start, 127, -128):
        if H % cand == 0:
            return cand
    return H


def ffn_forward(x, params, *, tile_m=256, tile_h=2048, matmul_dtype=jnp.bfloat16):
    """x: [B, S, D] float32. params: dict with w1 [D,4D], b1, w2 [4D,D], b2, gamma, beta."""
    B, S, D = x.shape
    M = B * S
    H = params["w1"].shape[1]

    # Row tile: multiple of 8 sublanes, no larger than the (padded) row count.
    tm = min(tile_m, max(8, -(-M // 8) * 8))
    tm = max(8, (tm // 8) * 8)
    M_pad = -(-M // tm) * tm

    th = _pick_tile_h(H, tile_h)
    n_k = H // th
    full_weights_resident = (th == H)

    x2d = x.reshape(M, D).astype(jnp.float32)
    if M_pad != M:
        x2d = jnp.pad(x2d, ((0, M_pad - M), (0, 0)))

    # Pre-cast weights once so the kernel DMAs matmul-dtype (bf16) tiles.
    w1 = params["w1"].astype(matmul_dtype)
    w2 = params["w2"].astype(matmul_dtype)
    b1 = params["b1"].reshape(1, H).astype(jnp.float32)
    b2 = params["b2"].reshape(1, D).astype(jnp.float32)
    gamma = params["gamma"].reshape(1).astype(jnp.float32)
    beta = params["beta"].reshape(1).astype(jnp.float32)

    # Explicit VMEM budget: tiles + weights + intermediates, 2x headroom, capped
    # below v7x's 64 MiB physical VMEM.
    mm_bytes = jnp.dtype(matmul_dtype).itemsize
    w_bufs = 1 if full_weights_resident else 2
    est_vmem = (
        2 * tm * D * 4                      # x tile (double-buffered)
        + 2 * tm * D * 4                    # output tile
        + w_bufs * D * th * mm_bytes        # w1 block(s)
        + w_bufs * th * D * mm_bytes        # w2 block(s)
        + 2 * (th + D) * 4                  # biases
        + tm * D * 4                        # f32 accumulator scratch
        + tm * th * 4                       # fc1 intermediate
    )
    vmem_limit = int(min(max(2 * est_vmem, 32 * 1024 * 1024), 48 * 1024 * 1024))

    grid = (M_pad // tm, n_k)

    def build(single_buffer_weights):
        wkw = {}
        if single_buffer_weights:
            # Weight/bias block indices never change -> single buffer is enough.
            wkw = dict(pipeline_mode=pl.Buffered(1))
        return pl.pallas_call(
            functools.partial(ffn_kernel, hidden_dim=D, matmul_dtype=matmul_dtype),
            out_shape=jax.ShapeDtypeStruct((M_pad, D), x.dtype),
            grid_spec=pltpu.PrefetchScalarGridSpec(
                num_scalar_prefetch=0,
                grid=grid,
                in_specs=[
                    pl.BlockSpec(memory_space=pltpu.SMEM),               # gamma (1,)
                    pl.BlockSpec(memory_space=pltpu.SMEM),               # beta  (1,)
                    pl.BlockSpec((tm, D), lambda i, k: (i, 0)),          # x row tile
                    pl.BlockSpec((D, th), lambda i, k: (0, k), **wkw),   # w1 column block
                    pl.BlockSpec((1, th), lambda i, k: (0, k), **wkw),   # b1 block
                    pl.BlockSpec((th, D), lambda i, k: (k, 0), **wkw),   # w2 row block
                    pl.BlockSpec((1, D), lambda i, k: (0, 0), **wkw),    # b2
                ],
                out_specs=pl.BlockSpec((tm, D), lambda i, k: (i, 0)),
                scratch_shapes=[pltpu.VMEM((tm, D), jnp.float32)],
            ),
            compiler_params=pltpu.CompilerParams(
                dimension_semantics=("parallel", "arbitrary"),
                vmem_limit_bytes=vmem_limit,
            ),
        )

    args = (gamma, beta, x2d, w1, b1, w2, b2)
    if full_weights_resident:
        try:
            out = build(True)(*args)
        except Exception:
            # pipeline_mode=pl.Buffered(1) not supported on this jax build: fall back
            # to default double buffering (costs VMEM only; semantics identical).
            out = build(False)(*args)
    else:
        out = build(False)(*args)

    if M_pad != M:
        out = out[:M]
    return out.reshape(B, S, D)


def init_params(key, hidden_dim):
    """Deterministic init mirroring the PyTorch module.

    fc1: Linear(D, 4D) -> weight stored [D, 4D] (transposed), xavier normal
    fc2: Linear(4D, D) -> weight stored [4D, D] (transposed), xavier normal
    Norm: scalar gamma=1.0, beta=0.0
    """
    D = hidden_dim
    H = 4 * D
    k1, k2, k3, k4 = jax.random.split(key, 4)

    std1 = (2.0 / (D + H)) ** 0.5
    std2 = (2.0 / (H + D)) ** 0.5
    w1 = std1 * jax.random.normal(k1, (D, H), dtype=jnp.float32)
    w2 = std2 * jax.random.normal(k2, (H, D), dtype=jnp.float32)
    # PyTorch Linear default bias init: U(-1/sqrt(fan_in), 1/sqrt(fan_in))
    b1 = jax.random.uniform(k3, (H,), jnp.float32, -1.0 / D ** 0.5, 1.0 / D ** 0.5)
    b2 = jax.random.uniform(k4, (D,), jnp.float32, -1.0 / H ** 0.5, 1.0 / H ** 0.5)

    return {
        "w1": w1, "b1": b1,
        "w2": w2, "b2": b2,
        "gamma": jnp.array(1.0, jnp.float32),
        "beta": jnp.array(0.0, jnp.float32),
    }


if __name__ == "__main__":
    # M = B*S = 512 rows -> two 256-row tiles (parallel axis has >= 2 steps); H = 1024.
    B, S, D = 4, 128, 256
    key = jax.random.PRNGKey(0)
    kx, kp = jax.random.split(key)

    x = jax.random.normal(kx, (B, S, D), dtype=jnp.float32)
    params = init_params(kp, D)

    # Pure-JAX f32 reference (dropout=False path of the PyTorch module).
    x2 = x.reshape(-1, D)
    h = jnp.maximum(x2 @ params["w1"] + params["b1"], 0.0)
    y = h @ params["w2"] + params["b2"] + x2
    mu = jnp.mean(y, axis=-1, keepdims=True)
    var = jnp.sum((y - mu) ** 2, axis=-1, keepdims=True) / (D - 1)  # unbiased, like torch.var
    ref = (params["gamma"] * (y - mu) / jnp.sqrt(var + 1e-8) + params["beta"]).reshape(B, S, D)

    # Default fast path: bf16 matmuls with f32 accumulation, weights resident, tm=256.
    out = jax.block_until_ready(ffn_forward(x, params))
    assert out.shape == x.shape
    assert jnp.allclose(out, ref, atol=5e-2, rtol=5e-2), "bf16 path mismatch vs reference"

    # H-tiled accumulator path (inner grid axis over H) in f32: tight check of the
    # accumulation / epilogue logic.
    out_f32 = jax.block_until_ready(
        ffn_forward(x, params, tile_m=128, tile_h=512, matmul_dtype=jnp.float32))
    assert jnp.allclose(out_f32, ref, atol=1e-3, rtol=1e-3), "f32 tiled path mismatch vs reference"

    print("KERNEL_OK")
</pallas_src>

<mosaic_0001>
module attributes {stable_mosaic.version = 11 : i64} {
  func.func @ffn_kernel(%arg0: i32, %arg1: i32, %arg2: memref<1xf32, #tpu.memory_space<smem>>, %arg3: memref<1xf32, #tpu.memory_space<smem>>, %arg4: memref<256x256xf32, #tpu.memory_space<vmem>>, %arg5: memref<256x1024xbf16, #tpu.memory_space<vmem>>, %arg6: memref<1x1024xf32, #tpu.memory_space<vmem>>, %arg7: memref<1024x256xbf16, #tpu.memory_space<vmem>>, %arg8: memref<1x256xf32, #tpu.memory_space<vmem>>, %arg9: memref<256x256xf32, #tpu.memory_space<vmem>>, %arg10: memref<256x256xf32, #tpu.memory_space<vmem>>) attributes {dimension_semantics = [#tpu.dimension_semantics<parallel>, #tpu.dimension_semantics<arbitrary>], iteration_bounds = array<i64: 2, 1>, scalar_prefetch = 0 : i64, scratch_operands = 1 : i64, tpu.core_type = #tpu.core_type<tc>, window_params = [{transform_indices = @transform_0, window_bounds = array<i64: 1>}, {transform_indices = @transform_1, window_bounds = array<i64: 1>}, {transform_indices = @transform_2, window_bounds = array<i64: 256, 256>}, {pipeline_mode = #tpu.pipeline_mode<synchronous>, transform_indices = @transform_3, window_bounds = array<i64: 256, 1024>}, {pipeline_mode = #tpu.pipeline_mode<synchronous>, transform_indices = @transform_4, window_bounds = array<i64: 1, 1024>}, {pipeline_mode = #tpu.pipeline_mode<synchronous>, transform_indices = @transform_5, window_bounds = array<i64: 1024, 256>}, {pipeline_mode = #tpu.pipeline_mode<synchronous>, transform_indices = @transform_6, window_bounds = array<i64: 1, 256>}, {transform_indices = @transform_7, window_bounds = array<i64: 256, 256>}]} {
    %c0_i32 = arith.constant 0 : i32
    %0 = arith.cmpi eq, %arg1, %c0_i32 : i32
    %1 = arith.extui %0 : i1 to i32
    %c0_i32_0 = arith.constant 0 : i32
    %2 = arith.cmpi ne, %1, %c0_i32_0 : i32
    scf.if %2 {
      %cst_16 = arith.constant 0.000000e+00 : f32
      %21 = vector.broadcast %cst_16 : f32 to vector<256x256xf32>
      %c0_17 = arith.constant 0 : index
      %c0_18 = arith.constant 0 : index
      %22 = vector.load %arg10[%c0_17, %c0_18] : memref<256x256xf32, #tpu.memory_space<vmem>>, vector<256x256xf32>
      tpu.vector_store %arg10[%c0_17, %c0_18], %21 {strides = array<i32>} : memref<256x256xf32, #tpu.memory_space<vmem>>, vector<256x256xf32>,
    } else {
    }
    %c0 = arith.constant 0 : index
    %c0_1 = arith.constant 0 : index
    %3 = vector.load %arg4[%c0, %c0_1] : memref<256x256xf32, #tpu.memory_space<vmem>>, vector<256x256xf32>
    %4 = arith.truncf %3 : vector<256x256xf32> to vector<256x256xbf16>
    %c0_2 = arith.constant 0 : index
    %c0_3 = arith.constant 0 : index
    %5 = vector.load %arg5[%c0_2, %c0_3] : memref<256x1024xbf16, #tpu.memory_space<vmem>>, vector<256x1024xbf16>
    %cst = arith.constant dense<0.000000e+00> : vector<256x1024xf32>
    %6 = tpu.matmul %4, %5, %cst {dimension_numbers = #tpu.dot_dimension_numbers<[1], [0], [0], [1], [0, 0, 1, 1], [], []>} : vector<256x256xbf16>, vector<256x1024xbf16>, vector<256x1024xf32> -> vector<256x1024xf32>
    %c0_4 = arith.constant 0 : index
    %c0_5 = arith.constant 0 : index
    %7 = vector.load %arg6[%c0_4, %c0_5] : memref<1x1024xf32, #tpu.memory_space<vmem>>, vector<1x1024xf32>
    %8 = vector.broadcast %7 : vector<1x1024xf32> to vector<256x1024xf32>
    %9 = arith.addf %6, %8 : vector<256x1024xf32>
    %cst_6 = arith.constant 0.000000e+00 : f32
    %10 = vector.broadcast %cst_6 : f32 to vector<256x1024xf32>
    %11 = arith.maximumf %9, %10 : vector<256x1024xf32>
    %c0_7 = arith.constant 0 : index
    %c0_8 = arith.constant 0 : index
    %12 = vector.load %arg10[%c0_7, %c0_8] : memref<256x256xf32, #tpu.memory_space<vmem>>, vector<256x256xf32>
    %13 = arith.truncf %11 : vector<256x1024xf32> to vector<256x1024xbf16>
    %c0_9 = arith.constant 0 : index
    %c0_10 = arith.constant 0 : index
    %14 = vector.load %arg7[%c0_9, %c0_10] : memref<1024x256xbf16, #tpu.memory_space<vmem>>, vector<1024x256xbf16>
    %cst_11 = arith.constant dense<0.000000e+00> : vector<256x256xf32>
    %15 = tpu.matmul %13, %14, %cst_11 {dimension_numbers = #tpu.dot_dimension_numbers<[1], [0], [0], [1], [0, 0, 1, 1], [], []>} : vector<256x1024xbf16>, vector<1024x256xbf16>, vector<256x256xf32> -> vector<256x256xf32>
    %16 = arith.addf %12, %15 : vector<256x256xf32>
    %c0_12 = arith.constant 0 : index
    %c0_13 = arith.constant 0 : index
    %17 = vector.load %arg10[%c0_12, %c0_13] : memref<256x256xf32, #tpu.memory_space<vmem>>, vector<256x256xf32>
    tpu.vector_store %arg10[%c0_12, %c0_13], %16 {strides = array<i32>} : memref<256x256xf32, #tpu.memory_space<vmem>>, vector<256x256xf32>,
    %c0_i32_14 = arith.constant 0 : i32
    %18 = arith.cmpi eq, %arg1, %c0_i32_14 : i32
    %19 = arith.extui %18 : i1 to i32
    %c0_i32_15 = arith.constant 0 : i32
    %20 = arith.cmpi ne, %19, %c0_i32_15 : i32
    scf.if %20 {
      %c0_16 = arith.constant 0 : index
      %c0_17 = arith.constant 0 : index
      %21 = vector.load %arg10[%c0_16, %c0_17] : memref<256x256xf32, #tpu.memory_space<vmem>>, vector<256x256xf32>
      %c0_18 = arith.constant 0 : index
      %c0_19 = arith.constant 0 : index
      %22 = vector.load %arg8[%c0_18, %c0_19] : memref<1x256xf32, #tpu.memory_space<vmem>>, vector<1x256xf32>
      %23 = vector.broadcast %22 : vector<1x256xf32> to vector<256x256xf32>
      %24 = arith.addf %21, %23 : vector<256x256xf32>
      %25 = arith.addf %24, %3 : vector<256x256xf32>
      %cst_20 = arith.constant dense<0.000000e+00> : vector<256xf32>
      %26 = vector.multi_reduction <add>, %25, %cst_20 [1] : vector<256x256xf32> to vector<256xf32>
      %27 = vector.shape_cast %26 : vector<256xf32> to vector<256x1xf32>
      %28 = arith.mulf %25, %25 : vector<256x256xf32>
      %cst_21 = arith.constant dense<0.000000e+00> : vector<256xf32>
      %29 = vector.multi_reduction <add>, %28, %cst_21 [1] : vector<256x256xf32> to vector<256xf32>
      %30 = vector.shape_cast %29 : vector<256xf32> to vector<256x1xf32>
      %cst_22 = arith.constant 2.560000e+02 : f32
      %31 = vector.broadcast %cst_22 : f32 to vector<256x1xf32>
      %32 = arith.divf %27, %31 : vector<256x1xf32>
      %33 = arith.mulf %27, %32 : vector<256x1xf32>
      %34 = arith.subf %30, %33 : vector<256x1xf32>
      %cst_23 = arith.constant 0.000000e+00 : f32
      %35 = vector.broadcast %cst_23 : f32 to vector<256x1xf32>
      %36 = arith.maximumf %34, %35 : vector<256x1xf32>
      %cst_24 = arith.constant 2.550000e+02 : f32
      %37 = vector.broadcast %cst_24 : f32 to vector<256x1xf32>
      %38 = arith.divf %36, %37 : vector<256x1xf32>
      %39 = vector.broadcast %32 : vector<256x1xf32> to vector<256x256xf32>
      %40 = arith.subf %25, %39 : vector<256x256xf32>
      %cst_25 = arith.constant 9.99999993E-9 : f32
      %41 = vector.broadcast %cst_25 : f32 to vector<256x1xf32>
      %42 = arith.addf %38, %41 : vector<256x1xf32>
      %43 = math.rsqrt %42 : vector<256x1xf32>
      %44 = vector.broadcast %43 : vector<256x1xf32> to vector<256x256xf32>
      %45 = arith.mulf %40, %44 : vector<256x256xf32>
      %c0_26 = arith.constant 0 : index
      %46 = memref.load %arg2[%c0_26] : memref<1xf32, #tpu.memory_space<smem>>
      %47 = vector.broadcast %46 : f32 to vector<256x256xf32>
      %48 = arith.mulf %47, %45 : vector<256x256xf32>
      %c0_27 = arith.constant 0 : index
      %49 = memref.load %arg3[%c0_27] : memref<1xf32, #tpu.memory_space<smem>>
      %50 = vector.broadcast %49 : f32 to vector<256x256xf32>
      %51 = arith.addf %48, %50 : vector<256x256xf32>
      %c0_28 = arith.constant 0 : index
      %c0_29 = arith.constant 0 : index
      %52 = vector.load %arg9[%c0_28, %c0_29] : memref<256x256xf32, #tpu.memory_space<vmem>>, vector<256x256xf32>
      tpu.vector_store %arg9[%c0_28, %c0_29], %51 {strides = array<i32>} : memref<256x256xf32, #tpu.memory_space<vmem>>, vector<256x256xf32>,
    } else {
    }
    return
  }
  func.func @transform_0(%arg0: i32, %arg1: i32) -> i32 {
    %c0_i32 = arith.constant 0 : i32
    %c0_i32_0 = arith.constant 0 : i32
    return %c0_i32 : i32
  }
  func.func @transform_1(%arg0: i32, %arg1: i32) -> i32 {
    %c0_i32 = arith.constant 0 : i32
    %c0_i32_0 = arith.constant 0 : i32
    return %c0_i32 : i32
  }
  func.func @transform_2(%arg0: i32, %arg1: i32) -> (i32, i32) {
    %c0_i32 = arith.constant 0 : i32
    %c0_i32_0 = arith.constant 0 : i32
    return %arg0, %c0_i32 : i32, i32
  }
  func.func @transform_3(%arg0: i32, %arg1: i32) -> (i32, i32) {
    %c0_i32 = arith.constant 0 : i32
    %c0_i32_0 = arith.constant 0 : i32
    return %c0_i32, %arg1 : i32, i32
  }
  func.func @transform_4(%arg0: i32, %arg1: i32) -> (i32, i32) {
    %c0_i32 = arith.constant 0 : i32
    %c0_i32_0 = arith.constant 0 : i32
    return %c0_i32, %arg1 : i32, i32
  }
  func.func @transform_5(%arg0: i32, %arg1: i32) -> (i32, i32) {
    %c0_i32 = arith.constant 0 : i32
    %c0_i32_0 = arith.constant 0 : i32
    return %arg1, %c0_i32 : i32, i32
  }
  func.func @transform_6(%arg0: i32, %arg1: i32) -> (i32, i32) {
    %c0_i32 = arith.constant 0 : i32
    %c0_i32_0 = arith.constant 0 : i32
    %c0_i32_1 = arith.constant 0 : i32
    return %c0_i32, %c0_i32_0 : i32, i32
  }
  func.func @transform_7(%arg0: i32, %arg1: i32) -> (i32, i32) {
    %c0_i32 = arith.constant 0 : i32
    %c0_i32_0 = arith.constant 0 : i32
    return %arg0, %c0_i32 : i32, i32
  }
}

module attributes {stable_mosaic.version = 11 : i64} {
  func.func @ffn_kernel(%arg0: i32, %arg1: i32, %arg2: memref<1xf32, #tpu.memory_space<smem>>, %arg3: memref<1xf32, #tpu.memory_space<smem>>, %arg4: memref<256x256xf32, #tpu.memory_space<vmem>>, %arg5: memref<256x1024xbf16, #tpu.memory_space<vmem>>, %arg6: memref<1x1024xf32, #tpu.memory_space<vmem>>, %arg7: memref<1024x256xbf16, #tpu.memory_space<vmem>>, %arg8: memref<1x256xf32, #tpu.memory_space<vmem>>, %arg9: memref<256x256xf32, #tpu.memory_space<vmem>>, %arg10: memref<256x256xf32, #tpu.memory_space<vmem>>) attributes {dimension_semantics = [#tpu.dimension_semantics<parallel>, #tpu.dimension_semantics<arbitrary>], iteration_bounds = array<i64: 2, 1>, scalar_prefetch = 0 : i64, scratch_operands = 1 : i64, tpu.core_type = #tpu.core_type<tc>, window_params = [{transform_indices = @transform_0, window_bounds = array<i64: 1>}, {transform_indices = @transform_1, window_bounds = array<i64: 1>}, {transform_indices = @transform_2, window_bounds = array<i64: 256, 256>}, {transform_indices = @transform_3, window_bounds = array<i64: 256, 1024>}, {transform_indices = @transform_4, window_bounds = array<i64: 1, 1024>}, {transform_indices = @transform_5, window_bounds = array<i64: 1024, 256>}, {pipeline_mode = #tpu.pipeline_mode<synchronous>, transform_indices = @transform_6, window_bounds = array<i64: 1, 256>}, {transform_indices = @transform_7, window_bounds = array<i64: 256, 256>}]} {
    %c0_i32 = arith.constant 0 : i32
    %0 = arith.cmpi eq, %arg1, %c0_i32 : i32
    %1 = arith.extui %0 : i1 to i32
    %c0_i32_0 = arith.constant 0 : i32
    %2 = arith.cmpi ne, %1, %c0_i32_0 : i32
    scf.if %2 {
      %cst_16 = arith.constant 0.000000e+00 : f32
      %21 = vector.broadcast %cst_16 : f32 to vector<256x256xf32>
      %c0_17 = arith.constant 0 : index
      %c0_18 = arith.constant 0 : index
      %22 = vector.load %arg10[%c0_17, %c0_18] : memref<256x256xf32, #tpu.memory_space<vmem>>, vector<256x256xf32>
      tpu.vector_store %arg10[%c0_17, %c0_18], %21 {strides = array<i32>} : memref<256x256xf32, #tpu.memory_space<vmem>>, vector<256x256xf32>,
    } else {
    }
    %c0 = arith.constant 0 : index
    %c0_1 = arith.constant 0 : index
    %3 = vector.load %arg4[%c0, %c0_1] : memref<256x256xf32, #tpu.memory_space<vmem>>, vector<256x256xf32>
    %4 = arith.truncf %3 : vector<256x256xf32> to vector<256x256xbf16>
    %c0_2 = arith.constant 0 : index
    %c0_3 = arith.constant 0 : index
    %5 = vector.load %arg5[%c0_2, %c0_3] : memref<256x1024xbf16, #tpu.memory_space<vmem>>, vector<256x1024xbf16>
    %cst = arith.constant dense<0.000000e+00> : vector<256x1024xf32>
    %6 = tpu.matmul %4, %5, %cst {dimension_numbers = #tpu.dot_dimension_numbers<[1], [0], [0], [1], [0, 0, 1, 1], [], []>} : vector<256x256xbf16>, vector<256x1024xbf16>, vector<256x1024xf32> -> vector<256x1024xf32>
    %c0_4 = arith.constant 0 : index
    %c0_5 = arith.constant 0 : index
    %7 = vector.load %arg6[%c0_4, %c0_5] : memref<1x1024xf32, #tpu.memory_space<vmem>>, vector<1x1024xf32>
    %8 = vector.broadcast %7 : vector<1x1024xf32> to vector<256x1024xf32>
    %9 = arith.addf %6, %8 : vector<256x1024xf32>
    %cst_6 = arith.constant 0.000000e+00 : f32
    %10 = vector.broadcast %cst_6 : f32 to vector<256x1024xf32>
    %11 = arith.maximumf %9, %10 : vector<256x1024xf32>
    %c0_7 = arith.constant 0 : index
    %c0_8 = arith.constant 0 : index
    %12 = vector.load %arg10[%c0_7, %c0_8] : memref<256x256xf32, #tpu.memory_space<vmem>>, vector<256x256xf32>
    %13 = arith.truncf %11 : vector<256x1024xf32> to vector<256x1024xbf16>
    %c0_9 = arith.constant 0 : index
    %c0_10 = arith.constant 0 : index
    %14 = vector.load %arg7[%c0_9, %c0_10] : memref<1024x256xbf16, #tpu.memory_space<vmem>>, vector<1024x256xbf16>
    %cst_11 = arith.constant dense<0.000000e+00> : vector<256x256xf32>
    %15 = tpu.matmul %13, %14, %cst_11 {dimension_numbers = #tpu.dot_dimension_numbers<[1], [0], [0], [1], [0, 0, 1, 1], [], []>} : vector<256x1024xbf16>, vector<1024x256xbf16>, vector<256x256xf32> -> vector<256x256xf32>
    %16 = arith.addf %12, %15 : vector<256x256xf32>
    %c0_12 = arith.constant 0 : index
    %c0_13 = arith.constant 0 : index
    %17 = vector.load %arg10[%c0_12, %c0_13] : memref<256x256xf32, #tpu.memory_space<vmem>>, vector<256x256xf32>
    tpu.vector_store %arg10[%c0_12, %c0_13], %16 {strides = array<i32>} : memref<256x256xf32, #tpu.memory_space<vmem>>, vector<256x256xf32>,
    %c0_i32_14 = arith.constant 0 : i32
    %18 = arith.cmpi eq, %arg1, %c0_i32_14 : i32
    %19 = arith.extui %18 : i1 to i32
    %c0_i32_15 = arith.constant 0 : i32
    %20 = arith.cmpi ne, %19, %c0_i32_15 : i32
    scf.if %20 {
      %c0_16 = arith.constant 0 : index
      %c0_17 = arith.constant 0 : index
      %21 = vector.load %arg10[%c0_16, %c0_17] : memref<256x256xf32, #tpu.memory_space<vmem>>, vector<256x256xf32>
      %c0_18 = arith.constant 0 : index
      %c0_19 = arith.constant 0 : index
      %22 = vector.load %arg8[%c0_18, %c0_19] : memref<1x256xf32, #tpu.memory_space<vmem>>, vector<1x256xf32>
      %23 = vector.broadcast %22 : vector<1x256xf32> to vector<256x256xf32>
      %24 = arith.addf %21, %23 : vector<256x256xf32>
      %25 = arith.addf %24, %3 : vector<256x256xf32>
      %cst_20 = arith.constant dense<0.000000e+00> : vector<256xf32>
      %26 = vector.multi_reduction <add>, %25, %cst_20 [1] : vector<256x256xf32> to vector<256xf32>
      %27 = vector.shape_cast %26 : vector<256xf32> to vector<256x1xf32>
      %28 = arith.mulf %25, %25 : vector<256x256xf32>
      %cst_21 = arith.constant dense<0.000000e+00> : vector<256xf32>
      %29 = vector.multi_reduction <add>, %28, %cst_21 [1] : vector<256x256xf32> to vector<256xf32>
      %30 = vector.shape_cast %29 : vector<256xf32> to vector<256x1xf32>
      %cst_22 = arith.constant 2.560000e+02 : f32
      %31 = vector.broadcast %cst_22 : f32 to vector<256x1xf32>
      %32 = arith.divf %27, %31 : vector<256x1xf32>
      %33 = arith.mulf %27, %32 : vector<256x1xf32>
      %34 = arith.subf %30, %33 : vector<256x1xf32>
      %cst_23 = arith.constant 0.000000e+00 : f32
      %35 = vector.broadcast %cst_23 : f32 to vector<256x1xf32>
      %36 = arith.maximumf %34, %35 : vector<256x1xf32>
      %cst_24 = arith.constant 2.550000e+02 : f32
      %37 = vector.broadcast %cst_24 : f32 to vector<256x1xf32>
      %38 = arith.divf %36, %37 : vector<256x1xf32>
      %39 = vector.broadcast %32 : vector<256x1xf32> to vector<256x256xf32>
      %40 = arith.subf %25, %39 : vector<256x256xf32>
      %cst_25 = arith.constant 9.99999993E-9 : f32
      %41 = vector.broadcast %cst_25 : f32 to vector<256x1xf32>
      %42 = arith.addf %38, %41 : vector<256x1xf32>
      %43 = math.rsqrt %42 : vector<256x1xf32>
      %44 = vector.broadcast %43 : vector<256x1xf32> to vector<256x256xf32>
      %45 = arith.mulf %40, %44 : vector<256x256xf32>
      %c0_26 = arith.constant 0 : index
      %46 = memref.load %arg2[%c0_26] : memref<1xf32, #tpu.memory_space<smem>>
      %47 = vector.broadcast %46 : f32 to vector<256x256xf32>
      %48 = arith.mulf %47, %45 : vector<256x256xf32>
      %c0_27 = arith.constant 0 : index
      %49 = memref.load %arg3[%c0_27] : memref<1xf32, #tpu.memory_space<smem>>
      %50 = vector.broadcast %49 : f32 to vector<256x256xf32>
      %51 = arith.addf %48, %50 : vector<256x256xf32>
      %c0_28 = arith.constant 0 : index
      %c0_29 = arith.constant 0 : index
      %52 = vector.load %arg9[%c0_28, %c0_29] : memref<256x256xf32, #tpu.memory_space<vmem>>, vector<256x256xf32>
      tpu.vector_store %arg9[%c0_28, %c0_29], %51 {strides = array<i32>} : memref<256x256xf32, #tpu.memory_space<vmem>>, vector<256x256xf32>,
    } else {
    }
    return
  }
  func.func @transform_0(%arg0: i32, %arg1: i32) -> i32 {
    %c0_i32 = arith.constant 0 : i32
    %c0_i32_0 = arith.constant 0 : i32
    return %c0_i32 : i32
  }
  func.func @transform_1(%arg0: i32, %arg1: i32) -> i32 {
    %c0_i32 = arith.constant 0 : i32
    %c0_i32_0 = arith.constant 0 : i32
    return %c0_i32 : i32
  }
  func.func @transform_2(%arg0: i32, %arg1: i32) -> (i32, i32) {
    %c0_i32 = arith.constant 0 : i32
    %c0_i32_0 = arith.constant 0 : i32
    return %arg0, %c0_i32 : i32, i32
  }
  func.func @transform_3(%arg0: i32, %arg1: i32) -> (i32, i32) {
    %c0_i32 = arith.constant 0 : i32
    %c0_i32_0 = arith.constant 0 : i32
    return %c0_i32, %arg1 : i32, i32
  }
  func.func @transform_4(%arg0: i32, %arg1: i32) -> (i32, i32) {
    %c0_i32 = arith.constant 0 : i32
    %c0_i32_0 = arith.constant 0 : i32
    return %c0_i32, %arg1 : i32, i32
  }
  func.func @transform_5(%arg0: i32, %arg1: i32) -> (i32, i32) {
    %c0_i32 = arith.constant 0 : i32
    %c0_i32_0 = arith.constant 0 : i32
    return %arg1, %c0_i32 : i32, i32
  }
  func.func @transform_6(%arg0: i32, %arg1: i32) -> (i32, i32) {
    %c0_i32 = arith.constant 0 : i32
    %c0_i32_0 = arith.constant 0 : i32
    %c0_i32_1 = arith.constant 0 : i32
    return %c0_i32, %c0_i32_0 : i32, i32
  }
  func.func @transform_7(%arg0: i32, %arg1: i32) -> (i32, i32) {
    %c0_i32 = arith.constant 0 : i32
    %c0_i32_0 = arith.constant 0 : i32
    return %arg0, %c0_i32 : i32, i32
  }
}

</mosaic_0001>

<bundles_post_ra>
// kernel: tpu_custom_call.1
= control target key start
LH: loop header
LB: loop body
LE: loop exit
PB: predicated region body
PF: predicated region fallthrough
CT: control target
= control target key end

     0   :  { %s8225_s0 = inlined_call_operand.<no memory space> [shape: f32[1], index: 0, kind: input, shape index: {}]   ;;  %s8226_s1 = inlined_call_operand.<no memory space> [shape: f32[1], index: 1, kind: input, shape index: {}]   ;;  %s8227_s2 = inlined_call_operand.hbm [shape: f32[512,256], index: 2, kind: input, shape index: {}]   ;;  %s8228_s3 = inlined_call_operand.hbm [shape: bf16[256,1024], index: 3, kind: input, shape index: {}]   ;;  %s8229_s4 = inlined_call_operand.vmem [shape: f32[1,1024], index: 4, kind: input, shape index: {}]   ;;  %s8230_s5 = inlined_call_operand.hbm [shape: bf16[1024,256], index: 5, kind: input, shape index: {}]   ;;  %s8231_s6 = inlined_call_operand.vmem [shape: f32[1,256], index: 6, kind: input, shape index: {}]   ;;  %s8232_s7 = inlined_call_operand.hbm [shape: f32[512,256], index: 7, kind: output, shape index: {}]  }
   0x1   :  { %12 = sst [smem:[#allocation3]] %s8225_s0 }
   0x2   :  { %13 = sst [smem:[#allocation4]] %s8226_s1 }
   0x3   :  { %14 = vsyncpa [#allocation6], 0 }
   0x4   :  { %16 = vsyncpa [#allocation6 + $0x1], 0 }
   0x5   :  { %17 = vsyncpa [#allocation9], 0 }
   0x6   :  { %18 = vsyncpa [#allocation7], 0 }
   0x7   :  { %20 = vsyncpa [#allocation7 + $0x1], 0  ;;  %s6505_s28 = smov 0   ;;  %s6507_s29 = smov 0  }
   0x8   :  { %s6509_s30 = smov 0   ;;  %s6511_s8 = smov 0  }
   0x9   :  { %s6513_s9 = smov 0   ;;  %s6515_s0 = smov 0  }
   0xa LB: > { %s5387_s1 = sadd.s32 4294967295, %s6445_s0   ;;  %s5388_s10 = sadd.s32 4294967294, %s6445_s0   ;;  %s6445_s0 = sphi %s6515_s0, %s26_s0   ;;  %s6441_s9 = sphi %s6513_s9, %s8332_s9   ;;  %s6437_s8 = sphi %s6511_s8, %s8331_s8   ;;  %s6433_s30 = sphi %s6509_s30, %s8330_s30   ;;  %s6429_s29 = sphi %s6507_s29, %s8329_s29   ;;  %s6425_s28 = sphi %s6505_s28, %s8328_s28  }
   0xb   : > { %p100_p0 = scmp.ne.s32.totalorder %s6429_s29, %s6425_s28  ;;  %p6539_p1 = scmp.eq.s32.totalorder %s5387_s1, 0 }
   0xc   : > { %p6543_p2 = scmp.eq.s32.totalorder %s5387_s1, 1  ;;  %p229_p3 = scmp.eq.s32.totalorder %s5388_s10, 1 }
   0xd   : > { %s8263_s11 = scalar_select %p6539_p1, 1, 0 }
   0xe   : > { %p6549_p4 = por %p6539_p1, %p100_p0  ;;  %p5389_p5 = scmp.ge.s32.totalorder %s6445_s0, 1 }
   0xf   : > { %p6554_p6 = por %p229_p3, %p100_p0  ;;  %p236_p7 = scmp.lt.s32.totalorder %s6445_s0, 3 }
  0x10   : > { %s8265_s13 = scalar_select %p6549_p4, 1, 0 }
  0x11   : > { %s8266_s14 = scalar_select %p6554_p6, 1, 0 }
  0x12   : > { %p6559_p8 = pnand %p5389_p5, %p236_p7  ;;  %s6447_s16 = smov [#allocation8]  }
  0x13   : > { %s257_s17 = sshll.u32 %s6447_s16, 4  ;;  %s6448_s19 = smov [#allocation10]   ;;  %s6563_s17 = int_to_ptr.vmem [resolvable:$true] %s257_s17 }
  0x14   : > { %p5873_p9 = pneg %p6559_p8  ;;  %s282_s20 = sshll.u32 %s6448_s19, 4  ;;  %s6574_s20 = int_to_ptr.vmem [resolvable:$true] %s282_s20 }
  0x15   : > { %s6273_s23 = scalar_lea.hbm %s8228_s3, 16384 }
  0x16   : > { %p6570_p11 = pnand %p5873_p9, %p6539_p1  ;;  %p6274_p12 = scmp.ne.s32.totalorder %s8228_s3, %s6273_s23 }
  0x17   : > { %p6280_p5 = scmp.lt.u32.totalorder %s6273_s23, %s8228_s3 }
  0x18   : > { %p6275_p13 = pneg %p6570_p11 }
  0x1a   : > { %p6276_p0 = pnand %p6275_p13, %p6274_p12 }
  0x1c   : > { %p6277_p3 = pneg %p6276_p0 }
  0x1e   : > { %p6282_p7 = pnand %p6280_p5, %p6277_p3 }
  0x20   : > { %6285 = shalt.err (!%p6282_p7)
}
  0x21   : > { %s6286_s1 = scalar_lea.vmem %s6563_s17, 16384  ;;  %p6294_p1 = scmp.lt.s32.totalorder %s6563_s17, %s6563_s17 }
  0x22   : > { %p6287_p9 = scmp.ne.s32.totalorder %s6563_s17, %s6286_s1  ;;  %p6295_p12 = scmp.lt.s32.totalorder %s6286_s1, %s6286_s1 }
  0x24   : > { %p6289_p10 = pnand %p6287_p9, %p6275_p13  ;;  %p6296_p0 = por %p6295_p12, %p6294_p1 }
  0x26   : > { %p6290_p6 = pneg %p6289_p10 }
  0x28   : > { %p6297_p4 = pnand %p6296_p0, %p6290_p6 }
  0x2a   : > { %6300 = shalt.err (!%p6297_p4)
}
  0x2b   : > { %s6449_s10 = smov 512   ;;  %s6450_s16 = smov 32  }
  0x2c   : > { %5876 = dma.hbm_to_vmem [thread:$0]  (!%p6570_p11), %s8228_s3, 16384, %s6563_s17, [#allocation9], %s6449_s10, %s6449_s10, %s6450_s16  }
  0x2d   : > { %s6301_s24 = scalar_lea.hbm %s8230_s5, 16384 }
  0x2e   : > { %p6302_p1 = scmp.ne.s32.totalorder %s8230_s5, %s6301_s24  ;;  %p6308_p10 = scmp.lt.u32.totalorder %s6301_s24, %s8230_s5 }
  0x30   : > { %p6304_p4 = pnand %p6302_p1, %p6275_p13 }
  0x32   : > { %p6305_p6 = pneg %p6304_p4 }
  0x34   : > { %p6310_p3 = pnand %p6308_p10, %p6305_p6 }
  0x36   : > { %6313 = shalt.err (!%p6310_p3)
}
  0x37   : > { %s6314_s17 = scalar_lea.vmem %s6574_s20, 16384  ;;  %p6322_p12 = scmp.lt.s32.totalorder %s6574_s20, %s6574_s20 }
  0x38   : > { %p6315_p5 = scmp.ne.s32.totalorder %s6574_s20, %s6314_s17  ;;  %p6323_p0 = scmp.lt.s32.totalorder %s6314_s17, %s6314_s17 }
  0x3a   : > { %p6317_p7 = pnand %p6315_p5, %p6275_p13  ;;  %p6324_p1 = por %p6323_p0, %p6322_p12 }
  0x3c   : > { %p6318_p9 = pneg %p6317_p7 }
  0x3e   : > { %p6325_p4 = pnand %p6324_p1, %p6318_p9 }
  0x40   : > { %6328 = shalt.err (!%p6325_p4)
}
  0x41   : > { %s6451_s10 = smov 128   ;;  %s6452_s16 = smov 8  }
  0x42   : > { %5879 = dma.hbm_to_vmem [thread:$0]  (!%p6570_p11), %s8230_s5, 16384, %s6574_s20, [#allocation9], %s6451_s10, %s6451_s10, %s6452_s16  }
  0x43   : > { %s38_s22 = sadd.s32 1, %s6441_s9  ;;  %s87_s23 = sadd.s32 1, %s6433_s30 }
  0x44   : > { %p40_p13 = scmp.ge.s32.totalorder %s38_s22, 2  ;;  %p94_p6 = scmp.ne.s32.totalorder %s6433_s30, %s6429_s29 }
  0x45   : > { %p95_p10 = scmp.eq.s32.totalorder %s6445_s0, 0  ;;  %p5890_p3 = scmp.lt.s32.totalorder %s6445_s0, 2 }
  0x46   : > { %s8334_s22 = smov (%p40_p13, %s38_s22), 0  ;;  %p6638_p7 = por %p6543_p2, %p94_p6 }
  0x47   : > { %p96_p5 = por %p95_p10, %p94_p6  ;;  %s84_s18 = ssub.s32 %s6441_s9, %s8334_s22 }
  0x48   : > { %s8269_s24 = scalar_select %p6638_p7, 1, 0 }
  0x49   : > { %s299_s25 = sand.u32 1, %s6433_s30   ;;  %p85_p9 = scmp.eq.s32.totalorder %s84_s18, 0 }
  0x4a   : > { %s5394_s20 = sshll.u32 %s299_s25, 9  ;;  %s5666_s26 = sshll.u32 %s6441_s9, 13 }
  0x4b   : > { %s6647_s27 = scalar_select %p85_p9, %s6433_s30, %s87_s23  }
  0x4c   : > { %s6652_s10 = scalar_lea.hbm %s8227_s2, %s5666_s26  ;;  %s303_s12 = scalar_lea.vmem [#allocation5], %s5394_s20 }
  0x4d   : > { %s311_s16 = sshll.u32 %s303_s12, 4  ;;  %p6656_p2 = pnand %p5890_p3, %p96_p5  ;;  %s6660_s16 = int_to_ptr.vmem [resolvable:$true] %s311_s16 }
  0x4e   : > { %s6662_s21 = scalar_lea.sflag [#allocation6], %s299_s25  ;;  %s6329_s23 = scalar_lea.hbm %s6652_s10, 8192 }
  0x4f   : > { %p6330_p11 = scmp.ne.s32.totalorder %s6652_s10, %s6329_s23  ;;  %p6331_p12 = pneg %p6656_p2 }
  0x50   : > { %s6334_s26 = scalar_lea.hbm %s8227_s2, 16384  ;;  %p6335_p4 = scmp.lt.u32.totalorder %s6652_s10, %s8227_s2 }
  0x51   : > { %p6332_p0 = pnand %p6331_p12, %p6330_p11  ;;  %p6336_p13 = scmp.lt.u32.totalorder %s6334_s26, %s6329_s23 }
  0x52   : > { %p6338_p10 = scmp.lt.u32.totalorder %s6329_s23, %s6652_s10 }
  0x53   : > { %p6333_p1 = pneg %p6332_p0  ;;  %p6337_p6 = por %p6336_p13, %p6335_p4 }
  0x55   : > { %p6339_p3 = por %p6338_p10, %p6337_p6 }
  0x57   : > { %p6340_p5 = pnand %p6339_p3, %p6333_p1 }
  0x59   : > { %6343 = shalt.err (!%p6340_p5)
}
  0x5a   : > { %s6344_s25 = scalar_lea.vmem %s6660_s16, 8192  ;;  %s6453_s12 = smov [#allocation5]  }
  0x5b   : > { %p6345_p9 = scmp.ne.s32.totalorder %s6660_s16, %s6344_s25  ;;  %s6349_s18 = sshll.u32 %s6453_s12, 4  ;;  %s6350_s18 = int_to_ptr.vmem [resolvable:$false] %s6349_s18 }
  0x5c   : > { %s6351_s20 = scalar_lea.vmem %s6350_s18, 16384  ;;  %p6352_p7 = scmp.lt.s32.totalorder %s6660_s16, %s6350_s18 }
  0x5d   : > { %p6347_p11 = pnand %p6345_p9, %p6331_p12  ;;  %p6353_p4 = scmp.lt.s32.totalorder %s6351_s20, %s6344_s25 }
  0x5f   : > { %p6348_p0 = pneg %p6347_p11  ;;  %p6354_p13 = por %p6353_p4, %p6352_p7 }
  0x61   : > { %p6355_p6 = pnand %p6354_p13, %p6348_p0 }
  0x63   : > { %6358 = shalt.err (!%p6355_p6)
}
  0x64   : > { %s6454_s23 = smov 256   ;;  %s6455_s26 = smov 16  }
  0x65   : > { %5883 = dma.hbm_to_vmem [thread:$0]  (!%p6656_p2), %s6652_s10, 8192, %s6660_s16, %s6662_s21, %s6454_s23, %s6454_s23, %s6455_s26  }
  0x66   : > { %323 = sbr.rel (%p6559_p8) target bundleno = 1320 (0x528), region = 48 }
  0x6d   : > { %s6693_s1 = sand.u32 1, %s6429_s29   ;;  %p8271_p7 = scmp.ne.s32.totalorder %s8265_s13, 0 }
  0x6e   : > { %s5399_s17 = sshll.u32 %s6693_s1, 9  ;;  %s326_s25 = scalar_lea.sflag [#allocation6], %s6693_s1 }
  0x6f   : > { %s6699_s12 = scalar_lea.vmem [#allocation5], %s5399_s17 }
  0x70   : > { %6412 = dma.done.wait (%p8271_p7), %s326_s25, 8192  }
  0x71   : > { %6414 = vsyncadd (%p8271_p7), %s326_s25, 4294959104  ;;  %p8272_p2 = scmp.ne.s32.totalorder %s8263_s11, 0 }
  0x73   : > { %6416 = dma.done.wait (%p8272_p2), [#allocation9], 32768  }
  0x74   : > { %6418 = vsyncadd (%p8272_p2), [#allocation9], 4294934528  ;;  %v545_v0 = vld [vmem:[#allocation8] sm:$0xff]  ;;  %v450_v17 = vld [vmem:[%s6699_s12 + $0x8] sm:$0xff]  ;;  %s5060_s21 = sld [smem:[#allocation3]]  ;;  %s7796_s20 = scalar_lea.vmem [#allocation11], %s5399_s17 }
  0x75   : > { %v549_v1 = vld [vmem:[#allocation8 + $0x20] sm:$0xff]  ;;  %v452_v18 = vld [vmem:[%s6699_s12 + $0x18] sm:$0xff]  ;;  %s5126_s18 = sld [smem:[#allocation4]]  ;;  %s5668_s23 = sshll.u32 %s6437_s8, 13 }
  0x76   : > { %v553_v2 = vld [vmem:[#allocation8 + $0x40] sm:$0xff]  ;;  %v5404_v3 = vcombine.high %v545_v0, %v549_v1  ;;  %v5403_v4 = vcombine.low %v545_v0, %v549_v1  ;;  %v6711_v20 = vpack.c.bf16 %v452_v18, %v450_v17  ;;  %v546_v1 = vld [vmem:[#allocation8 + $0x8] sm:$0xff]  ;;  %s5271_s26 = sshll.u32 %s7796_s20, 4  ;;  %s5257_s8 = scalar_lea.sflag [#allocation7], %s6693_s1  ;;  %s8172_s26 = int_to_ptr.vmem [resolvable:$true] %s5271_s26 }
  0x77   : > { %v557_v5 = vld [vmem:[#allocation8 + $0x60] sm:$0xff]  ;;  %s6359_s11 = scalar_lea.vmem %s8172_s26, 8192  ;;  %p8325_p12 = scmp.ne.s32.totalorder %s8269_s24, 0 }
  0x78   : > { %v5412_v6 = vcombine.high %v553_v2, %v557_v5  ;;  %v561_v7 = vld [vmem:[#allocation8 + $0x80] sm:$0xff]  ;;  %1355 = vmatprep.subr.bf16.mxu1 %v5404_v3  ;;  %v5411_v9 = vcombine.low %v553_v2, %v557_v5  ;;  %1387 = vmatprep.mubr.bf16.mxu1 %v6711_v20  ;;  %v550_v2 = vld [vmem:[#allocation8 + $0x28] sm:$0xff]  ;;  %v451_v5 = vld [vmem:[%s6699_s12 + $0x10] sm:$0xff]  ;;  %p6360_p8 = scmp.ne.s32.totalorder %s8172_s26, %s6359_s11  ;;  %s6456_s13 = smov [#allocation11]  }
  0x79   : > { %v565_v8 = vld [vmem:[#allocation8 + $0xa0] sm:$0xff]  ;;  %1356 = vmatpush1.bf16.msra.mxu1 %v5403_v4  ;;  %s6363_s15 = sshll.u32 %s6456_s13, 4  ;;  %s6364_s15 = int_to_ptr.vmem [resolvable:$false] %s6363_s15 }
  0x7a   : > { %1357 = vmatprep.subr.bf16.mxu1 %v5412_v6  ;;  %v5420_v10 = vcombine.high %v561_v7, %v565_v8  ;;  %v569_v11 = vld [vmem:[#allocation8 + $0xc0] sm:$0xff]  ;;  %v5419_v13 = vcombine.low %v561_v7, %v565_v8  ;;  %v454_v6 = vld [vmem:[%s6699_s12 + $0x28] sm:$0xff]  ;;  %v456_v7 = vld [vmem:[%s6699_s12 + $0x38] sm:$0xff]  ;;  %p6361_p1 = pnand %p6360_p8, %p8325_p12  ;;  %s6365_s10 = scalar_lea.vmem %s6364_s15, 16384 }
  0x7b   : > { %v573_v12 = vld [vmem:[#allocation8 + $0xe0] sm:$0xff]  ;;  %p6366_p3 = scmp.lt.s32.totalorder %s8172_s26, %s6364_s15  ;;  %p6367_p5 = scmp.lt.s32.totalorder %s6365_s10, %s6359_s11 }
  0x7c   : > { %v5428_v14 = vcombine.high %v569_v11, %v573_v12  ;;  %v577_v15 = vld [vmem:[#allocation8 + $0x100] sm:$0xff]  ;;  %v5427_v19 = vcombine.low %v569_v11, %v573_v12  ;;  %v5406_v11 = vcombine.high %v546_v1, %v550_v2  ;;  %p6362_p10 = pneg %p6361_p1 }
  0x7d   : > { %1358 = vmatpush1.bf16.msra.mxu1 %v5411_v9  ;;  %v581_v16 = vld [vmem:[#allocation8 + $0x120] sm:$0xff]  ;;  %v554_v9 = vld [vmem:[#allocation8 + $0x48] sm:$0xff]  ;;  %p6368_p9 = por %p6367_p5, %p6366_p3 }
  0x7e   : > { %1359 = vmatprep.subr.bf16.mxu1 %v5420_v10  ;;  %v5436_v21 = vcombine.high %v577_v15, %v581_v16  ;;  %v585_v22 = vld [vmem:[#allocation8 + $0x140] sm:$0xff]  ;;  %v5435_v24 = vcombine.low %v577_v15, %v581_v16  ;;  %v558_v10 = vld [vmem:[#allocation8 + $0x68] sm:$0xff] }
  0x7f   : > { %v589_v23 = vld [vmem:[#allocation8 + $0x160] sm:$0xff]  ;;  %v562_v15 = vld [vmem:[#allocation8 + $0x88] sm:$0xff]  ;;  %v5414_v17 = vcombine.high %v554_v9, %v558_v10  ;;  %p6369_p11 = pnand %p6368_p9, %p6362_p10 }
  0x80   : > { %v5444_v25 = vcombine.high %v585_v22, %v589_v23  ;;  %v593_v26 = vld [vmem:[#allocation8 + $0x180] sm:$0xff]  ;;  %v5443_v28 = vcombine.low %v585_v22, %v589_v23  ;;  %v566_v16 = vld [vmem:[#allocation8 + $0xa8] sm:$0xff]  ;;  %v460_v22 = vld [vmem:[%s6699_s12 + $0x58] sm:$0xff] }
  0x81   : > { %1360 = vmatpush1.bf16.msra.mxu1 %v5419_v13  ;;  %v597_v27 = vld [vmem:[#allocation8 + $0x1a0] sm:$0xff]  ;;  %v5405_v13 = vcombine.low %v546_v1, %v550_v2  ;;  %v6727_v23 = vld [vmem:[#allocation8 + $0x10] sm:$0xff] }
  0x82   : > { %1361 = vmatprep.subr.bf16.mxu1 %v5428_v14  ;;  %v5452_v29 = vcombine.high %v593_v26, %v597_v27  ;;  %v601_v30 = vld [vmem:[#allocation8 + $0x1c0] sm:$0xff]  ;;  %v5451_v32 = vcombine.low %v593_v26, %v597_v27  ;;  %v6720_v14 = vpack.c.bf16 %v456_v7, %v454_v6  ;;  %v570_v26 = vld [vmem:[#allocation8 + $0xc8] sm:$0xff]  ;;  %v467_v2 = vld [vmem:[%s6699_s12 + $0x90] sm:$0xff] }
  0x83   : > { %v605_v31 = vld [vmem:[#allocation8 + $0x1e0] sm:$0xff]  ;;  %v574_v27 = vld [vmem:[#allocation8 + $0xe8] sm:$0xff]  ;;  %v472_v6 = vld [vmem:[%s6699_s12 + $0xb8] sm:$0xff] }
  0x84   : > { %v5460_v33 = vcombine.high %v601_v30, %v605_v31  ;;  %v609_v34 = vld [vmem:[#allocation8 + $0x200] sm:$0xff]  ;;  %v5459_v36 = vcombine.low %v601_v30, %v605_v31 }
  0x85   : > { %1362 = vmatpush1.bf16.msra.mxu1 %v5427_v19  ;;  %v613_v35 = vld [vmem:[#allocation8 + $0x220] sm:$0xff]  ;;  %v455_v19 = vld [vmem:[%s6699_s12 + $0x30] sm:$0xff] }
  0x86   : > { %1363 = vmatprep.subr.bf16.mxu1 %v5436_v21  ;;  %v5468_v37 = vcombine.high %v609_v34, %v613_v35  ;;  %v617_v38 = vld [vmem:[#allocation8 + $0x240] sm:$0xff]  ;;  %v5467_v40 = vcombine.low %v609_v34, %v613_v35  ;;  %v458_v21 = vld [vmem:[%s6699_s12 + $0x48] sm:$0xff]  ;;  %v5430_v35 = vcombine.high %v570_v26, %v574_v27 }
  0x87   : > { %v621_v39 = vld [vmem:[#allocation8 + $0x260] sm:$0xff]  ;;  %v6736_v31 = vpack.c.bf16 %v460_v22, %v458_v21  ;;  %v582_v34 = vld [vmem:[#allocation8 + $0x128] sm:$0xff]  ;;  %v471_v21 = vld [vmem:[%s6699_s12 + $0xb0] sm:$0xff] }
  0x88   : > { %v5476_v41 = vcombine.high %v617_v38, %v621_v39  ;;  %v625_v42 = vld [vmem:[#allocation8 + $0x280] sm:$0xff]  ;;  %v5475_v44 = vcombine.low %v617_v38, %v621_v39  ;;  %v462_v38 = vld [vmem:[%s6699_s12 + $0x68] sm:$0xff]  ;;  %v464_v39 = vld [vmem:[%s6699_s12 + $0x78] sm:$0xff] }
  0x89   : > { %1364 = vmatpush1.bf16.msra.mxu1 %v5435_v24  ;;  %v629_v43 = vld [vmem:[#allocation8 + $0x2a0] sm:$0xff]  ;;  %v6729_v24 = vld [vmem:[#allocation8 + $0x30] sm:$0xff] }
  0x8a   : > { %1365 = vmatprep.subr.bf16.mxu1 %v5444_v25  ;;  %v5484_v45 = vcombine.high %v625_v42, %v629_v43  ;;  %v633_v46 = vld [vmem:[#allocation8 + $0x2c0] sm:$0xff]  ;;  %v5483_v48 = vcombine.low %v625_v42, %v629_v43  ;;  %v5413_v25 = vcombine.low %v554_v9, %v558_v10  ;;  %v590_v42 = vld [vmem:[#allocation8 + $0x168] sm:$0xff] }
  0x8b   : > { %v637_v47 = vld [vmem:[#allocation8 + $0x2e0] sm:$0xff]  ;;  %v622_v9 = vld [vmem:[#allocation8 + $0x268] sm:$0xff] }
  0x8c   : > { %v641_v49 = vld [vmem:[#allocation8 + $0x300] sm:$0xff]  ;;  %v5492_v51 = vcombine.high %v633_v46, %v637_v47  ;;  %v5491_v52 = vcombine.low %v633_v46, %v637_v47  ;;  %v594_v47 = vld [vmem:[#allocation8 + $0x188] sm:$0xff] }
  0x8d   : > { %1366 = vmatpush1.bf16.msra.mxu1 %v5443_v28  ;;  %v645_v50 = vld [vmem:[#allocation8 + $0x320] sm:$0xff]  ;;  %v5407_v28 = vcombine.low %v6727_v23, %v6729_v24 }
  0x8e   : > { %1367 = vmatprep.subr.bf16.mxu1 %v5452_v29  ;;  %v649_v53 = vld [vmem:[#allocation8 + $0x340] sm:$0xff]  ;;  %v5500_v55 = vcombine.high %v641_v49, %v645_v50  ;;  %v5499_v56 = vcombine.low %v641_v49, %v645_v50  ;;  %v5422_v29 = vcombine.high %v562_v15, %v566_v16 }
  0x8f   : > { %v653_v54 = vld [vmem:[#allocation8 + $0x360] sm:$0xff] }
  0x90   : > { %v657_v57 = vld [vmem:[#allocation8 + $0x380] sm:$0xff]  ;;  %v5508_v59 = vcombine.high %v649_v53, %v653_v54  ;;  %v5507_v60 = vcombine.low %v649_v53, %v653_v54  ;;  %v468_v53 = vld [vmem:[%s6699_s12 + $0x98] sm:$0xff] }
  0x91   : > { %1368 = vmatpush1.bf16.msra.mxu1 %v5451_v32  ;;  %v661_v58 = vld [vmem:[#allocation8 + $0x3a0] sm:$0xff]  ;;  %v5421_v32 = vcombine.low %v562_v15, %v566_v16  ;;  %v626_v16 = vld [vmem:[#allocation8 + $0x288] sm:$0xff] }
  0x92   : > { %1369 = vmatprep.subr.bf16.mxu1 %v5460_v33  ;;  %v665_v61 = vld [vmem:[#allocation8 + $0x3c0] sm:$0xff]  ;;  %v5516_v63 = vcombine.high %v657_v57, %v661_v58  ;;  %v5515_v0 = vcombine.low %v657_v57, %v661_v58  ;;  %v578_v33 = vld [vmem:[#allocation8 + $0x108] sm:$0xff] }
  0x93   : > { %v669_v62 = vld [vmem:[#allocation8 + $0x3e0] sm:$0xff]  ;;  %v5438_v43 = vcombine.high %v578_v33, %v582_v34  ;;  %v5437_v46 = vcombine.low %v578_v33, %v582_v34  ;;  %v634_v33 = vld [vmem:[#allocation8 + $0x2c8] sm:$0xff] }
  0x94   : > { %v5524_v3 = vcombine.high %v665_v61, %v669_v62  ;;  %v449_v4 = vld [vmem:[%s6699_s12] sm:$0xff]  ;;  %v5523_v8 = vcombine.low %v665_v61, %v669_v62  ;;  %v610_v62 = vld [vmem:[#allocation8 + $0x208] sm:$0xff] }
  0x95   : > { %1370 = vmatpush1.bf16.msra.mxu1 %v5459_v36  ;;  %v6718_v12 = vpack.c.bf16 %v451_v5, %v449_v4  ;;  %v453_v18 = vld [vmem:[%s6699_s12 + $0x20] sm:$0xff]  ;;  %v470_v5 = vld [vmem:[%s6699_s12 + $0xa8] sm:$0xff] }
  0x96   : > { %1371 = vmatprep.subr.bf16.mxu1 %v5468_v37  ;;  %v6734_v30 = vpack.c.bf16 %v455_v19, %v453_v18  ;;  %v457_v36 = vld [vmem:[%s6699_s12 + $0x40] sm:$0xff]  ;;  %v459_v37 = vld [vmem:[%s6699_s12 + $0x50] sm:$0xff]  ;;  %v638_v34 = vld [vmem:[#allocation8 + $0x2e8] sm:$0xff] }
  0x97   : > { %v461_v50 = vld [vmem:[%s6699_s12 + $0x60] sm:$0xff]  ;;  %v5955_v19 = vld [vmem:[#allocation10 + $0x14] ss:$8 sps:$4 sm:$0xff]  }
  0x98   : > { %v465_v1 = vld [vmem:[%s6699_s12 + $0x80] sm:$0xff] }
  0x99   : > { %1372 = vmatpush1.bf16.msra.mxu1 %v5467_v40  ;;  %v5429_v40 = vcombine.low %v570_v26, %v574_v27  ;;  %v5954_v4 = vld [vmem:[#allocation10] ss:$8 sps:$4 sm:$0xff]   ;;  %v6764_v10 = vpack.c.bf16 %v467_v2, %v465_v1  ;;  %v5958_v26 = vld [vmem:[#allocation10 + $0x24] ss:$8 sps:$4 sm:$0xff]   ;;  %v5967_v1 = vld [vmem:[#allocation10 + $0x54] ss:$8 sps:$4 sm:$0xff]  }
  0x9a   : > { %1373 = vmatprep.subr.bf16.mxu1 %v5476_v41  ;;  %v586_v41 = vld [vmem:[#allocation8 + $0x148] sm:$0xff]  ;;  %v469_v18 = vld [vmem:[%s6699_s12 + $0xa0] sm:$0xff]  ;;  %v479_v2 = vld [vmem:[%s6699_s12 + $0xf0] sm:$0xff] }
  0x9b   : > { %v5446_v49 = vcombine.high %v586_v41, %v590_v42  ;;  %v5445_v54 = vcombine.low %v586_v41, %v590_v42  ;;  %v474_v27 = vld [vmem:[%s6699_s12 + $0xc8] sm:$0xff]  ;;  %v473_v42 = vld [vmem:[%s6699_s12 + $0xc0] sm:$0xff] }
  0x9c   : > { %v646_v41 = vld [vmem:[#allocation8 + $0x328] sm:$0xff] }
  0x9d   : > { %1374 = vmatpush1.bf16.msra.mxu1 %v5475_v44  ;;  %v6744_v44 = vpack.c.bf16 %v459_v37, %v457_v36  ;;  %v6774_v36 = vpack.c.bf16 %v471_v21, %v469_v18  ;;  %v481_v21 = vld [vmem:[%s6699_s12 + $0x100] sm:$0xff] }
  0x9e   : > { %1375 = vmatprep.subr.bf16.mxu1 %v5484_v45  ;;  %v6746_v45 = vpack.c.bf16 %v464_v39, %v462_v38  ;;  %v5494_v39 = vcombine.high %v634_v33, %v638_v34 }
  0xa1   : > { %1376 = vmatpush1.bf16.msra.mxu1 %v5483_v48  ;;  %v598_v48 = vld [vmem:[#allocation8 + $0x1a8] sm:$0xff] }
  0xa2   : > { %1377 = vmatprep.subr.bf16.mxu1 %v5492_v51  ;;  %v463_v51 = vld [vmem:[%s6699_s12 + $0x70] sm:$0xff]  ;;  %v5454_v57 = vcombine.high %v594_v47, %v598_v48 }
  0xa3   : > { %v6754_v58 = vpack.c.bf16 %v463_v51, %v461_v50  ;;  %v478_v50 = vld [vmem:[%s6699_s12 + $0xe8] sm:$0xff]  ;;  %v480_v51 = vld [vmem:[%s6699_s12 + $0xf8] sm:$0xff] }
  0xa5   : > { %1378 = vmatpush1.bf16.msra.mxu1 %v5491_v52  ;;  %v466_v52 = vld [vmem:[%s6699_s12 + $0x88] sm:$0xff] }
  0xa6   : > { %1379 = vmatprep.subr.bf16.mxu1 %v5500_v55  ;;  %v602_v55 = vld [vmem:[#allocation8 + $0x1c8] sm:$0xff] }
  0xa9   : > { %1380 = vmatpush1.bf16.msra.mxu1 %v5499_v56  ;;  %v606_v56 = vld [vmem:[#allocation8 + $0x1e8] sm:$0xff] }
  0xaa   : > { %1381 = vmatprep.subr.bf16.mxu1 %v5508_v59  ;;  %v6756_v59 = vpack.c.bf16 %v468_v53, %v466_v52  ;;  %v5462_v61 = vcombine.high %v602_v55, %v606_v56  ;;  %v650_v53 = vld [vmem:[#allocation8 + $0x348] sm:$0xff] }
  0xad   : > { %1382 = vmatpush1.bf16.msra.mxu1 %v5507_v60  ;;  %v5453_v60 = vcombine.low %v594_v47, %v598_v48  ;;  %v5493_v47 = vcombine.low %v634_v33, %v638_v34  ;;  %v5963_v48 = vld [vmem:[#allocation10 + $0x30] ss:$8 sps:$4 sm:$0xff]   ;;  %v5408_v34 = vcombine.high %v6727_v23, %v6729_v24 }
  0xae   : > { %1383 = vmatprep.subr.bf16.mxu1 %v5516_v63  ;;  %v614_v63 = vld [vmem:[#allocation8 + $0x228] sm:$0xff]  ;;  %v488_v33 = vld [vmem:[%s6699_s12 + $0x138] sm:$0xff]  ;;  %v579_v23 = vld [vmem:[#allocation8 + $0x110] sm:$0xff] }
  0xaf   : > { %v5470_v7 = vcombine.high %v610_v62, %v614_v63  ;;  %v583_v24 = vld [vmem:[#allocation8 + $0x130] sm:$0xff] }
  0xb1   : > { %1384 = vmatpush1.bf16.msra.mxu1 %v5515_v0  ;;  %v5952_v0 = vld [vmem:[#allocation10 + $0x4] ss:$8 sps:$4 sm:$0xff]  }
  0xb2   : > { %1385 = vmatprep.subr.bf16.mxu1 %v5524_v3  ;;  %v5461_v3 = vcombine.low %v602_v55, %v606_v56  ;;  %3343 = vmatprep.subr.bf16.mxu0 %v5952_v0  ;;  %v5966_v55 = vld [vmem:[#allocation10 + $0x40] ss:$8 sps:$4 sm:$0xff]  }
  0xb3   : > { %3344 = vmatpush1.bf16.msra.mxu0 %v5954_v4  ;;  %v477_v0 = vld [vmem:[%s6699_s12 + $0xe0] sm:$0xff]  ;;  %v5969_v4 = vld [vmem:[#allocation10 + $0x50] ss:$8 sps:$4 sm:$0xff]  }
  0xb4   : > { %3345 = vmatprep.subr.bf16.mxu0 %v5955_v19 }
  0xb5   : > { %1386 = vmatpush1.bf16.msra.mxu1 %v5523_v8  ;;  %v618_v8 = vld [vmem:[#allocation8 + $0x248] sm:$0xff] }
  0xb6   : > { %1548 = vmatprep.subr.bf16.mxu1 %v5406_v11  ;;  %v6766_v11 = vpack.c.bf16 %v472_v6, %v470_v5  ;;  %v5478_v15 = vcombine.high %v618_v8, %v622_v9  ;;  %v5477_v22 = vcombine.low %v618_v8, %v622_v9  ;;  %v5970_v5 = vld [vmem:[#allocation10 + $0x64] ss:$8 sps:$4 sm:$0xff]  }
  0xb7   : > { %v482_v6 = vld [vmem:[%s6699_s12 + $0x108] sm:$0xff] }
  0xb8   : > { %1388 = vmatmul.mubr.bf16.vlgmr.msra.gmra.mrb[0].mxu1 %v6718_v12  ;;  %v666_v9 = vld [vmem:[#allocation8 + $0x3c8] sm:$0xff] }
  0xb9   : > { %1549 = vmatpush1.bf16.msra.mxu1 %v5405_v13  ;;  %1397 = vmatprep.mubr.bf16.mxu1 %v6720_v14  ;;  %v5469_v13 = vcombine.low %v610_v62, %v614_v63  ;;  %v658_v62 = vld [vmem:[#allocation8 + $0x388] sm:$0xff] }
  0xba   : > { %1550 = vmatprep.subr.bf16.mxu1 %v5414_v17  ;;  %v630_v17 = vld [vmem:[#allocation8 + $0x2a8] sm:$0xff] }
  0xbb   : > { %v5485_v38 = vcombine.low %v626_v16, %v630_v17  ;;  %v662_v63 = vld [vmem:[#allocation8 + $0x3a8] sm:$0xff] }
  0xbc   : > { %v5518_v8 = vcombine.high %v658_v62, %v662_v63  ;;  %v5517_v18 = vcombine.low %v658_v62, %v662_v63  ;;  %v496_v62 = vld [vmem:[%s6699_s12 + $0x178] sm:$0xff]  ;;  %v5990_v63 = vld [vmem:[#allocation10 + $0xc0] ss:$8 sps:$4 sm:$0xff]  }
  0xbd   : > { %1551 = vmatpush1.bf16.msra.mxu1 %v5413_v25  ;;  %v5957_v25 = vld [vmem:[#allocation10 + $0x10] ss:$8 sps:$4 sm:$0xff]  }
  0xbe   : > { %1552 = vmatprep.subr.bf16.mxu1 %v5422_v29  ;;  %v476_v29 = vld [vmem:[%s6699_s12 + $0xd8] sm:$0xff]  ;;  %3346 = vmatpush1.bf16.msra.mxu0 %v5957_v25  ;;  %v483_v25 = vld [vmem:[%s6699_s12 + $0x110] sm:$0xff] }
  0xbf   : > { %3347 = vmatprep.subr.bf16.mxu0 %v5958_v26  ;;  %v6776_v37 = vpack.c.bf16 %v476_v29, %v474_v27  ;;  %v5975_v27 = vld [vmem:[#allocation10 + $0x70] ss:$8 sps:$4 sm:$0xff]   ;;  %v5976_v29 = vld [vmem:[#allocation10 + $0x84] ss:$8 sps:$4 sm:$0xff]  }
  0xc0   : > { %1398 = vmatmul.mubr.bf16.gmra.mrb[4].mxu1 %v6734_v30 }
  0xc1   : > { %1407 = vmatprep.mubr.bf16.mxu1 %v6736_v31  ;;  %1553 = vmatpush1.bf16.msra.mxu1 %v5421_v32  ;;  %v5486_v32 = vcombine.high %v626_v16, %v630_v17  ;;  %v6794_v16 = vpack.c.bf16 %v479_v2, %v477_v0  ;;  %v5991_v2 = vld [vmem:[#allocation10 + $0xd4] ss:$8 sps:$4 sm:$0xff]  }
  0xc2   : > { %1554 = vmatprep.subr.bf16.mxu1 %v5430_v35  ;;  %v5960_v35 = vld [vmem:[#allocation10 + $0x20] ss:$8 sps:$4 sm:$0xff]  }
  0xc3   : > { %3348 = vmatpush1.bf16.msra.mxu0 %v5960_v35  ;;  %v5978_v35 = vld [vmem:[#allocation10 + $0x80] ss:$8 sps:$4 sm:$0xff]  }
  0xc5   : > { %1555 = vmatpush1.bf16.msra.mxu1 %v5429_v40  ;;  %v642_v40 = vld [vmem:[#allocation8 + $0x308] sm:$0xff] }
  0xc6   : > { %1556 = vmatprep.subr.bf16.mxu1 %v5438_v43  ;;  %v5961_v43 = vld [vmem:[#allocation10 + $0x34] ss:$8 sps:$4 sm:$0xff]   ;;  %v5502_v52 = vcombine.high %v642_v40, %v646_v41 }
  0xc7   : > { %3349 = vmatprep.subr.bf16.mxu0 %v5961_v43  ;;  %v5981_v43 = vld [vmem:[#allocation10 + $0x90] ss:$8 sps:$4 sm:$0xff]  }
  0xc8   : > { %1408 = vmatmul.mubr.bf16.gmra.mrb[8].mxu1 %v6744_v44  ;;  %3350 = vmatpush1.bf16.msra.mxu0 %v5963_v48  ;;  %v492_v48 = vld [vmem:[%s6699_s12 + $0x158] sm:$0xff] }
  0xc9   : > { %1417 = vmatprep.mubr.bf16.mxu1 %v6746_v45  ;;  %1557 = vmatpush1.bf16.msra.mxu1 %v5437_v46  ;;  %v475_v46 = vld [vmem:[%s6699_s12 + $0xd0] sm:$0xff] }
  0xca   : > { %1558 = vmatprep.subr.bf16.mxu1 %v5446_v49  ;;  %v5964_v49 = vld [vmem:[#allocation10 + $0x44] ss:$8 sps:$4 sm:$0xff]   ;;  %v6784_v56 = vpack.c.bf16 %v475_v46, %v473_v42  ;;  %v487_v42 = vld [vmem:[%s6699_s12 + $0x130] sm:$0xff] }
  0xcb   : > { %3351 = vmatprep.subr.bf16.mxu0 %v5964_v49  ;;  %v5982_v46 = vld [vmem:[#allocation10 + $0xa4] ss:$8 sps:$4 sm:$0xff]   ;;  %v5984_v49 = vld [vmem:[#allocation10 + $0xa0] ss:$8 sps:$4 sm:$0xff]  }
  0xcc   : > { %3352 = vmatpush1.bf16.msra.mxu0 %v5966_v55  ;;  %v5987_v55 = vld [vmem:[#allocation10 + $0xb0] ss:$8 sps:$4 sm:$0xff]  }
  0xcd   : > { %1559 = vmatpush1.bf16.msra.mxu1 %v5445_v54  ;;  %v654_v54 = vld [vmem:[#allocation8 + $0x368] sm:$0xff]  ;;  %3353 = vmatprep.subr.bf16.mxu0 %v5967_v1 }
  0xce   : > { %1560 = vmatprep.subr.bf16.mxu1 %v5454_v57  ;;  %v6786_v57 = vpack.c.bf16 %v480_v51, %v478_v50 }
  0xd0   : > { %1418 = vmatmul.mubr.bf16.gmra.mrb[12].mxu1 %v6754_v58  ;;  %3354 = vmatpush1.bf16.msra.mxu0 %v5969_v4  ;;  %v495_v4 = vld [vmem:[%s6699_s12 + $0x170] sm:$0xff] }
  0xd1   : > { %1427 = vmatprep.mubr.bf16.mxu1 %v6756_v59  ;;  %1561 = vmatpush1.bf16.msra.mxu1 %v5453_v60  ;;  %v5501_v60 = vcombine.low %v642_v40, %v646_v41  ;;  %v485_v40 = vld [vmem:[%s6699_s12 + $0x120] sm:$0xff]  ;;  %v5979_v41 = vld [vmem:[#allocation10 + $0x94] ss:$8 sps:$4 sm:$0xff]  }
  0xd2   : > { %1562 = vmatprep.subr.bf16.mxu1 %v5462_v61  ;;  %v5510_v61 = vcombine.high %v650_v53, %v654_v54  ;;  %3355 = vmatprep.subr.bf16.mxu0 %v5970_v5  ;;  %v6816_v50 = vpack.c.bf16 %v487_v42, %v485_v40  ;;  %v5993_v5 = vld [vmem:[#allocation10 + $0xd0] ss:$8 sps:$4 sm:$0xff]   ;;  %v6002_v40 = vld [vmem:[#allocation10 + $0x104] ss:$8 sps:$4 sm:$0xff]  }
  0xd5   : > { %1563 = vmatpush1.bf16.msra.mxu1 %v5461_v3  ;;  %v5509_v3 = vcombine.low %v650_v53, %v654_v54  ;;  %v5985_v53 = vld [vmem:[#allocation10 + $0xb4] ss:$8 sps:$4 sm:$0xff]  }
  0xd6   : > { %1564 = vmatprep.subr.bf16.mxu1 %v5470_v7  ;;  %v484_v7 = vld [vmem:[%s6699_s12 + $0x118] sm:$0xff]  ;;  %v491_v54 = vld [vmem:[%s6699_s12 + $0x150] sm:$0xff] }
  0xd7   : > { %v6796_v17 = vpack.c.bf16 %v484_v7, %v482_v6  ;;  %v498_v6 = vld [vmem:[%s6699_s12 + $0x188] sm:$0xff]  ;;  %v500_v7 = vld [vmem:[%s6699_s12 + $0x198] sm:$0xff] }
  0xd8   : > { %1428 = vmatmul.mubr.bf16.gmra.mrb[16].mxu1 %v6764_v10 }
  0xd9   : > { %1437 = vmatprep.mubr.bf16.mxu1 %v6766_v11  ;;  %1565 = vmatpush1.bf16.msra.mxu1 %v5469_v13  ;;  %v670_v13 = vld [vmem:[#allocation8 + $0x3e8] sm:$0xff] }
  0xda   : > { %1566 = vmatprep.subr.bf16.mxu1 %v5478_v15  ;;  %v5972_v15 = vld [vmem:[#allocation10 + $0x60] ss:$8 sps:$4 sm:$0xff]   ;;  %v5526_v19 = vcombine.high %v666_v9, %v670_v13  ;;  %v5525_v26 = vcombine.low %v666_v9, %v670_v13  ;;  %v5994_v9 = vld [vmem:[#allocation10 + $0xe4] ss:$8 sps:$4 sm:$0xff]   ;;  %v6838_v13 = vpack.c.bf16 %v500_v7, %v498_v6  ;;  %v575_v6 = vld [vmem:[#allocation8 + $0xf0] sm:$0xff] }
  0xdb   : > { %3356 = vmatpush1.bf16.msra.mxu0 %v5972_v15  ;;  %v5996_v15 = vld [vmem:[#allocation10 + $0xe0] ss:$8 sps:$4 sm:$0xff]   ;;  %v6883_v7 = vld [vmem:[#allocation8 + $0x18] sm:$0xff] }
  0xdd   : > { %1567 = vmatpush1.bf16.msra.mxu1 %v5477_v22  ;;  %v5973_v22 = vld [vmem:[#allocation10 + $0x74] ss:$8 sps:$4 sm:$0xff]  }
  0xde   : > { %1568 = vmatprep.subr.bf16.mxu1 %v5486_v32  ;;  %v486_v32 = vld [vmem:[%s6699_s12 + $0x128] sm:$0xff]  ;;  %3357 = vmatprep.subr.bf16.mxu0 %v5973_v22  ;;  %v5999_v22 = vld [vmem:[#allocation10 + $0xf0] ss:$8 sps:$4 sm:$0xff]  }
  0xdf   : > { %3358 = vmatpush1.bf16.msra.mxu0 %v5975_v27 }
  0xe0   : > { %1438 = vmatmul.mubr.bf16.gmra.mrb[20].mxu1 %v6774_v36  ;;  %3359 = vmatprep.subr.bf16.mxu0 %v5976_v29 }
  0xe1   : > { %1447 = vmatprep.mubr.bf16.mxu1 %v6776_v37  ;;  %1569 = vmatpush1.bf16.msra.mxu1 %v5485_v38  ;;  %v6806_v38 = vpack.c.bf16 %v483_v25, %v481_v21  ;;  %v499_v21 = vld [vmem:[%s6699_s12 + $0x190] sm:$0xff]  ;;  %v502_v25 = vld [vmem:[%s6699_s12 + $0x1a8] sm:$0xff] }
  0xe2   : > { %1570 = vmatprep.subr.bf16.mxu1 %v5494_v39  ;;  %v6808_v39 = vpack.c.bf16 %v488_v33, %v486_v32  ;;  %v501_v32 = vld [vmem:[%s6699_s12 + $0x1a0] sm:$0xff]  ;;  %v503_v33 = vld [vmem:[%s6699_s12 + $0x1b0] sm:$0xff] }
  0xe3   : > { %3360 = vmatpush1.bf16.msra.mxu0 %v5978_v35  ;;  %v508_v35 = vld [vmem:[%s6699_s12 + $0x1d8] sm:$0xff] }
  0xe4   : > { %3361 = vmatprep.subr.bf16.mxu0 %v5979_v41  ;;  %v6856_v41 = vpack.c.bf16 %v503_v33, %v501_v32  ;;  %v595_v33 = vld [vmem:[#allocation8 + $0x190] sm:$0xff] }
  0xe5   : > { %1571 = vmatpush1.bf16.msra.mxu1 %v5493_v47  ;;  %v490_v47 = vld [vmem:[%s6699_s12 + $0x148] sm:$0xff] }
  0xe6   : > { %1572 = vmatprep.subr.bf16.mxu1 %v5502_v52  ;;  %v6818_v51 = vpack.c.bf16 %v492_v48, %v490_v47  ;;  %v489_v52 = vld [vmem:[%s6699_s12 + $0x140] sm:$0xff]  ;;  %v510_v47 = vld [vmem:[%s6699_s12 + $0x1e8] sm:$0xff]  ;;  %v512_v48 = vld [vmem:[%s6699_s12 + $0x1f8] sm:$0xff] }
  0xe7   : > { %3362 = vmatpush1.bf16.msra.mxu0 %v5981_v43  ;;  %v6826_v0 = vpack.c.bf16 %v491_v54, %v489_v52  ;;  %v505_v43 = vld [vmem:[%s6699_s12 + $0x1c0] sm:$0xff]  ;;  %v6868_v52 = vpack.c.bf16 %v512_v48, %v510_v47  ;;  %v511_v54 = vld [vmem:[%s6699_s12 + $0x1f0] sm:$0xff] }
  0xe8   : > { %1448 = vmatmul.mubr.bf16.gmra.mrb[24].mxu1 %v6784_v56  ;;  %3363 = vmatprep.subr.bf16.mxu0 %v5982_v46  ;;  %v507_v46 = vld [vmem:[%s6699_s12 + $0x1d0] sm:$0xff] }
  0xe9   : > { %1457 = vmatprep.mubr.bf16.mxu1 %v6786_v57  ;;  %1573 = vmatpush1.bf16.msra.mxu1 %v5501_v60  ;;  %v5988_v60 = vld [vmem:[#allocation10 + $0xc4] ss:$8 sps:$4 sm:$0xff]  }
  0xea   : > { %1574 = vmatprep.subr.bf16.mxu1 %v5510_v61  ;;  %v494_v61 = vld [vmem:[%s6699_s12 + $0x168] sm:$0xff] }
  0xeb   : > { %3364 = vmatpush1.bf16.msra.mxu0 %v5984_v49  ;;  %v6828_v1 = vpack.c.bf16 %v496_v62, %v494_v61  ;;  %v6866_v49 = vpack.c.bf16 %v507_v46, %v505_v43  ;;  %v559_v61 = vld [vmem:[#allocation8 + $0x70] sm:$0xff] }
  0xec   : > { %3365 = vmatprep.subr.bf16.mxu0 %v5985_v53  ;;  %v509_v53 = vld [vmem:[%s6699_s12 + $0x1e0] sm:$0xff]  ;;  %v603_v43 = vld [vmem:[#allocation8 + $0x1d0] sm:$0xff] }
  0xed   : > { %1575 = vmatpush1.bf16.msra.mxu1 %v5509_v3  ;;  %v493_v3 = vld [vmem:[%s6699_s12 + $0x160] sm:$0xff]  ;;  %v607_v46 = vld [vmem:[#allocation8 + $0x1f0] sm:$0xff] }
  0xee   : > { %1576 = vmatprep.subr.bf16.mxu1 %v5518_v8  ;;  %v6836_v8 = vpack.c.bf16 %v495_v4, %v493_v3  ;;  %v5464_v48 = vcombine.high %v603_v43, %v607_v46 }
  0xef   : > { %3366 = vmatpush1.bf16.msra.mxu0 %v5987_v55  ;;  %v6874_v55 = vpack.c.bf16 %v511_v54, %v509_v53  ;;  %v611_v53 = vld [vmem:[#allocation8 + $0x210] sm:$0xff] }
  0xf0   : > { %1458 = vmatmul.mubr.bf16.gmra.mrb[28].mxu1 %v6794_v16  ;;  %3367 = vmatprep.subr.bf16.mxu0 %v5988_v60  ;;  %v555_v60 = vld [vmem:[#allocation8 + $0x50] sm:$0xff] }
  0xf1   : > { %1467 = vmatprep.mubr.bf16.mxu1 %v6796_v17  ;;  %1577 = vmatpush1.bf16.msra.mxu1 %v5517_v18  ;;  %v5997_v18 = vld [vmem:[#allocation10 + $0xf4] ss:$8 sps:$4 sm:$0xff]   ;;  %v5416_v62 = vcombine.high %v555_v60, %v559_v61  ;;  %v5415_v3 = vcombine.low %v555_v60, %v559_v61  ;;  %v5463_v60 = vcombine.low %v603_v43, %v607_v46 }
  0xf2   : > { %1578 = vmatprep.subr.bf16.mxu1 %v5526_v19  ;;  %v497_v19 = vld [vmem:[%s6699_s12 + $0x180] sm:$0xff]  ;;  %v615_v54 = vld [vmem:[#allocation8 + $0x230] sm:$0xff] }
  0xf3   : > { %3368 = vmatpush1.bf16.msra.mxu0 %v5990_v63  ;;  %v6846_v27 = vpack.c.bf16 %v499_v21, %v497_v19  ;;  %v563_v63 = vld [vmem:[#allocation8 + $0x90] sm:$0xff]  ;;  %v5440_v21 = vcombine.high %v579_v23, %v583_v24  ;;  %v5472_v61 = vcombine.high %v611_v53, %v615_v54 }
  0xf4   : > { %3369 = vmatprep.subr.bf16.mxu0 %v5991_v2  ;;  %v567_v2 = vld [vmem:[#allocation8 + $0xb0] sm:$0xff] }
  0xf5   : > { %1579 = vmatpush1.bf16.msra.mxu1 %v5525_v26  ;;  %v504_v26 = vld [vmem:[%s6699_s12 + $0x1b8] sm:$0xff]  ;;  %v5424_v4 = vcombine.high %v563_v63, %v567_v2  ;;  %v663_v43 = vld [vmem:[#allocation8 + $0x3b0] sm:$0xff] }
  0xf6   : > { %1741 = vmatprep.subr.bf16.mxu1 %v5408_v34  ;;  %v6848_v29 = vpack.c.bf16 %v504_v26, %v502_v25  ;;  %v506_v34 = vld [vmem:[%s6699_s12 + $0x1c8] sm:$0xff]  ;;  %v591_v25 = vld [vmem:[#allocation8 + $0x170] sm:$0xff]  ;;  %v5439_v26 = vcombine.low %v579_v23, %v583_v24 }
  0xf7   : > { %3370 = vmatpush1.bf16.msra.mxu0 %v5993_v5  ;;  %v6858_v42 = vpack.c.bf16 %v508_v35, %v506_v34  ;;  %v571_v5 = vld [vmem:[#allocation8 + $0xd0] sm:$0xff] }
  0xf8   : > { %1468 = vmatmul.mubr.bf16.gmra.mrb[32].mxu1 %v6806_v38  ;;  %3371 = vmatprep.subr.bf16.mxu0 %v5994_v9  ;;  %v6885_v9 = vld [vmem:[#allocation8 + $0x38] sm:$0xff]  ;;  %v5432_v19 = vcombine.high %v571_v5, %v575_v6  ;;  %v599_v34 = vld [vmem:[#allocation8 + $0x1b0] sm:$0xff] }
  0xf9   : > { %1477 = vmatprep.mubr.bf16.mxu1 %v6808_v39  ;;  %v5455_v47 = vcombine.low %v595_v33, %v599_v34  ;;  %v639_v23 = vld [vmem:[#allocation8 + $0x2f0] sm:$0xff] }
  0xfb   : > { %3372 = vmatpush1.bf16.msra.mxu0 %v5996_v15  ;;  %v5423_v15 = vcombine.low %v563_v63, %v567_v2  ;;  %v623_v63 = vld [vmem:[#allocation8 + $0x270] sm:$0xff]  ;;  %v5471_v2 = vcombine.low %v611_v53, %v615_v54 }
  0xfc   : > { %3373 = vmatprep.subr.bf16.mxu0 %v5997_v18  ;;  %v5409_v18 = vcombine.low %v6883_v7, %v6885_v9  ;;  %v671_v53 = vld [vmem:[#allocation8 + $0x3f0] sm:$0xff] }
  0xff   : > { %3374 = vmatpush1.bf16.msra.mxu0 %v5999_v22  ;;  %v587_v22 = vld [vmem:[#allocation8 + $0x150] sm:$0xff] }
 0x100   : > { %1478 = vmatmul.mubr.bf16.gmra.mrb[36].mxu1 %v6816_v50  ;;  %3536 = vmatprep.subr.bf16.mxu0 %v6002_v40  ;;  %v5448_v32 = vcombine.high %v587_v22, %v591_v25  ;;  %v5447_v35 = vcombine.low %v587_v22, %v591_v25  ;;  %v5456_v40 = vcombine.high %v595_v33, %v599_v34  ;;  %v647_v22 = vld [vmem:[#allocation8 + $0x330] sm:$0xff] }
 0x101   : > { %1487 = vmatprep.mubr.bf16.mxu1 %v6818_v51  ;;  %v655_v33 = vld [vmem:[#allocation8 + $0x370] sm:$0xff] }
 0x108   : > { %1488 = vmatmul.mubr.bf16.gmra.mrb[40].mxu1 %v6826_v0 }
 0x109   : > { %1497 = vmatprep.mubr.bf16.mxu1 %v6828_v1 }
 0x110   : > { %1498 = vmatmul.mubr.bf16.gmra.mrb[44].mxu1 %v6836_v8 }
 0x111   : > { %1507 = vmatprep.mubr.bf16.mxu1 %v6838_v13 }
 0x118   : > { %1508 = vmatmul.mubr.bf16.gmra.mrb[48].mxu1 %v6846_v27 }
 0x119   : > { %1517 = vmatprep.mubr.bf16.mxu1 %v6848_v29 }
 0x120   : > { %1518 = vmatmul.mubr.bf16.gmra.mrb[52].mxu1 %v6856_v41 }
 0x121   : > { %1527 = vmatprep.mubr.bf16.mxu1 %v6858_v42 }
 0x128   : > { %1528 = vmatmul.mubr.bf16.gmra.mrb[56].mxu1 %v6866_v49 }
 0x129   : > { %1537 = vmatprep.mubr.bf16.mxu1 %v6868_v52 }
 0x130   : > { %1538 = vmatmul.mubr.bf16.gmra.mrb[60].mxu1 %v6874_v55 }
 0x131   : > { %1580 = vmatprep.mubr.bf16.mxu1 %v6711_v20 }
 0x138   : > { %1581 = vmatmul.mubr.bf16.vlgmr.msra.gmra.mrb[64].mxu1 %v6718_v12 }
 0x139   : > { %1742 = vmatpush1.bf16.msra.mxu1 %v5407_v28  ;;  %1590 = vmatprep.mubr.bf16.mxu1 %v6720_v14  ;;  %v5431_v28 = vcombine.low %v571_v5, %v575_v6  ;;  %v631_v5 = vld [vmem:[#allocation8 + $0x2b0] sm:$0xff] }
 0x13a   : > { %1743 = vmatprep.subr.bf16.mxu1 %v5416_v62  ;;  %v619_v62 = vld [vmem:[#allocation8 + $0x250] sm:$0xff] }
 0x13b   : > { %v5479_v6 = vcombine.low %v619_v62, %v623_v63 }
 0x13d   : > { %1744 = vmatpush1.bf16.msra.mxu1 %v5415_v3  ;;  %v5480_v3 = vcombine.high %v619_v62, %v623_v63  ;;  %v5410_v62 = vcombine.high %v6883_v7, %v6885_v9  ;;  %v675_v63 = vlaneseq }
 0x13e   : > { %1745 = vmatprep.subr.bf16.mxu1 %v5424_v4  ;;  %v627_v4 = vld [vmem:[#allocation8 + $0x290] sm:$0xff] }
 0x13f   : > { %v5487_v24 = vcombine.low %v627_v4, %v631_v5 }
 0x140   : > { %1591 = vmatmul.mubr.bf16.gmra.mrb[68].mxu1 %v6734_v30 }
 0x141   : > { %1600 = vmatprep.mubr.bf16.mxu1 %v6736_v31  ;;  %1746 = vmatpush1.bf16.msra.mxu1 %v5423_v15  ;;  %v5488_v15 = vcombine.high %v627_v4, %v631_v5  ;;  %v6915_v4 = vld [vmem:[%s8229_s4] sm:$0xff] }
 0x142   : > { %1747 = vmatprep.subr.bf16.mxu1 %v5432_v19  ;;  %v635_v19 = vld [vmem:[#allocation8 + $0x2d0] sm:$0xff] }
 0x143   : > { %v5495_v25 = vcombine.low %v635_v19, %v639_v23 }
 0x145   : > { %1748 = vmatpush1.bf16.msra.mxu1 %v5431_v28  ;;  %v5496_v28 = vcombine.high %v635_v19, %v639_v23 }
 0x146   : > { %1749 = vmatprep.subr.bf16.mxu1 %v5440_v21  ;;  %v643_v21 = vld [vmem:[#allocation8 + $0x310] sm:$0xff] }
 0x147   : > { %v5503_v34 = vcombine.low %v643_v21, %v647_v22 }
 0x148   : > { %1601 = vmatmul.mubr.bf16.gmra.mrb[72].mxu1 %v6744_v44 }
 0x149   : > { %1610 = vmatprep.mubr.bf16.mxu1 %v6746_v45  ;;  %1750 = vmatpush1.bf16.msra.mxu1 %v5439_v26  ;;  %v5504_v26 = vcombine.high %v643_v21, %v647_v22 }
 0x14a   : > { %1751 = vmatprep.subr.bf16.mxu1 %v5448_v32  ;;  %v651_v32 = vld [vmem:[#allocation8 + $0x350] sm:$0xff] }
 0x14b   : > { %v5511_v46 = vcombine.low %v651_v32, %v655_v33 }
 0x14d   : > { %1752 = vmatpush1.bf16.msra.mxu1 %v5447_v35  ;;  %v5512_v35 = vcombine.high %v651_v32, %v655_v33 }
 0x14e   : > { %1753 = vmatprep.subr.bf16.mxu1 %v5456_v40  ;;  %v659_v40 = vld [vmem:[#allocation8 + $0x390] sm:$0xff] }
 0x14f   : > { %v5519_v54 = vcombine.low %v659_v40, %v663_v43 }
 0x150   : > { %1611 = vmatmul.mubr.bf16.gmra.mrb[76].mxu1 %v6754_v58 }
 0x151   : > { %1620 = vmatprep.mubr.bf16.mxu1 %v6756_v59  ;;  %1754 = vmatpush1.bf16.msra.mxu1 %v5455_v47  ;;  %v5520_v47 = vcombine.high %v659_v40, %v663_v43 }
 0x152   : > { %1755 = vmatprep.subr.bf16.mxu1 %v5464_v48  ;;  %v667_v48 = vld [vmem:[#allocation8 + $0x3d0] sm:$0xff] }
 0x155   : > { %1756 = vmatpush1.bf16.msra.mxu1 %v5463_v60  ;;  %v5528_v60 = vcombine.high %v667_v48, %v671_v53 }
 0x156   : > { %1757 = vmatprep.subr.bf16.mxu1 %v5472_v61  ;;  %v5527_v61 = vcombine.low %v667_v48, %v671_v53 }
 0x158   : > { %1621 = vmatmul.mubr.bf16.gmra.mrb[80].mxu1 %v6764_v10 }
 0x159   : > { %1630 = vmatprep.mubr.bf16.mxu1 %v6766_v11  ;;  %1758 = vmatpush1.bf16.msra.mxu1 %v5471_v2  ;;  %v6908_v2 = vshrl.u32 %v675_v63, 7 }
 0x15a   : > { %1759 = vmatprep.subr.bf16.mxu1 %v5480_v3 }
 0x15b   : > { %v677_v3 = vsub.s32 0, %v6908_v2  ;;  %v681_v5 = vsub.s32 1, %v6908_v2 }
 0x15d   : > { %1760 = vmatpush1.bf16.msra.mxu1 %v5479_v6  ;;  %v6922_v6 = vrot.slane %v6915_v4, %v677_v3 }
 0x15e   : > { %1761 = vmatprep.subr.bf16.mxu1 %v5488_v15  ;;  %v6927_v15 = vrot.slane %v6915_v4, %v681_v5 }
 0x160   : > { %1631 = vmatmul.mubr.bf16.gmra.mrb[84].mxu1 %v6774_v36 }
 0x161   : > { %1640 = vmatprep.mubr.bf16.mxu1 %v6776_v37  ;;  %1762 = vmatpush1.bf16.msra.mxu1 %v5487_v24 }
 0x162   : > { %1763 = vmatprep.subr.bf16.mxu1 %v5496_v28 }
 0x165   : > { %1764 = vmatpush1.bf16.msra.mxu1 %v5495_v25 }
 0x166   : > { %1765 = vmatprep.subr.bf16.mxu1 %v5504_v26 }
 0x168   : > { %1641 = vmatmul.mubr.bf16.gmra.mrb[88].mxu1 %v6784_v56 }
 0x169   : > { %1650 = vmatprep.mubr.bf16.mxu1 %v6786_v57  ;;  %1766 = vmatpush1.bf16.msra.mxu1 %v5503_v34 }
 0x16a   : > { %1767 = vmatprep.subr.bf16.mxu1 %v5512_v35 }
 0x16d   : > { %1768 = vmatpush1.bf16.msra.mxu1 %v5511_v46 }
 0x16e   : > { %1769 = vmatprep.subr.bf16.mxu1 %v5520_v47  ;;  %v6000_v47 = vld [vmem:[#allocation10 + $0x100] ss:$8 sps:$4 sm:$0xff]  }
 0x170   : > { %1651 = vmatmul.mubr.bf16.gmra.mrb[92].mxu1 %v6794_v16 }
 0x171   : > { %1660 = vmatprep.mubr.bf16.mxu1 %v6796_v17  ;;  %1770 = vmatpush1.bf16.msra.mxu1 %v5519_v54  ;;  %v6005_v54 = vld [vmem:[#allocation10 + $0x114] ss:$8 sps:$4 sm:$0xff]  }
 0x172   : > { %1771 = vmatprep.subr.bf16.mxu1 %v5528_v60 }
 0x175   : > { %1772 = vmatpush1.bf16.msra.mxu1 %v5527_v61 }
 0x176   : > { %1934 = vmatprep.subr.bf16.mxu1 %v5410_v62 }
 0x178   : > { %1661 = vmatmul.mubr.bf16.gmra.mrb[96].mxu1 %v6806_v38 }
 0x179   : > { %1670 = vmatprep.mubr.bf16.mxu1 %v6808_v39 }
 0x180   : > { %1671 = vmatmul.mubr.bf16.gmra.mrb[100].mxu1 %v6816_v50 }
 0x181   : > { %1680 = vmatprep.mubr.bf16.mxu1 %v6818_v51 }
 0x188   : > { %1681 = vmatmul.mubr.bf16.gmra.mrb[104].mxu1 %v6826_v0 }
 0x189   : > { %1690 = vmatprep.mubr.bf16.mxu1 %v6828_v1 }
 0x18b   : > { %v1389_v19 = vpop.f32.mrb[0].mxu1 }
 0x18c   : > { %v1390_v23 = vadd.f32 %v1389_v19, %v6922_v6  ;;  %v1391_v24 = vpop.f32.mrb[1].mxu1 }
 0x18d   : > { %v1392_v28 = vadd.f32 %v1391_v24, %v6927_v15  ;;  %v1393_v21 = vpop.f32.mrb[2].mxu1 }
 0x18e   : > { %v1394_v22 = vadd.f32 %v1393_v21, %v6922_v6  ;;  %v1395_v25 = vpop.f32.mrb[3].mxu1  ;;  %v2127_v32 = vmax.f32 %v1390_v23, 0.0  ;;  %v6003_v23 = vld [vmem:[#allocation10 + $0x110] ss:$8 sps:$4 sm:$0xff]   ;;  %v6008_v21 = vld [vmem:[#allocation10 + $0x124] ss:$8 sps:$4 sm:$0xff]  }
 0x18f   : > { %v1396_v26 = vadd.f32 %v1395_v25, %v6927_v15  ;;  %v2128_v34 = vmax.f32 %v1392_v28, 0.0 }
 0x190   : > { %v2135_v33 = vmax.f32 %v1394_v22, 0.0  ;;  %1691 = vmatmul.mubr.bf16.gmra.mrb[108].mxu1 %v6836_v8 }
 0x191   : > { %v2136_v35 = vmax.f32 %v1396_v26, 0.0  ;;  %1700 = vmatprep.mubr.bf16.mxu1 %v6838_v13 }
 0x192   : > { %v2447_v40 = vpack.c.bf16 %v2135_v33, %v2127_v32 }
 0x193   : > { %v1399_v43 = vpop.f32.mrb[4].mxu1  ;;  %v2448_v46 = vpack.c.bf16 %v2136_v35, %v2128_v34  ;;  %v6006_v34 = vld [vmem:[#allocation10 + $0x120] ss:$8 sps:$4 sm:$0xff]  }
 0x194   : > { %v1400_v48 = vadd.f32 %v1399_v43, %v6922_v6  ;;  %v1401_v53 = vpop.f32.mrb[5].mxu1  ;;  %v6011_v43 = vld [vmem:[#allocation10 + $0x134] ss:$8 sps:$4 sm:$0xff]  }
 0x195   : > { %v1402_v60 = vadd.f32 %v1401_v53, %v6927_v15  ;;  %v1403_v61 = vpop.f32.mrb[6].mxu1  ;;  %3375 = vmatprep.mubr.bf16.mxu0 %v2448_v46 }
 0x196   : > { %v1404_v62 = vadd.f32 %v1403_v61, %v6922_v6  ;;  %v1405_v63 = vpop.f32.mrb[7].mxu1  ;;  %3376 = vmatmul.mubr.bf16.vlgmr.msra.gmra.mrb[0].mxu0 %v2447_v40  ;;  %v2143_v24 = vmax.f32 %v1400_v48, 0.0 }
 0x197   : > { %v1406_v19 = vadd.f32 %v1405_v63, %v6927_v15  ;;  %3537 = vmatpush1.bf16.msra.mxu0 %v6000_v47  ;;  %v2144_v22 = vmax.f32 %v1402_v60, 0.0  ;;  %v6009_v60 = vld [vmem:[#allocation10 + $0x130] ss:$8 sps:$4 sm:$0xff]   ;;  %v6014_v63 = vld [vmem:[#allocation10 + $0x144] ss:$8 sps:$4 sm:$0xff]  }
 0x198   : > { %v2151_v28 = vmax.f32 %v1404_v62, 0.0  ;;  %1701 = vmatmul.mubr.bf16.gmra.mrb[112].mxu1 %v6846_v27  ;;  %3538 = vmatprep.subr.bf16.mxu0 %v6005_v54 }
 0x199   : > { %v2152_v25 = vmax.f32 %v1406_v19, 0.0  ;;  %1710 = vmatprep.mubr.bf16.mxu1 %v6848_v29 }
 0x19a   : > { %v2455_v26 = vpack.c.bf16 %v2151_v28, %v2143_v24 }
 0x19b   : > { %v2456_v32 = vpack.c.bf16 %v2152_v25, %v2144_v22  ;;  %v1409_v33 = vpop.f32.mrb[8].mxu1  ;;  %3539 = vmatpush1.bf16.msra.mxu0 %v6003_v23  ;;  %v6012_v22 = vld [vmem:[#allocation10 + $0x140] ss:$8 sps:$4 sm:$0xff]  }
 0x19c   : > { %v1410_v35 = vadd.f32 %v1409_v33, %v6922_v6  ;;  %v1411_v40 = vpop.f32.mrb[9].mxu1  ;;  %3540 = vmatprep.subr.bf16.mxu0 %v6008_v21 }
 0x19d   : > { %v1412_v46 = vadd.f32 %v1411_v40, %v6927_v15  ;;  %v1413_v47 = vpop.f32.mrb[10].mxu1  ;;  %3385 = vmatprep.mubr.bf16.mxu0 %v2456_v32  ;;  %v6017_v32 = vld [vmem:[#allocation10 + $0x154] ss:$8 sps:$4 sm:$0xff]  }
 0x19e   : > { %v1414_v48 = vadd.f32 %v1413_v47, %v6922_v6  ;;  %v1415_v53 = vpop.f32.mrb[11].mxu1  ;;  %3386 = vmatmul.mubr.bf16.gmra.mrb[4].mxu0 %v2455_v26  ;;  %v2159_v61 = vmax.f32 %v1410_v35, 0.0 }
 0x19f   : > { %v1416_v54 = vadd.f32 %v1415_v53, %v6927_v15  ;;  %3541 = vmatpush1.bf16.msra.mxu0 %v6006_v34  ;;  %v2160_v19 = vmax.f32 %v1412_v46, 0.0  ;;  %v6015_v46 = vld [vmem:[#allocation10 + $0x150] ss:$8 sps:$4 sm:$0xff]   ;;  %v6020_v53 = vld [vmem:[#allocation10 + $0x164] ss:$8 sps:$4 sm:$0xff]  }
 0x1a0   : > { %v2167_v62 = vmax.f32 %v1414_v48, 0.0  ;;  %1711 = vmatmul.mubr.bf16.gmra.mrb[116].mxu1 %v6856_v41  ;;  %3542 = vmatprep.subr.bf16.mxu0 %v6011_v43 }
 0x1a1   : > { %v2168_v23 = vmax.f32 %v1416_v54, 0.0  ;;  %1720 = vmatprep.mubr.bf16.mxu1 %v6858_v42 }
 0x1a2   : > { %v2463_v24 = vpack.c.bf16 %v2167_v62, %v2159_v61 }
 0x1a3   : > { %v2464_v28 = vpack.c.bf16 %v2168_v23, %v2160_v19  ;;  %v1419_v21 = vpop.f32.mrb[12].mxu1  ;;  %3543 = vmatpush1.bf16.msra.mxu0 %v6009_v60  ;;  %v6018_v19 = vld [vmem:[#allocation10 + $0x160] ss:$8 sps:$4 sm:$0xff]  }
 0x1a4   : > { %v1420_v25 = vadd.f32 %v1419_v21, %v6922_v6  ;;  %v1421_v26 = vpop.f32.mrb[13].mxu1  ;;  %3544 = vmatprep.subr.bf16.mxu0 %v6014_v63 }
 0x1a5   : > { %v1422_v33 = vadd.f32 %v1421_v26, %v6927_v15  ;;  %v1423_v34 = vpop.f32.mrb[14].mxu1  ;;  %3395 = vmatprep.mubr.bf16.mxu0 %v2464_v28  ;;  %v6023_v28 = vld [vmem:[#allocation10 + $0x174] ss:$8 sps:$4 sm:$0xff]  }
 0x1a6   : > { %v1424_v35 = vadd.f32 %v1423_v34, %v6922_v6  ;;  %v1425_v40 = vpop.f32.mrb[15].mxu1  ;;  %3396 = vmatmul.mubr.bf16.gmra.mrb[8].mxu0 %v2463_v24  ;;  %v2175_v47 = vmax.f32 %v1420_v25, 0.0 }
 0x1a7   : > { %v1426_v43 = vadd.f32 %v1425_v40, %v6927_v15  ;;  %3545 = vmatpush1.bf16.msra.mxu0 %v6012_v22  ;;  %v2176_v54 = vmax.f32 %v1422_v33, 0.0  ;;  %v6021_v33 = vld [vmem:[#allocation10 + $0x170] ss:$8 sps:$4 sm:$0xff]   ;;  %v6026_v40 = vld [vmem:[#allocation10 + $0x184] ss:$8 sps:$4 sm:$0xff]  }
 0x1a8   : > { %v2183_v48 = vmax.f32 %v1424_v35, 0.0  ;;  %1721 = vmatmul.mubr.bf16.gmra.mrb[120].mxu1 %v6866_v49  ;;  %3546 = vmatprep.subr.bf16.mxu0 %v6017_v32 }
 0x1a9   : > { %v2184_v60 = vmax.f32 %v1426_v43, 0.0  ;;  %1730 = vmatprep.mubr.bf16.mxu1 %v6868_v52 }
 0x1aa   : > { %v2471_v61 = vpack.c.bf16 %v2183_v48, %v2175_v47 }
 0x1ab   : > { %v2472_v62 = vpack.c.bf16 %v2184_v60, %v2176_v54  ;;  %v1429_v63 = vpop.f32.mrb[16].mxu1  ;;  %3547 = vmatpush1.bf16.msra.mxu0 %v6015_v46  ;;  %v556_v54 = vld [vmem:[#allocation8 + $0x58] sm:$0xff] }
 0x1ac   : > { %v1430_v23 = vadd.f32 %v1429_v63, %v6922_v6  ;;  %v1431_v24 = vpop.f32.mrb[17].mxu1  ;;  %3548 = vmatprep.subr.bf16.mxu0 %v6020_v53  ;;  %v560_v60 = vld [vmem:[#allocation8 + $0x78] sm:$0xff] }
 0x1ad   : > { %v1432_v21 = vadd.f32 %v1431_v24, %v6927_v15  ;;  %v1433_v22 = vpop.f32.mrb[18].mxu1  ;;  %3405 = vmatprep.mubr.bf16.mxu0 %v2472_v62 }
 0x1ae   : > { %v1434_v25 = vadd.f32 %v1433_v22, %v6922_v6  ;;  %v1435_v26 = vpop.f32.mrb[19].mxu1  ;;  %3406 = vmatmul.mubr.bf16.gmra.mrb[12].mxu0 %v2471_v61  ;;  %v2191_v34 = vmax.f32 %v1430_v23, 0.0  ;;  %v6024_v61 = vld [vmem:[#allocation10 + $0x180] ss:$8 sps:$4 sm:$0xff]   ;;  %v5418_v22 = vcombine.high %v556_v54, %v560_v60 }
 0x1af   : > { %v1436_v32 = vadd.f32 %v1435_v26, %v6927_v15  ;;  %3549 = vmatpush1.bf16.msra.mxu0 %v6018_v19  ;;  %v2192_v43 = vmax.f32 %v1432_v21, 0.0  ;;  %v6029_v19 = vld [vmem:[#allocation10 + $0x194] ss:$8 sps:$4 sm:$0xff]  }
 0x1b0   : > { %v2199_v35 = vmax.f32 %v1434_v25, 0.0  ;;  %1731 = vmatmul.mubr.bf16.gmra.mrb[124].mxu1 %v6874_v55  ;;  %3550 = vmatprep.subr.bf16.mxu0 %v6023_v28  ;;  %v564_v26 = vld [vmem:[#allocation8 + $0x98] sm:$0xff] }
 0x1b1   : > { %v2200_v46 = vmax.f32 %v1436_v32, 0.0  ;;  %1773 = vmatprep.mubr.bf16.mxu1 %v6711_v20  ;;  %v568_v32 = vld [vmem:[#allocation8 + $0xb8] sm:$0xff] }
 0x1b2   : > { %v2479_v47 = vpack.c.bf16 %v2199_v35, %v2191_v34 }
 0x1b3   : > { %v2480_v48 = vpack.c.bf16 %v2200_v46, %v2192_v43  ;;  %v1439_v53 = vpop.f32.mrb[20].mxu1  ;;  %3551 = vmatpush1.bf16.msra.mxu0 %v6021_v33  ;;  %v6027_v33 = vld [vmem:[#allocation10 + $0x190] ss:$8 sps:$4 sm:$0xff]  }
 0x1b4   : > { %v1440_v62 = vadd.f32 %v1439_v53, %v6922_v6  ;;  %v1441_v63 = vpop.f32.mrb[21].mxu1  ;;  %3552 = vmatprep.subr.bf16.mxu0 %v6026_v40  ;;  %v6032_v40 = vld [vmem:[#allocation10 + $0x1a4] ss:$8 sps:$4 sm:$0xff]   ;;  %v5426_v53 = vcombine.high %v564_v26, %v568_v32 }
 0x1b5   : > { %v1442_v23 = vadd.f32 %v1441_v63, %v6927_v15  ;;  %v1443_v24 = vpop.f32.mrb[22].mxu1  ;;  %3415 = vmatprep.mubr.bf16.mxu0 %v2480_v48 }
 0x1b6   : > { %v1444_v28 = vadd.f32 %v1443_v24, %v6922_v6  ;;  %v1445_v21 = vpop.f32.mrb[23].mxu1  ;;  %3416 = vmatmul.mubr.bf16.gmra.mrb[16].mxu0 %v2479_v47  ;;  %v2207_v34 = vmax.f32 %v1440_v62, 0.0  ;;  %v5417_v47 = vcombine.low %v556_v54, %v560_v60  ;;  %v572_v62 = vld [vmem:[#allocation8 + $0xd8] sm:$0xff] }
 0x1b7   : > { %v1446_v25 = vadd.f32 %v1445_v21, %v6927_v15  ;;  %3553 = vmatpush1.bf16.msra.mxu0 %v6024_v61  ;;  %v2208_v43 = vmax.f32 %v1442_v23, 0.0  ;;  %v576_v24 = vld [vmem:[#allocation8 + $0xf8] sm:$0xff] }
 0x1b8   : > { %v2215_v35 = vmax.f32 %v1444_v28, 0.0  ;;  %1774 = vmatmul.mubr.bf16.vlgmr.msra.gmra.mrb[128].mxu1 %v6718_v12  ;;  %3554 = vmatprep.subr.bf16.mxu0 %v6029_v19  ;;  %v6030_v28 = vld [vmem:[#allocation10 + $0x1a0] ss:$8 sps:$4 sm:$0xff]   ;;  %v6035_v21 = vld [vmem:[#allocation10 + $0x1b4] ss:$8 sps:$4 sm:$0xff]  }
 0x1b9   : > { %v2216_v46 = vmax.f32 %v1446_v25, 0.0  ;;  %1935 = vmatpush1.bf16.msra.mxu1 %v5409_v18  ;;  %1783 = vmatprep.mubr.bf16.mxu1 %v6720_v14  ;;  %v5425_v18 = vcombine.low %v564_v26, %v568_v32  ;;  %v5433_v32 = vcombine.low %v572_v62, %v576_v24 }
 0x1ba   : > { %v2487_v48 = vpack.c.bf16 %v2215_v35, %v2207_v34  ;;  %1936 = vmatprep.subr.bf16.mxu1 %v5418_v22  ;;  %v5434_v22 = vcombine.high %v572_v62, %v576_v24  ;;  %v584_v34 = vld [vmem:[#allocation8 + $0x138] sm:$0xff] }
 0x1bb   : > { %v2488_v61 = vpack.c.bf16 %v2216_v46, %v2208_v43  ;;  %v1449_v63 = vpop.f32.mrb[24].mxu1  ;;  %3555 = vmatpush1.bf16.msra.mxu0 %v6027_v33  ;;  %v580_v33 = vld [vmem:[#allocation8 + $0x118] sm:$0xff]  ;;  %v6038_v46 = vld [vmem:[#allocation10 + $0x1c4] ss:$8 sps:$4 sm:$0xff]  }
 0x1bc   : > { %v1450_v19 = vadd.f32 %v1449_v63, %v6922_v6  ;;  %v1451_v23 = vpop.f32.mrb[25].mxu1  ;;  %3556 = vmatprep.subr.bf16.mxu0 %v6032_v40  ;;  %v6033_v35 = vld [vmem:[#allocation10 + $0x1b0] ss:$8 sps:$4 sm:$0xff]   ;;  %v5441_v62 = vcombine.low %v580_v33, %v584_v34 }
 0x1bd   : > { %v1452_v7 = vadd.f32 %v1451_v23, %v6927_v15  ;;  %v1453_v9 = vpop.f32.mrb[26].mxu1  ;;  %3425 = vmatprep.mubr.bf16.mxu0 %v2488_v61  ;;  %1937 = vmatpush1.bf16.msra.mxu1 %v5417_v47  ;;  %v588_v23 = vld [vmem:[#allocation8 + $0x158] sm:$0xff] }
 0x1be   : > { %v1454_v54 = vadd.f32 %v1453_v9, %v6922_v6  ;;  %v1455_v60 = vpop.f32.mrb[27].mxu1  ;;  %3426 = vmatmul.mubr.bf16.gmra.mrb[20].mxu0 %v2487_v48  ;;  %1938 = vmatprep.subr.bf16.mxu1 %v5426_v53  ;;  %v2223_v40 = vmax.f32 %v1450_v19, 0.0  ;;  %v5442_v53 = vcombine.high %v580_v33, %v584_v34  ;;  %v6036_v19 = vld [vmem:[#allocation10 + $0x1c0] ss:$8 sps:$4 sm:$0xff]  }
 0x1bf   : > { %v1456_v25 = vadd.f32 %v1455_v60, %v6927_v15  ;;  %3557 = vmatpush1.bf16.msra.mxu0 %v6030_v28  ;;  %v2224_v47 = vmax.f32 %v1452_v7, 0.0  ;;  %v592_v28 = vld [vmem:[#allocation8 + $0x178] sm:$0xff] }
 0x1c0   : > { %v2231_v43 = vmax.f32 %v1454_v54, 0.0  ;;  %1784 = vmatmul.mubr.bf16.gmra.mrb[132].mxu1 %v6734_v30  ;;  %3558 = vmatprep.subr.bf16.mxu0 %v6035_v21  ;;  %v6041_v21 = vld [vmem:[#allocation10 + $0x1d4] ss:$8 sps:$4 sm:$0xff]   ;;  %v5449_v34 = vcombine.low %v588_v23, %v592_v28 }
 0x1c1   : > { %v2232_v26 = vmax.f32 %v1456_v25, 0.0  ;;  %1793 = vmatprep.mubr.bf16.mxu1 %v6736_v31  ;;  %1939 = vmatpush1.bf16.msra.mxu1 %v5425_v18 }
 0x1c2   : > { %v2495_v48 = vpack.c.bf16 %v2231_v43, %v2223_v40  ;;  %1940 = vmatprep.subr.bf16.mxu1 %v5434_v22  ;;  %v5450_v22 = vcombine.high %v588_v23, %v592_v28  ;;  %v600_v40 = vld [vmem:[#allocation8 + $0x1b8] sm:$0xff] }
 0x1c3   : > { %v2496_v61 = vpack.c.bf16 %v2232_v26, %v2224_v47  ;;  %v1459_v63 = vpop.f32.mrb[28].mxu1  ;;  %3559 = vmatpush1.bf16.msra.mxu0 %v6033_v35  ;;  %v596_v35 = vld [vmem:[#allocation8 + $0x198] sm:$0xff]  ;;  %v6044_v26 = vld [vmem:[#allocation10 + $0x1e4] ss:$8 sps:$4 sm:$0xff]  }
 0x1c4   : > { %v1460_v9 = vadd.f32 %v1459_v63, %v6922_v6  ;;  %v1461_v54 = vpop.f32.mrb[29].mxu1  ;;  %3560 = vmatprep.subr.bf16.mxu0 %v6038_v46  ;;  %v6039_v43 = vld [vmem:[#allocation10 + $0x1d0] ss:$8 sps:$4 sm:$0xff]   ;;  %v5457_v23 = vcombine.low %v596_v35, %v600_v40 }
 0x1c5   : > { %v1462_v7 = vadd.f32 %v1461_v54, %v6927_v15  ;;  %v1463_v60 = vpop.f32.mrb[30].mxu1  ;;  %3435 = vmatprep.mubr.bf16.mxu0 %v2496_v61  ;;  %1941 = vmatpush1.bf16.msra.mxu1 %v5433_v32  ;;  %v604_v54 = vld [vmem:[#allocation8 + $0x1d8] sm:$0xff] }
 0x1c6   : > { %v1464_v24 = vadd.f32 %v1463_v60, %v6922_v6  ;;  %v1465_v18 = vpop.f32.mrb[31].mxu1  ;;  %3436 = vmatmul.mubr.bf16.gmra.mrb[24].mxu0 %v2495_v48  ;;  %1942 = vmatprep.subr.bf16.mxu1 %v5442_v53  ;;  %v2239_v46 = vmax.f32 %v1460_v9, 0.0  ;;  %v5458_v53 = vcombine.high %v596_v35, %v600_v40  ;;  %v6042_v9 = vld [vmem:[#allocation10 + $0x1e0] ss:$8 sps:$4 sm:$0xff]  }
 0x1c7   : > { %v1466_v25 = vadd.f32 %v1465_v18, %v6927_v15  ;;  %3561 = vmatpush1.bf16.msra.mxu0 %v6036_v19  ;;  %v2240_v32 = vmax.f32 %v1462_v7, 0.0  ;;  %v608_v19 = vld [vmem:[#allocation8 + $0x1f8] sm:$0xff] }
 0x1c8   : > { %v2247_v47 = vmax.f32 %v1464_v24, 0.0  ;;  %1794 = vmatmul.mubr.bf16.gmra.mrb[136].mxu1 %v6744_v44  ;;  %3562 = vmatprep.subr.bf16.mxu0 %v6041_v21  ;;  %v6047_v21 = vld [vmem:[#allocation10 + $0x1f4] ss:$8 sps:$4 sm:$0xff]   ;;  %v5465_v40 = vcombine.low %v604_v54, %v608_v19 }
 0x1c9   : > { %v2248_v33 = vmax.f32 %v1466_v25, 0.0  ;;  %1803 = vmatprep.mubr.bf16.mxu1 %v6746_v45  ;;  %1943 = vmatpush1.bf16.msra.mxu1 %v5441_v62 }
 0x1ca   : > { %v2503_v48 = vpack.c.bf16 %v2247_v47, %v2239_v46  ;;  %1944 = vmatprep.subr.bf16.mxu1 %v5450_v22  ;;  %v5466_v22 = vcombine.high %v604_v54, %v608_v19  ;;  %v616_v46 = vld [vmem:[#allocation8 + $0x238] sm:$0xff] }
 0x1cb   : > { %v2504_v61 = vpack.c.bf16 %v2248_v33, %v2240_v32  ;;  %v1469_v63 = vpop.f32.mrb[32].mxu1  ;;  %3563 = vmatpush1.bf16.msra.mxu0 %v6039_v43  ;;  %v612_v43 = vld [vmem:[#allocation8 + $0x218] sm:$0xff]  ;;  %v6050_v33 = vld [vmem:[#allocation10 + $0x204] ss:$8 sps:$4 sm:$0xff]  }
 0x1cc   : > { %v1470_v60 = vadd.f32 %v1469_v63, %v6922_v6  ;;  %v1471_v24 = vpop.f32.mrb[33].mxu1  ;;  %3564 = vmatprep.subr.bf16.mxu0 %v6044_v26  ;;  %v6045_v47 = vld [vmem:[#allocation10 + $0x1f0] ss:$8 sps:$4 sm:$0xff]  }
 0x1cd   : > { %v1472_v7 = vadd.f32 %v1471_v24, %v6927_v15  ;;  %v1473_v18 = vpop.f32.mrb[34].mxu1  ;;  %3445 = vmatprep.mubr.bf16.mxu0 %v2504_v61  ;;  %1945 = vmatpush1.bf16.msra.mxu1 %v5449_v34  ;;  %v620_v24 = vld [vmem:[#allocation8 + $0x258] sm:$0xff] }
 0x1ce   : > { %v1474_v28 = vadd.f32 %v1473_v18, %v6922_v6  ;;  %v1475_v62 = vpop.f32.mrb[35].mxu1  ;;  %3446 = vmatmul.mubr.bf16.gmra.mrb[28].mxu0 %v2503_v48  ;;  %1946 = vmatprep.subr.bf16.mxu1 %v5458_v53  ;;  %v2255_v26 = vmax.f32 %v1470_v60, 0.0  ;;  %v5474_v53 = vcombine.high %v612_v43, %v616_v46 }
 0x1cf   : > { %v1476_v25 = vadd.f32 %v1475_v62, %v6927_v15  ;;  %3565 = vmatpush1.bf16.msra.mxu0 %v6042_v9  ;;  %v2256_v34 = vmax.f32 %v1472_v7, 0.0  ;;  %v624_v9 = vld [vmem:[#allocation8 + $0x278] sm:$0xff] }
 0x1d0   : > { %v2263_v32 = vmax.f32 %v1474_v28, 0.0  ;;  %1804 = vmatmul.mubr.bf16.gmra.mrb[140].mxu1 %v6754_v58  ;;  %3566 = vmatprep.subr.bf16.mxu0 %v6047_v21  ;;  %v5473_v28 = vcombine.low %v612_v43, %v616_v46  ;;  %v5481_v43 = vcombine.low %v620_v24, %v624_v9 }
 0x1d1   : > { %v2264_v35 = vmax.f32 %v1476_v25, 0.0  ;;  %1813 = vmatprep.mubr.bf16.mxu1 %v6756_v59  ;;  %1947 = vmatpush1.bf16.msra.mxu1 %v5457_v23  ;;  %v5482_v23 = vcombine.high %v620_v24, %v624_v9  ;;  %v632_v25 = vld [vmem:[#allocation8 + $0x2b8] sm:$0xff] }
 0x1d2   : > { %v2511_v48 = vpack.c.bf16 %v2263_v32, %v2255_v26  ;;  %1948 = vmatprep.subr.bf16.mxu1 %v5466_v22  ;;  %v628_v22 = vld [vmem:[#allocation8 + $0x298] sm:$0xff] }
 0x1d3   : > { %v2512_v61 = vpack.c.bf16 %v2264_v35, %v2256_v34  ;;  %v1479_v63 = vpop.f32.mrb[36].mxu1  ;;  %3567 = vmatpush1.bf16.msra.mxu0 %v6045_v47  ;;  %v5490_v34 = vcombine.high %v628_v22, %v632_v25 }
 0x1d4   : > { %v1480_v60 = vadd.f32 %v1479_v63, %v6922_v6  ;;  %v1481_v18 = vpop.f32.mrb[37].mxu1  ;;  %3729 = vmatprep.subr.bf16.mxu0 %v6050_v33 }
 0x1d5   : > { %v1482_v21 = vadd.f32 %v1481_v18, %v6927_v15  ;;  %v1483_v7 = vpop.f32.mrb[38].mxu1  ;;  %3455 = vmatprep.mubr.bf16.mxu0 %v2512_v61  ;;  %1949 = vmatpush1.bf16.msra.mxu1 %v5465_v40 }
 0x1d6   : > { %v1484_v54 = vadd.f32 %v1483_v7, %v6922_v6  ;;  %v1485_v19 = vpop.f32.mrb[39].mxu1  ;;  %3456 = vmatmul.mubr.bf16.gmra.mrb[32].mxu0 %v2511_v48  ;;  %1950 = vmatprep.subr.bf16.mxu1 %v5474_v53  ;;  %v2271_v47 = vmax.f32 %v1480_v60, 0.0  ;;  %v636_v48 = vld [vmem:[#allocation8 + $0x2d8] sm:$0xff] }
 0x1d7   : > { %v1486_v62 = vadd.f32 %v1485_v19, %v6927_v15  ;;  %v2272_v32 = vmax.f32 %v1482_v21, 0.0  ;;  %v640_v53 = vld [vmem:[#allocation8 + $0x2f8] sm:$0xff]  ;;  %v5489_v21 = vcombine.low %v628_v22, %v632_v25 }
 0x1d8   : > { %v2279_v26 = vmax.f32 %v1484_v54, 0.0  ;;  %1814 = vmatmul.mubr.bf16.gmra.mrb[144].mxu1 %v6764_v10  ;;  %v5498_v24 = vcombine.high %v636_v48, %v640_v53  ;;  %v644_v54 = vld [vmem:[#allocation8 + $0x318] sm:$0xff]  ;;  %v5497_v22 = vcombine.low %v636_v48, %v640_v53 }
 0x1d9   : > { %v2280_v33 = vmax.f32 %v1486_v62, 0.0  ;;  %1823 = vmatprep.mubr.bf16.mxu1 %v6766_v11  ;;  %1951 = vmatpush1.bf16.msra.mxu1 %v5473_v28  ;;  %v648_v19 = vld [vmem:[#allocation8 + $0x338] sm:$0xff] }
 0x1da   : > { %v2519_v46 = vpack.c.bf16 %v2279_v26, %v2271_v47  ;;  %1952 = vmatprep.subr.bf16.mxu1 %v5482_v23 }
 0x1db   : > { %v2520_v35 = vpack.c.bf16 %v2280_v33, %v2272_v32  ;;  %v1489_v40 = vpop.f32.mrb[40].mxu1  ;;  %v5506_v32 = vcombine.high %v644_v54, %v648_v19 }
 0x1dc   : > { %v1490_v61 = vadd.f32 %v1489_v40, %v6922_v6  ;;  %v1491_v63 = vpop.f32.mrb[41].mxu1 }
 0x1dd   : > { %v1492_v60 = vadd.f32 %v1491_v63, %v6927_v15  ;;  %v1493_v18 = vpop.f32.mrb[42].mxu1  ;;  %3465 = vmatprep.mubr.bf16.mxu0 %v2520_v35  ;;  %1953 = vmatpush1.bf16.msra.mxu1 %v5481_v43 }
 0x1de   : > { %v1494_v7 = vadd.f32 %v1493_v18, %v6922_v6  ;;  %v1495_v28 = vpop.f32.mrb[43].mxu1  ;;  %3466 = vmatmul.mubr.bf16.gmra.mrb[36].mxu0 %v2519_v46  ;;  %1954 = vmatprep.subr.bf16.mxu1 %v5490_v34  ;;  %v2287_v23 = vmax.f32 %v1490_v61, 0.0  ;;  %v652_v46 = vld [vmem:[#allocation8 + $0x358] sm:$0xff] }
 0x1df   : > { %v1496_v9 = vadd.f32 %v1495_v28, %v6927_v15  ;;  %v2288_v47 = vmax.f32 %v1492_v60, 0.0  ;;  %v656_v34 = vld [vmem:[#allocation8 + $0x378] sm:$0xff]  ;;  %v5505_v60 = vcombine.low %v644_v54, %v648_v19 }
 0x1e0   : > { %v2295_v62 = vmax.f32 %v1494_v7, 0.0  ;;  %1824 = vmatmul.mubr.bf16.gmra.mrb[148].mxu1 %v6774_v36  ;;  %v5514_v48 = vcombine.high %v652_v46, %v656_v34  ;;  %v660_v7 = vld [vmem:[#allocation8 + $0x398] sm:$0xff]  ;;  %v5513_v54 = vcombine.low %v652_v46, %v656_v34 }
 0x1e1   : > { %v2296_v26 = vmax.f32 %v1496_v9, 0.0  ;;  %1833 = vmatprep.mubr.bf16.mxu1 %v6776_v37  ;;  %1955 = vmatpush1.bf16.msra.mxu1 %v5489_v21  ;;  %v664_v28 = vld [vmem:[#allocation8 + $0x3b8] sm:$0xff] }
 0x1e2   : > { %v2527_v25 = vpack.c.bf16 %v2295_v62, %v2287_v23  ;;  %1956 = vmatprep.subr.bf16.mxu1 %v5498_v24 }
 0x1e3   : > { %v2528_v33 = vpack.c.bf16 %v2296_v26, %v2288_v47  ;;  %v1499_v43 = vpop.f32.mrb[44].mxu1  ;;  %v5522_v47 = vcombine.high %v660_v7, %v664_v28 }
 0x1e4   : > { %v1500_v35 = vadd.f32 %v1499_v43, %v6922_v6  ;;  %v1501_v40 = vpop.f32.mrb[45].mxu1 }
 0x1e5   : > { %v1502_v61 = vadd.f32 %v1501_v40, %v6927_v15  ;;  %v1503_v63 = vpop.f32.mrb[46].mxu1  ;;  %3475 = vmatprep.mubr.bf16.mxu0 %v2528_v33  ;;  %1957 = vmatpush1.bf16.msra.mxu1 %v5497_v22 }
 0x1e6   : > { %v1504_v18 = vadd.f32 %v1503_v63, %v6922_v6  ;;  %v1505_v21 = vpop.f32.mrb[47].mxu1  ;;  %3476 = vmatmul.mubr.bf16.gmra.mrb[40].mxu0 %v2527_v25  ;;  %1958 = vmatprep.subr.bf16.mxu1 %v5506_v32  ;;  %v2303_v24 = vmax.f32 %v1500_v35, 0.0  ;;  %v668_v25 = vld [vmem:[#allocation8 + $0x3d8] sm:$0xff] }
 0x1e7   : > { %v1506_v53 = vadd.f32 %v1505_v21, %v6927_v15  ;;  %v2304_v23 = vmax.f32 %v1502_v61, 0.0  ;;  %v672_v32 = vld [vmem:[#allocation8 + $0x3f8] sm:$0xff]  ;;  %v5521_v61 = vcombine.low %v660_v7, %v664_v28 }
 0x1e8   : > { %v2311_v9 = vmax.f32 %v1504_v18, 0.0  ;;  %1834 = vmatmul.mubr.bf16.gmra.mrb[152].mxu1 %v6784_v56  ;;  %v5530_v46 = vcombine.high %v668_v25, %v672_v32 }
 0x1e9   : > { %v2312_v62 = vmax.f32 %v1506_v53, 0.0  ;;  %1843 = vmatprep.mubr.bf16.mxu1 %v6786_v57  ;;  %1959 = vmatpush1.bf16.msra.mxu1 %v5505_v60 }
 0x1ea   : > { %v2535_v19 = vpack.c.bf16 %v2311_v9, %v2303_v24  ;;  %1960 = vmatprep.subr.bf16.mxu1 %v5514_v48  ;;  %v5529_v24 = vcombine.low %v668_v25, %v672_v32 }
 0x1eb   : > { %v2536_v26 = vpack.c.bf16 %v2312_v62, %v2304_v23  ;;  %v1509_v22 = vpop.f32.mrb[48].mxu1 }
 0x1ec   : > { %v1510_v33 = vadd.f32 %v1509_v22, %v6922_v6  ;;  %v1511_v43 = vpop.f32.mrb[49].mxu1 }
 0x1ed   : > { %v1512_v35 = vadd.f32 %v1511_v43, %v6927_v15  ;;  %v1513_v40 = vpop.f32.mrb[50].mxu1  ;;  %3485 = vmatprep.mubr.bf16.mxu0 %v2536_v26  ;;  %1961 = vmatpush1.bf16.msra.mxu1 %v5513_v54 }
 0x1ee   : > { %v1514_v63 = vadd.f32 %v1513_v40, %v6922_v6  ;;  %v1515_v60 = vpop.f32.mrb[51].mxu1  ;;  %3486 = vmatmul.mubr.bf16.gmra.mrb[44].mxu0 %v2535_v19  ;;  %1962 = vmatprep.subr.bf16.mxu1 %v5522_v47  ;;  %v2319_v18 = vmax.f32 %v1510_v33, 0.0 }
 0x1ef   : > { %v1516_v34 = vadd.f32 %v1515_v60, %v6927_v15  ;;  %v2320_v48 = vmax.f32 %v1512_v35, 0.0 }
 0x1f0   : > { %v2327_v21 = vmax.f32 %v1514_v63, 0.0  ;;  %1844 = vmatmul.mubr.bf16.gmra.mrb[156].mxu1 %v6794_v16 }
 0x1f1   : > { %v2328_v53 = vmax.f32 %v1516_v34, 0.0  ;;  %1853 = vmatprep.mubr.bf16.mxu1 %v6796_v17  ;;  %1963 = vmatpush1.bf16.msra.mxu1 %v5521_v61 }
 0x1f2   : > { %v2543_v9 = vpack.c.bf16 %v2327_v21, %v2319_v18  ;;  %1964 = vmatprep.subr.bf16.mxu1 %v5530_v46 }
 0x1f3   : > { %v2544_v7 = vpack.c.bf16 %v2328_v53, %v2320_v48  ;;  %v1519_v28 = vpop.f32.mrb[52].mxu1 }
 0x1f4   : > { %v1520_v23 = vadd.f32 %v1519_v28, %v6922_v6  ;;  %v1521_v62 = vpop.f32.mrb[53].mxu1 }
 0x1f5   : > { %v1522_v54 = vadd.f32 %v1521_v62, %v6927_v15  ;;  %v1523_v19 = vpop.f32.mrb[54].mxu1  ;;  %3495 = vmatprep.mubr.bf16.mxu0 %v2544_v7  ;;  %1965 = vmatpush1.bf16.msra.mxu1 %v5529_v24 }
 0x1f6   : > { %v1524_v47 = vadd.f32 %v1523_v19, %v6922_v6  ;;  %v1525_v26 = vpop.f32.mrb[55].mxu1  ;;  %3496 = vmatmul.mubr.bf16.gmra.mrb[48].mxu0 %v2543_v9  ;;  %v2335_v33 = vmax.f32 %v1520_v23, 0.0 }
 0x1f7   : > { %v1526_v22 = vadd.f32 %v1525_v26, %v6927_v15  ;;  %v2336_v32 = vmax.f32 %v1522_v54, 0.0 }
 0x1f8   : > { %v2343_v25 = vmax.f32 %v1524_v47, 0.0  ;;  %1854 = vmatmul.mubr.bf16.gmra.mrb[160].mxu1 %v6806_v38  ;;  %v685_v47 = vsub.s32 2, %v6908_v2 }
 0x1f9   : > { %v2344_v43 = vmax.f32 %v1526_v22, 0.0  ;;  %1863 = vmatprep.mubr.bf16.mxu1 %v6808_v39 }
 0x1fa   : > { %v2551_v35 = vpack.c.bf16 %v2343_v25, %v2335_v33  ;;  %v689_v33 = vsub.s32 3, %v6908_v2 }
 0x1fb   : > { %v2552_v40 = vpack.c.bf16 %v2344_v43, %v2336_v32  ;;  %v1529_v61 = vpop.f32.mrb[56].mxu1 }
 0x1fc   : > { %v1530_v63 = vadd.f32 %v1529_v61, %v6922_v6  ;;  %v1531_v60 = vpop.f32.mrb[57].mxu1  ;;  %v7031_v61 = vrot.slane %v6915_v4, %v685_v47 }
 0x1fd   : > { %v1532_v46 = vadd.f32 %v1531_v60, %v6927_v15  ;;  %v1533_v34 = vpop.f32.mrb[58].mxu1  ;;  %3505 = vmatprep.mubr.bf16.mxu0 %v2552_v40 }
 0x1fe   : > { %v1534_v18 = vadd.f32 %v1533_v34, %v6922_v6  ;;  %v1535_v21 = vpop.f32.mrb[59].mxu1  ;;  %3506 = vmatmul.mubr.bf16.gmra.mrb[52].mxu0 %v2551_v35  ;;  %v2351_v53 = vmax.f32 %v1530_v63, 0.0 }
 0x1ff   : > { %v1536_v48 = vadd.f32 %v1535_v21, %v6927_v15  ;;  %v2352_v9 = vmax.f32 %v1532_v46, 0.0  ;;  %v7034_v46 = vrot.slane %v6915_v4, %v689_v33 }
 0x200   : > { %v2359_v24 = vmax.f32 %v1534_v18, 0.0  ;;  %1864 = vmatmul.mubr.bf16.gmra.mrb[164].mxu1 %v6816_v50 }
 0x201   : > { %v2360_v7 = vmax.f32 %v1536_v48, 0.0  ;;  %1873 = vmatprep.mubr.bf16.mxu1 %v6818_v51 }
 0x202   : > { %v2559_v28 = vpack.c.bf16 %v2359_v24, %v2351_v53 }
 0x203   : > { %v2560_v23 = vpack.c.bf16 %v2360_v7, %v2352_v9  ;;  %v1539_v62 = vpop.f32.mrb[60].mxu1 }
 0x204   : > { %v1540_v54 = vadd.f32 %v1539_v62, %v6922_v6  ;;  %v1541_v19 = vpop.f32.mrb[61].mxu1 }
 0x205   : > { %v1542_v26 = vadd.f32 %v1541_v19, %v6927_v15  ;;  %v1543_v22 = vpop.f32.mrb[62].mxu1  ;;  %3515 = vmatprep.mubr.bf16.mxu0 %v2560_v23 }
 0x206   : > { %v1544_v25 = vadd.f32 %v1543_v22, %v6922_v6  ;;  %v1545_v32 = vpop.f32.mrb[63].mxu1  ;;  %3516 = vmatmul.mubr.bf16.gmra.mrb[56].mxu0 %v2559_v28  ;;  %v2367_v35 = vmax.f32 %v1540_v54, 0.0 }
 0x207   : > { %v1546_v43 = vadd.f32 %v1545_v32, %v6927_v15  ;;  %v2368_v63 = vmax.f32 %v1542_v26, 0.0  ;;  %v6048_v26 = vld [vmem:[#allocation10 + $0x200] ss:$8 sps:$4 sm:$0xff]  }
 0x208   : > { %v2375_v40 = vmax.f32 %v1544_v25, 0.0  ;;  %1874 = vmatmul.mubr.bf16.gmra.mrb[168].mxu1 %v6826_v0  ;;  %v6053_v25 = vld [vmem:[#allocation10 + $0x214] ss:$8 sps:$4 sm:$0xff]  }
 0x209   : > { %v2376_v60 = vmax.f32 %v1546_v43, 0.0  ;;  %1883 = vmatprep.mubr.bf16.mxu1 %v6828_v1 }
 0x20a   : > { %v2567_v34 = vpack.c.bf16 %v2375_v40, %v2367_v35 }
 0x20b   : > { %v2568_v6 = vpack.c.bf16 %v2376_v60, %v2368_v63  ;;  %v1582_v18 = vpop.f32.mrb[64].mxu1  ;;  %v6051_v60 = vld [vmem:[#allocation10 + $0x210] ss:$8 sps:$4 sm:$0xff]  }
 0x20c   : > { %v1583_v21 = vadd.f32 %v1582_v18, %v7031_v61  ;;  %v1584_v15 = vpop.f32.mrb[65].mxu1  ;;  %v6056_v18 = vld [vmem:[#allocation10 + $0x224] ss:$8 sps:$4 sm:$0xff]  }
 0x20d   : > { %v1585_v48 = vadd.f32 %v1584_v15, %v7034_v46  ;;  %v1586_v53 = vpop.f32.mrb[66].mxu1  ;;  %3525 = vmatprep.mubr.bf16.mxu0 %v2568_v6 }
 0x20e   : > { %v1587_v24 = vadd.f32 %v1586_v53, %v7031_v61  ;;  %v1588_v9 = vpop.f32.mrb[67].mxu1  ;;  %3526 = vmatmul.mubr.bf16.gmra.mrb[60].mxu0 %v2567_v34  ;;  %v2129_v4 = vmax.f32 %v1583_v21, 0.0 }
 0x20f   : > { %v1589_v7 = vadd.f32 %v1588_v9, %v7034_v46  ;;  %v2130_v23 = vmax.f32 %v1585_v48, 0.0  ;;  %v6054_v9 = vld [vmem:[#allocation10 + $0x220] ss:$8 sps:$4 sm:$0xff]  }
 0x210   : > { %v2137_v28 = vmax.f32 %v1587_v24, 0.0  ;;  %1884 = vmatmul.mubr.bf16.gmra.mrb[172].mxu1 %v6836_v8 }
 0x211   : > { %v2138_v62 = vmax.f32 %v1589_v7, 0.0  ;;  %1893 = vmatprep.mubr.bf16.mxu1 %v6838_v13 }
 0x212   : > { %v2449_v54 = vpack.c.bf16 %v2137_v28, %v2129_v4  ;;  %v6059_v28 = vld [vmem:[#allocation10 + $0x234] ss:$8 sps:$4 sm:$0xff]  }
 0x213   : > { %v2450_v19 = vpack.c.bf16 %v2138_v62, %v2130_v23  ;;  %v1592_v47 = vpop.f32.mrb[68].mxu1 }
 0x214   : > { %v1593_v22 = vadd.f32 %v1592_v47, %v7031_v61  ;;  %v1594_v33 = vpop.f32.mrb[69].mxu1 }
 0x215   : > { %v1595_v32 = vadd.f32 %v1594_v33, %v7034_v46  ;;  %v1596_v43 = vpop.f32.mrb[70].mxu1  ;;  %3568 = vmatprep.mubr.bf16.mxu0 %v2450_v19 }
 0x216   : > { %v1597_v35 = vadd.f32 %v1596_v43, %v7031_v61  ;;  %v1598_v40 = vpop.f32.mrb[71].mxu1  ;;  %3569 = vmatmul.mubr.bf16.vlgmr.msra.gmra.mrb[0].mxu0 %v2449_v54  ;;  %v2145_v34 = vmax.f32 %v1593_v22, 0.0 }
 0x217   : > { %v1599_v63 = vadd.f32 %v1598_v40, %v7034_v46  ;;  %3730 = vmatpush1.bf16.msra.mxu0 %v6048_v26  ;;  %v2146_v21 = vmax.f32 %v1595_v32, 0.0  ;;  %v6057_v26 = vld [vmem:[#allocation10 + $0x230] ss:$8 sps:$4 sm:$0xff]  }
 0x218   : > { %v2153_v6 = vmax.f32 %v1597_v35, 0.0  ;;  %1894 = vmatmul.mubr.bf16.gmra.mrb[176].mxu1 %v6846_v27  ;;  %3731 = vmatprep.subr.bf16.mxu0 %v6053_v25  ;;  %v6062_v25 = vld [vmem:[#allocation10 + $0x244] ss:$8 sps:$4 sm:$0xff]  }
 0x219   : > { %v2154_v15 = vmax.f32 %v1599_v63, 0.0  ;;  %1903 = vmatprep.mubr.bf16.mxu1 %v6848_v29 }
 0x21a   : > { %v2457_v48 = vpack.c.bf16 %v2153_v6, %v2145_v34 }
 0x21b   : > { %v2458_v53 = vpack.c.bf16 %v2154_v15, %v2146_v21  ;;  %v1602_v24 = vpop.f32.mrb[72].mxu1  ;;  %3732 = vmatpush1.bf16.msra.mxu0 %v6051_v60  ;;  %v6060_v60 = vld [vmem:[#allocation10 + $0x240] ss:$8 sps:$4 sm:$0xff]  }
 0x21c   : > { %v1603_v7 = vadd.f32 %v1602_v24, %v7031_v61  ;;  %v1604_v4 = vpop.f32.mrb[73].mxu1  ;;  %3733 = vmatprep.subr.bf16.mxu0 %v6056_v18  ;;  %v6065_v18 = vld [vmem:[#allocation10 + $0x254] ss:$8 sps:$4 sm:$0xff]  }
 0x21d   : > { %v1605_v23 = vadd.f32 %v1604_v4, %v7034_v46  ;;  %v1606_v62 = vpop.f32.mrb[74].mxu1  ;;  %3578 = vmatprep.mubr.bf16.mxu0 %v2458_v53 }
 0x21e   : > { %v1607_v54 = vadd.f32 %v1606_v62, %v7031_v61  ;;  %v1608_v19 = vpop.f32.mrb[75].mxu1  ;;  %3579 = vmatmul.mubr.bf16.gmra.mrb[4].mxu0 %v2457_v48  ;;  %v2161_v22 = vmax.f32 %v1603_v7, 0.0 }
 0x21f   : > { %v1609_v47 = vadd.f32 %v1608_v19, %v7034_v46  ;;  %3734 = vmatpush1.bf16.msra.mxu0 %v6054_v9  ;;  %v2162_v32 = vmax.f32 %v1605_v23, 0.0  ;;  %v6063_v9 = vld [vmem:[#allocation10 + $0x250] ss:$8 sps:$4 sm:$0xff]  }
 0x220   : > { %v2169_v33 = vmax.f32 %v1607_v54, 0.0  ;;  %1904 = vmatmul.mubr.bf16.gmra.mrb[180].mxu1 %v6856_v41  ;;  %3735 = vmatprep.subr.bf16.mxu0 %v6059_v28  ;;  %v6068_v28 = vld [vmem:[#allocation10 + $0x264] ss:$8 sps:$4 sm:$0xff]  }
 0x221   : > { %v2170_v43 = vmax.f32 %v1609_v47, 0.0  ;;  %1913 = vmatprep.mubr.bf16.mxu1 %v6858_v42 }
 0x222   : > { %v2465_v35 = vpack.c.bf16 %v2169_v33, %v2161_v22 }
 0x223   : > { %v2466_v40 = vpack.c.bf16 %v2170_v43, %v2162_v32  ;;  %v1612_v63 = vpop.f32.mrb[76].mxu1  ;;  %3736 = vmatpush1.bf16.msra.mxu0 %v6057_v26  ;;  %v6066_v26 = vld [vmem:[#allocation10 + $0x260] ss:$8 sps:$4 sm:$0xff]  }
 0x224   : > { %v1613_v34 = vadd.f32 %v1612_v63, %v7031_v61  ;;  %v1614_v6 = vpop.f32.mrb[77].mxu1  ;;  %3737 = vmatprep.subr.bf16.mxu0 %v6062_v25  ;;  %v6071_v25 = vld [vmem:[#allocation10 + $0x274] ss:$8 sps:$4 sm:$0xff]  }
 0x225   : > { %v1615_v21 = vadd.f32 %v1614_v6, %v7034_v46  ;;  %v1616_v15 = vpop.f32.mrb[78].mxu1  ;;  %3588 = vmatprep.mubr.bf16.mxu0 %v2466_v40 }
 0x226   : > { %v1617_v48 = vadd.f32 %v1616_v15, %v7031_v61  ;;  %v1618_v53 = vpop.f32.mrb[79].mxu1  ;;  %3589 = vmatmul.mubr.bf16.gmra.mrb[8].mxu0 %v2465_v35  ;;  %v2177_v7 = vmax.f32 %v1613_v34, 0.0 }
 0x227   : > { %v1619_v24 = vadd.f32 %v1618_v53, %v7034_v46  ;;  %3738 = vmatpush1.bf16.msra.mxu0 %v6060_v60  ;;  %v2178_v23 = vmax.f32 %v1615_v21, 0.0  ;;  %v6069_v60 = vld [vmem:[#allocation10 + $0x270] ss:$8 sps:$4 sm:$0xff]  }
 0x228   : > { %v2185_v4 = vmax.f32 %v1617_v48, 0.0  ;;  %1914 = vmatmul.mubr.bf16.gmra.mrb[184].mxu1 %v6866_v49  ;;  %3739 = vmatprep.subr.bf16.mxu0 %v6065_v18  ;;  %v6074_v18 = vld [vmem:[#allocation10 + $0x284] ss:$8 sps:$4 sm:$0xff]  }
 0x229   : > { %v2186_v62 = vmax.f32 %v1619_v24, 0.0  ;;  %1923 = vmatprep.mubr.bf16.mxu1 %v6868_v52 }
 0x22a   : > { %v2473_v54 = vpack.c.bf16 %v2185_v4, %v2177_v7 }
 0x22b   : > { %v2474_v19 = vpack.c.bf16 %v2186_v62, %v2178_v23  ;;  %v1622_v47 = vpop.f32.mrb[80].mxu1  ;;  %3740 = vmatpush1.bf16.msra.mxu0 %v6063_v9  ;;  %v6072_v9 = vld [vmem:[#allocation10 + $0x280] ss:$8 sps:$4 sm:$0xff]  }
 0x22c   : > { %v1623_v22 = vadd.f32 %v1622_v47, %v7031_v61  ;;  %v1624_v33 = vpop.f32.mrb[81].mxu1  ;;  %3741 = vmatprep.subr.bf16.mxu0 %v6068_v28  ;;  %v6077_v28 = vld [vmem:[#allocation10 + $0x294] ss:$8 sps:$4 sm:$0xff]   ;;  %v6075_v47 = vld [vmem:[#allocation10 + $0x290] ss:$8 sps:$4 sm:$0xff]  }
 0x22d   : > { %v1625_v32 = vadd.f32 %v1624_v33, %v7034_v46  ;;  %v1626_v43 = vpop.f32.mrb[82].mxu1  ;;  %3598 = vmatprep.mubr.bf16.mxu0 %v2474_v19  ;;  %v6080_v33 = vld [vmem:[#allocation10 + $0x2a4] ss:$8 sps:$4 sm:$0xff]  }
 0x22e   : > { %v1627_v35 = vadd.f32 %v1626_v43, %v7031_v61  ;;  %v1628_v40 = vpop.f32.mrb[83].mxu1  ;;  %3599 = vmatmul.mubr.bf16.gmra.mrb[12].mxu0 %v2473_v54  ;;  %v2193_v34 = vmax.f32 %v1623_v22, 0.0 }
 0x22f   : > { %v1629_v63 = vadd.f32 %v1628_v40, %v7034_v46  ;;  %3742 = vmatpush1.bf16.msra.mxu0 %v6066_v26  ;;  %v2194_v21 = vmax.f32 %v1625_v32, 0.0 }
 0x230   : > { %v2201_v6 = vmax.f32 %v1627_v35, 0.0  ;;  %1924 = vmatmul.mubr.bf16.gmra.mrb[188].mxu1 %v6874_v55  ;;  %3743 = vmatprep.subr.bf16.mxu0 %v6071_v25 }
 0x231   : > { %v2202_v15 = vmax.f32 %v1629_v63, 0.0  ;;  %1966 = vmatprep.mubr.bf16.mxu1 %v6711_v20  ;;  %v6078_v63 = vld [vmem:[#allocation10 + $0x2a0] ss:$8 sps:$4 sm:$0xff]  }
 0x232   : > { %v2481_v48 = vpack.c.bf16 %v2201_v6, %v2193_v34  ;;  %v6083_v6 = vld [vmem:[#allocation10 + $0x2b4] ss:$8 sps:$4 sm:$0xff]  }
 0x233   : > { %v2482_v53 = vpack.c.bf16 %v2202_v15, %v2194_v21  ;;  %v1632_v24 = vpop.f32.mrb[84].mxu1  ;;  %3744 = vmatpush1.bf16.msra.mxu0 %v6069_v60 }
 0x234   : > { %v1633_v7 = vadd.f32 %v1632_v24, %v7031_v61  ;;  %v1634_v4 = vpop.f32.mrb[85].mxu1  ;;  %3745 = vmatprep.subr.bf16.mxu0 %v6074_v18 }
 0x235   : > { %v1635_v23 = vadd.f32 %v1634_v4, %v7034_v46  ;;  %v1636_v62 = vpop.f32.mrb[86].mxu1  ;;  %3608 = vmatprep.mubr.bf16.mxu0 %v2482_v53 }
 0x236   : > { %v1637_v54 = vadd.f32 %v1636_v62, %v7031_v61  ;;  %v1638_v19 = vpop.f32.mrb[87].mxu1  ;;  %3609 = vmatmul.mubr.bf16.gmra.mrb[16].mxu0 %v2481_v48  ;;  %v2209_v26 = vmax.f32 %v1633_v7, 0.0  ;;  %v6081_v48 = vld [vmem:[#allocation10 + $0x2b0] ss:$8 sps:$4 sm:$0xff]  }
 0x237   : > { %v1639_v20 = vadd.f32 %v1638_v19, %v7034_v46  ;;  %3746 = vmatpush1.bf16.msra.mxu0 %v6072_v9  ;;  %v2210_v25 = vmax.f32 %v1635_v23, 0.0  ;;  %v6086_v9 = vld [vmem:[#allocation10 + $0x2c4] ss:$8 sps:$4 sm:$0xff]  }
 0x238   : > { %v2217_v22 = vmax.f32 %v1637_v54, 0.0  ;;  %1967 = vmatmul.mubr.bf16.vlgmr.msra.gmra.mrb[192].mxu1 %v6718_v12  ;;  %3747 = vmatprep.subr.bf16.mxu0 %v6077_v28  ;;  %v6084_v54 = vld [vmem:[#allocation10 + $0x2c0] ss:$8 sps:$4 sm:$0xff]  }
 0x239   : > { %v2218_v32 = vmax.f32 %v1639_v20, 0.0  ;;  %1976 = vmatprep.mubr.bf16.mxu1 %v6720_v14 }
 0x23a   : > { %v2489_v43 = vpack.c.bf16 %v2217_v22, %v2209_v26 }
 0x23b   : > { %v2490_v35 = vpack.c.bf16 %v2218_v32, %v2210_v25  ;;  %v1642_v40 = vpop.f32.mrb[88].mxu1  ;;  %3748 = vmatpush1.bf16.msra.mxu0 %v6075_v47  ;;  %v6089_v47 = vld [vmem:[#allocation10 + $0x2d4] ss:$8 sps:$4 sm:$0xff]   ;;  %v6087_v25 = vld [vmem:[#allocation10 + $0x2d0] ss:$8 sps:$4 sm:$0xff]  }
 0x23c   : > { %v1643_v60 = vadd.f32 %v1642_v40, %v7031_v61  ;;  %v1644_v34 = vpop.f32.mrb[89].mxu1  ;;  %3749 = vmatprep.subr.bf16.mxu0 %v6080_v33 }
 0x23d   : > { %v1645_v18 = vadd.f32 %v1644_v34, %v7034_v46  ;;  %v1646_v21 = vpop.f32.mrb[90].mxu1  ;;  %3618 = vmatprep.mubr.bf16.mxu0 %v2490_v35  ;;  %v6092_v35 = vld [vmem:[#allocation10 + $0x2e4] ss:$8 sps:$4 sm:$0xff]  }
 0x23e   : > { %v1647_v12 = vadd.f32 %v1646_v21, %v7031_v61  ;;  %v1648_v15 = vpop.f32.mrb[91].mxu1  ;;  %3619 = vmatmul.mubr.bf16.gmra.mrb[20].mxu0 %v2489_v43  ;;  %v2225_v53 = vmax.f32 %v1643_v60, 0.0 }
 0x23f   : > { %v1649_v14 = vadd.f32 %v1648_v15, %v7034_v46  ;;  %3750 = vmatpush1.bf16.msra.mxu0 %v6078_v63  ;;  %v2226_v7 = vmax.f32 %v1645_v18, 0.0  ;;  %v6090_v18 = vld [vmem:[#allocation10 + $0x2e0] ss:$8 sps:$4 sm:$0xff]   ;;  %v6095_v15 = vld [vmem:[#allocation10 + $0x2f4] ss:$8 sps:$4 sm:$0xff]  }
 0x240   : > { %v2233_v24 = vmax.f32 %v1647_v12, 0.0  ;;  %1977 = vmatmul.mubr.bf16.gmra.mrb[196].mxu1 %v6734_v30  ;;  %3751 = vmatprep.subr.bf16.mxu0 %v6083_v6 }
 0x241   : > { %v2234_v4 = vmax.f32 %v1649_v14, 0.0  ;;  %1986 = vmatprep.mubr.bf16.mxu1 %v6736_v31 }
 0x242   : > { %v2497_v28 = vpack.c.bf16 %v2233_v24, %v2225_v53  ;;  %v6093_v24 = vld [vmem:[#allocation10 + $0x2f0] ss:$8 sps:$4 sm:$0xff]  }
 0x243   : > { %v2498_v23 = vpack.c.bf16 %v2234_v4, %v2226_v7  ;;  %v1652_v62 = vpop.f32.mrb[92].mxu1  ;;  %3752 = vmatpush1.bf16.msra.mxu0 %v6081_v48  ;;  %v6098_v4 = vld [vmem:[#allocation10 + $0x304] ss:$8 sps:$4 sm:$0xff]  }
 0x244   : > { %v1653_v19 = vadd.f32 %v1652_v62, %v7031_v61  ;;  %v1654_v20 = vpop.f32.mrb[93].mxu1  ;;  %3753 = vmatprep.subr.bf16.mxu0 %v6086_v9 }
 0x245   : > { %v1655_v26 = vadd.f32 %v1654_v20, %v7034_v46  ;;  %v1656_v22 = vpop.f32.mrb[94].mxu1  ;;  %3628 = vmatprep.mubr.bf16.mxu0 %v2498_v23 }
 0x246   : > { %v1657_v30 = vadd.f32 %v1656_v22, %v7031_v61  ;;  %v1658_v33 = vpop.f32.mrb[95].mxu1  ;;  %3629 = vmatmul.mubr.bf16.gmra.mrb[24].mxu0 %v2497_v28  ;;  %v2241_v32 = vmax.f32 %v1653_v19, 0.0 }
 0x247   : > { %v1659_v31 = vadd.f32 %v1658_v33, %v7034_v46  ;;  %3754 = vmatpush1.bf16.msra.mxu0 %v6084_v54  ;;  %v2242_v40 = vmax.f32 %v1655_v26, 0.0 }
 0x248   : > { %v2249_v43 = vmax.f32 %v1657_v30, 0.0  ;;  %1987 = vmatmul.mubr.bf16.gmra.mrb[200].mxu1 %v6744_v44  ;;  %3755 = vmatprep.subr.bf16.mxu0 %v6089_v47 }
 0x249   : > { %v2250_v63 = vmax.f32 %v1659_v31, 0.0  ;;  %1996 = vmatprep.mubr.bf16.mxu1 %v6746_v45 }
 0x24a   : > { %v2505_v60 = vpack.c.bf16 %v2249_v43, %v2241_v32 }
 0x24b   : > { %v2506_v34 = vpack.c.bf16 %v2250_v63, %v2242_v40  ;;  %v1662_v6 = vpop.f32.mrb[96].mxu1  ;;  %3756 = vmatpush1.bf16.msra.mxu0 %v6087_v25 }
 0x24c   : > { %v1663_v21 = vadd.f32 %v1662_v6, %v7031_v61  ;;  %v1664_v12 = vpop.f32.mrb[97].mxu1  ;;  %3757 = vmatprep.subr.bf16.mxu0 %v6092_v35 }
 0x24d   : > { %v1665_v14 = vadd.f32 %v1664_v12, %v7034_v46  ;;  %v1666_v48 = vpop.f32.mrb[98].mxu1  ;;  %3638 = vmatprep.mubr.bf16.mxu0 %v2506_v34 }
 0x24e   : > { %v1667_v44 = vadd.f32 %v1666_v48, %v7031_v61  ;;  %v1668_v53 = vpop.f32.mrb[99].mxu1  ;;  %3639 = vmatmul.mubr.bf16.gmra.mrb[28].mxu0 %v2505_v60  ;;  %v2257_v9 = vmax.f32 %v1663_v21, 0.0 }
 0x24f   : > { %v1669_v45 = vadd.f32 %v1668_v53, %v7034_v46  ;;  %3758 = vmatpush1.bf16.msra.mxu0 %v6090_v18  ;;  %v2258_v28 = vmax.f32 %v1665_v14, 0.0 }
 0x250   : > { %v2265_v7 = vmax.f32 %v1667_v44, 0.0  ;;  %1997 = vmatmul.mubr.bf16.gmra.mrb[204].mxu1 %v6754_v58  ;;  %3759 = vmatprep.subr.bf16.mxu0 %v6095_v15 }
 0x251   : > { %v2266_v23 = vmax.f32 %v1669_v45, 0.0  ;;  %2006 = vmatprep.mubr.bf16.mxu1 %v6756_v59 }
 0x252   : > { %v2513_v62 = vpack.c.bf16 %v2265_v7, %v2257_v9 }
 0x253   : > { %v2514_v54 = vpack.c.bf16 %v2266_v23, %v2258_v28  ;;  %v1672_v19 = vpop.f32.mrb[100].mxu1  ;;  %3760 = vmatpush1.bf16.msra.mxu0 %v6093_v24 }
 0x254   : > { %v1673_v20 = vadd.f32 %v1672_v19, %v7031_v61  ;;  %v1674_v47 = vpop.f32.mrb[101].mxu1  ;;  %3922 = vmatprep.subr.bf16.mxu0 %v6098_v4 }
 0x255   : > { %v1675_v26 = vadd.f32 %v1674_v47, %v7034_v46  ;;  %v1676_v22 = vpop.f32.mrb[102].mxu1  ;;  %3648 = vmatprep.mubr.bf16.mxu0 %v2514_v54 }
 0x256   : > { %v1677_v58 = vadd.f32 %v1676_v22, %v7031_v61  ;;  %v1678_v30 = vpop.f32.mrb[103].mxu1  ;;  %3649 = vmatmul.mubr.bf16.gmra.mrb[32].mxu0 %v2513_v62  ;;  %v2273_v31 = vmax.f32 %v1673_v20, 0.0 }
 0x257   : > { %v1679_v33 = vadd.f32 %v1678_v30, %v7034_v46  ;;  %v2274_v25 = vmax.f32 %v1675_v26, 0.0 }
 0x258   : > { %v2281_v59 = vmax.f32 %v1677_v58, 0.0  ;;  %2007 = vmatmul.mubr.bf16.gmra.mrb[208].mxu1 %v6764_v10 }
 0x259   : > { %v2282_v32 = vmax.f32 %v1679_v33, 0.0  ;;  %2016 = vmatprep.mubr.bf16.mxu1 %v6766_v11 }
 0x25a   : > { %v2521_v43 = vpack.c.bf16 %v2281_v59, %v2273_v31 }
 0x25b   : > { %v2522_v35 = vpack.c.bf16 %v2282_v32, %v2274_v25  ;;  %v1682_v40 = vpop.f32.mrb[104].mxu1 }
 0x25c   : > { %v1683_v63 = vadd.f32 %v1682_v40, %v7031_v61  ;;  %v1684_v60 = vpop.f32.mrb[105].mxu1 }
 0x25d   : > { %v1685_v34 = vadd.f32 %v1684_v60, %v7034_v46  ;;  %v1686_v6 = vpop.f32.mrb[106].mxu1  ;;  %3658 = vmatprep.mubr.bf16.mxu0 %v2522_v35 }
 0x25e   : > { %v1687_v18 = vadd.f32 %v1686_v6, %v7031_v61  ;;  %v1688_v21 = vpop.f32.mrb[107].mxu1  ;;  %3659 = vmatmul.mubr.bf16.gmra.mrb[36].mxu0 %v2521_v43  ;;  %v2289_v12 = vmax.f32 %v1683_v63, 0.0 }
 0x25f   : > { %v1689_v10 = vadd.f32 %v1688_v21, %v7034_v46  ;;  %v2290_v11 = vmax.f32 %v1685_v34, 0.0 }
 0x260   : > { %v2297_v15 = vmax.f32 %v1687_v18, 0.0  ;;  %2017 = vmatmul.mubr.bf16.gmra.mrb[212].mxu1 %v6774_v36 }
 0x261   : > { %v2298_v14 = vmax.f32 %v1689_v10, 0.0  ;;  %2026 = vmatprep.mubr.bf16.mxu1 %v6776_v37 }
 0x262   : > { %v2529_v48 = vpack.c.bf16 %v2297_v15, %v2289_v12 }
 0x263   : > { %v2530_v44 = vpack.c.bf16 %v2298_v14, %v2290_v11  ;;  %v1692_v53 = vpop.f32.mrb[108].mxu1 }
 0x264   : > { %v1693_v45 = vadd.f32 %v1692_v53, %v7031_v61  ;;  %v1694_v24 = vpop.f32.mrb[109].mxu1 }
 0x265   : > { %v1695_v9 = vadd.f32 %v1694_v24, %v7034_v46  ;;  %v1696_v7 = vpop.f32.mrb[110].mxu1  ;;  %3668 = vmatprep.mubr.bf16.mxu0 %v2530_v44 }
 0x266   : > { %v1697_v4 = vadd.f32 %v1696_v7, %v7031_v61  ;;  %v1698_v28 = vpop.f32.mrb[111].mxu1  ;;  %3669 = vmatmul.mubr.bf16.gmra.mrb[40].mxu0 %v2529_v48  ;;  %v2305_v23 = vmax.f32 %v1693_v45, 0.0 }
 0x267   : > { %v1699_v36 = vadd.f32 %v1698_v28, %v7034_v46  ;;  %v2306_v37 = vmax.f32 %v1695_v9, 0.0 }
 0x268   : > { %v2313_v62 = vmax.f32 %v1697_v4, 0.0  ;;  %2027 = vmatmul.mubr.bf16.gmra.mrb[216].mxu1 %v6784_v56 }
 0x269   : > { %v2314_v54 = vmax.f32 %v1699_v36, 0.0  ;;  %2036 = vmatprep.mubr.bf16.mxu1 %v6786_v57 }
 0x26a   : > { %v2537_v19 = vpack.c.bf16 %v2313_v62, %v2305_v23 }
 0x26b   : > { %v2538_v20 = vpack.c.bf16 %v2314_v54, %v2306_v37  ;;  %v1702_v47 = vpop.f32.mrb[112].mxu1 }
 0x26c   : > { %v1703_v26 = vadd.f32 %v1702_v47, %v7031_v61  ;;  %v1704_v22 = vpop.f32.mrb[113].mxu1 }
 0x26d   : > { %v1705_v58 = vadd.f32 %v1704_v22, %v7034_v46  ;;  %v1706_v30 = vpop.f32.mrb[114].mxu1  ;;  %3678 = vmatprep.mubr.bf16.mxu0 %v2538_v20  ;;  %v693_v20 = vsub.s32 4, %v6908_v2  ;;  %v697_v22 = vsub.s32 5, %v6908_v2 }
 0x26e   : > { %v1707_v33 = vadd.f32 %v1706_v30, %v7031_v61  ;;  %v1708_v31 = vpop.f32.mrb[115].mxu1  ;;  %3679 = vmatmul.mubr.bf16.gmra.mrb[44].mxu0 %v2537_v19  ;;  %v2321_v59 = vmax.f32 %v1703_v26, 0.0 }
 0x26f   : > { %v1709_v56 = vadd.f32 %v1708_v31, %v7034_v46  ;;  %v2322_v57 = vmax.f32 %v1705_v58, 0.0  ;;  %v7137_v31 = vld [vmem:[%s8229_s4] sm:$0xff] }
 0x270   : > { %v2329_v25 = vmax.f32 %v1707_v33, 0.0  ;;  %2037 = vmatmul.mubr.bf16.gmra.mrb[220].mxu1 %v6794_v16 }
 0x271   : > { %v2330_v32 = vmax.f32 %v1709_v56, 0.0  ;;  %2046 = vmatprep.mubr.bf16.mxu1 %v6796_v17  ;;  %v7140_v56 = vrot.slane %v7137_v31, %v693_v20 }
 0x272   : > { %v2545_v43 = vpack.c.bf16 %v2329_v25, %v2321_v59 }
 0x273   : > { %v2546_v35 = vpack.c.bf16 %v2330_v32, %v2322_v57  ;;  %v1712_v40 = vpop.f32.mrb[116].mxu1 }
 0x274   : > { %v1713_v63 = vadd.f32 %v1712_v40, %v7031_v61  ;;  %v1714_v60 = vpop.f32.mrb[117].mxu1 }
 0x275   : > { %v1715_v34 = vadd.f32 %v1714_v60, %v7034_v46  ;;  %v1716_v6 = vpop.f32.mrb[118].mxu1  ;;  %3688 = vmatprep.mubr.bf16.mxu0 %v2546_v35 }
 0x276   : > { %v1717_v18 = vadd.f32 %v1716_v6, %v7031_v61  ;;  %v1718_v21 = vpop.f32.mrb[119].mxu1  ;;  %3689 = vmatmul.mubr.bf16.gmra.mrb[48].mxu0 %v2545_v43  ;;  %v2337_v10 = vmax.f32 %v1713_v63, 0.0 }
 0x277   : > { %v1719_v16 = vadd.f32 %v1718_v21, %v7034_v46  ;;  %v2338_v17 = vmax.f32 %v1715_v34, 0.0 }
 0x278   : > { %v2345_v12 = vmax.f32 %v1717_v18, 0.0  ;;  %2047 = vmatmul.mubr.bf16.gmra.mrb[224].mxu1 %v6806_v38 }
 0x279   : > { %v2346_v15 = vmax.f32 %v1719_v16, 0.0  ;;  %2056 = vmatprep.mubr.bf16.mxu1 %v6808_v39 }
 0x27a   : > { %v2553_v11 = vpack.c.bf16 %v2345_v12, %v2337_v10 }
 0x27b   : > { %v2554_v14 = vpack.c.bf16 %v2346_v15, %v2338_v17  ;;  %v1722_v48 = vpop.f32.mrb[120].mxu1  ;;  %v6096_v17 = vld [vmem:[#allocation10 + $0x300] ss:$8 sps:$4 sm:$0xff]  }
 0x27c   : > { %v1723_v44 = vadd.f32 %v1722_v48, %v7031_v61  ;;  %v1724_v53 = vpop.f32.mrb[121].mxu1 }
 0x27d   : > { %v1725_v45 = vadd.f32 %v1724_v53, %v7034_v46  ;;  %v1726_v24 = vpop.f32.mrb[122].mxu1  ;;  %3698 = vmatprep.mubr.bf16.mxu0 %v2554_v14  ;;  %v6101_v14 = vld [vmem:[#allocation10 + $0x314] ss:$8 sps:$4 sm:$0xff]  }
 0x27e   : > { %v1727_v9 = vadd.f32 %v1726_v24, %v7031_v61  ;;  %v1728_v7 = vpop.f32.mrb[123].mxu1  ;;  %3699 = vmatmul.mubr.bf16.gmra.mrb[52].mxu0 %v2553_v11  ;;  %v2353_v4 = vmax.f32 %v1723_v44, 0.0 }
 0x27f   : > { %v1729_v38 = vadd.f32 %v1728_v7, %v7034_v46  ;;  %v2354_v39 = vmax.f32 %v1725_v45, 0.0  ;;  %v6104_v7 = vld [vmem:[#allocation10 + $0x324] ss:$8 sps:$4 sm:$0xff]  }
 0x280   : > { %v2361_v28 = vmax.f32 %v1727_v9, 0.0  ;;  %2057 = vmatmul.mubr.bf16.gmra.mrb[228].mxu1 %v6816_v50 }
 0x281   : > { %v2362_v36 = vmax.f32 %v1729_v38, 0.0  ;;  %2066 = vmatprep.mubr.bf16.mxu1 %v6818_v51 }
 0x282   : > { %v2561_v23 = vpack.c.bf16 %v2361_v28, %v2353_v4 }
 0x283   : > { %v2562_v62 = vpack.c.bf16 %v2362_v36, %v2354_v39  ;;  %v1732_v37 = vpop.f32.mrb[124].mxu1 }
 0x284   : > { %v1733_v54 = vadd.f32 %v1732_v37, %v7031_v61  ;;  %v1734_v19 = vpop.f32.mrb[125].mxu1 }
 0x285   : > { %v1735_v47 = vadd.f32 %v1734_v19, %v7034_v46  ;;  %v1736_v26 = vpop.f32.mrb[126].mxu1  ;;  %3708 = vmatprep.mubr.bf16.mxu0 %v2562_v62 }
 0x286   : > { %v1737_v50 = vadd.f32 %v1736_v26, %v7031_v61  ;;  %v1738_v58 = vpop.f32.mrb[127].mxu1  ;;  %3709 = vmatmul.mubr.bf16.gmra.mrb[56].mxu0 %v2561_v23  ;;  %v2369_v30 = vmax.f32 %v1733_v54, 0.0  ;;  %v7143_v61 = vrot.slane %v7137_v31, %v697_v22  ;;  %v6102_v23 = vld [vmem:[#allocation10 + $0x320] ss:$8 sps:$4 sm:$0xff]   ;;  %v6107_v54 = vld [vmem:[#allocation10 + $0x334] ss:$8 sps:$4 sm:$0xff]  }
 0x287   : > { %v1739_v51 = vadd.f32 %v1738_v58, %v7034_v46  ;;  %v2370_v59 = vmax.f32 %v1735_v47, 0.0  ;;  %v6105_v26 = vld [vmem:[#allocation10 + $0x330] ss:$8 sps:$4 sm:$0xff]   ;;  %v6110_v58 = vld [vmem:[#allocation10 + $0x344] ss:$8 sps:$4 sm:$0xff]  }
 0x288   : > { %v2377_v33 = vmax.f32 %v1737_v50, 0.0  ;;  %2067 = vmatmul.mubr.bf16.gmra.mrb[232].mxu1 %v6826_v0 }
 0x289   : > { %v2378_v25 = vmax.f32 %v1739_v51, 0.0  ;;  %2076 = vmatprep.mubr.bf16.mxu1 %v6828_v1 }
 0x28a   : > { %v2569_v46 = vpack.c.bf16 %v2377_v33, %v2369_v30 }
 0x28b   : > { %v2570_v57 = vpack.c.bf16 %v2378_v25, %v2370_v59  ;;  %v1775_v32 = vpop.f32.mrb[128].mxu1 }
 0x28c   : > { %v1776_v0 = vadd.f32 %v1775_v32, %v7140_v56  ;;  %v1777_v43 = vpop.f32.mrb[129].mxu1 }
 0x28d   : > { %v1778_v35 = vadd.f32 %v1777_v43, %v7143_v61  ;;  %v1779_v40 = vpop.f32.mrb[130].mxu1  ;;  %3718 = vmatprep.mubr.bf16.mxu0 %v2570_v57 }
 0x28e   : > { %v1780_v63 = vadd.f32 %v1779_v40, %v7140_v56  ;;  %v1781_v60 = vpop.f32.mrb[131].mxu1  ;;  %3719 = vmatmul.mubr.bf16.gmra.mrb[60].mxu0 %v2569_v46  ;;  %v2131_v6 = vmax.f32 %v1776_v0, 0.0  ;;  %v6108_v46 = vld [vmem:[#allocation10 + $0x340] ss:$8 sps:$4 sm:$0xff]   ;;  %v6113_v0 = vld [vmem:[#allocation10 + $0x354] ss:$8 sps:$4 sm:$0xff]  }
 0x28f   : > { %v1782_v34 = vadd.f32 %v1781_v60, %v7143_v61  ;;  %v2132_v1 = vmax.f32 %v1778_v35, 0.0 }
 0x290   : > { %v2139_v18 = vmax.f32 %v1780_v63, 0.0  ;;  %2077 = vmatmul.mubr.bf16.gmra.mrb[236].mxu1 %v6836_v8  ;;  %v6111_v63 = vld [vmem:[#allocation10 + $0x350] ss:$8 sps:$4 sm:$0xff]  }
 0x291   : > { %v2140_v21 = vmax.f32 %v1782_v34, 0.0  ;;  %2086 = vmatprep.mubr.bf16.mxu1 %v6838_v13  ;;  %v6099_v13 = vld [vmem:[#allocation10 + $0x310] ss:$8 sps:$4 sm:$0xff]  }
 0x292   : > { %v2451_v16 = vpack.c.bf16 %v2139_v18, %v2131_v6  ;;  %v6116_v6 = vld [vmem:[#allocation10 + $0x364] ss:$8 sps:$4 sm:$0xff]  }
 0x293   : > { %v2452_v10 = vpack.c.bf16 %v2140_v21, %v2132_v1  ;;  %v1785_v12 = vpop.f32.mrb[132].mxu1 }
 0x294   : > { %v1786_v15 = vadd.f32 %v1785_v12, %v7140_v56  ;;  %v1787_v11 = vpop.f32.mrb[133].mxu1  ;;  %v6114_v12 = vld [vmem:[#allocation10 + $0x360] ss:$8 sps:$4 sm:$0xff]  }
 0x295   : > { %v1788_v48 = vadd.f32 %v1787_v11, %v7143_v61  ;;  %v1789_v44 = vpop.f32.mrb[134].mxu1  ;;  %3761 = vmatprep.mubr.bf16.mxu0 %v2452_v10  ;;  %v6119_v11 = vld [vmem:[#allocation10 + $0x374] ss:$8 sps:$4 sm:$0xff]  }
 0x296   : > { %v1790_v53 = vadd.f32 %v1789_v44, %v7140_v56  ;;  %v1791_v45 = vpop.f32.mrb[135].mxu1  ;;  %3762 = vmatmul.mubr.bf16.vlgmr.msra.gmra.mrb[0].mxu0 %v2451_v16  ;;  %v2147_v24 = vmax.f32 %v1786_v15, 0.0 }
 0x297   : > { %v1792_v8 = vadd.f32 %v1791_v45, %v7143_v61  ;;  %3923 = vmatpush1.bf16.msra.mxu0 %v6096_v17  ;;  %v2148_v38 = vmax.f32 %v1788_v48, 0.0 }
 0x298   : > { %v2155_v9 = vmax.f32 %v1790_v53, 0.0  ;;  %2087 = vmatmul.mubr.bf16.gmra.mrb[240].mxu1 %v6846_v27  ;;  %3924 = vmatprep.subr.bf16.mxu0 %v6101_v14  ;;  %v6117_v53 = vld [vmem:[#allocation10 + $0x370] ss:$8 sps:$4 sm:$0xff]  }
 0x299   : > { %v2156_v4 = vmax.f32 %v1792_v8, 0.0  ;;  %2096 = vmatprep.mubr.bf16.mxu1 %v6848_v29 }
 0x29a   : > { %v2459_v28 = vpack.c.bf16 %v2155_v9, %v2147_v24 }
 0x29b   : > { %v2460_v39 = vpack.c.bf16 %v2156_v4, %v2148_v38  ;;  %v1795_v36 = vpop.f32.mrb[136].mxu1  ;;  %3925 = vmatpush1.bf16.msra.mxu0 %v6099_v13  ;;  %v6122_v13 = vld [vmem:[#allocation10 + $0x384] ss:$8 sps:$4 sm:$0xff]  }
 0x29c   : > { %v1796_v62 = vadd.f32 %v1795_v36, %v7140_v56  ;;  %v1797_v37 = vpop.f32.mrb[137].mxu1  ;;  %3926 = vmatprep.subr.bf16.mxu0 %v6104_v7 }
 0x29d   : > { %v1798_v19 = vadd.f32 %v1797_v37, %v7143_v61  ;;  %v1799_v20 = vpop.f32.mrb[138].mxu1  ;;  %3771 = vmatprep.mubr.bf16.mxu0 %v2460_v39 }
 0x29e   : > { %v1800_v27 = vadd.f32 %v1799_v20, %v7140_v56  ;;  %v1801_v47 = vpop.f32.mrb[139].mxu1  ;;  %3772 = vmatmul.mubr.bf16.gmra.mrb[4].mxu0 %v2459_v28  ;;  %v2163_v22 = vmax.f32 %v1796_v62, 0.0  ;;  %v6120_v28 = vld [vmem:[#allocation10 + $0x380] ss:$8 sps:$4 sm:$0xff]   ;;  %v6123_v20 = vld [vmem:[#allocation10 + $0x390] ss:$8 sps:$4 sm:$0xff]  }
 0x29f   : > { %v1802_v29 = vadd.f32 %v1801_v47, %v7143_v61  ;;  %3927 = vmatpush1.bf16.msra.mxu0 %v6102_v23  ;;  %v2164_v51 = vmax.f32 %v1798_v19, 0.0  ;;  %v6125_v23 = vld [vmem:[#allocation10 + $0x394] ss:$8 sps:$4 sm:$0xff]  }
 0x2a0   : > { %v2171_v50 = vmax.f32 %v1800_v27, 0.0  ;;  %2097 = vmatmul.mubr.bf16.gmra.mrb[244].mxu1 %v6856_v41  ;;  %3928 = vmatprep.subr.bf16.mxu0 %v6107_v54 }
 0x2a1   : > { %v2172_v30 = vmax.f32 %v1802_v29, 0.0  ;;  %2106 = vmatprep.mubr.bf16.mxu1 %v6858_v42  ;;  %v6128_v29 = vld [vmem:[#allocation10 + $0x3a4] ss:$8 sps:$4 sm:$0xff]  }
 0x2a2   : > { %v2467_v33 = vpack.c.bf16 %v2171_v50, %v2163_v22 }
 0x2a3   : > { %v2468_v59 = vpack.c.bf16 %v2172_v30, %v2164_v51  ;;  %v1805_v25 = vpop.f32.mrb[140].mxu1  ;;  %3929 = vmatpush1.bf16.msra.mxu0 %v6105_v26  ;;  %v6126_v30 = vld [vmem:[#allocation10 + $0x3a0] ss:$8 sps:$4 sm:$0xff]  }
 0x2a4   : > { %v1806_v57 = vadd.f32 %v1805_v25, %v7140_v56  ;;  %v1807_v32 = vpop.f32.mrb[141].mxu1  ;;  %3930 = vmatprep.subr.bf16.mxu0 %v6110_v58  ;;  %v6131_v25 = vld [vmem:[#allocation10 + $0x3b4] ss:$8 sps:$4 sm:$0xff]  }
 0x2a5   : > { %v1808_v43 = vadd.f32 %v1807_v32, %v7143_v61  ;;  %v1809_v35 = vpop.f32.mrb[142].mxu1  ;;  %3781 = vmatprep.mubr.bf16.mxu0 %v2468_v59 }
 0x2a6   : > { %v1810_v41 = vadd.f32 %v1809_v35, %v7140_v56  ;;  %v1811_v40 = vpop.f32.mrb[143].mxu1  ;;  %3782 = vmatmul.mubr.bf16.gmra.mrb[8].mxu0 %v2467_v33  ;;  %v2179_v60 = vmax.f32 %v1806_v57, 0.0  ;;  %v6129_v35 = vld [vmem:[#allocation10 + $0x3b0] ss:$8 sps:$4 sm:$0xff]  }
 0x2a7   : > { %v1812_v42 = vadd.f32 %v1811_v40, %v7143_v61  ;;  %3931 = vmatpush1.bf16.msra.mxu0 %v6108_v46  ;;  %v2180_v18 = vmax.f32 %v1808_v43, 0.0 }
 0x2a8   : > { %v2187_v34 = vmax.f32 %v1810_v41, 0.0  ;;  %2107 = vmatmul.mubr.bf16.gmra.mrb[248].mxu1 %v6866_v49  ;;  %3932 = vmatprep.subr.bf16.mxu0 %v6113_v0 }
 0x2a9   : > { %v2188_v1 = vmax.f32 %v1812_v42, 0.0  ;;  %2116 = vmatprep.mubr.bf16.mxu1 %v6868_v52  ;;  %v6134_v42 = vld [vmem:[#allocation10 + $0x3c4] ss:$8 sps:$4 sm:$0xff]  }
 0x2aa   : > { %v2475_v21 = vpack.c.bf16 %v2187_v34, %v2179_v60 }
 0x2ab   : > { %v2476_v16 = vpack.c.bf16 %v2188_v1, %v2180_v18  ;;  %v1815_v10 = vpop.f32.mrb[144].mxu1  ;;  %3933 = vmatpush1.bf16.msra.mxu0 %v6111_v63  ;;  %v6132_v1 = vld [vmem:[#allocation10 + $0x3c0] ss:$8 sps:$4 sm:$0xff]  }
 0x2ac   : > { %v1816_v17 = vadd.f32 %v1815_v10, %v7140_v56  ;;  %v1817_v15 = vpop.f32.mrb[145].mxu1  ;;  %3934 = vmatprep.subr.bf16.mxu0 %v6116_v6  ;;  %v6137_v10 = vld [vmem:[#allocation10 + $0x3d4] ss:$8 sps:$4 sm:$0xff]  }
 0x2ad   : > { %v1818_v14 = vadd.f32 %v1817_v15, %v7143_v61  ;;  %v1819_v48 = vpop.f32.mrb[146].mxu1  ;;  %3791 = vmatprep.mubr.bf16.mxu0 %v2476_v16 }
 0x2ae   : > { %v1820_v49 = vadd.f32 %v1819_v48, %v7140_v56  ;;  %v1821_v44 = vpop.f32.mrb[147].mxu1  ;;  %3792 = vmatmul.mubr.bf16.gmra.mrb[12].mxu0 %v2475_v21  ;;  %v2195_v45 = vmax.f32 %v1816_v17, 0.0  ;;  %v6135_v48 = vld [vmem:[#allocation10 + $0x3d0] ss:$8 sps:$4 sm:$0xff]  }
 0x2af   : > { %v1822_v52 = vadd.f32 %v1821_v44, %v7143_v61  ;;  %3935 = vmatpush1.bf16.msra.mxu0 %v6114_v12  ;;  %v2196_v24 = vmax.f32 %v1818_v14, 0.0 }
 0x2b0   : > { %v2203_v8 = vmax.f32 %v1820_v49, 0.0  ;;  %2117 = vmatmul.mubr.bf16.gmra.mrb[252].mxu1 %v6874_v55  ;;  %3936 = vmatprep.subr.bf16.mxu0 %v6119_v11 }
 0x2b1   : > { %v2204_v9 = vmax.f32 %v1822_v52, 0.0  ;;  %v6140_v52 = vld [vmem:[#allocation10 + $0x3e4] ss:$8 sps:$4 sm:$0xff]  }
 0x2b2   : > { %v2483_v7 = vpack.c.bf16 %v2203_v8, %v2195_v45 }
 0x2b3   : > { %v2484_v38 = vpack.c.bf16 %v2204_v9, %v2196_v24  ;;  %v1825_v4 = vpop.f32.mrb[148].mxu1  ;;  %3937 = vmatpush1.bf16.msra.mxu0 %v6117_v53  ;;  %v6138_v9 = vld [vmem:[#allocation10 + $0x3e0] ss:$8 sps:$4 sm:$0xff]  }
 0x2b4   : > { %v1826_v39 = vadd.f32 %v1825_v4, %v7140_v56  ;;  %v1827_v36 = vpop.f32.mrb[149].mxu1  ;;  %3938 = vmatprep.subr.bf16.mxu0 %v6122_v13  ;;  %v6143_v4 = vld [vmem:[#allocation10 + $0x3f4] ss:$8 sps:$4 sm:$0xff]  }
 0x2b5   : > { %v1828_v62 = vadd.f32 %v1827_v36, %v7143_v61  ;;  %v1829_v37 = vpop.f32.mrb[150].mxu1  ;;  %3801 = vmatprep.mubr.bf16.mxu0 %v2484_v38 }
 0x2b6   : > { %v1830_v55 = vadd.f32 %v1829_v37, %v7140_v56  ;;  %v1831_v54 = vpop.f32.mrb[151].mxu1  ;;  %3802 = vmatmul.mubr.bf16.gmra.mrb[16].mxu0 %v2483_v7  ;;  %v2211_v27 = vmax.f32 %v1826_v39, 0.0  ;;  %v6141_v37 = vld [vmem:[#allocation10 + $0x3f0] ss:$8 sps:$4 sm:$0xff]  }
 0x2b7   : > { %v1832_v19 = vadd.f32 %v1831_v54, %v7143_v61  ;;  %3939 = vmatpush1.bf16.msra.mxu0 %v6120_v28  ;;  %v2212_v26 = vmax.f32 %v1828_v62, 0.0 }
 0x2b8   : > { %v2219_v47 = vmax.f32 %v1830_v55, 0.0  ;;  %3940 = vmatprep.subr.bf16.mxu0 %v6125_v23 }
 0x2b9   : > { %v2220_v22 = vmax.f32 %v1832_v19, 0.0 }
 0x2ba   : > { %v2491_v50 = vpack.c.bf16 %v2219_v47, %v2211_v27 }
 0x2bb   : > { %v2492_v58 = vpack.c.bf16 %v2220_v22, %v2212_v26  ;;  %v1835_v51 = vpop.f32.mrb[152].mxu1  ;;  %3941 = vmatpush1.bf16.msra.mxu0 %v6123_v20 }
 0x2bc   : > { %v1836_v33 = vadd.f32 %v1835_v51, %v7140_v56  ;;  %v1837_v59 = vpop.f32.mrb[153].mxu1  ;;  %3942 = vmatprep.subr.bf16.mxu0 %v6128_v29 }
 0x2bd   : > { %v1838_v46 = vadd.f32 %v1837_v59, %v7143_v61  ;;  %v1839_v57 = vpop.f32.mrb[154].mxu1  ;;  %3811 = vmatprep.mubr.bf16.mxu0 %v2492_v58 }
 0x2be   : > { %v1840_v32 = vadd.f32 %v1839_v57, %v7140_v56  ;;  %v1841_v0 = vpop.f32.mrb[155].mxu1  ;;  %3812 = vmatmul.mubr.bf16.gmra.mrb[20].mxu0 %v2491_v50  ;;  %v2227_v41 = vmax.f32 %v1836_v33, 0.0 }
 0x2bf   : > { %v1842_v43 = vadd.f32 %v1841_v0, %v7143_v61  ;;  %3943 = vmatpush1.bf16.msra.mxu0 %v6126_v30  ;;  %v2228_v63 = vmax.f32 %v1838_v46, 0.0 }
 0x2c0   : > { %v2235_v40 = vmax.f32 %v1840_v32, 0.0  ;;  %3944 = vmatprep.subr.bf16.mxu0 %v6131_v25 }
 0x2c1   : > { %v2236_v60 = vmax.f32 %v1842_v43, 0.0 }
 0x2c2   : > { %v2499_v34 = vpack.c.bf16 %v2235_v40, %v2227_v41 }
 0x2c3   : > { %v2500_v6 = vpack.c.bf16 %v2236_v60, %v2228_v63  ;;  %v1845_v18 = vpop.f32.mrb[156].mxu1  ;;  %3945 = vmatpush1.bf16.msra.mxu0 %v6129_v35 }
 0x2c4   : > { %v1846_v21 = vadd.f32 %v1845_v18, %v7140_v56  ;;  %v1847_v16 = vpop.f32.mrb[157].mxu1  ;;  %3946 = vmatprep.subr.bf16.mxu0 %v6134_v42 }
 0x2c5   : > { %v1848_v12 = vadd.f32 %v1847_v16, %v7143_v61  ;;  %v1849_v17 = vpop.f32.mrb[158].mxu1  ;;  %3821 = vmatprep.mubr.bf16.mxu0 %v2500_v6 }
 0x2c6   : > { %v1850_v15 = vadd.f32 %v1849_v17, %v7140_v56  ;;  %v1851_v11 = vpop.f32.mrb[159].mxu1  ;;  %3822 = vmatmul.mubr.bf16.gmra.mrb[24].mxu0 %v2499_v34  ;;  %v2243_v49 = vmax.f32 %v1846_v21, 0.0 }
 0x2c7   : > { %v1852_v14 = vadd.f32 %v1851_v11, %v7143_v61  ;;  %3947 = vmatpush1.bf16.msra.mxu0 %v6132_v1  ;;  %v2244_v53 = vmax.f32 %v1848_v12, 0.0 }
 0x2c8   : > { %v2251_v44 = vmax.f32 %v1850_v15, 0.0  ;;  %3948 = vmatprep.subr.bf16.mxu0 %v6137_v10 }
 0x2c9   : > { %v2252_v45 = vmax.f32 %v1852_v14, 0.0 }
 0x2ca   : > { %v2507_v8 = vpack.c.bf16 %v2251_v44, %v2243_v49 }
 0x2cb   : > { %v2508_v13 = vpack.c.bf16 %v2252_v45, %v2244_v53  ;;  %v1855_v24 = vpop.f32.mrb[160].mxu1  ;;  %3949 = vmatpush1.bf16.msra.mxu0 %v6135_v48 }
 0x2cc   : > { %v1856_v7 = vadd.f32 %v1855_v24, %v7140_v56  ;;  %v1857_v38 = vpop.f32.mrb[161].mxu1  ;;  %3950 = vmatprep.subr.bf16.mxu0 %v6140_v52 }
 0x2cd   : > { %v1858_v28 = vadd.f32 %v1857_v38, %v7143_v61  ;;  %v1859_v39 = vpop.f32.mrb[162].mxu1  ;;  %3831 = vmatprep.mubr.bf16.mxu0 %v2508_v13 }
 0x2ce   : > { %v1860_v36 = vadd.f32 %v1859_v39, %v7140_v56  ;;  %v1861_v23 = vpop.f32.mrb[163].mxu1  ;;  %3832 = vmatmul.mubr.bf16.gmra.mrb[28].mxu0 %v2507_v8  ;;  %v2259_v55 = vmax.f32 %v1856_v7, 0.0 }
 0x2cf   : > { %v1862_v62 = vadd.f32 %v1861_v23, %v7143_v61  ;;  %3951 = vmatpush1.bf16.msra.mxu0 %v6138_v9  ;;  %v2260_v19 = vmax.f32 %v1858_v28, 0.0 }
 0x2d0   : > { %v2267_v54 = vmax.f32 %v1860_v36, 0.0  ;;  %3952 = vmatprep.subr.bf16.mxu0 %v6143_v4 }
 0x2d1   : > { %v2268_v20 = vmax.f32 %v1862_v62, 0.0 }
 0x2d2   : > { %v2515_v27 = vpack.c.bf16 %v2267_v54, %v2259_v55 }
 0x2d3   : > { %v2516_v47 = vpack.c.bf16 %v2268_v20, %v2260_v19  ;;  %v1865_v29 = vpop.f32.mrb[164].mxu1  ;;  %3953 = vmatpush1.bf16.msra.mxu0 %v6141_v37 }
 0x2d4   : > { %v1866_v26 = vadd.f32 %v1865_v29, %v7140_v56  ;;  %v1867_v22 = vpop.f32.mrb[165].mxu1 }
 0x2d5   : > { %v1868_v50 = vadd.f32 %v1867_v22, %v7143_v61  ;;  %v1869_v58 = vpop.f32.mrb[166].mxu1  ;;  %3841 = vmatprep.mubr.bf16.mxu0 %v2516_v47 }
 0x2d6   : > { %v1870_v51 = vadd.f32 %v1869_v58, %v7140_v56  ;;  %v1871_v30 = vpop.f32.mrb[167].mxu1  ;;  %3842 = vmatmul.mubr.bf16.gmra.mrb[32].mxu0 %v2515_v27  ;;  %v2275_v59 = vmax.f32 %v1866_v26, 0.0 }
 0x2d7   : > { %v1872_v33 = vadd.f32 %v1871_v30, %v7143_v61  ;;  %v2276_v46 = vmax.f32 %v1868_v50, 0.0 }
 0x2d8   : > { %v2283_v25 = vmax.f32 %v1870_v51, 0.0 }
 0x2d9   : > { %v2284_v57 = vmax.f32 %v1872_v33, 0.0 }
 0x2da   : > { %v2523_v32 = vpack.c.bf16 %v2283_v25, %v2275_v59 }
 0x2db   : > { %v2524_v0 = vpack.c.bf16 %v2284_v57, %v2276_v46  ;;  %v1875_v43 = vpop.f32.mrb[168].mxu1 }
 0x2dc   : > { %v1876_v35 = vadd.f32 %v1875_v43, %v7140_v56  ;;  %v1877_v41 = vpop.f32.mrb[169].mxu1 }
 0x2dd   : > { %v1878_v40 = vadd.f32 %v1877_v41, %v7143_v61  ;;  %v1879_v42 = vpop.f32.mrb[170].mxu1  ;;  %3851 = vmatprep.mubr.bf16.mxu0 %v2524_v0 }
 0x2de   : > { %v1880_v63 = vadd.f32 %v1879_v42, %v7140_v56  ;;  %v1881_v60 = vpop.f32.mrb[171].mxu1  ;;  %3852 = vmatmul.mubr.bf16.gmra.mrb[36].mxu0 %v2523_v32  ;;  %v2291_v6 = vmax.f32 %v1876_v35, 0.0 }
 0x2df   : > { %v1882_v34 = vadd.f32 %v1881_v60, %v7143_v61  ;;  %v2292_v1 = vmax.f32 %v1878_v40, 0.0 }
 0x2e0   : > { %v2299_v18 = vmax.f32 %v1880_v63, 0.0 }
 0x2e1   : > { %v2300_v21 = vmax.f32 %v1882_v34, 0.0 }
 0x2e2   : > { %v2531_v16 = vpack.c.bf16 %v2299_v18, %v2291_v6 }
 0x2e3   : > { %v2532_v10 = vpack.c.bf16 %v2300_v21, %v2292_v1  ;;  %v1885_v12 = vpop.f32.mrb[172].mxu1 }
 0x2e4   : > { %v1886_v17 = vadd.f32 %v1885_v12, %v7140_v56  ;;  %v1887_v15 = vpop.f32.mrb[173].mxu1 }
 0x2e5   : > { %v1888_v11 = vadd.f32 %v1887_v15, %v7143_v61  ;;  %v1889_v14 = vpop.f32.mrb[174].mxu1  ;;  %3861 = vmatprep.mubr.bf16.mxu0 %v2532_v10 }
 0x2e6   : > { %v1890_v48 = vadd.f32 %v1889_v14, %v7140_v56  ;;  %v1891_v49 = vpop.f32.mrb[175].mxu1  ;;  %3862 = vmatmul.mubr.bf16.gmra.mrb[40].mxu0 %v2531_v16  ;;  %v2307_v52 = vmax.f32 %v1886_v17, 0.0  ;;  %v701_v17 = vsub.s32 6, %v6908_v2  ;;  %v705_v14 = vsub.s32 7, %v6908_v2 }
 0x2e7   : > { %v1892_v44 = vadd.f32 %v1891_v49, %v7143_v61  ;;  %v2308_v45 = vmax.f32 %v1888_v11, 0.0 }
 0x2e8   : > { %v2315_v53 = vmax.f32 %v1890_v48, 0.0 }
 0x2e9   : > { %v2316_v8 = vmax.f32 %v1892_v44, 0.0 }
 0x2ea   : > { %v2539_v13 = vpack.c.bf16 %v2315_v53, %v2307_v52 }
 0x2eb   : > { %v2540_v24 = vpack.c.bf16 %v2316_v8, %v2308_v45  ;;  %v1895_v9 = vpop.f32.mrb[176].mxu1  ;;  %v7222_v45 = vrot.slane %v7137_v31, %v701_v17 }
 0x2ec   : > { %v1896_v7 = vadd.f32 %v1895_v9, %v7140_v56  ;;  %v1897_v38 = vpop.f32.mrb[177].mxu1 }
 0x2ed   : > { %v1898_v4 = vadd.f32 %v1897_v38, %v7143_v61  ;;  %v1899_v28 = vpop.f32.mrb[178].mxu1  ;;  %3871 = vmatprep.mubr.bf16.mxu0 %v2540_v24  ;;  %v7225_v24 = vrot.slane %v7137_v31, %v705_v14 }
 0x2ee   : > { %v1900_v39 = vadd.f32 %v1899_v28, %v7140_v56  ;;  %v1901_v36 = vpop.f32.mrb[179].mxu1  ;;  %3872 = vmatmul.mubr.bf16.gmra.mrb[44].mxu0 %v2539_v13  ;;  %v2323_v62 = vmax.f32 %v1896_v7, 0.0 }
 0x2ef   : > { %v1902_v23 = vadd.f32 %v1901_v36, %v7143_v61  ;;  %v2324_v55 = vmax.f32 %v1898_v4, 0.0 }
 0x2f0   : > { %v2331_v37 = vmax.f32 %v1900_v39, 0.0 }
 0x2f1   : > { %v2332_v54 = vmax.f32 %v1902_v23, 0.0 }
 0x2f2   : > { %v2547_v19 = vpack.c.bf16 %v2331_v37, %v2323_v62 }
 0x2f3   : > { %v2548_v20 = vpack.c.bf16 %v2332_v54, %v2324_v55  ;;  %v1905_v27 = vpop.f32.mrb[180].mxu1 }
 0x2f4   : > { %v1906_v47 = vadd.f32 %v1905_v27, %v7140_v56  ;;  %v1907_v29 = vpop.f32.mrb[181].mxu1 }
 0x2f5   : > { %v1908_v26 = vadd.f32 %v1907_v29, %v7143_v61  ;;  %v1909_v22 = vpop.f32.mrb[182].mxu1  ;;  %3881 = vmatprep.mubr.bf16.mxu0 %v2548_v20 }
 0x2f6   : > { %v1910_v50 = vadd.f32 %v1909_v22, %v7140_v56  ;;  %v1911_v58 = vpop.f32.mrb[183].mxu1  ;;  %3882 = vmatmul.mubr.bf16.gmra.mrb[48].mxu0 %v2547_v19  ;;  %v2339_v30 = vmax.f32 %v1906_v47, 0.0 }
 0x2f7   : > { %v1912_v51 = vadd.f32 %v1911_v58, %v7143_v61  ;;  %v2340_v59 = vmax.f32 %v1908_v26, 0.0 }
 0x2f8   : > { %v2347_v33 = vmax.f32 %v1910_v50, 0.0 }
 0x2f9   : > { %v2348_v25 = vmax.f32 %v1912_v51, 0.0 }
 0x2fa   : > { %v2555_v46 = vpack.c.bf16 %v2347_v33, %v2339_v30 }
 0x2fb   : > { %v2556_v57 = vpack.c.bf16 %v2348_v25, %v2340_v59  ;;  %v1915_v32 = vpop.f32.mrb[184].mxu1 }
 0x2fc   : > { %v1916_v0 = vadd.f32 %v1915_v32, %v7140_v56  ;;  %v1917_v43 = vpop.f32.mrb[185].mxu1 }
 0x2fd   : > { %v1918_v35 = vadd.f32 %v1917_v43, %v7143_v61  ;;  %v1919_v41 = vpop.f32.mrb[186].mxu1  ;;  %3891 = vmatprep.mubr.bf16.mxu0 %v2556_v57 }
 0x2fe   : > { %v1920_v40 = vadd.f32 %v1919_v41, %v7140_v56  ;;  %v1921_v42 = vpop.f32.mrb[187].mxu1  ;;  %3892 = vmatmul.mubr.bf16.gmra.mrb[52].mxu0 %v2555_v46  ;;  %v2355_v60 = vmax.f32 %v1916_v0, 0.0 }
 0x2ff   : > { %v1922_v63 = vadd.f32 %v1921_v42, %v7143_v61  ;;  %v2356_v6 = vmax.f32 %v1918_v35, 0.0 }
 0x300   : > { %v2363_v34 = vmax.f32 %v1920_v40, 0.0 }
 0x301   : > { %v2364_v18 = vmax.f32 %v1922_v63, 0.0 }
 0x302   : > { %v2563_v1 = vpack.c.bf16 %v2363_v34, %v2355_v60 }
 0x303   : > { %v2564_v21 = vpack.c.bf16 %v2364_v18, %v2356_v6  ;;  %v1925_v16 = vpop.f32.mrb[188].mxu1 }
 0x304   : > { %v1926_v10 = vadd.f32 %v1925_v16, %v7140_v56  ;;  %v1927_v12 = vpop.f32.mrb[189].mxu1 }
 0x305   : > { %v1928_v15 = vadd.f32 %v1927_v12, %v7143_v61  ;;  %v1929_v11 = vpop.f32.mrb[190].mxu1  ;;  %3901 = vmatprep.mubr.bf16.mxu0 %v2564_v21 }
 0x306   : > { %v1930_v48 = vadd.f32 %v1929_v11, %v7140_v56  ;;  %v1931_v49 = vpop.f32.mrb[191].mxu1  ;;  %3902 = vmatmul.mubr.bf16.gmra.mrb[56].mxu0 %v2563_v1  ;;  %v2371_v52 = vmax.f32 %v1926_v10, 0.0 }
 0x307   : > { %v1932_v44 = vadd.f32 %v1931_v49, %v7143_v61  ;;  %v2372_v8 = vmax.f32 %v1928_v15, 0.0 }
 0x308   : > { %v2379_v53 = vmax.f32 %v1930_v48, 0.0 }
 0x309   : > { %v2380_v13 = vmax.f32 %v1932_v44, 0.0 }
 0x30a   : > { %v2571_v9 = vpack.c.bf16 %v2379_v53, %v2371_v52 }
 0x30b   : > { %v2572_v7 = vpack.c.bf16 %v2380_v13, %v2372_v8  ;;  %v1968_v38 = vpop.f32.mrb[192].mxu1 }
 0x30c   : > { %v1969_v4 = vadd.f32 %v1968_v38, %v7222_v45  ;;  %v1970_v56 = vpop.f32.mrb[193].mxu1 }
 0x30d   : > { %v1971_v28 = vadd.f32 %v1970_v56, %v7225_v24  ;;  %v1972_v39 = vpop.f32.mrb[194].mxu1  ;;  %3911 = vmatprep.mubr.bf16.mxu0 %v2572_v7 }
 0x30e   : > { %v1973_v61 = vadd.f32 %v1972_v39, %v7222_v45  ;;  %v1974_v36 = vpop.f32.mrb[195].mxu1  ;;  %3912 = vmatmul.mubr.bf16.gmra.mrb[60].mxu0 %v2571_v9  ;;  %v2133_v62 = vmax.f32 %v1969_v4, 0.0 }
 0x30f   : > { %v1975_v23 = vadd.f32 %v1974_v36, %v7225_v24  ;;  %v2134_v31 = vmax.f32 %v1971_v28, 0.0 }
 0x310   : > { %v2141_v37 = vmax.f32 %v1973_v61, 0.0 }
 0x311   : > { %v2142_v55 = vmax.f32 %v1975_v23, 0.0 }
 0x312   : > { %v2453_v54 = vpack.c.bf16 %v2141_v37, %v2133_v62 }
 0x313   : > { %v2454_v19 = vpack.c.bf16 %v2142_v55, %v2134_v31  ;;  %v1978_v20 = vpop.f32.mrb[196].mxu1 }
 0x314   : > { %v1979_v27 = vadd.f32 %v1978_v20, %v7222_v45  ;;  %v1980_v47 = vpop.f32.mrb[197].mxu1 }
 0x315   : > { %v1981_v29 = vadd.f32 %v1980_v47, %v7225_v24  ;;  %v1982_v26 = vpop.f32.mrb[198].mxu1  ;;  %3954 = vmatprep.mubr.bf16.mxu0 %v2454_v19 }
 0x316   : > { %v1983_v22 = vadd.f32 %v1982_v26, %v7222_v45  ;;  %v1984_v50 = vpop.f32.mrb[199].mxu1  ;;  %3955 = vmatmul.mubr.bf16.vlgmr.msra.gmra.mrb[0].mxu0 %v2453_v54  ;;  %v2149_v51 = vmax.f32 %v1979_v27, 0.0 }
 0x317   : > { %v1985_v58 = vadd.f32 %v1984_v50, %v7225_v24  ;;  %v2150_v33 = vmax.f32 %v1981_v29, 0.0 }
 0x318   : > { %v2157_v30 = vmax.f32 %v1983_v22, 0.0 }
 0x319   : > { %v2158_v59 = vmax.f32 %v1985_v58, 0.0 }
 0x31a   : > { %v2461_v25 = vpack.c.bf16 %v2157_v30, %v2149_v51 }
 0x31b   : > { %v2462_v46 = vpack.c.bf16 %v2158_v59, %v2150_v33  ;;  %v1988_v57 = vpop.f32.mrb[200].mxu1 }
 0x31c   : > { %v1989_v32 = vadd.f32 %v1988_v57, %v7222_v45  ;;  %v1990_v0 = vpop.f32.mrb[201].mxu1 }
 0x31d   : > { %v1991_v43 = vadd.f32 %v1990_v0, %v7225_v24  ;;  %v1992_v35 = vpop.f32.mrb[202].mxu1  ;;  %3964 = vmatprep.mubr.bf16.mxu0 %v2462_v46 }
 0x31e   : > { %v2165_v41 = vmax.f32 %v1989_v32, 0.0  ;;  %v1993_v40 = vadd.f32 %v1992_v35, %v7222_v45  ;;  %v1994_v42 = vpop.f32.mrb[203].mxu1  ;;  %3965 = vmatmul.mubr.bf16.gmra.mrb[4].mxu0 %v2461_v25 }
 0x31f   : > { %v2166_v63 = vmax.f32 %v1991_v43, 0.0  ;;  %v1995_v60 = vadd.f32 %v1994_v42, %v7225_v24 }
 0x320   : > { %v2173_v34 = vmax.f32 %v1993_v40, 0.0 }
 0x321   : > { %v2174_v6 = vmax.f32 %v1995_v60, 0.0 }
 0x322   : > { %v2469_v18 = vpack.c.bf16 %v2173_v34, %v2165_v41 }
 0x323   : > { %v2470_v1 = vpack.c.bf16 %v2174_v6, %v2166_v63  ;;  %v1998_v21 = vpop.f32.mrb[204].mxu1 }
 0x324   : > { %v1999_v16 = vadd.f32 %v1998_v21, %v7222_v45  ;;  %v2000_v10 = vpop.f32.mrb[205].mxu1 }
 0x325   : > { %v2001_v12 = vadd.f32 %v2000_v10, %v7225_v24  ;;  %v2002_v17 = vpop.f32.mrb[206].mxu1  ;;  %3974 = vmatprep.mubr.bf16.mxu0 %v2470_v1 }
 0x326   : > { %v2181_v15 = vmax.f32 %v1999_v16, 0.0  ;;  %v2003_v11 = vadd.f32 %v2002_v17, %v7222_v45  ;;  %v2004_v14 = vpop.f32.mrb[207].mxu1  ;;  %3975 = vmatmul.mubr.bf16.gmra.mrb[8].mxu0 %v2469_v18 }
 0x327   : > { %v2182_v48 = vmax.f32 %v2001_v12, 0.0  ;;  %v2005_v49 = vadd.f32 %v2004_v14, %v7225_v24 }
 0x328   : > { %v2189_v44 = vmax.f32 %v2003_v11, 0.0 }
 0x329   : > { %v2190_v52 = vmax.f32 %v2005_v49, 0.0 }
 0x32a   : > { %v2477_v53 = vpack.c.bf16 %v2189_v44, %v2181_v15 }
 0x32b   : > { %v2478_v8 = vpack.c.bf16 %v2190_v52, %v2182_v48  ;;  %v2008_v13 = vpop.f32.mrb[208].mxu1 }
 0x32c   : > { %v2009_v9 = vadd.f32 %v2008_v13, %v7222_v45  ;;  %v2010_v7 = vpop.f32.mrb[209].mxu1 }
 0x32d   : > { %v2011_v38 = vadd.f32 %v2010_v7, %v7225_v24  ;;  %v2012_v4 = vpop.f32.mrb[210].mxu1  ;;  %3984 = vmatprep.mubr.bf16.mxu0 %v2478_v8 }
 0x32e   : > { %v2197_v56 = vmax.f32 %v2009_v9, 0.0  ;;  %v2013_v28 = vadd.f32 %v2012_v4, %v7222_v45  ;;  %v2014_v39 = vpop.f32.mrb[211].mxu1  ;;  %3985 = vmatmul.mubr.bf16.gmra.mrb[12].mxu0 %v2477_v53 }
 0x32f   : > { %v2198_v61 = vmax.f32 %v2011_v38, 0.0  ;;  %v2015_v36 = vadd.f32 %v2014_v39, %v7225_v24 }
 0x330   : > { %v2205_v23 = vmax.f32 %v2013_v28, 0.0 }
 0x331   : > { %v2206_v62 = vmax.f32 %v2015_v36, 0.0 }
 0x332   : > { %v2485_v37 = vpack.c.bf16 %v2205_v23, %v2197_v56 }
 0x333   : > { %v2486_v31 = vpack.c.bf16 %v2206_v62, %v2198_v61  ;;  %v2018_v55 = vpop.f32.mrb[212].mxu1 }
 0x334   : > { %v2019_v54 = vadd.f32 %v2018_v55, %v7222_v45  ;;  %v2020_v19 = vpop.f32.mrb[213].mxu1 }
 0x335   : > { %v2021_v20 = vadd.f32 %v2020_v19, %v7225_v24  ;;  %v2022_v27 = vpop.f32.mrb[214].mxu1  ;;  %3994 = vmatprep.mubr.bf16.mxu0 %v2486_v31 }
 0x336   : > { %v2213_v47 = vmax.f32 %v2019_v54, 0.0  ;;  %v2023_v29 = vadd.f32 %v2022_v27, %v7222_v45  ;;  %v2024_v26 = vpop.f32.mrb[215].mxu1  ;;  %3995 = vmatmul.mubr.bf16.gmra.mrb[16].mxu0 %v2485_v37 }
 0x337   : > { %v2214_v22 = vmax.f32 %v2021_v20, 0.0  ;;  %v2025_v50 = vadd.f32 %v2024_v26, %v7225_v24 }
 0x338   : > { %v2221_v58 = vmax.f32 %v2023_v29, 0.0 }
 0x339   : > { %v2222_v51 = vmax.f32 %v2025_v50, 0.0 }
 0x33a   : > { %v2493_v30 = vpack.c.bf16 %v2221_v58, %v2213_v47 }
 0x33b   : > { %v2494_v33 = vpack.c.bf16 %v2222_v51, %v2214_v22  ;;  %v2028_v59 = vpop.f32.mrb[216].mxu1 }
 0x33c   : > { %v2029_v25 = vadd.f32 %v2028_v59, %v7222_v45  ;;  %v2030_v46 = vpop.f32.mrb[217].mxu1 }
 0x33d   : > { %v2031_v57 = vadd.f32 %v2030_v46, %v7225_v24  ;;  %v2032_v32 = vpop.f32.mrb[218].mxu1  ;;  %4004 = vmatprep.mubr.bf16.mxu0 %v2494_v33 }
 0x33e   : > { %v2229_v0 = vmax.f32 %v2029_v25, 0.0  ;;  %v2033_v43 = vadd.f32 %v2032_v32, %v7222_v45  ;;  %v2034_v35 = vpop.f32.mrb[219].mxu1  ;;  %4005 = vmatmul.mubr.bf16.gmra.mrb[20].mxu0 %v2493_v30 }
 0x33f   : > { %v2230_v41 = vmax.f32 %v2031_v57, 0.0  ;;  %v2035_v40 = vadd.f32 %v2034_v35, %v7225_v24 }
 0x340   : > { %v2237_v42 = vmax.f32 %v2033_v43, 0.0 }
 0x341   : > { %v2238_v63 = vmax.f32 %v2035_v40, 0.0 }
 0x342   : > { %v2501_v60 = vpack.c.bf16 %v2237_v42, %v2229_v0 }
 0x343   : > { %v2502_v34 = vpack.c.bf16 %v2238_v63, %v2230_v41  ;;  %v2038_v6 = vpop.f32.mrb[220].mxu1 }
 0x344   : > { %v2039_v18 = vadd.f32 %v2038_v6, %v7222_v45  ;;  %v2040_v1 = vpop.f32.mrb[221].mxu1 }
 0x345   : > { %v2041_v21 = vadd.f32 %v2040_v1, %v7225_v24  ;;  %v2042_v16 = vpop.f32.mrb[222].mxu1  ;;  %4014 = vmatprep.mubr.bf16.mxu0 %v2502_v34 }
 0x346   : > { %v2245_v10 = vmax.f32 %v2039_v18, 0.0  ;;  %v2043_v12 = vadd.f32 %v2042_v16, %v7222_v45  ;;  %v2044_v17 = vpop.f32.mrb[223].mxu1  ;;  %4015 = vmatmul.mubr.bf16.gmra.mrb[24].mxu0 %v2501_v60 }
 0x347   : > { %v2246_v15 = vmax.f32 %v2041_v21, 0.0  ;;  %v2045_v11 = vadd.f32 %v2044_v17, %v7225_v24 }
 0x348   : > { %v2253_v14 = vmax.f32 %v2043_v12, 0.0 }
 0x349   : > { %v2254_v48 = vmax.f32 %v2045_v11, 0.0 }
 0x34a   : > { %v2509_v49 = vpack.c.bf16 %v2253_v14, %v2245_v10 }
 0x34b   : > { %v2510_v44 = vpack.c.bf16 %v2254_v48, %v2246_v15  ;;  %v2048_v52 = vpop.f32.mrb[224].mxu1 }
 0x34c   : > { %v2049_v53 = vadd.f32 %v2048_v52, %v7222_v45  ;;  %v2050_v8 = vpop.f32.mrb[225].mxu1 }
 0x34d   : > { %v2051_v13 = vadd.f32 %v2050_v8, %v7225_v24  ;;  %v2052_v9 = vpop.f32.mrb[226].mxu1  ;;  %4024 = vmatprep.mubr.bf16.mxu0 %v2510_v44 }
 0x34e   : > { %v2261_v7 = vmax.f32 %v2049_v53, 0.0  ;;  %v2053_v38 = vadd.f32 %v2052_v9, %v7222_v45  ;;  %v2054_v4 = vpop.f32.mrb[227].mxu1  ;;  %4025 = vmatmul.mubr.bf16.gmra.mrb[28].mxu0 %v2509_v49 }
 0x34f   : > { %v2262_v56 = vmax.f32 %v2051_v13, 0.0  ;;  %v2055_v28 = vadd.f32 %v2054_v4, %v7225_v24 }
 0x350   : > { %v2269_v39 = vmax.f32 %v2053_v38, 0.0 }
 0x351   : > { %v2270_v61 = vmax.f32 %v2055_v28, 0.0 }
 0x352   : > { %v2517_v36 = vpack.c.bf16 %v2269_v39, %v2261_v7 }
 0x353   : > { %v2518_v23 = vpack.c.bf16 %v2270_v61, %v2262_v56  ;;  %v2058_v62 = vpop.f32.mrb[228].mxu1 }
 0x354   : > { %v2059_v37 = vadd.f32 %v2058_v62, %v7222_v45  ;;  %v2060_v31 = vpop.f32.mrb[229].mxu1 }
 0x355   : > { %v2061_v55 = vadd.f32 %v2060_v31, %v7225_v24  ;;  %v2062_v54 = vpop.f32.mrb[230].mxu1  ;;  %4034 = vmatprep.mubr.bf16.mxu0 %v2518_v23 }
 0x356   : > { %v2277_v19 = vmax.f32 %v2059_v37, 0.0  ;;  %v2063_v20 = vadd.f32 %v2062_v54, %v7222_v45  ;;  %v2064_v27 = vpop.f32.mrb[231].mxu1  ;;  %4035 = vmatmul.mubr.bf16.gmra.mrb[32].mxu0 %v2517_v36 }
 0x357   : > { %v2278_v47 = vmax.f32 %v2061_v55, 0.0  ;;  %v2065_v29 = vadd.f32 %v2064_v27, %v7225_v24 }
 0x358   : > { %v2285_v26 = vmax.f32 %v2063_v20, 0.0 }
 0x359   : > { %v2286_v22 = vmax.f32 %v2065_v29, 0.0 }
 0x35a   : > { %v2525_v50 = vpack.c.bf16 %v2285_v26, %v2277_v19 }
 0x35b   : > { %v2526_v58 = vpack.c.bf16 %v2286_v22, %v2278_v47  ;;  %v2068_v51 = vpop.f32.mrb[232].mxu1 }
 0x35c   : > { %v2069_v30 = vadd.f32 %v2068_v51, %v7222_v45  ;;  %v2070_v33 = vpop.f32.mrb[233].mxu1 }
 0x35d   : > { %v2071_v59 = vadd.f32 %v2070_v33, %v7225_v24  ;;  %v2072_v25 = vpop.f32.mrb[234].mxu1  ;;  %4044 = vmatprep.mubr.bf16.mxu0 %v2526_v58 }
 0x35e   : > { %v2293_v46 = vmax.f32 %v2069_v30, 0.0  ;;  %v2073_v57 = vadd.f32 %v2072_v25, %v7222_v45  ;;  %v2074_v32 = vpop.f32.mrb[235].mxu1  ;;  %4045 = vmatmul.mubr.bf16.gmra.mrb[36].mxu0 %v2525_v50 }
 0x35f   : > { %v2294_v0 = vmax.f32 %v2071_v59, 0.0  ;;  %v2075_v43 = vadd.f32 %v2074_v32, %v7225_v24 }
 0x360   : > { %v2301_v35 = vmax.f32 %v2073_v57, 0.0 }
 0x361   : > { %v2302_v41 = vmax.f32 %v2075_v43, 0.0 }
 0x362   : > { %v2533_v40 = vpack.c.bf16 %v2301_v35, %v2293_v46 }
 0x363   : > { %v2534_v42 = vpack.c.bf16 %v2302_v41, %v2294_v0  ;;  %v2078_v63 = vpop.f32.mrb[236].mxu1 }
 0x364   : > { %v2079_v60 = vadd.f32 %v2078_v63, %v7222_v45  ;;  %v2080_v34 = vpop.f32.mrb[237].mxu1 }
 0x365   : > { %v2081_v6 = vadd.f32 %v2080_v34, %v7225_v24  ;;  %v2082_v18 = vpop.f32.mrb[238].mxu1  ;;  %4054 = vmatprep.mubr.bf16.mxu0 %v2534_v42 }
 0x366   : > { %v2309_v1 = vmax.f32 %v2079_v60, 0.0  ;;  %v2083_v21 = vadd.f32 %v2082_v18, %v7222_v45  ;;  %v2084_v16 = vpop.f32.mrb[239].mxu1  ;;  %4055 = vmatmul.mubr.bf16.gmra.mrb[40].mxu0 %v2533_v40 }
 0x367   : > { %v2310_v10 = vmax.f32 %v2081_v6, 0.0  ;;  %v2085_v12 = vadd.f32 %v2084_v16, %v7225_v24 }
 0x368   : > { %v2317_v17 = vmax.f32 %v2083_v21, 0.0 }
 0x369   : > { %v2318_v15 = vmax.f32 %v2085_v12, 0.0 }
 0x36a   : > { %v2541_v11 = vpack.c.bf16 %v2317_v17, %v2309_v1 }
 0x36b   : > { %v2542_v14 = vpack.c.bf16 %v2318_v15, %v2310_v10  ;;  %v2088_v48 = vpop.f32.mrb[240].mxu1  ;;  %v4310_v15 = vld [vmem:[%s8231_s6] sm:$0x3] }
 0x36c   : > { %v2089_v49 = vadd.f32 %v2088_v48, %v7222_v45  ;;  %v2090_v44 = vpop.f32.mrb[241].mxu1 }
 0x36d   : > { %v2091_v52 = vadd.f32 %v2090_v44, %v7225_v24  ;;  %v2092_v53 = vpop.f32.mrb[242].mxu1  ;;  %4064 = vmatprep.mubr.bf16.mxu0 %v2542_v14 }
 0x36e   : > { %v2325_v8 = vmax.f32 %v2089_v49, 0.0  ;;  %v2093_v13 = vadd.f32 %v2092_v53, %v7222_v45  ;;  %v2094_v9 = vpop.f32.mrb[243].mxu1  ;;  %4065 = vmatmul.mubr.bf16.gmra.mrb[44].mxu0 %v2541_v11 }
 0x36f   : > { %v2326_v7 = vmax.f32 %v2091_v52, 0.0  ;;  %v2095_v38 = vadd.f32 %v2094_v9, %v7225_v24  ;;  %v6209_v52 = vld [vmem:[%s6699_s12] sm:$0xff] }
 0x370   : > { %v2333_v4 = vmax.f32 %v2093_v13, 0.0 }
 0x371   : > { %v2334_v56 = vmax.f32 %v2095_v38, 0.0  ;;  %v6212_v38 = vld [vmem:[%s6699_s12 + $0x18] sm:$0xff] }
 0x372   : > { %v2549_v28 = vpack.c.bf16 %v2333_v4, %v2325_v8 }
 0x373   : > { %v2550_v39 = vpack.c.bf16 %v2334_v56, %v2326_v7  ;;  %v2098_v61 = vpop.f32.mrb[244].mxu1 }
 0x374   : > { %v2099_v36 = vadd.f32 %v2098_v61, %v7222_v45  ;;  %v2100_v23 = vpop.f32.mrb[245].mxu1 }
 0x375   : > { %v2101_v62 = vadd.f32 %v2100_v23, %v7225_v24  ;;  %v2102_v37 = vpop.f32.mrb[246].mxu1  ;;  %4074 = vmatprep.mubr.bf16.mxu0 %v2550_v39 }
 0x376   : > { %v2341_v31 = vmax.f32 %v2099_v36, 0.0  ;;  %v2103_v55 = vadd.f32 %v2102_v37, %v7222_v45  ;;  %v2104_v54 = vpop.f32.mrb[247].mxu1  ;;  %4075 = vmatmul.mubr.bf16.gmra.mrb[48].mxu0 %v2549_v28 }
 0x377   : > { %v2342_v19 = vmax.f32 %v2101_v62, 0.0  ;;  %v2105_v20 = vadd.f32 %v2104_v54, %v7225_v24 }
 0x378   : > { %v2349_v27 = vmax.f32 %v2103_v55, 0.0 }
 0x379   : > { %v2350_v47 = vmax.f32 %v2105_v20, 0.0  ;;  %v6213_v20 = vld [vmem:[%s6699_s12 + $0x20] sm:$0xff] }
 0x37a   : > { %v2557_v29 = vpack.c.bf16 %v2349_v27, %v2341_v31 }
 0x37b   : > { %v2558_v26 = vpack.c.bf16 %v2350_v47, %v2342_v19  ;;  %v2108_v22 = vpop.f32.mrb[248].mxu1 }
 0x37c   : > { %v2109_v50 = vadd.f32 %v2108_v22, %v7222_v45  ;;  %v2110_v58 = vpop.f32.mrb[249].mxu1 }
 0x37d   : > { %v2111_v51 = vadd.f32 %v2110_v58, %v7225_v24  ;;  %v2112_v30 = vpop.f32.mrb[250].mxu1  ;;  %4084 = vmatprep.mubr.bf16.mxu0 %v2558_v26  ;;  %v6214_v26 = vld [vmem:[%s6699_s12 + $0x28] sm:$0xff]  ;;  %v6215_v58 = vld [vmem:[%s6699_s12 + $0x30] sm:$0xff] }
 0x37e   : > { %v2357_v33 = vmax.f32 %v2109_v50, 0.0  ;;  %v2113_v59 = vadd.f32 %v2112_v30, %v7222_v45  ;;  %v2114_v25 = vpop.f32.mrb[251].mxu1  ;;  %4085 = vmatmul.mubr.bf16.gmra.mrb[52].mxu0 %v2557_v29 }
 0x37f   : > { %v2358_v46 = vmax.f32 %v2111_v51, 0.0  ;;  %v2115_v57 = vadd.f32 %v2114_v25, %v7225_v24 }
 0x380   : > { %v2365_v32 = vmax.f32 %v2113_v59, 0.0 }
 0x381   : > { %v2366_v0 = vmax.f32 %v2115_v57, 0.0 }
 0x382   : > { %v2565_v43 = vpack.c.bf16 %v2365_v32, %v2357_v33  ;;  %v6216_v33 = vld [vmem:[%s6699_s12 + $0x38] sm:$0xff] }
 0x383   : > { %v2566_v35 = vpack.c.bf16 %v2366_v0, %v2358_v46  ;;  %v2118_v41 = vpop.f32.mrb[252].mxu1 }
 0x384   : > { %v2119_v40 = vadd.f32 %v2118_v41, %v7222_v45  ;;  %v2120_v42 = vpop.f32.mrb[253].mxu1 }
 0x385   : > { %v2121_v63 = vadd.f32 %v2120_v42, %v7225_v24  ;;  %v2122_v60 = vpop.f32.mrb[254].mxu1  ;;  %4094 = vmatprep.mubr.bf16.mxu0 %v2566_v35 }
 0x386   : > { %v2373_v34 = vmax.f32 %v2119_v40, 0.0  ;;  %v2123_v6 = vadd.f32 %v2122_v60, %v7222_v45  ;;  %v2124_v18 = vpop.f32.mrb[255].mxu1  ;;  %4095 = vmatmul.mubr.bf16.gmra.mrb[56].mxu0 %v2565_v43  ;;  %v7296_v45 = vrot.slane %v4310_v15, %v677_v3  ;;  %v6210_v3 = vld [vmem:[%s6699_s12 + $0x8] sm:$0xff] }
 0x387   : > { %v2374_v1 = vmax.f32 %v2121_v63, 0.0  ;;  %v2125_v21 = vadd.f32 %v2124_v18, %v7225_v24  ;;  %v7300_v24 = vrot.slane %v4310_v15, %v681_v5  ;;  %v6211_v5 = vld [vmem:[%s6699_s12 + $0x10] sm:$0xff] }
 0x388   : > { %v2381_v16 = vmax.f32 %v2123_v6, 0.0 }
 0x389   : > { %v2382_v10 = vmax.f32 %v2125_v21, 0.0  ;;  %v6218_v21 = vld [vmem:[%s6699_s12 + $0x48] sm:$0xff] }
 0x38a   : > { %v2573_v12 = vpack.c.bf16 %v2381_v16, %v2373_v34  ;;  %v6217_v34 = vld [vmem:[%s6699_s12 + $0x40] sm:$0xff] }
 0x38b   : > { %v2574_v17 = vpack.c.bf16 %v2382_v10, %v2374_v1 }
 0x38d   : > { %4104 = vmatprep.mubr.bf16.mxu0 %v2574_v17 }
 0x38e   : > { %4105 = vmatmul.mubr.bf16.gmra.mrb[60].mxu0 %v2573_v12  ;;  %v6219_v12 = vld [vmem:[%s6699_s12 + $0x50] sm:$0xff] }
 0x3e9   : > { %v3956_v11 = vpop.f32.mrb[0].mxu0 }
 0x3ea   : > { %v4322_v14 = vadd.f32 %v7296_v45, %v3956_v11  ;;  %v3958_v48 = vpop.f32.mrb[1].mxu0  ;;  %v6220_v11 = vld [vmem:[%s6699_s12 + $0x58] sm:$0xff] }
 0x3eb   : > { %v4323_v49 = vadd.f32 %v7300_v24, %v3958_v48  ;;  %v3960_v44 = vpop.f32.mrb[2].mxu0 }
 0x3ec   : > { %v7305_v53 = vadd.f32 %v6209_v52, %v4322_v14  ;;  %v4324_v8 = vadd.f32 %v7296_v45, %v3960_v44  ;;  %v3962_v13 = vpop.f32.mrb[3].mxu0 }
 0x3ed   : > { %v7309_v9 = vadd.f32 %v6210_v3, %v4323_v49  ;;  %v4325_v2 = vadd.f32 %v7300_v24, %v3962_v13 }
 0x3ee   : > { %v7313_v7 = vadd.f32 %v6211_v5, %v4324_v8  ;;  %v4546_v62 = vmul.f32 %v7305_v53, %v7305_v53 }
 0x3ef   : > { %v7316_v4 = vadd.f32 %v6212_v38, %v4325_v2  ;;  %v4450_v56 = vadd.f32 %v7309_v9, %v7305_v53  ;;  %v4547_v37 = vmul.f32 %v7309_v9, %v7309_v9 }
 0x3f0   : > { %v4548_v28 = vmul.f32 %v7313_v7, %v7313_v7 }
 0x3f1   : > { %4451 = vadd.xlane.f32.xlu0 %v4450_v56  ;;  %v3966_v39 = vpop.f32.mrb[4].mxu0  ;;  %v4549_v61 = vmul.f32 %v7316_v4, %v7316_v4  ;;  %v4453_v19 = vadd.f32 %v7316_v4, %v7313_v7  ;;  %v4610_v30 = vadd.f32 %v4547_v37, %v4546_v62  ;;  %v6222_v62 = vld [vmem:[%s6699_s12 + $0x68] sm:$0xff] }
 0x3f2   : > { %v4326_v36 = vadd.f32 %v7296_v45, %v3966_v39  ;;  %v3968_v23 = vpop.f32.mrb[5].mxu0  ;;  %v6221_v39 = vld [vmem:[%s6699_s12 + $0x60] sm:$0xff] }
 0x3f3   : > { %v4327_v31 = vadd.f32 %v7300_v24, %v3968_v23  ;;  %v3970_v55 = vpop.f32.mrb[6].mxu0  ;;  %v4613_v54 = vadd.f32 %v4549_v61, %v4548_v28 }
 0x3f4   : > { %v7333_v27 = vadd.f32 %v6213_v20, %v4326_v36  ;;  %v4328_v47 = vadd.f32 %v7296_v45, %v3970_v55  ;;  %v3972_v29 = vpop.f32.mrb[7].mxu0  ;;  %v6223_v55 = vld [vmem:[%s6699_s12 + $0x70] sm:$0xff]  ;;  %v6224_v20 = vld [vmem:[%s6699_s12 + $0x78] sm:$0xff] }
 0x3f5   : > { %v7337_v22 = vadd.f32 %v6214_v26, %v4327_v31  ;;  %v4329_v50 = vadd.f32 %v7300_v24, %v3972_v29  ;;  %4614 = vadd.xlane.f32.xlu1 %v4613_v54  ;;  %4454 = vadd.xlane.f32.xlu0 %v4453_v19 }
 0x3f6   : > { %v7341_v51 = vadd.f32 %v6215_v58, %v4328_v47  ;;  %v4550_v46 = vmul.f32 %v7333_v27, %v7333_v27 }
 0x3f7   : > { %v7344_v59 = vadd.f32 %v6216_v33, %v4329_v50  ;;  %v4456_v25 = vadd.f32 %v7337_v22, %v7333_v27  ;;  %v4551_v57 = vmul.f32 %v7337_v22, %v7337_v22 }
 0x3f8   : > { %v4552_v35 = vmul.f32 %v7341_v51, %v7341_v51 }
 0x3f9   : > { %4611 = vadd.xlane.f32.xlu0 %v4610_v30  ;;  %4457 = vadd.xlane.f32.xlu1 %v4456_v25  ;;  %v3976_v32 = vpop.f32.mrb[8].mxu0  ;;  %v4553_v41 = vmul.f32 %v7344_v59, %v7344_v59  ;;  %v4616_v63 = vadd.f32 %v4551_v57, %v4550_v46  ;;  %v4459_v60 = vadd.f32 %v7344_v59, %v7341_v51 }
 0x3fa   : > { %v4330_v0 = vadd.f32 %v7296_v45, %v3976_v32  ;;  %v3978_v43 = vpop.f32.mrb[9].mxu0 }
 0x3fb   : > { %v4331_v40 = vadd.f32 %v7300_v24, %v3978_v43  ;;  %v3980_v42 = vpop.f32.mrb[10].mxu0  ;;  %v4619_v15 = vadd.f32 %v4553_v41, %v4552_v35  ;;  %v6225_v35 = vld [vmem:[%s6699_s12 + $0x80] sm:$0xff] }
 0x3fc   : > { %v7361_v6 = vadd.f32 %v6217_v34, %v4330_v0  ;;  %v4332_v18 = vadd.f32 %v7296_v45, %v3980_v42  ;;  %v3982_v1 = vpop.f32.mrb[11].mxu0 }
 0x3fd   : > { %v7365_v16 = vadd.f32 %v6218_v21, %v4331_v40  ;;  %v4333_v10 = vadd.f32 %v7300_v24, %v3982_v1  ;;  %4617 = vadd.xlane.f32.xlu0 %v4616_v63  ;;  %4460 = vadd.xlane.f32.xlu1 %v4459_v60  ;;  %v6226_v63 = vld [vmem:[%s6699_s12 + $0x88] sm:$0xff] }
 0x3fe   : > { %v7369_v17 = vadd.f32 %v6219_v12, %v4332_v18  ;;  %v4554_v49 = vmul.f32 %v7361_v6, %v7361_v6  ;;  %v6227_v18 = vld [vmem:[%s6699_s12 + $0x90] sm:$0xff] }
 0x3ff   : > { %v7372_v14 = vadd.f32 %v6220_v11, %v4333_v10  ;;  %v4462_v48 = vadd.f32 %v7365_v16, %v7361_v6  ;;  %v4555_v44 = vmul.f32 %v7365_v16, %v7365_v16  ;;  %v6228_v10 = vld [vmem:[%s6699_s12 + $0x98] sm:$0xff] }
 0x400   : > { %v4556_v3 = vmul.f32 %v7369_v17, %v7369_v17 }
 0x401   : > { %4620 = vadd.xlane.f32.xlu1 %v4619_v15  ;;  %4463 = vadd.xlane.f32.xlu0 %v4462_v48  ;;  %v3986_v52 = vpop.f32.mrb[12].mxu0  ;;  %v4557_v2 = vmul.f32 %v7372_v14, %v7372_v14  ;;  %v4622_v56 = vadd.f32 %v4555_v44, %v4554_v49  ;;  %v4465_v28 = vadd.f32 %v7372_v14, %v7369_v17 }
 0x402   : > { %v4334_v8 = vadd.f32 %v7296_v45, %v3986_v52  ;;  %v3988_v13 = vpop.f32.mrb[13].mxu0 }
 0x403   : > { %v4335_v5 = vadd.f32 %v7300_v24, %v3988_v13  ;;  %v3990_v38 = vpop.f32.mrb[14].mxu0  ;;  %v4625_v19 = vadd.f32 %v4557_v2, %v4556_v3 }
 0x404   : > { %v7389_v61 = vadd.f32 %v6221_v39, %v4334_v8  ;;  %v4336_v36 = vadd.f32 %v7296_v45, %v3990_v38  ;;  %v3992_v23 = vpop.f32.mrb[15].mxu0 }
 0x405   : > { %v7393_v37 = vadd.f32 %v6222_v62, %v4335_v5  ;;  %v4337_v31 = vadd.f32 %v7300_v24, %v3992_v23  ;;  %4623 = vadd.xlane.f32.xlu0 %v4622_v56  ;;  %4466 = vadd.xlane.f32.xlu1 %v4465_v28  ;;  %v6229_v56 = vld [vmem:[%s6699_s12 + $0xa0] sm:$0xff]  ;;  %v6230_v23 = vld [vmem:[%s6699_s12 + $0xa8] sm:$0xff] }
 0x406   : > { %v7397_v54 = vadd.f32 %v6223_v55, %v4336_v36  ;;  %v4558_v26 = vmul.f32 %v7389_v61, %v7389_v61  ;;  %v6231_v55 = vld [vmem:[%s6699_s12 + $0xb0] sm:$0xff] }
 0x407   : > { %v7400_v47 = vadd.f32 %v6224_v20, %v4337_v31  ;;  %v4468_v29 = vadd.f32 %v7393_v37, %v7389_v61  ;;  %v4559_v50 = vmul.f32 %v7393_v37, %v7393_v37 }
 0x408   : > { %v4560_v25 = vmul.f32 %v7397_v54, %v7397_v54 }
 0x409   : > { %4626 = vadd.xlane.f32.xlu1 %v4625_v19  ;;  %4469 = vadd.xlane.f32.xlu0 %v4468_v29  ;;  %v3996_v58 = vpop.f32.mrb[16].mxu0  ;;  %v4561_v46 = vmul.f32 %v7400_v47, %v7400_v47  ;;  %v4628_v0 = vadd.f32 %v4559_v50, %v4558_v26  ;;  %v4471_v43 = vadd.f32 %v7400_v47, %v7397_v54  ;;  %v6232_v29 = vld [vmem:[%s6699_s12 + $0xb8] sm:$0xff] }
 0x40a   : > { %v4338_v30 = vadd.f32 %v7296_v45, %v3996_v58  ;;  %v3998_v33 = vpop.f32.mrb[17].mxu0 }
 0x40b   : > { %v4339_v57 = vadd.f32 %v7300_v24, %v3998_v33  ;;  %v4000_v32 = vpop.f32.mrb[18].mxu0  ;;  %v4631_v21 = vadd.f32 %v4561_v46, %v4560_v25 }
 0x40c   : > { %v7417_v41 = vadd.f32 %v6225_v35, %v4338_v30  ;;  %v4340_v40 = vadd.f32 %v7296_v45, %v4000_v32  ;;  %v4002_v42 = vpop.f32.mrb[19].mxu0 }
 0x40d   : > { %v7421_v60 = vadd.f32 %v6226_v63, %v4339_v57  ;;  %v4341_v34 = vadd.f32 %v7300_v24, %v4002_v42  ;;  %4629 = vadd.xlane.f32.xlu0 %v4628_v0  ;;  %4472 = vadd.xlane.f32.xlu1 %v4471_v43  ;;  %v6233_v42 = vld [vmem:[%s6699_s12 + $0xc0] sm:$0xff] }
 0x40e   : > { %v7425_v1 = vadd.f32 %v6227_v18, %v4340_v40  ;;  %v4562_v11 = vmul.f32 %v7417_v41, %v7417_v41 }
 0x40f   : > { %v7428_v12 = vadd.f32 %v6228_v10, %v4341_v34  ;;  %v4474_v15 = vadd.f32 %v7421_v60, %v7417_v41  ;;  %v4563_v48 = vmul.f32 %v7421_v60, %v7421_v60 }
 0x410   : > { %v4564_v8 = vmul.f32 %v7425_v1, %v7425_v1 }
 0x411   : > { %4632 = vadd.xlane.f32.xlu1 %v4631_v21  ;;  %4475 = vadd.xlane.f32.xlu0 %v4474_v15  ;;  %v4006_v49 = vpop.f32.mrb[20].mxu0  ;;  %v4565_v13 = vmul.f32 %v7428_v12, %v7428_v12  ;;  %v4634_v5 = vadd.f32 %v4563_v48, %v4562_v11  ;;  %v4477_v38 = vadd.f32 %v7428_v12, %v7425_v1  ;;  %v6234_v21 = vld [vmem:[%s6699_s12 + $0xc8] sm:$0xff]  ;;  %v6235_v11 = vld [vmem:[%s6699_s12 + $0xd0] sm:$0xff] }
 0x412   : > { %v4342_v44 = vadd.f32 %v7296_v45, %v4006_v49  ;;  %v4008_v52 = vpop.f32.mrb[21].mxu0 }
 0x413   : > { %v4343_v3 = vadd.f32 %v7300_v24, %v4008_v52  ;;  %v4010_v2 = vpop.f32.mrb[22].mxu0  ;;  %v4637_v20 = vadd.f32 %v4565_v13, %v4564_v8 }
 0x414   : > { %v7445_v28 = vadd.f32 %v6229_v56, %v4342_v44  ;;  %v4344_v39 = vadd.f32 %v7296_v45, %v4010_v2  ;;  %v4012_v36 = vpop.f32.mrb[23].mxu0  ;;  %v6236_v44 = vld [vmem:[%s6699_s12 + $0xd8] sm:$0xff] }
 0x415   : > { %v7449_v62 = vadd.f32 %v6230_v23, %v4343_v3  ;;  %v4345_v31 = vadd.f32 %v7300_v24, %v4012_v36  ;;  %4635 = vadd.xlane.f32.xlu0 %v4634_v5  ;;  %4478 = vadd.xlane.f32.xlu1 %v4477_v38 }
 0x416   : > { %v7453_v19 = vadd.f32 %v6231_v55, %v4344_v39  ;;  %v4566_v58 = vmul.f32 %v7445_v28, %v7445_v28 }
 0x417   : > { %v7456_v26 = vadd.f32 %v6232_v29, %v4345_v31  ;;  %v4480_v50 = vadd.f32 %v7449_v62, %v7445_v28  ;;  %v4567_v30 = vmul.f32 %v7449_v62, %v7449_v62 }
 0x418   : > { %v4568_v57 = vmul.f32 %v7453_v19, %v7453_v19 }
 0x419   : > { %4638 = vadd.xlane.f32.xlu1 %v4637_v20  ;;  %4481 = vadd.xlane.f32.xlu0 %v4480_v50  ;;  %v4016_v33 = vpop.f32.mrb[24].mxu0  ;;  %v4569_v32 = vmul.f32 %v7456_v26, %v7456_v26  ;;  %v4640_v35 = vadd.f32 %v4567_v30, %v4566_v58  ;;  %v4483_v40 = vadd.f32 %v7456_v26, %v7453_v19  ;;  %v6237_v20 = vld [vmem:[%s6699_s12 + $0xe0] sm:$0xff]  ;;  %v6238_v30 = vld [vmem:[%s6699_s12 + $0xe8] sm:$0xff] }
 0x41a   : > { %v4346_v25 = vadd.f32 %v7296_v45, %v4016_v33  ;;  %v4018_v46 = vpop.f32.mrb[25].mxu0 }
 0x41b   : > { %v4347_v0 = vadd.f32 %v7300_v24, %v4018_v46  ;;  %v4020_v43 = vpop.f32.mrb[26].mxu0  ;;  %v4643_v49 = vadd.f32 %v4569_v32, %v4568_v57  ;;  %v6239_v46 = vld [vmem:[%s6699_s12 + $0xf0] sm:$0xff] }
 0x41c   : > { %v7473_v63 = vadd.f32 %v6233_v42, %v4346_v25  ;;  %v4348_v34 = vadd.f32 %v7296_v45, %v4020_v43  ;;  %v4022_v18 = vpop.f32.mrb[27].mxu0 }
 0x41d   : > { %v7477_v10 = vadd.f32 %v6234_v21, %v4347_v0  ;;  %v4349_v15 = vadd.f32 %v7300_v24, %v4022_v18  ;;  %4641 = vadd.xlane.f32.xlu0 %v4640_v35  ;;  %4484 = vadd.xlane.f32.xlu1 %v4483_v40  ;;  %v6240_v0 = vld [vmem:[%s6699_s12 + $0xf8] sm:$0xff] }
 0x41e   : > { %v7481_v48 = vadd.f32 %v6235_v11, %v4348_v34  ;;  %v4570_v13 = vmul.f32 %v7473_v63, %v7473_v63 }
 0x41f   : > { %v7484_v52 = vadd.f32 %v6236_v44, %v4349_v15  ;;  %v4486_v8 = vadd.f32 %v7477_v10, %v7473_v63  ;;  %v4571_v3 = vmul.f32 %v7477_v10, %v7477_v10 }
 0x420   : > { %v4572_v56 = vmul.f32 %v7481_v48, %v7481_v48 }
 0x421   : > { %4644 = vadd.xlane.f32.xlu1 %v4643_v49  ;;  %4487 = vadd.xlane.f32.xlu0 %v4486_v8  ;;  %v4026_v2 = vpop.f32.mrb[28].mxu0  ;;  %v4573_v39 = vmul.f32 %v7484_v52, %v7484_v52  ;;  %v4646_v31 = vadd.f32 %v4571_v3, %v4570_v13  ;;  %v4489_v55 = vadd.f32 %v7484_v52, %v7481_v48  ;;  %v6241_v3 = vld [vmem:[%s6699_s12 + $0x100] sm:$0xff] }
 0x422   : > { %v4350_v5 = vadd.f32 %v7296_v45, %v4026_v2  ;;  %v4028_v38 = vpop.f32.mrb[29].mxu0 }
 0x423   : > { %v4351_v36 = vadd.f32 %v7300_v24, %v4028_v38  ;;  %v4030_v23 = vpop.f32.mrb[30].mxu0  ;;  %v4649_v32 = vadd.f32 %v4573_v39, %v4572_v56  ;;  %v6242_v56 = vld [vmem:[%s6699_s12 + $0x108] sm:$0xff] }
 0x424   : > { %v7501_v29 = vadd.f32 %v6237_v20, %v4350_v5  ;;  %v4352_v50 = vadd.f32 %v7296_v45, %v4030_v23  ;;  %v4032_v58 = vpop.f32.mrb[31].mxu0  ;;  %v6243_v23 = vld [vmem:[%s6699_s12 + $0x110] sm:$0xff]  ;;  %v6244_v20 = vld [vmem:[%s6699_s12 + $0x118] sm:$0xff] }
 0x425   : > { %v7505_v33 = vadd.f32 %v6238_v30, %v4351_v36  ;;  %v4353_v25 = vadd.f32 %v7300_v24, %v4032_v58  ;;  %4647 = vadd.xlane.f32.xlu0 %v4646_v31  ;;  %4490 = vadd.xlane.f32.xlu1 %v4489_v55 }
 0x426   : > { %v7509_v57 = vadd.f32 %v6239_v46, %v4352_v50  ;;  %v4574_v40 = vmul.f32 %v7501_v29, %v7501_v29 }
 0x427   : > { %v7512_v43 = vadd.f32 %v6240_v0, %v4353_v25  ;;  %v4492_v35 = vadd.f32 %v7505_v33, %v7501_v29  ;;  %v4575_v42 = vmul.f32 %v7505_v33, %v7505_v33 }
 0x428   : > { %v4576_v15 = vmul.f32 %v7509_v57, %v7509_v57 }
 0x429   : > { %4650 = vadd.xlane.f32.xlu1 %v4649_v32  ;;  %4493 = vadd.xlane.f32.xlu0 %v4492_v35  ;;  %v4036_v34 = vpop.f32.mrb[32].mxu0  ;;  %v4577_v11 = vmul.f32 %v7512_v43, %v7512_v43  ;;  %v4652_v8 = vadd.f32 %v4575_v42, %v4574_v40  ;;  %v4495_v13 = vadd.f32 %v7512_v43, %v7509_v57 }
 0x42a   : > { %v4354_v18 = vadd.f32 %v7296_v45, %v4036_v34  ;;  %v4038_v21 = vpop.f32.mrb[33].mxu0 }
 0x42b   : > { %v4355_v49 = vadd.f32 %v7300_v24, %v4038_v21  ;;  %v4040_v44 = vpop.f32.mrb[34].mxu0  ;;  %v4655_v55 = vadd.f32 %v4577_v11, %v4576_v15  ;;  %v6245_v15 = vld [vmem:[%s6699_s12 + $0x120] sm:$0xff] }
 0x42c   : > { %v7529_v2 = vadd.f32 %v6241_v3, %v4354_v18  ;;  %v4356_v5 = vadd.f32 %v7296_v45, %v4040_v44  ;;  %v4042_v38 = vpop.f32.mrb[35].mxu0 }
 0x42d   : > { %v7533_v39 = vadd.f32 %v6242_v56, %v4355_v49  ;;  %v4357_v36 = vadd.f32 %v7300_v24, %v4042_v38  ;;  %4653 = vadd.xlane.f32.xlu0 %v4652_v8  ;;  %4496 = vadd.xlane.f32.xlu1 %v4495_v13  ;;  %v6246_v8 = vld [vmem:[%s6699_s12 + $0x128] sm:$0xff] }
 0x42e   : > { %v7537_v31 = vadd.f32 %v6243_v23, %v4356_v5  ;;  %v4578_v30 = vmul.f32 %v7529_v2, %v7529_v2  ;;  %v6247_v5 = vld [vmem:[%s6699_s12 + $0x130] sm:$0xff] }
 0x42f   : > { %v7540_v50 = vadd.f32 %v6244_v20, %v4357_v36  ;;  %v4498_v58 = vadd.f32 %v7533_v39, %v7529_v2  ;;  %v4579_v25 = vmul.f32 %v7533_v39, %v7533_v39  ;;  %v6248_v36 = vld [vmem:[%s6699_s12 + $0x138] sm:$0xff] }
 0x430   : > { %v4580_v35 = vmul.f32 %v7537_v31, %v7537_v31 }
 0x431   : > { %4656 = vadd.xlane.f32.xlu1 %v4655_v55  ;;  %4499 = vadd.xlane.f32.xlu0 %v4498_v58  ;;  %v4046_v46 = vpop.f32.mrb[36].mxu0  ;;  %v4581_v40 = vmul.f32 %v7540_v50, %v7540_v50  ;;  %v4658_v18 = vadd.f32 %v4579_v25, %v4578_v30  ;;  %v4501_v21 = vadd.f32 %v7540_v50, %v7537_v31 }
 0x432   : > { %v4358_v32 = vadd.f32 %v7296_v45, %v4046_v46  ;;  %v4048_v0 = vpop.f32.mrb[37].mxu0 }
 0x433   : > { %v4359_v42 = vadd.f32 %v7300_v24, %v4048_v0  ;;  %v4050_v34 = vpop.f32.mrb[38].mxu0  ;;  %v4661_v56 = vadd.f32 %v4581_v40, %v4580_v35 }
 0x434   : > { %v7557_v11 = vadd.f32 %v6245_v15, %v4358_v32  ;;  %v4360_v49 = vadd.f32 %v7296_v45, %v4050_v34  ;;  %v4052_v44 = vpop.f32.mrb[39].mxu0 }
 0x435   : > { %v7561_v13 = vadd.f32 %v6246_v8, %v4359_v42  ;;  %v4361_v3 = vadd.f32 %v7300_v24, %v4052_v44  ;;  %4659 = vadd.xlane.f32.xlu0 %v4658_v18  ;;  %4502 = vadd.xlane.f32.xlu1 %v4501_v21  ;;  %v6249_v18 = vld [vmem:[%s6699_s12 + $0x140] sm:$0xff]  ;;  %v6250_v44 = vld [vmem:[%s6699_s12 + $0x148] sm:$0xff] }
 0x436   : > { %v7565_v38 = vadd.f32 %v6247_v5, %v4360_v49  ;;  %v4582_v20 = vmul.f32 %v7557_v11, %v7557_v11  ;;  %v6251_v5 = vld [vmem:[%s6699_s12 + $0x150] sm:$0xff] }
 0x437   : > { %v7568_v23 = vadd.f32 %v6248_v36, %v4361_v3  ;;  %v4504_v55 = vadd.f32 %v7561_v13, %v7557_v11  ;;  %v4583_v58 = vmul.f32 %v7561_v13, %v7561_v13 }
 0x438   : > { %8273 = vst [vmem:[#allocation15_spill] sm:$0xff] %v7565_v38  ;;  %v4584_v32 = vmul.f32 %v7565_v38, %v7565_v38 }
 0x439   : > { %8274 = vst [vmem:[#allocation16_spill] sm:$0xff] %v7568_v23  ;;  %4662 = vadd.xlane.f32.xlu1 %v4661_v56  ;;  %4505 = vadd.xlane.f32.xlu0 %v4504_v55  ;;  %v4056_v30 = vpop.f32.mrb[40].mxu0  ;;  %v4585_v0 = vmul.f32 %v7568_v23, %v7568_v23  ;;  %v4664_v42 = vadd.f32 %v4583_v58, %v4582_v20  ;;  %v6252_v55 = vld [vmem:[%s6699_s12 + $0x158] sm:$0xff] }
 0x43a   : > { %v4362_v25 = vadd.f32 %v7296_v45, %v4056_v30  ;;  %v4058_v46 = vpop.f32.mrb[41].mxu0  ;;  %v4507_v34 = vadd.f32 %v7568_v23, %v7565_v38 }
 0x43b   : > { %v4363_v35 = vadd.f32 %v7300_v24, %v4058_v46  ;;  %v4060_v40 = vpop.f32.mrb[42].mxu0  ;;  %v4667_v36 = vadd.f32 %v4585_v0, %v4584_v32 }
 0x43c   : > { %v7585_v21 = vadd.f32 %v6249_v18, %v4362_v25  ;;  %v4364_v15 = vadd.f32 %v7296_v45, %v4060_v40  ;;  %v4062_v49 = vpop.f32.mrb[43].mxu0 }
 0x43d   : > { %v7589_v8 = vadd.f32 %v6250_v44, %v4363_v35  ;;  %v4365_v3 = vadd.f32 %v7300_v24, %v4062_v49  ;;  %4665 = vadd.xlane.f32.xlu0 %v4664_v42  ;;  %4508 = vadd.xlane.f32.xlu1 %v4507_v34  ;;  %v6253_v49 = vld [vmem:[%s6699_s12 + $0x160] sm:$0xff] }
 0x43e   : > { %8275 = vst [vmem:[#allocation17_spill] sm:$0xff] %v7585_v21  ;;  %v7593_v56 = vadd.f32 %v6251_v5, %v4364_v15  ;;  %v4586_v30 = vmul.f32 %v7585_v21, %v7585_v21 }
 0x43f   : > { %8276 = vst [vmem:[#allocation18_spill] sm:$0xff] %v7589_v8  ;;  %v7596_v20 = vadd.f32 %v6252_v55, %v4365_v3  ;;  %v4510_v58 = vadd.f32 %v7589_v8, %v7585_v21  ;;  %v4587_v25 = vmul.f32 %v7589_v8, %v7589_v8 }
 0x440   : > { %8277 = vst [vmem:[#allocation19_spill] sm:$0xff] %v7593_v56  ;;  %v4588_v0 = vmul.f32 %v7593_v56, %v7593_v56 }
 0x441   : > { %8278 = vst [vmem:[#allocation20_spill] sm:$0xff] %v7596_v20  ;;  %4668 = vadd.xlane.f32.xlu1 %v4667_v36  ;;  %4511 = vadd.xlane.f32.xlu0 %v4510_v58  ;;  %v4066_v46 = vpop.f32.mrb[44].mxu0  ;;  %v4589_v40 = vmul.f32 %v7596_v20, %v7596_v20  ;;  %v4670_v18 = vadd.f32 %v4587_v25, %v4586_v30  ;;  %v6254_v36 = vld [vmem:[%s6699_s12 + $0x168] sm:$0xff]  ;;  %v6256_v25 = vld [vmem:[%s6699_s12 + $0x178] sm:$0xff] }
 0x442   : > { %v4366_v35 = vadd.f32 %v7296_v45, %v4066_v46  ;;  %v4068_v32 = vpop.f32.mrb[45].mxu0  ;;  %v4513_v15 = vadd.f32 %v7596_v20, %v7593_v56  ;;  %v6255_v46 = vld [vmem:[%s6699_s12 + $0x170] sm:$0xff] }
 0x443   : > { %v4367_v42 = vadd.f32 %v7300_v24, %v4068_v32  ;;  %v4070_v34 = vpop.f32.mrb[46].mxu0  ;;  %v4673_v30 = vadd.f32 %v4589_v40, %v4588_v0 }
 0x444   : > { %v7613_v44 = vadd.f32 %v6253_v49, %v4366_v35  ;;  %v4368_v3 = vadd.f32 %v7296_v45, %v4070_v34  ;;  %v4072_v5 = vpop.f32.mrb[47].mxu0 }
 0x445   : > { %v7617_v55 = vadd.f32 %v6254_v36, %v4367_v42  ;;  %v4369_v58 = vadd.f32 %v7300_v24, %v4072_v5  ;;  %4671 = vadd.xlane.f32.xlu0 %v4670_v18  ;;  %4514 = vadd.xlane.f32.xlu1 %v4513_v15 }
 0x446   : > { %8279 = vst [vmem:[#allocation21_spill] sm:$0xff] %v7613_v44  ;;  %v7621_v32 = vadd.f32 %v6255_v46, %v4368_v3  ;;  %v4590_v34 = vmul.f32 %v7613_v44, %v7613_v44  ;;  %v6257_v46 = vld [vmem:[%s6699_s12 + $0x180] sm:$0xff] }
 0x447   : > { %8280 = vst [vmem:[#allocation22_spill] sm:$0xff] %v7617_v55  ;;  %v7624_v20 = vadd.f32 %v6256_v25, %v4369_v58  ;;  %v4516_v35 = vadd.f32 %v7617_v55, %v7613_v44  ;;  %v4591_v42 = vmul.f32 %v7617_v55, %v7617_v55 }
 0x448   : > { %8281 = vst [vmem:[#allocation23_spill] sm:$0xff] %v7621_v32  ;;  %v4592_v40 = vmul.f32 %v7621_v32, %v7621_v32 }
 0x449   : > { %8282 = vst [vmem:[#allocation24_spill] sm:$0xff] %v7624_v20  ;;  %4674 = vadd.xlane.f32.xlu1 %v4673_v30  ;;  %4517 = vadd.xlane.f32.xlu0 %v4516_v35  ;;  %v4076_v18 = vpop.f32.mrb[48].mxu0  ;;  %v4593_v49 = vmul.f32 %v7624_v20, %v7624_v20  ;;  %v4676_v36 = vadd.f32 %v4591_v42, %v4590_v34  ;;  %v6260_v42 = vld [vmem:[%s6699_s12 + $0x198] sm:$0xff] }
 0x44a   : > { %v4370_v15 = vadd.f32 %v7296_v45, %v4076_v18  ;;  %v4078_v0 = vpop.f32.mrb[49].mxu0  ;;  %v4519_v58 = vadd.f32 %v7624_v20, %v7621_v32  ;;  %v6258_v18 = vld [vmem:[%s6699_s12 + $0x188] sm:$0xff] }
 0x44b   : > { %v4371_v3 = vadd.f32 %v7300_v24, %v4078_v0  ;;  %v4080_v5 = vpop.f32.mrb[50].mxu0  ;;  %v6259_v0 = vld [vmem:[%s6699_s12 + $0x190] sm:$0xff]  ;;  %v4679_v34 = vadd.f32 %v4593_v49, %v4592_v40 }
 0x44c   : > { %v7641_v30 = vadd.f32 %v6257_v46, %v4370_v15  ;;  %v4372_v25 = vadd.f32 %v7296_v45, %v4080_v5  ;;  %v4082_v35 = vpop.f32.mrb[51].mxu0 }
 0x44d   : > { %v7645_v55 = vadd.f32 %v6258_v18, %v4371_v3  ;;  %v4373_v44 = vadd.f32 %v7300_v24, %v4082_v35  ;;  %4677 = vadd.xlane.f32.xlu0 %v4676_v36  ;;  %4520 = vadd.xlane.f32.xlu1 %v4519_v58 }
 0x44e   : > { %8283 = vst [vmem:[#allocation25_spill] sm:$0xff] %v7641_v30  ;;  %v7649_v56 = vadd.f32 %v6259_v0, %v4372_v25  ;;  %v4594_v5 = vmul.f32 %v7641_v30, %v7641_v30  ;;  %v6261_v0 = vld [vmem:[%s6699_s12 + $0x1a0] sm:$0xff] }
 0x44f   : > { %8284 = vst [vmem:[#allocation26_spill] sm:$0xff] %v7645_v55  ;;  %v7652_v20 = vadd.f32 %v6260_v42, %v4373_v44  ;;  %v4522_v15 = vadd.f32 %v7645_v55, %v7641_v30  ;;  %v4595_v3 = vmul.f32 %v7645_v55, %v7645_v55 }
 0x450   : > { %8285 = vst [vmem:[#allocation27_spill] sm:$0xff] %v7649_v56  ;;  %v4596_v44 = vmul.f32 %v7649_v56, %v7649_v56 }
 0x451   : > { %8286 = vst [vmem:[#allocation28_spill] sm:$0xff] %v7652_v20  ;;  %4680 = vadd.xlane.f32.xlu1 %v4679_v34  ;;  %4523 = vadd.xlane.f32.xlu0 %v4522_v15  ;;  %v4086_v36 = vpop.f32.mrb[52].mxu0  ;;  %v4597_v49 = vmul.f32 %v7652_v20, %v7652_v20  ;;  %v4682_v35 = vadd.f32 %v4595_v3, %v4594_v5  ;;  %v6264_v3 = vld [vmem:[%s6699_s12 + $0x1b8] sm:$0xff] }
 0x452   : > { %v4374_v58 = vadd.f32 %v7296_v45, %v4086_v36  ;;  %v4088_v40 = vpop.f32.mrb[53].mxu0  ;;  %v4525_v18 = vadd.f32 %v7652_v20, %v7649_v56  ;;  %v6262_v36 = vld [vmem:[%s6699_s12 + $0x1a8] sm:$0xff] }
 0x453   : > { %v4375_v46 = vadd.f32 %v7300_v24, %v4088_v40  ;;  %v4090_v25 = vpop.f32.mrb[54].mxu0  ;;  %v6263_v40 = vld [vmem:[%s6699_s12 + $0x1b0] sm:$0xff]  ;;  %v4685_v5 = vadd.f32 %v4597_v49, %v4596_v44 }
 0x454   : > { %v7669_v34 = vadd.f32 %v6261_v0, %v4374_v58  ;;  %v4376_v42 = vadd.f32 %v7296_v45, %v4090_v25  ;;  %v4092_v15 = vpop.f32.mrb[55].mxu0 }
 0x455   : > { %v7673_v55 = vadd.f32 %v6262_v36, %v4375_v46  ;;  %v4377_v30 = vadd.f32 %v7300_v24, %v4092_v15  ;;  %4683 = vadd.xlane.f32.xlu0 %v4682_v35  ;;  %4526 = vadd.xlane.f32.xlu1 %v4525_v18 }
 0x456   : > { %8287 = vst [vmem:[#allocation29_spill] sm:$0xff] %v7669_v34  ;;  %v7677_v32 = vadd.f32 %v6263_v40, %v4376_v42  ;;  %v4598_v25 = vmul.f32 %v7669_v34, %v7669_v34  ;;  %v6265_v40 = vld [vmem:[%s6699_s12 + $0x1c0] sm:$0xff] }
 0x457   : > { %8288 = vst [vmem:[#allocation30_spill] sm:$0xff] %v7673_v55  ;;  %v7680_v20 = vadd.f32 %v6264_v3, %v4377_v30  ;;  %v4528_v58 = vadd.f32 %v7673_v55, %v7669_v34  ;;  %v4599_v46 = vmul.f32 %v7673_v55, %v7673_v55 }
 0x458   : > { %8289 = vst [vmem:[#allocation31_spill] sm:$0xff] %v7677_v32  ;;  %v4600_v30 = vmul.f32 %v7677_v32, %v7677_v32 }
 0x459   : > { %8290 = vst [vmem:[#allocation32_spill] sm:$0xff] %v7680_v20  ;;  %4686 = vadd.xlane.f32.xlu1 %v4685_v5  ;;  %4529 = vadd.xlane.f32.xlu0 %v4528_v58  ;;  %v4096_v35 = vpop.f32.mrb[56].mxu0  ;;  %v4601_v49 = vmul.f32 %v7680_v20, %v7680_v20  ;;  %v4688_v15 = vadd.f32 %v4599_v46, %v4598_v25  ;;  %v6268_v46 = vld [vmem:[%s6699_s12 + $0x1d8] sm:$0xff] }
 0x45a   : > { %v4378_v18 = vadd.f32 %v7296_v45, %v4096_v35  ;;  %v4098_v44 = vpop.f32.mrb[57].mxu0  ;;  %v4531_v36 = vadd.f32 %v7680_v20, %v7677_v32  ;;  %v6266_v35 = vld [vmem:[%s6699_s12 + $0x1c8] sm:$0xff] }
 0x45b   : > { %v4379_v0 = vadd.f32 %v7300_v24, %v4098_v44  ;;  %v4100_v42 = vpop.f32.mrb[58].mxu0  ;;  %v6267_v44 = vld [vmem:[%s6699_s12 + $0x1d0] sm:$0xff]  ;;  %v4691_v25 = vadd.f32 %v4601_v49, %v4600_v30 }
 0x45c   : > { %v7697_v5 = vadd.f32 %v6265_v40, %v4378_v18  ;;  %v4380_v3 = vadd.f32 %v7296_v45, %v4100_v42  ;;  %v4102_v58 = vpop.f32.mrb[59].mxu0 }
 0x45d   : > { %v7701_v55 = vadd.f32 %v6266_v35, %v4379_v0  ;;  %v4381_v34 = vadd.f32 %v7300_v24, %v4102_v58  ;;  %4689 = vadd.xlane.f32.xlu0 %v4688_v15  ;;  %4532 = vadd.xlane.f32.xlu1 %v4531_v36 }
 0x45e   : > { %8291 = vst [vmem:[#allocation33_spill] sm:$0xff] %v7697_v5  ;;  %v7705_v56 = vadd.f32 %v6267_v44, %v4380_v3  ;;  %v4602_v42 = vmul.f32 %v7697_v5, %v7697_v5  ;;  %v6269_v44 = vld [vmem:[%s6699_s12 + $0x1e0] sm:$0xff] }
 0x45f   : > { %8292 = vst [vmem:[#allocation34_spill] sm:$0xff] %v7701_v55  ;;  %v7708_v20 = vadd.f32 %v6268_v46, %v4381_v34  ;;  %v4534_v18 = vadd.f32 %v7701_v55, %v7697_v5  ;;  %v4603_v0 = vmul.f32 %v7701_v55, %v7701_v55 }
 0x460   : > { %8293 = vst [vmem:[#allocation35_spill] sm:$0xff] %v7705_v56  ;;  %v4604_v34 = vmul.f32 %v7705_v56, %v7705_v56 }
 0x461   : > { %8294 = vst [vmem:[#allocation36_spill] sm:$0xff] %v7708_v20  ;;  %4692 = vadd.xlane.f32.xlu1 %v4691_v25  ;;  %4535 = vadd.xlane.f32.xlu0 %v4534_v18  ;;  %v4106_v15 = vpop.f32.mrb[60].mxu0  ;;  %v4605_v49 = vmul.f32 %v7708_v20, %v7708_v20  ;;  %v4694_v58 = vadd.f32 %v4603_v0, %v4602_v42  ;;  %v6272_v0 = vld [vmem:[%s6699_s12 + $0x1f8] sm:$0xff] }
 0x462   : > { %v4382_v36 = vadd.f32 %v7296_v45, %v4106_v15  ;;  %v4108_v30 = vpop.f32.mrb[61].mxu0  ;;  %v4537_v35 = vadd.f32 %v7708_v20, %v7705_v56  ;;  %v6270_v15 = vld [vmem:[%s6699_s12 + $0x1e8] sm:$0xff] }
 0x463   : > { %v4383_v40 = vadd.f32 %v7300_v24, %v4108_v30  ;;  %v4110_v3 = vpop.f32.mrb[62].mxu0  ;;  %v6271_v30 = vld [vmem:[%s6699_s12 + $0x1f0] sm:$0xff]  ;;  %v4697_v42 = vadd.f32 %v4605_v49, %v4604_v34  ;;  %s8170_s12 = scalar_lea.hbm %s8232_s7, %s5668_s23 }
 0x464   : > { %v7725_v25 = vadd.f32 %v6269_v44, %v4382_v36  ;;  %v4384_v46 = vadd.f32 %v7296_v45, %v4110_v3  ;;  %v4112_v18 = vpop.f32.mrb[63].mxu0 }
 0x465   : > { %v7729_v55 = vadd.f32 %v6270_v15, %v4383_v40  ;;  %v4385_v5 = vadd.f32 %v7300_v24, %v4112_v18  ;;  %4695 = vadd.xlane.f32.xlu0 %v4694_v58  ;;  %4538 = vadd.xlane.f32.xlu1 %v4537_v35 }
 0x466   : > { %8295 = vst [vmem:[#allocation37_spill] sm:$0xff] %v7725_v25  ;;  %v7733_v32 = vadd.f32 %v6271_v30, %v4384_v46  ;;  %v4606_v45 = vmul.f32 %v7725_v25, %v7725_v25 }
 0x467   : > { %8296 = vst [vmem:[#allocation38_spill] sm:$0xff] %v7729_v55  ;;  %v7736_v8 = vadd.f32 %v6272_v0, %v4385_v5  ;;  %v4540_v36 = vadd.f32 %v7729_v55, %v7725_v25  ;;  %v4607_v40 = vmul.f32 %v7729_v55, %v7729_v55 }
 0x468   : > { %8297 = vst [vmem:[#allocation39_spill] sm:$0xff] %v7733_v32  ;;  %v4608_v34 = vmul.f32 %v7733_v32, %v7733_v32 }
 0x469   : > { %8298 = vst [vmem:[#allocation40_spill] sm:$0xff] %v7736_v8  ;;  %4698 = vadd.xlane.f32.xlu1 %v4697_v42  ;;  %4541 = vadd.xlane.f32.xlu0 %v4540_v36  ;;  %v4700_v24 = vadd.f32 %v4607_v40, %v4606_v45  ;;  %v4543_v3 = vadd.f32 %v7736_v8, %v7733_v32 }
 0x46a   : > { %v4609_v5 = vmul.f32 %v7736_v8, %v7736_v8 }
 0x46c   : > { %v4703_v49 = vadd.f32 %v4609_v5, %v4608_v34 }
 0x46d   : > { %4701 = vadd.xlane.f32.xlu0 %v4700_v24  ;;  %4544 = vadd.xlane.f32.xlu1 %v4543_v3 }
 0x471   : > { %4704 = vadd.xlane.f32.xlu1 %v4703_v49 }
 0x47e   : > { %v4452_v58 = vpop.xlane.xlu0 %4451 }
 0x47f   : > { %v7750_v35 = vmul.f32 0.00390625, %v4452_v58 }
 0x481   : > { %v4739_v15 = vmul.f32 %v7750_v35, %v4452_v58 }
 0x482   : > { %v4615_v44 = vpop.xlane.xlu1 %4614  ;;  %v4455_v46 = vpop.xlane.xlu0 %4454 }
 0x483   : > { %v4708_v18 = vmul.f32 0.00390625, %v4455_v46 }
 0x485   : > { %v4740_v30 = vmul.f32 %v4708_v18, %v4455_v46 }
 0x486   : > { %v4612_v42 = vpop.xlane.xlu0 %4611  ;;  %v4458_v0 = vpop.xlane.xlu1 %4457 }
 0x487   : > { %v4772_v36 = vsub.f32 %v4615_v44, %v4740_v30  ;;  %v4771_v45 = vsub.f32 %v4612_v42, %v4739_v15  ;;  %v7753_v40 = vmul.f32 0.00390625, %v4458_v0 }
 0x489   : > { %v4804_v8 = vmax.f32 %v4772_v36, 0.0  ;;  %v4803_v24 = vmax.f32 %v4771_v45, 0.0  ;;  %v4741_v3 = vmul.f32 %v7753_v40, %v4458_v0  ;;  %v4873_v21 = vsub.f32 %v7337_v22, %v7753_v40 }
 0x48a   : > { %v4618_v34 = vpop.xlane.xlu0 %4617  ;;  %v4461_v5 = vpop.xlane.xlu1 %4460 }
 0x48b   : > { %v4837_v49 = vmul.f32 0.003921569, %v4804_v8  ;;  %v4836_v32 = vmul.f32 0.003921569, %v4803_v24  ;;  %v4773_v55 = vsub.f32 %v4618_v34, %v4741_v3  ;;  %v7756_v25 = vmul.f32 0.00390625, %v4461_v5 }
 0x48d   : > { %v4933_v20 = vadd.f32 1e-08, %v4837_v49  ;;  %v4932_v58 = vadd.f32 1e-08, %v4836_v32  ;;  %v4805_v46 = vmax.f32 %v4773_v55, 0.0  ;;  %v4742_v56 = vmul.f32 %v7756_v25, %v4461_v5 }
 0x48e   : > { %v4621_v44 = vpop.xlane.xlu1 %4620  ;;  %v4464_v15 = vpop.xlane.xlu0 %4463  ;;  %v4874_v22 = vsub.f32 %v7341_v51, %v7756_v25 }
 0x48f   : > { %6144 = vrsqrt.f32 %v4933_v20  ;;  %v4838_v30 = vmul.f32 0.003921569, %v4805_v46  ;;  %v4774_v42 = vsub.f32 %v4621_v44, %v4742_v56  ;;  %v7759_v36 = vmul.f32 0.00390625, %v4464_v15 }
 0x490   : > { %6146 = vrsqrt.f32 %v4932_v58  ;;  %v7765_v56 = vstv %s5060_s21 }
 0x491   : > { %v4934_v8 = vadd.f32 1e-08, %v4838_v30  ;;  %v4806_v0 = vmax.f32 %v4774_v42, 0.0  ;;  %v4743_v45 = vmul.f32 %v7759_v36, %v4464_v15  ;;  %v4868_v15 = vsub.f32 %v7305_v53, %v7750_v35 }
 0x492   : > { %v4624_v24 = vpop.xlane.xlu0 %4623  ;;  %v4467_v3 = vpop.xlane.xlu1 %4466  ;;  %v4872_v53 = vsub.f32 %v7333_v27, %v7753_v40 }
 0x493   : > { %6148 = vrsqrt.f32 %v4934_v8  ;;  %v4839_v55 = vmul.f32 0.003921569, %v4806_v0  ;;  %v4775_v32 = vsub.f32 %v4624_v24, %v4743_v45  ;;  %v7762_v34 = vmul.f32 0.00390625, %v4467_v3 }
 0x494   : > { %v7771_v8 = vstv %s5126_s18  ;;  %v4870_v0 = vsub.f32 %v7313_v7, %v4708_v18  ;;  %v4871_v45 = vsub.f32 %v7316_v4, %v4708_v18 }
 0x495   : > { %v4935_v5 = vadd.f32 1e-08, %v4839_v55  ;;  %v4807_v49 = vmax.f32 %v4775_v32, 0.0  ;;  %v4744_v20 = vmul.f32 %v7762_v34, %v4467_v3  ;;  %v4869_v3 = vsub.f32 %v7309_v9, %v7750_v35 }
 0x496   : > { %v4627_v46 = vpop.xlane.xlu1 %4626  ;;  %v4470_v44 = vpop.xlane.xlu0 %4469 }
 0x497   : > { %6150 = vrsqrt.f32 %v4935_v5  ;;  %v4840_v58 = vmul.f32 0.003921569, %v4807_v49  ;;  %v4776_v30 = vsub.f32 %v4627_v46, %v4744_v20  ;;  %v7767_v42 = vmul.f32 0.00390625, %v4470_v44 }
 0x499   : > { %v6145_v24 = vpop.eup %6144  ;;  %v4936_v55 = vadd.f32 1e-08, %v4840_v58  ;;  %v4808_v32 = vmax.f32 %v4776_v30, 0.0  ;;  %v4745_v5 = vmul.f32 %v7767_v42, %v4470_v44 }
 0x49a   : > { %v6147_v49 = vpop.eup %6146  ;;  %v4998_v20 = vmul.f32 %v6145_v24, %v4870_v0  ;;  %v4999_v46 = vmul.f32 %v6145_v24, %v4871_v45  ;;  %v4630_v7 = vpop.xlane.xlu0 %4629 }
 0x49b   : > { %v4473_v23 = vpop.xlane.xlu1 %4472  ;;  %v4996_v4 = vmul.f32 %v6147_v49, %v4868_v15  ;;  %v4997_v18 = vmul.f32 %v6147_v49, %v4869_v3  ;;  %6152 = vrsqrt.f32 %v4936_v55  ;;  %v4841_v38 = vmul.f32 0.003921569, %v4808_v32 }
 0x49c   : > { %v5064_v9 = vmul.f32 %v7765_v56, %v4998_v20  ;;  %v5065_v35 = vmul.f32 %v7765_v56, %v4999_v46  ;;  %v4777_v44 = vsub.f32 %v4630_v7, %v4745_v5  ;;  %v7784_v58 = vmul.f32 0.00390625, %v4473_v23 }
 0x49d   : > { %v6149_v30 = vpop.eup %6148  ;;  %v5062_v27 = vmul.f32 %v7765_v56, %v4996_v4  ;;  %v5063_v0 = vmul.f32 %v7765_v56, %v4997_v18  ;;  %v4937_v40 = vadd.f32 1e-08, %v4841_v38 }
 0x49e   : > { %v5130_v15 = vadd.f32 %v7771_v8, %v5064_v9  ;;  %v5131_v45 = vadd.f32 %v7771_v8, %v5065_v35  ;;  %v5000_v24 = vmul.f32 %v6149_v30, %v4872_v53  ;;  %v5001_v3 = vmul.f32 %v6149_v30, %v4873_v21  ;;  %v4476_v32 = vpop.xlane.xlu0 %4475 }
 0x49f   : > { %v4633_v55 = vpop.xlane.xlu1 %4632  ;;  %v5128_v5 = vadd.f32 %v7771_v8, %v5062_v27  ;;  %v5129_v49 = vadd.f32 %v7771_v8, %v5063_v0  ;;  %6154 = vrsqrt.f32 %v4937_v40  ;;  %v4809_v20 = vmax.f32 %v4777_v44, 0.0 }
 0x4a0   : > { %5194 = vst [vmem:[%s7796_s20 + $0x10] sm:$0xff] %v5130_v15  ;;  %5195 = vst [vmem:[%s7796_s20 + $0x18] sm:$0xff] %v5131_v45  ;;  %v5066_v51 = vmul.f32 %v7765_v56, %v5000_v24  ;;  %v5067_v38 = vmul.f32 %v7765_v56, %v5001_v3  ;;  %v4875_v21 = vsub.f32 %v7344_v59, %v7756_v25  ;;  %v7807_v4 = vmul.f32 0.00390625, %v4476_v32 }
 0x4a1   : > { %v4746_v46 = vmul.f32 %v7784_v58, %v4473_v23  ;;  %v6151_v53 = vpop.eup %6150  ;;  %5192 = vst [vmem:[%s7796_s20] sm:$0xff] %v5128_v5  ;;  %5193 = vst [vmem:[%s7796_s20 + $0x8] sm:$0xff] %v5129_v49  ;;  %v4842_v7 = vmul.f32 0.003921569, %v4809_v20  ;;  %v4876_v59 = vsub.f32 %v7361_v6, %v7759_v36  ;;  %v4877_v45 = vsub.f32 %v7365_v16, %v7759_v36 }
 0x4a2   : > { %v5132_v18 = vadd.f32 %v7771_v8, %v5066_v51  ;;  %v5133_v9 = vadd.f32 %v7771_v8, %v5067_v38  ;;  %v5002_v35 = vmul.f32 %v6151_v53, %v4874_v22  ;;  %v5003_v44 = vmul.f32 %v6151_v53, %v4875_v21  ;;  %v4636_v30 = vpop.xlane.xlu0 %4635 }
 0x4a3   : > { %v4479_v27 = vpop.xlane.xlu1 %4478  ;;  %v4938_v23 = vadd.f32 1e-08, %v4842_v7  ;;  %v4778_v25 = vsub.f32 %v4633_v55, %v4746_v46  ;;  %v4747_v0 = vmul.f32 %v7807_v4, %v4476_v32  ;;  %v4878_v38 = vsub.f32 %v7369_v17, %v7762_v34 }
 0x4a4   : > { %5196 = vst [vmem:[%s7796_s20 + $0x20] sm:$0xff] %v5132_v18  ;;  %5197 = vst [vmem:[%s7796_s20 + $0x28] sm:$0xff] %v5133_v9  ;;  %v5068_v40 = vmul.f32 %v7765_v56, %v5002_v35  ;;  %v5069_v15 = vmul.f32 %v7765_v56, %v5003_v44  ;;  %v7820_v22 = vmul.f32 0.00390625, %v4479_v27  ;;  %v4879_v7 = vsub.f32 %v7372_v14, %v7762_v34 }
 0x4a5   : > { %v6153_v24 = vpop.eup %6152  ;;  %6156 = vrsqrt.f32 %v4938_v23  ;;  %v4810_v6 = vmax.f32 %v4778_v25, 0.0  ;;  %v4779_v3 = vsub.f32 %v4636_v30, %v4747_v0 }
 0x4a6   : > { %v5134_v55 = vadd.f32 %v7771_v8, %v5068_v40  ;;  %v5135_v32 = vadd.f32 %v7771_v8, %v5069_v15  ;;  %v5004_v5 = vmul.f32 %v6153_v24, %v4876_v59  ;;  %v5005_v49 = vmul.f32 %v6153_v24, %v4877_v45  ;;  %v4482_v51 = vpop.xlane.xlu0 %4481 }
 0x4a7   : > { %v4639_v20 = vpop.xlane.xlu1 %4638  ;;  %v4843_v16 = vmul.f32 0.003921569, %v4810_v6  ;;  %v4811_v36 = vmax.f32 %v4779_v3, 0.0  ;;  %v4748_v21 = vmul.f32 %v7820_v22, %v4479_v27  ;;  %v7833_v18 = vmul.f32 0.00390625, %v4482_v51 }
 0x4a8   : > { %5198 = vst [vmem:[%s7796_s20 + $0x30] sm:$0xff] %v5134_v55  ;;  %5199 = vst [vmem:[%s7796_s20 + $0x38] sm:$0xff] %v5135_v32  ;;  %v5070_v46 = vmul.f32 %v7765_v56, %v5004_v5  ;;  %v5071_v53 = vmul.f32 %v7765_v56, %v5005_v49  ;;  %v4880_v5 = vsub.f32 %v7389_v61, %v7767_v42 }
 0x4a9   : > { %v6155_v9 = vpop.eup %6154  ;;  %v4939_v35 = vadd.f32 1e-08, %v4843_v16  ;;  %v4844_v17 = vmul.f32 0.003921569, %v4811_v36  ;;  %v4780_v44 = vsub.f32 %v4639_v20, %v4748_v21  ;;  %v4749_v14 = vmul.f32 %v7833_v18, %v4482_v51 }
 0x4aa   : > { %v5136_v30 = vadd.f32 %v7771_v8, %v5070_v46  ;;  %v5137_v27 = vadd.f32 %v7771_v8, %v5071_v53  ;;  %v5006_v59 = vmul.f32 %v6155_v9, %v4878_v38  ;;  %v5007_v23 = vmul.f32 %v6155_v9, %v4879_v7  ;;  %v4642_v25 = vpop.xlane.xlu0 %4641 }
 0x4ab   : > { %v4485_v0 = vpop.xlane.xlu1 %4484  ;;  %6158 = vrsqrt.f32 %v4939_v35  ;;  %v4940_v40 = vadd.f32 1e-08, %v4844_v17  ;;  %v4812_v15 = vmax.f32 %v4780_v44, 0.0  ;;  %v4781_v6 = vsub.f32 %v4642_v25, %v4749_v14 }
 0x4ac   : > { %5200 = vst [vmem:[%s7796_s20 + $0x40] sm:$0xff] %v5136_v30  ;;  %5201 = vst [vmem:[%s7796_s20 + $0x48] sm:$0xff] %v5137_v27  ;;  %v5072_v34 = vmul.f32 %v7765_v56, %v5006_v59  ;;  %v5073_v45 = vmul.f32 %v7765_v56, %v5007_v23  ;;  %v7842_v3 = vmul.f32 0.00390625, %v4485_v0  ;;  %v4881_v49 = vsub.f32 %v7393_v37, %v7767_v42 }
 0x4ad   : > { %6160 = vrsqrt.f32 %v4940_v40  ;;  %v4845_v24 = vmul.f32 0.003921569, %v4812_v15  ;;  %v4813_v36 = vmax.f32 %v4781_v6, 0.0  ;;  %v4882_v42 = vsub.f32 %v7397_v54, %v7784_v58 }
 0x4ae   : > { %v5138_v55 = vadd.f32 %v7771_v8, %v5072_v34  ;;  %v5139_v32 = vadd.f32 %v7771_v8, %v5073_v45  ;;  %v4488_v51 = vpop.xlane.xlu0 %4487  ;;  %v4750_v21 = vmul.f32 %v7842_v3, %v4485_v0  ;;  %v4883_v27 = vsub.f32 %v7400_v47, %v7784_v58 }
 0x4af   : > { %v4645_v20 = vpop.xlane.xlu1 %4644  ;;  %v6157_v38 = vpop.eup %6156  ;;  %v4941_v16 = vadd.f32 1e-08, %v4845_v24  ;;  %v7853_v7 = vmul.f32 0.00390625, %v4488_v51  ;;  %v4846_v9 = vmul.f32 0.003921569, %v4813_v36  ;;  %v4884_v54 = vsub.f32 %v7417_v41, %v7807_v4 }
 0x4b0   : > { %5202 = vst [vmem:[%s7796_s20 + $0x50] sm:$0xff] %v5138_v55  ;;  %5203 = vst [vmem:[%s7796_s20 + $0x58] sm:$0xff] %v5139_v32  ;;  %v5008_v46 = vmul.f32 %v6157_v38, %v4880_v5  ;;  %v5009_v53 = vmul.f32 %v6157_v38, %v4881_v49  ;;  %v4782_v35 = vsub.f32 %v4645_v20, %v4750_v21 }
 0x4b1   : > { %6162 = vrsqrt.f32 %v4941_v16  ;;  %v4751_v17 = vmul.f32 %v7853_v7, %v4488_v51  ;;  %v4942_v59 = vadd.f32 1e-08, %v4846_v9  ;;  %v4885_v34 = vsub.f32 %v7421_v60, %v7807_v4 }
 0x4b2   : > { %v5074_v61 = vmul.f32 %v7765_v56, %v5008_v46  ;;  %v5075_v37 = vmul.f32 %v7765_v56, %v5009_v53  ;;  %v4648_v44 = vpop.xlane.xlu0 %4647  ;;  %v4814_v23 = vmax.f32 %v4782_v35, 0.0  ;;  %v4886_v6 = vsub.f32 %v7425_v1, %v7820_v22 }
 0x4b3   : > { %v4491_v30 = vpop.xlane.xlu1 %4490  ;;  %v4783_v15 = vsub.f32 %v4648_v44, %v4751_v17  ;;  %6164 = vrsqrt.f32 %v4942_v59  ;;  %v4887_v49 = vsub.f32 %v7428_v12, %v7820_v22 }
 0x4b4   : > { %v7862_v25 = vmul.f32 0.00390625, %v4491_v30  ;;  %v5140_v0 = vadd.f32 %v7771_v8, %v5074_v61  ;;  %v5141_v40 = vadd.f32 %v7771_v8, %v5075_v37  ;;  %v4847_v45 = vmul.f32 0.003921569, %v4814_v23 }
 0x4b5   : > { %v6159_v14 = vpop.eup %6158  ;;  %v4815_v55 = vmax.f32 %v4783_v15, 0.0 }
 0x4b6   : > { %v4752_v47 = vmul.f32 %v7862_v25, %v4491_v30  ;;  %5204 = vst [vmem:[%s7796_s20 + $0x60] sm:$0xff] %v5140_v0  ;;  %5205 = vst [vmem:[%s7796_s20 + $0x68] sm:$0xff] %v5141_v40  ;;  %v5010_v58 = vmul.f32 %v6159_v14, %v4882_v42  ;;  %v5011_v24 = vmul.f32 %v6159_v14, %v4883_v27  ;;  %v4494_v5 = vpop.xlane.xlu0 %4493  ;;  %v4943_v20 = vadd.f32 1e-08, %v4847_v45 }
 0x4b7   : > { %v4651_v32 = vpop.xlane.xlu1 %4650  ;;  %v6161_v41 = vpop.eup %6160  ;;  %v7877_v4 = vmul.f32 0.00390625, %v4494_v5  ;;  %v4848_v1 = vmul.f32 0.003921569, %v4815_v55  ;;  %v4888_v14 = vsub.f32 %v7445_v28, %v7833_v18 }
 0x4b8   : > { %v4784_v60 = vsub.f32 %v4651_v32, %v4752_v47  ;;  %v5076_v51 = vmul.f32 %v7765_v56, %v5010_v58  ;;  %v5077_v38 = vmul.f32 %v7765_v56, %v5011_v24  ;;  %v5012_v16 = vmul.f32 %v6161_v41, %v4884_v54 }
 0x4b9   : > { %v5013_v36 = vmul.f32 %v6161_v41, %v4885_v34  ;;  %6166 = vrsqrt.f32 %v4943_v20  ;;  %v4753_v46 = vmul.f32 %v7877_v4, %v4494_v5  ;;  %v4944_v42 = vadd.f32 1e-08, %v4848_v1 }
 0x4ba   : > { %v4816_v21 = vmax.f32 %v4784_v60, 0.0  ;;  %v5142_v53 = vadd.f32 %v7771_v8, %v5076_v51  ;;  %v5143_v12 = vadd.f32 %v7771_v8, %v5077_v38  ;;  %v5078_v22 = vmul.f32 %v7765_v56, %v5012_v16  ;;  %v4654_v35 = vpop.xlane.xlu0 %4653 }
 0x4bb   : > { %v5079_v9 = vmul.f32 %v7765_v56, %v5013_v36  ;;  %v4497_v61 = vpop.xlane.xlu1 %4496  ;;  %v6163_v37 = vpop.eup %6162  ;;  %6168 = vrsqrt.f32 %v4944_v42  ;;  %v4785_v0 = vsub.f32 %v4654_v35, %v4753_v46  ;;  %v4889_v34 = vsub.f32 %v7449_v62, %v7833_v18 }
 0x4bc   : > { %v4849_v17 = vmul.f32 0.003921569, %v4816_v21  ;;  %5206 = vst [vmem:[%s7796_s20 + $0x70] sm:$0xff] %v5142_v53  ;;  %5207 = vst [vmem:[%s7796_s20 + $0x78] sm:$0xff] %v5143_v12  ;;  %v5144_v44 = vadd.f32 %v7771_v8, %v5078_v22  ;;  %v5014_v27 = vmul.f32 %v6163_v37, %v4886_v6  ;;  %v5015_v59 = vmul.f32 %v6163_v37, %v4887_v49 }
 0x4bd   : > { %v5145_v30 = vadd.f32 %v7771_v8, %v5079_v9  ;;  %v7890_v40 = vmul.f32 0.00390625, %v4497_v61  ;;  %v6165_v58 = vpop.eup %6164  ;;  %v4817_v24 = vmax.f32 %v4785_v0, 0.0  ;;  %v4890_v60 = vsub.f32 %v7453_v19, %v7842_v3 }
 0x4be   : > { %v4945_v23 = vadd.f32 1e-08, %v4849_v17  ;;  %5208 = vst [vmem:[%s7796_s20 + $0x80] sm:$0xff] %v5144_v44  ;;  %v5080_v54 = vmul.f32 %v7765_v56, %v5014_v27  ;;  %v5081_v15 = vmul.f32 %v7765_v56, %v5015_v59  ;;  %v4500_v47 = vpop.xlane.xlu0 %4499  ;;  %v5016_v5 = vmul.f32 %v6165_v58, %v4888_v14 }
 0x4bf   : > { %5209 = vst [vmem:[%s7796_s20 + $0x88] sm:$0xff] %v5145_v30  ;;  %v4657_v45 = vpop.xlane.xlu1 %4656  ;;  %v4754_v6 = vmul.f32 %v7890_v40, %v4497_v61  ;;  %v5017_v41 = vmul.f32 %v6165_v58, %v4889_v34  ;;  %v4850_v49 = vmul.f32 0.003921569, %v4817_v24  ;;  %v7903_v28 = vmul.f32 0.00390625, %v4500_v47 }
 0x4c0   : > { %6170 = vrsqrt.f32 %v4945_v23  ;;  %v5146_v55 = vadd.f32 %v7771_v8, %v5080_v54  ;;  %v5147_v32 = vadd.f32 %v7771_v8, %v5081_v15  ;;  %v5082_v62 = vmul.f32 %v7765_v56, %v5016_v5 }
 0x4c1   : > { %v4786_v20 = vsub.f32 %v4657_v45, %v4754_v6  ;;  %v5083_v18 = vmul.f32 %v7765_v56, %v5017_v41  ;;  %v4891_v51 = vsub.f32 %v7456_v26, %v7842_v3  ;;  %v4892_v1 = vsub.f32 %v7473_v63, %v7853_v7 }
 0x4c2   : > { %5210 = vst [vmem:[%s7796_s20 + $0x90] sm:$0xff] %v5146_v55  ;;  %5211 = vst [vmem:[%s7796_s20 + $0x98] sm:$0xff] %v5147_v32  ;;  %v4660_v38 = vpop.xlane.xlu0 %4659  ;;  %v4946_v21 = vadd.f32 1e-08, %v4850_v49  ;;  %v4755_v53 = vmul.f32 %v7903_v28, %v4500_v47  ;;  %v5148_v12 = vadd.f32 %v7771_v8, %v5082_v62  ;;  %v4893_v26 = vsub.f32 %v7477_v10, %v7853_v7 }
 0x4c3   : > { %v4503_v16 = vpop.xlane.xlu1 %4502  ;;  %v6167_v36 = vpop.eup %6166  ;;  %v4818_v46 = vmax.f32 %v4786_v20, 0.0  ;;  %v5149_v22 = vadd.f32 %v7771_v8, %v5083_v18  ;;  %v4894_v37 = vsub.f32 %v7481_v48, %v7862_v25  ;;  %v4895_v10 = vsub.f32 %v7484_v52, %v7862_v25 }
 0x4c4   : > { %v5018_v19 = vmul.f32 %v6167_v36, %v4890_v60  ;;  %v5019_v9 = vmul.f32 %v6167_v36, %v4891_v51  ;;  %6172 = vrsqrt.f32 %v4946_v21  ;;  %v4787_v35 = vsub.f32 %v4660_v38, %v4755_v53  ;;  %5212 = vst [vmem:[%s7796_s20 + $0xa0] sm:$0xff] %v5148_v12 }
 0x4c5   : > { %v4851_v3 = vmul.f32 0.003921569, %v4818_v46  ;;  %5213 = vst [vmem:[%s7796_s20 + $0xa8] sm:$0xff] %v5149_v22  ;;  %v7926_v42 = vmul.f32 0.00390625, %v4503_v16  ;;  %v6169_v30 = vpop.eup %6168  ;;  %v4896_v62 = vsub.f32 %v7501_v29, %v7877_v4  ;;  %v4897_v18 = vsub.f32 %v7505_v33, %v7877_v4 }
 0x4c6   : > { %v5084_v63 = vmul.f32 %v7765_v56, %v5018_v19  ;;  %v5085_v61 = vmul.f32 %v7765_v56, %v5019_v9  ;;  %v4506_v44 = vpop.xlane.xlu0 %4505  ;;  %v4819_v27 = vmax.f32 %v4787_v35, 0.0  ;;  %v5020_v54 = vmul.f32 %v6169_v30, %v4892_v1 }
 0x4c7   : > { %v4663_v17 = vpop.xlane.xlu1 %4662  ;;  %v4947_v7 = vadd.f32 1e-08, %v4851_v3  ;;  %v7930_v59 = vmul.f32 0.00390625, %v4506_v44  ;;  %v5021_v48 = vmul.f32 %v6169_v30, %v4893_v26  ;;  %v4756_v34 = vmul.f32 %v7926_v42, %v4503_v16 }
 0x4c8   : > { %v5150_v23 = vadd.f32 %v7771_v8, %v5084_v63  ;;  %v5151_v0 = vadd.f32 %v7771_v8, %v5085_v61  ;;  %v4852_v14 = vmul.f32 0.003921569, %v4819_v27  ;;  %v5086_v45 = vmul.f32 %v7765_v56, %v5020_v54 }
 0x4c9   : > { %6174 = vrsqrt.f32 %v4947_v7  ;;  %v5087_v52 = vmul.f32 %v7765_v56, %v5021_v48  ;;  %v4788_v55 = vsub.f32 %v4663_v17, %v4756_v34  ;;  %v4757_v32 = vmul.f32 %v7930_v59, %v4506_v44 }
 0x4ca   : > { %v6171_v15 = vpop.eup %6170  ;;  %5214 = vst [vmem:[%s7796_s20 + $0xb0] sm:$0xff] %v5150_v23  ;;  %5215 = vst [vmem:[%s7796_s20 + $0xb8] sm:$0xff] %v5151_v0  ;;  %v4666_v58 = vpop.xlane.xlu0 %4665  ;;  %v4948_v6 = vadd.f32 1e-08, %v4852_v14  ;;  %v5152_v5 = vadd.f32 %v7771_v8, %v5086_v45  ;;  %v4898_v19 = vsub.f32 %v7509_v57, %v7890_v40  ;;  %v4899_v9 = vsub.f32 %v7512_v43, %v7890_v40 }
 0x4cb   : > { %v5022_v25 = vmul.f32 %v6171_v15, %v4894_v37  ;;  %v5023_v47 = vmul.f32 %v6171_v15, %v4895_v10  ;;  %v4509_v24 = vpop.xlane.xlu1 %4508  ;;  %v5153_v41 = vadd.f32 %v7771_v8, %v5087_v52  ;;  %v4820_v60 = vmax.f32 %v4788_v55, 0.0 }
 0x4cc   : > { %6176 = vrsqrt.f32 %v4948_v6  ;;  %5216 = vst [vmem:[%s7796_s20 + $0xc0] sm:$0xff] %v5152_v5  ;;  %v4789_v16 = vsub.f32 %v4666_v58, %v4757_v32  ;;  %v7952_v36 = vmul.f32 0.00390625, %v4509_v24  ;;  %v4900_v14 = vsub.f32 %v7529_v2, %v7903_v28 }
 0x4cd   : > { %v5088_v49 = vmul.f32 %v7765_v56, %v5022_v25  ;;  %v5089_v20 = vmul.f32 %v7765_v56, %v5023_v47  ;;  %5217 = vst [vmem:[%s7796_s20 + $0xc8] sm:$0xff] %v5153_v41  ;;  %v4853_v53 = vmul.f32 0.003921569, %v4820_v60  ;;  %v4901_v34 = vsub.f32 %v7533_v39, %v7903_v28 }
 0x4ce   : > { %v4512_v21 = vpop.xlane.xlu0 %4511  ;;  %v6173_v46 = vpop.eup %6172  ;;  %v4821_v12 = vmax.f32 %v4789_v16, 0.0  ;;  %v4758_v22 = vmul.f32 %v7952_v36, %v4509_v24  ;;  %v4902_v60 = vsub.f32 %v7537_v31, %v7926_v42 }
 0x4cf   : > { %v5154_v51 = vadd.f32 %v7771_v8, %v5088_v49  ;;  %v5155_v38 = vadd.f32 %v7771_v8, %v5089_v20  ;;  %v4669_v1 = vpop.xlane.xlu1 %4668  ;;  %v7954_v29 = vmul.f32 0.00390625, %v4512_v21  ;;  %v5024_v33 = vmul.f32 %v6173_v46, %v4896_v62 }
 0x4d0   : > { %v5025_v4 = vmul.f32 %v6173_v46, %v4897_v18  ;;  %v4949_v26 = vadd.f32 1e-08, %v4853_v53  ;;  %v4854_v61 = vmul.f32 0.003921569, %v4821_v12  ;;  %v4790_v37 = vsub.f32 %v4669_v1, %v4758_v22 }
 0x4d1   : > { %5218 = vst [vmem:[%s7796_s20 + $0xd0] sm:$0xff] %v5154_v51  ;;  %5219 = vst [vmem:[%s7796_s20 + $0xd8] sm:$0xff] %v5155_v38  ;;  %v4759_v3 = vmul.f32 %v7954_v29, %v4512_v21  ;;  %v5090_v35 = vmul.f32 %v7765_v56, %v5024_v33  ;;  %v4903_v51 = vsub.f32 %v7540_v50, %v7926_v42 }
 0x4d2   : > { %v5091_v63 = vmul.f32 %v7765_v56, %v5025_v4  ;;  %v4672_v17 = vpop.xlane.xlu0 %4671  ;;  %6178 = vrsqrt.f32 %v4949_v26  ;;  %v4950_v27 = vadd.f32 1e-08, %v4854_v61  ;;  %v4822_v23 = vmax.f32 %v4790_v37, 0.0 }
 0x4d3   : > { %v4515_v44 = vpop.xlane.xlu1 %4514  ;;  %v6175_v30 = vpop.eup %6174  ;;  %v4791_v10 = vsub.f32 %v4672_v17, %v4759_v3  ;;  %v5156_v57 = vadd.f32 %v7771_v8, %v5090_v35  ;;  %v4904_v22 = vsub.f32 %v7557_v11, %v7930_v59  ;;  %v8299_v17 = vld [vmem:[#allocation15_spill] sm:$0xff] }
 0x4d4   : > { %v5157_v43 = vadd.f32 %v7771_v8, %v5091_v63  ;;  %v5026_v40 = vmul.f32 %v6175_v30, %v4898_v19  ;;  %v5027_v7 = vmul.f32 %v6175_v30, %v4899_v9  ;;  %v7968_v54 = vmul.f32 0.00390625, %v4515_v44 }
 0x4d5   : > { %v4823_v0 = vmax.f32 %v4791_v10, 0.0  ;;  %5220 = vst [vmem:[%s7796_s20 + $0xe0] sm:$0xff] %v5156_v57  ;;  %6180 = vrsqrt.f32 %v4950_v27  ;;  %v4855_v47 = vmul.f32 0.003921569, %v4822_v23  ;;  %v4905_v63 = vsub.f32 %v7561_v13, %v7930_v59  ;;  %v8300_v13 = vld [vmem:[#allocation16_spill] sm:$0xff] }
 0x4d6   : > { %5221 = vst [vmem:[%s7796_s20 + $0xe8] sm:$0xff] %v5157_v43  ;;  %v5092_v48 = vmul.f32 %v7765_v56, %v5026_v40  ;;  %v5093_v15 = vmul.f32 %v7765_v56, %v5027_v7  ;;  %v4518_v52 = vpop.xlane.xlu0 %4517  ;;  %v6177_v25 = vpop.eup %6176  ;;  %v4760_v24 = vmul.f32 %v7968_v54, %v4515_v44  ;;  %v4906_v44 = vsub.f32 %v8299_v17, %v7952_v36  ;;  %v8305_v17 = vld [vmem:[#allocation21_spill] sm:$0xff] }
 0x4d7   : > { %v4675_v45 = vpop.xlane.xlu1 %4674  ;;  %v4856_v58 = vmul.f32 0.003921569, %v4823_v0  ;;  %v5028_v32 = vmul.f32 %v6177_v25, %v4900_v14  ;;  %v5029_v5 = vmul.f32 %v6177_v25, %v4901_v34  ;;  %v4951_v41 = vadd.f32 1e-08, %v4855_v47  ;;  %v8301_v25 = vld [vmem:[#allocation17_spill] sm:$0xff] }
 0x4d8   : > { %v5158_v6 = vadd.f32 %v7771_v8, %v5092_v48  ;;  %v5159_v55 = vadd.f32 %v7771_v8, %v5093_v15  ;;  %v4792_v49 = vsub.f32 %v4675_v45, %v4760_v24  ;;  %v7985_v20 = vmul.f32 0.00390625, %v4518_v52 }
 0x4d9   : > { %v4952_v2 = vadd.f32 1e-08, %v4856_v58  ;;  %v5094_v39 = vmul.f32 %v7765_v56, %v5028_v32  ;;  %v5095_v28 = vmul.f32 %v7765_v56, %v5029_v5  ;;  %6182 = vrsqrt.f32 %v4951_v41  ;;  %v8302_v58 = vld [vmem:[#allocation18_spill] sm:$0xff] }
 0x4da   : > { %5222 = vst [vmem:[%s7796_s20 + $0xf0] sm:$0xff] %v5158_v6  ;;  %5223 = vst [vmem:[%s7796_s20 + $0xf8] sm:$0xff] %v5159_v55  ;;  %v4678_v62 = vpop.xlane.xlu0 %4677  ;;  %v4824_v21 = vmax.f32 %v4792_v49, 0.0  ;;  %v4761_v53 = vmul.f32 %v7985_v20, %v4518_v52  ;;  %v4907_v59 = vsub.f32 %v8300_v13, %v7952_v36  ;;  %v4908_v47 = vsub.f32 %v8301_v25, %v7954_v29 }
 0x4db   : > { %v4521_v18 = vpop.xlane.xlu1 %4520  ;;  %v5160_v16 = vadd.f32 %v7771_v8, %v5094_v39  ;;  %v5161_v1 = vadd.f32 %v7771_v8, %v5095_v28  ;;  %6184 = vrsqrt.f32 %v4952_v2  ;;  %v4909_v36 = vsub.f32 %v8302_v58, %v7954_v29 }
 0x4dc   : > { %v7991_v38 = vmul.f32 0.00390625, %v4521_v18  ;;  %v6179_v46 = vpop.eup %6178  ;;  %v4857_v12 = vmul.f32 0.003921569, %v4824_v21  ;;  %v4793_v19 = vsub.f32 %v4678_v62, %v4761_v53 }
 0x4dd   : > { %5224 = vst [vmem:[%s7796_s20 + $0x100] sm:$0xff] %v5160_v16  ;;  %5225 = vst [vmem:[%s7796_s20 + $0x108] sm:$0xff] %v5161_v1  ;;  %v5030_v31 = vmul.f32 %v6179_v46, %v4902_v60  ;;  %v5031_v4 = vmul.f32 %v6179_v46, %v4903_v51 }
 0x4de   : > { %v4762_v33 = vmul.f32 %v7991_v38, %v4521_v18  ;;  %v4524_v42 = vpop.xlane.xlu0 %4523  ;;  %v4953_v61 = vadd.f32 1e-08, %v4857_v12  ;;  %v4825_v30 = vmax.f32 %v4793_v19, 0.0  ;;  %v8303_v19 = vld [vmem:[#allocation19_spill] sm:$0xff] }
 0x4df   : > { %v4681_v50 = vpop.xlane.xlu1 %4680  ;;  %v8001_v26 = vmul.f32 0.00390625, %v4524_v42  ;;  %v5096_v3 = vmul.f32 %v7765_v56, %v5030_v31  ;;  %v5097_v35 = vmul.f32 %v7765_v56, %v5031_v4  ;;  %v6181_v37 = vpop.eup %6180 }
 0x4e0   : > { %v4794_v9 = vsub.f32 %v4681_v50, %v4762_v33  ;;  %v5032_v40 = vmul.f32 %v6181_v37, %v4904_v22  ;;  %v5033_v7 = vmul.f32 %v6181_v37, %v4905_v63  ;;  %6186 = vrsqrt.f32 %v4953_v61 }
 0x4e1   : > { %v4763_v10 = vmul.f32 %v8001_v26, %v4524_v42  ;;  %v5162_v57 = vadd.f32 %v7771_v8, %v5096_v3  ;;  %v5163_v43 = vadd.f32 %v7771_v8, %v5097_v35  ;;  %v4858_v0 = vmul.f32 0.003921569, %v4825_v30  ;;  %v8304_v3 = vld [vmem:[#allocation20_spill] sm:$0xff]  ;;  %v8306_v30 = vld [vmem:[#allocation22_spill] sm:$0xff] }
 0x4e2   : > { %v4826_v11 = vmax.f32 %v4794_v9, 0.0  ;;  %v4684_v27 = vpop.xlane.xlu0 %4683  ;;  %v5098_v15 = vmul.f32 %v7765_v56, %v5032_v40  ;;  %v5099_v14 = vmul.f32 %v7765_v56, %v5033_v7  ;;  %v4910_v9 = vsub.f32 %v8303_v19, %v7968_v54 }
 0x4e3   : > { %v4527_v23 = vpop.xlane.xlu1 %4526  ;;  %5226 = vst [vmem:[%s7796_s20 + $0x110] sm:$0xff] %v5162_v57  ;;  %5227 = vst [vmem:[%s7796_s20 + $0x118] sm:$0xff] %v5163_v43  ;;  %v4795_v34 = vsub.f32 %v4684_v27, %v4763_v10  ;;  %v6183_v52 = vpop.eup %6182  ;;  %v4954_v24 = vadd.f32 1e-08, %v4858_v0  ;;  %v4911_v35 = vsub.f32 %v8304_v3, %v7968_v54 }
 0x4e4   : > { %v4859_v48 = vmul.f32 0.003921569, %v4826_v11  ;;  %v8018_v45 = vmul.f32 0.00390625, %v4527_v23  ;;  %v5164_v32 = vadd.f32 %v7771_v8, %v5098_v15  ;;  %v5165_v5 = vadd.f32 %v7771_v8, %v5099_v14 }
 0x4e5   : > { %v6185_v55 = vpop.eup %6184  ;;  %v5034_v41 = vmul.f32 %v6183_v52, %v4906_v44  ;;  %v5035_v2 = vmul.f32 %v6183_v52, %v4907_v59  ;;  %6188 = vrsqrt.f32 %v4954_v24  ;;  %v4827_v18 = vmax.f32 %v4795_v34, 0.0  ;;  %v8308_v59 = vld [vmem:[#allocation24_spill] sm:$0xff] }
 0x4e6   : > { %v4955_v6 = vadd.f32 1e-08, %v4859_v48  ;;  %v4530_v28 = vpop.xlane.xlu0 %4529  ;;  %v5036_v49 = vmul.f32 %v6185_v55, %v4908_v47  ;;  %v5037_v62 = vmul.f32 %v6185_v55, %v4909_v36  ;;  %5228 = vst [vmem:[%s7796_s20 + $0x120] sm:$0xff] %v5164_v32  ;;  %5229 = vst [vmem:[%s7796_s20 + $0x128] sm:$0xff] %v5165_v5  ;;  %v4764_v51 = vmul.f32 %v8018_v45, %v4527_v23  ;;  %v8307_v23 = vld [vmem:[#allocation23_spill] sm:$0xff]  ;;  %v8309_v47 = vld [vmem:[#allocation25_spill] sm:$0xff] }
 0x4e7   : > { %v4687_v39 = vpop.xlane.xlu1 %4686  ;;  %v5100_v60 = vmul.f32 %v7765_v56, %v5034_v41  ;;  %v5101_v29 = vmul.f32 %v7765_v56, %v5035_v2  ;;  %v4860_v21 = vmul.f32 0.003921569, %v4827_v18  ;;  %v8037_v22 = vmul.f32 0.00390625, %v4530_v28  ;;  %v8310_v36 = vld [vmem:[#allocation26_spill] sm:$0xff] }
 0x4e8   : > { %6190 = vrsqrt.f32 %v4955_v6  ;;  %v5102_v16 = vmul.f32 %v7765_v56, %v5036_v49  ;;  %v5103_v1 = vmul.f32 %v7765_v56, %v5037_v62  ;;  %v4796_v33 = vsub.f32 %v4687_v39, %v4764_v51 }
 0x4e9   : > { %v5166_v46 = vadd.f32 %v7771_v8, %v5100_v60  ;;  %v5167_v53 = vadd.f32 %v7771_v8, %v5101_v29  ;;  %v4956_v42 = vadd.f32 1e-08, %v4860_v21  ;;  %v4912_v44 = vsub.f32 %v8305_v17, %v7985_v20 }
 0x4ea   : > { %v4690_v31 = vpop.xlane.xlu0 %4689  ;;  %v5168_v12 = vadd.f32 %v7771_v8, %v5102_v16  ;;  %v5169_v50 = vadd.f32 %v7771_v8, %v5103_v1  ;;  %v4828_v63 = vmax.f32 %v4796_v33, 0.0  ;;  %v6187_v37 = vpop.eup %6186  ;;  %v4913_v11 = vsub.f32 %v8306_v30, %v7985_v20 }
 0x4eb   : > { %v4533_v4 = vpop.xlane.xlu1 %4532  ;;  %5230 = vst [vmem:[%s7796_s20 + $0x130] sm:$0xff] %v5166_v46  ;;  %5231 = vst [vmem:[%s7796_s20 + $0x138] sm:$0xff] %v5167_v53  ;;  %6192 = vrsqrt.f32 %v4956_v42  ;;  %v4765_v10 = vmul.f32 %v8037_v22, %v4530_v28  ;;  %v5038_v57 = vmul.f32 %v6187_v37, %v4910_v9  ;;  %v5039_v43 = vmul.f32 %v6187_v37, %v4911_v35 }
 0x4ec   : > { %v8045_v61 = vmul.f32 0.00390625, %v4533_v4  ;;  %5232 = vst [vmem:[%s7796_s20 + $0x140] sm:$0xff] %v5168_v12  ;;  %5233 = vst [vmem:[%s7796_s20 + $0x148] sm:$0xff] %v5169_v50  ;;  %v4861_v40 = vmul.f32 0.003921569, %v4828_v63  ;;  %v4914_v13 = vsub.f32 %v8307_v23, %v7991_v38  ;;  %v4915_v0 = vsub.f32 %v8308_v59, %v7991_v38 }
 0x4ed   : > { %v4797_v48 = vsub.f32 %v4690_v31, %v4765_v10  ;;  %v5104_v20 = vmul.f32 %v7765_v56, %v5038_v57  ;;  %v5105_v14 = vmul.f32 %v7765_v56, %v5039_v43  ;;  %v4916_v58 = vsub.f32 %v8309_v47, %v8001_v26 }
 0x4ee   : > { %v4766_v54 = vmul.f32 %v8045_v61, %v4533_v4  ;;  %v4536_v27 = vpop.xlane.xlu0 %4535  ;;  %v4957_v34 = vadd.f32 1e-08, %v4861_v40  ;;  %v4917_v24 = vsub.f32 %v8310_v36, %v8001_v26  ;;  %v8313_v36 = vld [vmem:[#allocation29_spill] sm:$0xff] }
 0x4ef   : > { %v4693_v7 = vpop.xlane.xlu1 %4692  ;;  %v8059_v15 = vmul.f32 0.00390625, %v4536_v27  ;;  %v6189_v25 = vpop.eup %6188  ;;  %v4829_v6 = vmax.f32 %v4797_v48, 0.0  ;;  %v5170_v32 = vadd.f32 %v7771_v8, %v5104_v20  ;;  %v5171_v5 = vadd.f32 %v7771_v8, %v5105_v14 }
 0x4f0   : > { %v4798_v52 = vsub.f32 %v4693_v7, %v4766_v54  ;;  %v5040_v41 = vmul.f32 %v6189_v25, %v4912_v44  ;;  %v5041_v2 = vmul.f32 %v6189_v25, %v4913_v11  ;;  %6194 = vrsqrt.f32 %v4957_v34  ;;  %v8311_v54 = vld [vmem:[#allocation27_spill] sm:$0xff] }
 0x4f1   : > { %v4767_v38 = vmul.f32 %v8059_v15, %v4536_v27  ;;  %v4862_v18 = vmul.f32 0.003921569, %v4829_v6  ;;  %5234 = vst [vmem:[%s7796_s20 + $0x150] sm:$0xff] %v5170_v32  ;;  %5235 = vst [vmem:[%s7796_s20 + $0x158] sm:$0xff] %v5171_v5  ;;  %v4918_v7 = vsub.f32 %v8311_v54, %v8018_v45  ;;  %v8312_v27 = vld [vmem:[#allocation28_spill] sm:$0xff]  ;;  %v8314_v5 = vld [vmem:[#allocation30_spill] sm:$0xff] }
 0x4f2   : > { %v6191_v55 = vpop.eup %6190  ;;  %v4696_v39 = vpop.xlane.xlu0 %4695  ;;  %v5106_v26 = vmul.f32 %v7765_v56, %v5040_v41  ;;  %v5107_v60 = vmul.f32 %v7765_v56, %v5041_v2  ;;  %v4830_v29 = vmax.f32 %v4798_v52, 0.0  ;;  %v4919_v23 = vsub.f32 %v8312_v27, %v8018_v45 }
 0x4f3   : > { %v4539_v28 = vpop.xlane.xlu1 %4538  ;;  %v5042_v49 = vmul.f32 %v6191_v55, %v4914_v13  ;;  %v5043_v62 = vmul.f32 %v6191_v55, %v4915_v0  ;;  %v4799_v51 = vsub.f32 %v4696_v39, %v4767_v38  ;;  %v4958_v21 = vadd.f32 1e-08, %v4862_v18 }
 0x4f4   : > { %v8076_v46 = vmul.f32 0.00390625, %v4539_v28  ;;  %v5172_v53 = vadd.f32 %v7771_v8, %v5106_v26  ;;  %v5173_v33 = vadd.f32 %v7771_v8, %v5107_v60  ;;  %v4863_v31 = vmul.f32 0.003921569, %v4830_v29  ;;  %v8315_v60 = vld [vmem:[#allocation31_spill] sm:$0xff] }
 0x4f5   : > { %v5108_v16 = vmul.f32 %v7765_v56, %v5042_v49  ;;  %v5109_v1 = vmul.f32 %v7765_v56, %v5043_v62  ;;  %v4831_v4 = vmax.f32 %v4799_v51, 0.0  ;;  %v6193_v42 = vpop.eup %6192  ;;  %6196 = vrsqrt.f32 %v4958_v21  ;;  %v8316_v51 = vld [vmem:[#allocation32_spill] sm:$0xff] }
 0x4f6   : > { %v4542_v50 = vpop.xlane.xlu0 %4541  ;;  %v4768_v3 = vmul.f32 %v8076_v46, %v4539_v28  ;;  %5236 = vst [vmem:[%s7796_s20 + $0x160] sm:$0xff] %v5172_v53  ;;  %5237 = vst [vmem:[%s7796_s20 + $0x168] sm:$0xff] %v5173_v33  ;;  %v5044_v35 = vmul.f32 %v6193_v42, %v4916_v58  ;;  %v5045_v63 = vmul.f32 %v6193_v42, %v4917_v24  ;;  %v4959_v37 = vadd.f32 1e-08, %v4863_v31  ;;  %v8317_v31 = vld [vmem:[#allocation33_spill] sm:$0xff] }
 0x4f7   : > { %v4699_v12 = vpop.xlane.xlu1 %4698  ;;  %v5174_v19 = vadd.f32 %v7771_v8, %v5108_v16  ;;  %v5175_v9 = vadd.f32 %v7771_v8, %v5109_v1  ;;  %v4864_v17 = vmul.f32 0.003921569, %v4831_v4  ;;  %v8087_v30 = vmul.f32 0.00390625, %v4542_v50 }
 0x4f8   : > { %v4800_v44 = vsub.f32 %v4699_v12, %v4768_v3  ;;  %v5110_v11 = vmul.f32 %v7765_v56, %v5044_v35  ;;  %v5111_v10 = vmul.f32 %v7765_v56, %v5045_v63  ;;  %6198 = vrsqrt.f32 %v4959_v37  ;;  %v8318_v12 = vld [vmem:[#allocation34_spill] sm:$0xff] }
 0x4f9   : > { %5238 = vst [vmem:[%s7796_s20 + $0x170] sm:$0xff] %v5174_v19  ;;  %5239 = vst [vmem:[%s7796_s20 + $0x178] sm:$0xff] %v5175_v9  ;;  %v4960_v57 = vadd.f32 1e-08, %v4864_v17  ;;  %v4769_v59 = vmul.f32 %v8087_v30, %v4542_v50  ;;  %v4920_v24 = vsub.f32 %v8313_v36, %v8037_v22  ;;  %v4921_v41 = vsub.f32 %v8314_v5, %v8037_v22  ;;  %v8324_v5 = vld [vmem:[#allocation40_spill] sm:$0xff] }
 0x4fa   : > { %v4702_v43 = vpop.xlane.xlu0 %4701  ;;  %v4832_v13 = vmax.f32 %v4800_v44, 0.0  ;;  %v5176_v0 = vadd.f32 %v7771_v8, %v5110_v11  ;;  %v5177_v48 = vadd.f32 %v7771_v8, %v5111_v10  ;;  %v6195_v14 = vpop.eup %6194  ;;  %v4922_v29 = vsub.f32 %v8315_v60, %v8045_v61 }
 0x4fb   : > { %v4545_v40 = vpop.xlane.xlu1 %4544  ;;  %6200 = vrsqrt.f32 %v4960_v57  ;;  %v4801_v52 = vsub.f32 %v4702_v43, %v4769_v59  ;;  %v5046_v25 = vmul.f32 %v6195_v14, %v4918_v7  ;;  %v5047_v47 = vmul.f32 %v6195_v14, %v4919_v23  ;;  %v8320_v7 = vld [vmem:[#allocation36_spill] sm:$0xff] }
 0x4fc   : > { %v8098_v20 = vmul.f32 0.00390625, %v4545_v40  ;;  %v4865_v34 = vmul.f32 0.003921569, %v4832_v13  ;;  %5240 = vst [vmem:[%s7796_s20 + $0x180] sm:$0xff] %v5176_v0  ;;  %5241 = vst [vmem:[%s7796_s20 + $0x188] sm:$0xff] %v5177_v48  ;;  %v4923_v16 = vsub.f32 %v8316_v51, %v8045_v61  ;;  %v4924_v4 = vsub.f32 %v8317_v31, %v8059_v15 }
 0x4fd   : > { %v4833_v38 = vmax.f32 %v4801_v52, 0.0  ;;  %v5112_v55 = vmul.f32 %v7765_v56, %v5046_v25  ;;  %v5113_v32 = vmul.f32 %v7765_v56, %v5047_v47  ;;  %v4925_v50 = vsub.f32 %v8318_v12, %v8059_v15  ;;  %v8322_v25 = vld [vmem:[#allocation38_spill] sm:$0xff] }
 0x4fe   : > { %v4770_v58 = vmul.f32 %v8098_v20, %v4545_v40  ;;  %v4961_v6 = vadd.f32 1e-08, %v4865_v34  ;;  %v8319_v40 = vld [vmem:[#allocation35_spill] sm:$0xff]  ;;  %v4927_v27 = vsub.f32 %v8320_v7, %v8076_v46  ;;  %v4929_v47 = vsub.f32 %v8322_v25, %v8087_v30 }
 0x4ff   : > { %v4705_v45 = vpop.xlane.xlu1 %4704  ;;  %v6197_v39 = vpop.eup %6196  ;;  %v4866_v28 = vmul.f32 0.003921569, %v4833_v38  ;;  %v5178_v49 = vadd.f32 %v7771_v8, %v5112_v55  ;;  %v5179_v62 = vadd.f32 %v7771_v8, %v5113_v32  ;;  %v4926_v54 = vsub.f32 %v8319_v40, %v8076_v46  ;;  %v8321_v46 = vld [vmem:[#allocation37_spill] sm:$0xff]  ;;  %v8323_v32 = vld [vmem:[#allocation39_spill] sm:$0xff] }
 0x500   : > { %v4802_v2 = vsub.f32 %v4705_v45, %v4770_v58  ;;  %6202 = vrsqrt.f32 %v4961_v6  ;;  %v5048_v18 = vmul.f32 %v6197_v39, %v4920_v24  ;;  %v5049_v26 = vmul.f32 %v6197_v39, %v4921_v41 }
 0x501   : > { %v4962_v1 = vadd.f32 1e-08, %v4866_v28  ;;  %5242 = vst [vmem:[%s7796_s20 + $0x190] sm:$0xff] %v5178_v49  ;;  %5243 = vst [vmem:[%s7796_s20 + $0x198] sm:$0xff] %v5179_v62  ;;  %v4928_v52 = vsub.f32 %v8321_v46, %v8087_v30  ;;  %v4930_v30 = vsub.f32 %v8323_v32, %v8098_v20  ;;  %v4931_v41 = vsub.f32 %v8324_v5, %v8098_v20 }
 0x502   : > { %v4834_v21 = vmax.f32 %v4802_v2, 0.0  ;;  %v6199_v53 = vpop.eup %6198  ;;  %v5114_v22 = vmul.f32 %v7765_v56, %v5048_v18  ;;  %v5115_v33 = vmul.f32 %v7765_v56, %v5049_v26 }
 0x503   : > { %v5050_v42 = vmul.f32 %v6199_v53, %v4922_v29  ;;  %v5051_v19 = vmul.f32 %v6199_v53, %v4923_v16  ;;  %6204 = vrsqrt.f32 %v4962_v1 }
 0x504   : > { %v4867_v61 = vmul.f32 0.003921569, %v4834_v21  ;;  %v5180_v3 = vadd.f32 %v7771_v8, %v5114_v22  ;;  %v5181_v35 = vadd.f32 %v7771_v8, %v5115_v33 }
 0x505   : > { %v6201_v9 = vpop.eup %6200  ;;  %v5116_v63 = vmul.f32 %v7765_v56, %v5050_v42  ;;  %v5117_v37 = vmul.f32 %v7765_v56, %v5051_v19 }
 0x506   : > { %v5052_v17 = vmul.f32 %v6201_v9, %v4924_v4  ;;  %v5053_v44 = vmul.f32 %v6201_v9, %v4925_v50  ;;  %5244 = vst [vmem:[%s7796_s20 + $0x1a0] sm:$0xff] %v5180_v3  ;;  %5245 = vst [vmem:[%s7796_s20 + $0x1a8] sm:$0xff] %v5181_v35  ;;  %v4963_v15 = vadd.f32 1e-08, %v4867_v61 }
 0x507   : > { %v5182_v11 = vadd.f32 %v7771_v8, %v5116_v63  ;;  %v5183_v10 = vadd.f32 %v7771_v8, %v5117_v37 }
 0x508   : > { %v5118_v57 = vmul.f32 %v7765_v56, %v5052_v17  ;;  %v5119_v43 = vmul.f32 %v7765_v56, %v5053_v44  ;;  %6206 = vrsqrt.f32 %v4963_v15 }
 0x509   : > { %5246 = vst [vmem:[%s7796_s20 + $0x1b0] sm:$0xff] %v5182_v11  ;;  %5247 = vst [vmem:[%s7796_s20 + $0x1b8] sm:$0xff] %v5183_v10 }
 0x50a   : > { %v6203_v23 = vpop.eup %6202  ;;  %v5184_v13 = vadd.f32 %v7771_v8, %v5118_v57  ;;  %v5185_v59 = vadd.f32 %v7771_v8, %v5119_v43 }
 0x50b   : > { %v5054_v0 = vmul.f32 %v6203_v23, %v4926_v54  ;;  %v5055_v48 = vmul.f32 %v6203_v23, %v4927_v27 }
 0x50c   : > { %5248 = vst [vmem:[%s7796_s20 + $0x1c0] sm:$0xff] %v5184_v13  ;;  %5249 = vst [vmem:[%s7796_s20 + $0x1c8] sm:$0xff] %v5185_v59 }
 0x50d   : > { %v5120_v14 = vmul.f32 %v7765_v56, %v5054_v0  ;;  %v5121_v34 = vmul.f32 %v7765_v56, %v5055_v48  ;;  %v6205_v58 = vpop.eup %6204 }
 0x50e   : > { %v5056_v24 = vmul.f32 %v6205_v58, %v4928_v52  ;;  %v5057_v6 = vmul.f32 %v6205_v58, %v4929_v47 }
 0x50f   : > { %v5186_v45 = vadd.f32 %v7771_v8, %v5120_v14  ;;  %v5187_v36 = vadd.f32 %v7771_v8, %v5121_v34 }
 0x510   : > { %v5122_v38 = vmul.f32 %v7765_v56, %v5056_v24  ;;  %v5123_v55 = vmul.f32 %v7765_v56, %v5057_v6 }
 0x511   : > { %5250 = vst [vmem:[%s7796_s20 + $0x1d0] sm:$0xff] %v5186_v45  ;;  %5251 = vst [vmem:[%s7796_s20 + $0x1d8] sm:$0xff] %v5187_v36 }
 0x512   : > { %v6207_v2 = vpop.eup %6206  ;;  %v5188_v39 = vadd.f32 %v7771_v8, %v5122_v38  ;;  %v5189_v28 = vadd.f32 %v7771_v8, %v5123_v55 }
 0x513   : > { %v5058_v49 = vmul.f32 %v6207_v2, %v4930_v30  ;;  %v5059_v62 = vmul.f32 %v6207_v2, %v4931_v41 }
 0x514   : > { %5252 = vst [vmem:[%s7796_s20 + $0x1e0] sm:$0xff] %v5188_v39  ;;  %5253 = vst [vmem:[%s7796_s20 + $0x1e8] sm:$0xff] %v5189_v28 }
 0x515   : > { %v5124_v18 = vmul.f32 %v7765_v56, %v5058_v49  ;;  %v5125_v26 = vmul.f32 %v7765_v56, %v5059_v62 }
 0x517   : > { %v5190_v20 = vadd.f32 %v7771_v8, %v5124_v18  ;;  %v5191_v60 = vadd.f32 %v7771_v8, %v5125_v26 }
 0x519   : > { %5254 = vst [vmem:[%s7796_s20 + $0x1f0] sm:$0xff] %v5190_v20  ;;  %5255 = vst [vmem:[%s7796_s20 + $0x1f8] sm:$0xff] %v5191_v60 }
 0x51a   : > { %6372 = shalt.err (!%p6369_p11)
}
 0x51b   : > { %s6373_s16 = scalar_lea.hbm %s8170_s12, 8192  ;;  %s6377_s18 = scalar_lea.hbm %s8232_s7, 16384 }
 0x51c   : > { %p6374_p0 = scmp.ne.s32.totalorder %s8170_s12, %s6373_s16  ;;  %p6378_p6 = scmp.lt.u32.totalorder %s8170_s12, %s8232_s7 }
 0x51d   : > { %p6379_p7 = scmp.lt.u32.totalorder %s6377_s18, %s6373_s16  ;;  %p6381_p8 = scmp.lt.u32.totalorder %s6373_s16, %s8170_s12 }
 0x51e   : > { %p6375_p4 = pnand %p6374_p0, %p8325_p12 }
 0x51f   : > { %p6380_p2 = por %p6379_p7, %p6378_p6 }
 0x520   : > { %p6376_p13 = pneg %p6375_p4 }
 0x521   : > { %p6382_p1 = por %p6381_p8, %p6380_p2 }
 0x523   : > { %p6383_p10 = pnand %p6382_p1, %p6376_p13 }
 0x525   : > { %6386 = shalt.err (!%p6383_p10)
}
 0x526   : > { %s6457_s17 = smov 256   ;;  %s6458_s25 = smov 16  }
 0x527   : > { %5871 = dma.vmem_to_hbm [thread:$0]  (%p8325_p12), %s8172_s26, 8192, %s8170_s12, %s5257_s8, %s6457_s17, %s6457_s17, %s6458_s25  }
 0x528 PF: > { %s5286_s11 = sand.u32 1, %s6425_s28   ;;  %p8326_p3 = scmp.ne.s32.totalorder %s8266_s14, 0 }
 0x529   : > { %p8327_p5 = scmp.ge.s32.totalorder %s6445_s0, 2  ;;  %s5287_s13 = scalar_lea.sflag [#allocation7], %s5286_s11 }
 0x52b   : > { %p5885_p9 = pnand %p8327_p5, %p8326_p3 }
 0x52d   : > { %6420 = dma.done.wait (!%p5885_p9), %s5287_s13, 8192  }
 0x52e   : > { %6422 = vsyncadd (!%p5885_p9), %s5287_s13, 4294959104  ;;  %s26_s0 = sadd.s32 1, %s6445_s0   ;;  %s8328_s28 = smov %s6429_s29 }
 0x52f   : > { %p23_p11 = scmp.ge.s32.totalorder %s26_s0, 4   ;;  %s8329_s29 = smov %s6433_s30 }
 0x530   : > { %s8330_s30 = smov %s6647_s27  ;;  %s8331_s8 = smov %s6441_s9 }
 0x531   : > { %s8332_s9 = smov %s8334_s22  ;;  %25 = sbr.rel (!%p23_p11) target bundleno = 10 (0xa), region = 114 }
 0x538   :  { %5292 = vsyncpa [#allocation6], 1 }
 0x539   :  { %5294 = vsyncpa [#allocation6 + $0x1], 1 }
 0x53a   :  { %5295 = vsyncpa [#allocation9], 1 }
 0x53b   :  { %5296 = vsyncpa [#allocation7], 1 }
 0x53c   :  { %5298 = vsyncpa [#allocation7 + $0x1], 1 }

// kernel: tpu_custom_call.1
= control target key start
LH: loop header
LB: loop body
LE: loop exit
PB: predicated region body
PF: predicated region fallthrough
CT: control target
= control target key end

     0   :  { %s8225_s0 = inlined_call_operand.<no memory space> [shape: f32[1], index: 0, kind: input, shape index: {}]   ;;  %s8226_s1 = inlined_call_operand.<no memory space> [shape: f32[1], index: 1, kind: input, shape index: {}]   ;;  %s8227_s2 = inlined_call_operand.hbm [shape: f32[512,256], index: 2, kind: input, shape index: {}]   ;;  %s8228_s3 = inlined_call_operand.hbm [shape: bf16[256,1024], index: 3, kind: input, shape index: {}]   ;;  %s8229_s4 = inlined_call_operand.vmem [shape: f32[1,1024], index: 4, kind: input, shape index: {}]   ;;  %s8230_s5 = inlined_call_operand.hbm [shape: bf16[1024,256], index: 5, kind: input, shape index: {}]   ;;  %s8231_s6 = inlined_call_operand.vmem [shape: f32[1,256], index: 6, kind: input, shape index: {}]   ;;  %s8232_s7 = inlined_call_operand.hbm [shape: f32[512,256], index: 7, kind: output, shape index: {}]  }
   0x1   :  { %12 = sst [smem:[#allocation3]] %s8225_s0 }
   0x2   :  { %13 = sst [smem:[#allocation4]] %s8226_s1 }
   0x3   :  { %14 = vsyncpa [#allocation6], 0 }
   0x4   :  { %16 = vsyncpa [#allocation6 + $0x1], 0 }
   0x5   :  { %17 = vsyncpa [#allocation9], 0 }
   0x6   :  { %18 = vsyncpa [#allocation7], 0 }
   0x7   :  { %20 = vsyncpa [#allocation7 + $0x1], 0  ;;  %s6505_s28 = smov 0   ;;  %s6507_s29 = smov 0  }
   0x8   :  { %s6509_s30 = smov 0   ;;  %s6511_s8 = smov 0  }
   0x9   :  { %s6513_s9 = smov 0   ;;  %s6515_s0 = smov 0  }
   0xa LB: > { %s5387_s1 = sadd.s32 4294967295, %s6445_s0   ;;  %s5388_s10 = sadd.s32 4294967294, %s6445_s0   ;;  %s6445_s0 = sphi %s6515_s0, %s26_s0   ;;  %s6441_s9 = sphi %s6513_s9, %s8332_s9   ;;  %s6437_s8 = sphi %s6511_s8, %s8331_s8   ;;  %s6433_s30 = sphi %s6509_s30, %s8330_s30   ;;  %s6429_s29 = sphi %s6507_s29, %s8329_s29   ;;  %s6425_s28 = sphi %s6505_s28, %s8328_s28  }
   0xb   : > { %p100_p0 = scmp.ne.s32.totalorder %s6429_s29, %s6425_s28  ;;  %p6539_p1 = scmp.eq.s32.totalorder %s5387_s1, 0 }
   0xc   : > { %p6543_p2 = scmp.eq.s32.totalorder %s5387_s1, 1  ;;  %p229_p3 = scmp.eq.s32.totalorder %s5388_s10, 1 }
   0xd   : > { %s8263_s11 = scalar_select %p6539_p1, 1, 0 }
   0xe   : > { %p6549_p4 = por %p6539_p1, %p100_p0  ;;  %p5389_p5 = scmp.ge.s32.totalorder %s6445_s0, 1 }
   0xf   : > { %p6554_p6 = por %p229_p3, %p100_p0  ;;  %p236_p7 = scmp.lt.s32.totalorder %s6445_s0, 3 }
  0x10   : > { %s8265_s13 = scalar_select %p6549_p4, 1, 0 }
  0x11   : > { %s8266_s14 = scalar_select %p6554_p6, 1, 0 }
  0x12   : > { %p6559_p8 = pnand %p5389_p5, %p236_p7  ;;  %s6447_s16 = smov [#allocation8]  }
  0x13   : > { %s257_s17 = sshll.u32 %s6447_s16, 4  ;;  %s6448_s19 = smov [#allocation10]   ;;  %s6563_s17 = int_to_ptr.vmem [resolvable:$true] %s257_s17 }
  0x14   : > { %p5873_p9 = pneg %p6559_p8  ;;  %s282_s20 = sshll.u32 %s6448_s19, 4  ;;  %s6574_s20 = int_to_ptr.vmem [resolvable:$true] %s282_s20 }
  0x15   : > { %s6273_s23 = scalar_lea.hbm %s8228_s3, 16384 }
  0x16   : > { %p6570_p11 = pnand %p5873_p9, %p6539_p1  ;;  %p6274_p12 = scmp.ne.s32.totalorder %s8228_s3, %s6273_s23 }
  0x17   : > { %p6280_p5 = scmp.lt.u32.totalorder %s6273_s23, %s8228_s3 }
  0x18   : > { %p6275_p13 = pneg %p6570_p11 }
  0x1a   : > { %p6276_p0 = pnand %p6275_p13, %p6274_p12 }
  0x1c   : > { %p6277_p3 = pneg %p6276_p0 }
  0x1e   : > { %p6282_p7 = pnand %p6280_p5, %p6277_p3 }
  0x20   : > { %6285 = shalt.err (!%p6282_p7)
}
  0x21   : > { %s6286_s1 = scalar_lea.vmem %s6563_s17, 16384  ;;  %p6294_p1 = scmp.lt.s32.totalorder %s6563_s17, %s6563_s17 }
  0x22   : > { %p6287_p9 = scmp.ne.s32.totalorder %s6563_s17, %s6286_s1  ;;  %p6295_p12 = scmp.lt.s32.totalorder %s6286_s1, %s6286_s1 }
  0x24   : > { %p6289_p10 = pnand %p6287_p9, %p6275_p13  ;;  %p6296_p0 = por %p6295_p12, %p6294_p1 }
  0x26   : > { %p6290_p6 = pneg %p6289_p10 }
  0x28   : > { %p6297_p4 = pnand %p6296_p0, %p6290_p6 }
  0x2a   : > { %6300 = shalt.err (!%p6297_p4)
}
  0x2b   : > { %s6449_s10 = smov 512   ;;  %s6450_s16 = smov 32  }
  0x2c   : > { %5876 = dma.hbm_to_vmem [thread:$0]  (!%p6570_p11), %s8228_s3, 16384, %s6563_s17, [#allocation9], %s6449_s10, %s6449_s10, %s6450_s16  }
  0x2d   : > { %s6301_s24 = scalar_lea.hbm %s8230_s5, 16384 }
  0x2e   : > { %p6302_p1 = scmp.ne.s32.totalorder %s8230_s5, %s6301_s24  ;;  %p6308_p10 = scmp.lt.u32.totalorder %s6301_s24, %s8230_s5 }
  0x30   : > { %p6304_p4 = pnand %p6302_p1, %p6275_p13 }
  0x32   : > { %p6305_p6 = pneg %p6304_p4 }
  0x34   : > { %p6310_p3 = pnand %p6308_p10, %p6305_p6 }
  0x36   : > { %6313 = shalt.err (!%p6310_p3)
}
  0x37   : > { %s6314_s17 = scalar_lea.vmem %s6574_s20, 16384  ;;  %p6322_p12 = scmp.lt.s32.totalorder %s6574_s20, %s6574_s20 }
  0x38   : > { %p6315_p5 = scmp.ne.s32.totalorder %s6574_s20, %s6314_s17  ;;  %p6323_p0 = scmp.lt.s32.totalorder %s6314_s17, %s6314_s17 }
  0x3a   : > { %p6317_p7 = pnand %p6315_p5, %p6275_p13  ;;  %p6324_p1 = por %p6323_p0, %p6322_p12 }
  0x3c   : > { %p6318_p9 = pneg %p6317_p7 }
  0x3e   : > { %p6325_p4 = pnand %p6324_p1, %p6318_p9 }
  0x40   : > { %6328 = shalt.err (!%p6325_p4)
}
  0x41   : > { %s6451_s10 = smov 128   ;;  %s6452_s16 = smov 8  }
  0x42   : > { %5879 = dma.hbm_to_vmem [thread:$0]  (!%p6570_p11), %s8230_s5, 16384, %s6574_s20, [#allocation9], %s6451_s10, %s6451_s10, %s6452_s16  }
  0x43   : > { %s38_s22 = sadd.s32 1, %s6441_s9  ;;  %s87_s23 = sadd.s32 1, %s6433_s30 }
  0x44   : > { %p40_p13 = scmp.ge.s32.totalorder %s38_s22, 2  ;;  %p94_p6 = scmp.ne.s32.totalorder %s6433_s30, %s6429_s29 }
  0x45   : > { %p95_p10 = scmp.eq.s32.totalorder %s6445_s0, 0  ;;  %p5890_p3 = scmp.lt.s32.totalorder %s6445_s0, 2 }
  0x46   : > { %s8334_s22 = smov (%p40_p13, %s38_s22), 0  ;;  %p6638_p7 = por %p6543_p2, %p94_p6 }
  0x47   : > { %p96_p5 = por %p95_p10, %p94_p6  ;;  %s84_s18 = ssub.s32 %s6441_s9, %s8334_s22 }
  0x48   : > { %s8269_s24 = scalar_select %p6638_p7, 1, 0 }
  0x49   : > { %s299_s25 = sand.u32 1, %s6433_s30   ;;  %p85_p9 = scmp.eq.s32.totalorder %s84_s18, 0 }
  0x4a   : > { %s5394_s20 = sshll.u32 %s299_s25, 9  ;;  %s5666_s26 = sshll.u32 %s6441_s9, 13 }
  0x4b   : > { %s6647_s27 = scalar_select %p85_p9, %s6433_s30, %s87_s23  }
  0x4c   : > { %s6652_s10 = scalar_lea.hbm %s8227_s2, %s5666_s26  ;;  %s303_s12 = scalar_lea.vmem [#allocation5], %s5394_s20 }
  0x4d   : > { %s311_s16 = sshll.u32 %s303_s12, 4  ;;  %p6656_p2 = pnand %p5890_p3, %p96_p5  ;;  %s6660_s16 = int_to_ptr.vmem [resolvable:$true] %s311_s16 }
  0x4e   : > { %s6662_s21 = scalar_lea.sflag [#allocation6], %s299_s25  ;;  %s6329_s23 = scalar_lea.hbm %s6652_s10, 8192 }
  0x4f   : > { %p6330_p11 = scmp.ne.s32.totalorder %s6652_s10, %s6329_s23  ;;  %p6331_p12 = pneg %p6656_p2 }
  0x50   : > { %s6334_s26 = scalar_lea.hbm %s8227_s2, 16384  ;;  %p6335_p4 = scmp.lt.u32.totalorder %s6652_s10, %s8227_s2 }
  0x51   : > { %p6332_p0 = pnand %p6331_p12, %p6330_p11  ;;  %p6336_p13 = scmp.lt.u32.totalorder %s6334_s26, %s6329_s23 }
  0x52   : > { %p6338_p10 = scmp.lt.u32.totalorder %s6329_s23, %s6652_s10 }
  0x53   : > { %p6333_p1 = pneg %p6332_p0  ;;  %p6337_p6 = por %p6336_p13, %p6335_p4 }
  0x55   : > { %p6339_p3 = por %p6338_p10, %p6337_p6 }
  0x57   : > { %p6340_p5 = pnand %p6339_p3, %p6333_p1 }
  0x59   : > { %6343 = shalt.err (!%p6340_p5)
}
  0x5a   : > { %s6344_s25 = scalar_lea.vmem %s6660_s16, 8192  ;;  %s6453_s12 = smov [#allocation5]  }
  0x5b   : > { %p6345_p9 = scmp.ne.s32.totalorder %s6660_s16, %s6344_s25  ;;  %s6349_s18 = sshll.u32 %s6453_s12, 4  ;;  %s6350_s18 = int_to_ptr.vmem [resolvable:$false] %s6349_s18 }
  0x5c   : > { %s6351_s20 = scalar_lea.vmem %s6350_s18, 16384  ;;  %p6352_p7 = scmp.lt.s32.totalorder %s6660_s16, %s6350_s18 }
  0x5d   : > { %p6347_p11 = pnand %p6345_p9, %p6331_p12  ;;  %p6353_p4 = scmp.lt.s32.totalorder %s6351_s20, %s6344_s25 }
  0x5f   : > { %p6348_p0 = pneg %p6347_p11  ;;  %p6354_p13 = por %p6353_p4, %p6352_p7 }
  0x61   : > { %p6355_p6 = pnand %p6354_p13, %p6348_p0 }
  0x63   : > { %6358 = shalt.err (!%p6355_p6)
}
  0x64   : > { %s6454_s23 = smov 256   ;;  %s6455_s26 = smov 16  }
  0x65   : > { %5883 = dma.hbm_to_vmem [thread:$0]  (!%p6656_p2), %s6652_s10, 8192, %s6660_s16, %s6662_s21, %s6454_s23, %s6454_s23, %s6455_s26  }
  0x66   : > { %323 = sbr.rel (%p6559_p8) target bundleno = 1320 (0x528), region = 48 }
  0x6d   : > { %s6693_s1 = sand.u32 1, %s6429_s29   ;;  %p8271_p7 = scmp.ne.s32.totalorder %s8265_s13, 0 }
  0x6e   : > { %s5399_s17 = sshll.u32 %s6693_s1, 9  ;;  %s326_s25 = scalar_lea.sflag [#allocation6], %s6693_s1 }
  0x6f   : > { %s6699_s12 = scalar_lea.vmem [#allocation5], %s5399_s17 }
  0x70   : > { %6412 = dma.done.wait (%p8271_p7), %s326_s25, 8192  }
  0x71   : > { %6414 = vsyncadd (%p8271_p7), %s326_s25, 4294959104  ;;  %p8272_p2 = scmp.ne.s32.totalorder %s8263_s11, 0 }
  0x73   : > { %6416 = dma.done.wait (%p8272_p2), [#allocation9], 32768  }
  0x74   : > { %6418 = vsyncadd (%p8272_p2), [#allocation9], 4294934528  ;;  %v545_v0 = vld [vmem:[#allocation8] sm:$0xff]  ;;  %v450_v17 = vld [vmem:[%s6699_s12 + $0x8] sm:$0xff]  ;;  %s5060_s21 = sld [smem:[#allocation3]]  ;;  %s7796_s20 = scalar_lea.vmem [#allocation11], %s5399_s17 }
  0x75   : > { %v549_v1 = vld [vmem:[#allocation8 + $0x20] sm:$0xff]  ;;  %v452_v18 = vld [vmem:[%s6699_s12 + $0x18] sm:$0xff]  ;;  %s5126_s18 = sld [smem:[#allocation4]]  ;;  %s5668_s23 = sshll.u32 %s6437_s8, 13 }
  0x76   : > { %v553_v2 = vld [vmem:[#allocation8 + $0x40] sm:$0xff]  ;;  %v5404_v3 = vcombine.high %v545_v0, %v549_v1  ;;  %v5403_v4 = vcombine.low %v545_v0, %v549_v1  ;;  %v6711_v20 = vpack.c.bf16 %v452_v18, %v450_v17  ;;  %v546_v1 = vld [vmem:[#allocation8 + $0x8] sm:$0xff]  ;;  %s5271_s26 = sshll.u32 %s7796_s20, 4  ;;  %s5257_s8 = scalar_lea.sflag [#allocation7], %s6693_s1  ;;  %s8172_s26 = int_to_ptr.vmem [resolvable:$true] %s5271_s26 }
  0x77   : > { %v557_v5 = vld [vmem:[#allocation8 + $0x60] sm:$0xff]  ;;  %s6359_s11 = scalar_lea.vmem %s8172_s26, 8192  ;;  %p8325_p12 = scmp.ne.s32.totalorder %s8269_s24, 0 }
  0x78   : > { %v5412_v6 = vcombine.high %v553_v2, %v557_v5  ;;  %v561_v7 = vld [vmem:[#allocation8 + $0x80] sm:$0xff]  ;;  %1355 = vmatprep.subr.bf16.mxu1 %v5404_v3  ;;  %v5411_v9 = vcombine.low %v553_v2, %v557_v5  ;;  %1387 = vmatprep.mubr.bf16.mxu1 %v6711_v20  ;;  %v550_v2 = vld [vmem:[#allocation8 + $0x28] sm:$0xff]  ;;  %v451_v5 = vld [vmem:[%s6699_s12 + $0x10] sm:$0xff]  ;;  %p6360_p8 = scmp.ne.s32.totalorder %s8172_s26, %s6359_s11  ;;  %s6456_s13 = smov [#allocation11]  }
  0x79   : > { %v565_v8 = vld [vmem:[#allocation8 + $0xa0] sm:$0xff]  ;;  %1356 = vmatpush1.bf16.msra.mxu1 %v5403_v4  ;;  %s6363_s15 = sshll.u32 %s6456_s13, 4  ;;  %s6364_s15 = int_to_ptr.vmem [resolvable:$false] %s6363_s15 }
  0x7a   : > { %1357 = vmatprep.subr.bf16.mxu1 %v5412_v6  ;;  %v5420_v10 = vcombine.high %v561_v7, %v565_v8  ;;  %v569_v11 = vld [vmem:[#allocation8 + $0xc0] sm:$0xff]  ;;  %v5419_v13 = vcombine.low %v561_v7, %v565_v8  ;;  %v454_v6 = vld [vmem:[%s6699_s12 + $0x28] sm:$0xff]  ;;  %v456_v7 = vld [vmem:[%s6699_s12 + $0x38] sm:$0xff]  ;;  %p6361_p1 = pnand %p6360_p8, %p8325_p12  ;;  %s6365_s10 = scalar_lea.vmem %s6364_s15, 16384 }
  0x7b   : > { %v573_v12 = vld [vmem:[#allocation8 + $0xe0] sm:$0xff]  ;;  %p6366_p3 = scmp.lt.s32.totalorder %s8172_s26, %s6364_s15  ;;  %p6367_p5 = scmp.lt.s32.totalorder %s6365_s10, %s6359_s11 }
  0x7c   : > { %v5428_v14 = vcombine.high %v569_v11, %v573_v12  ;;  %v577_v15 = vld [vmem:[#allocation8 + $0x100] sm:$0xff]  ;;  %v5427_v19 = vcombine.low %v569_v11, %v573_v12  ;;  %v5406_v11 = vcombine.high %v546_v1, %v550_v2  ;;  %p6362_p10 = pneg %p6361_p1 }
  0x7d   : > { %1358 = vmatpush1.bf16.msra.mxu1 %v5411_v9  ;;  %v581_v16 = vld [vmem:[#allocation8 + $0x120] sm:$0xff]  ;;  %v554_v9 = vld [vmem:[#allocation8 + $0x48] sm:$0xff]  ;;  %p6368_p9 = por %p6367_p5, %p6366_p3 }
  0x7e   : > { %1359 = vmatprep.subr.bf16.mxu1 %v5420_v10  ;;  %v5436_v21 = vcombine.high %v577_v15, %v581_v16  ;;  %v585_v22 = vld [vmem:[#allocation8 + $0x140] sm:$0xff]  ;;  %v5435_v24 = vcombine.low %v577_v15, %v581_v16  ;;  %v558_v10 = vld [vmem:[#allocation8 + $0x68] sm:$0xff] }
  0x7f   : > { %v589_v23 = vld [vmem:[#allocation8 + $0x160] sm:$0xff]  ;;  %v562_v15 = vld [vmem:[#allocation8 + $0x88] sm:$0xff]  ;;  %v5414_v17 = vcombine.high %v554_v9, %v558_v10  ;;  %p6369_p11 = pnand %p6368_p9, %p6362_p10 }
  0x80   : > { %v5444_v25 = vcombine.high %v585_v22, %v589_v23  ;;  %v593_v26 = vld [vmem:[#allocation8 + $0x180] sm:$0xff]  ;;  %v5443_v28 = vcombine.low %v585_v22, %v589_v23  ;;  %v566_v16 = vld [vmem:[#allocation8 + $0xa8] sm:$0xff]  ;;  %v460_v22 = vld [vmem:[%s6699_s12 + $0x58] sm:$0xff] }
  0x81   : > { %1360 = vmatpush1.bf16.msra.mxu1 %v5419_v13  ;;  %v597_v27 = vld [vmem:[#allocation8 + $0x1a0] sm:$0xff]  ;;  %v5405_v13 = vcombine.low %v546_v1, %v550_v2  ;;  %v6727_v23 = vld [vmem:[#allocation8 + $0x10] sm:$0xff] }
  0x82   : > { %1361 = vmatprep.subr.bf16.mxu1 %v5428_v14  ;;  %v5452_v29 = vcombine.high %v593_v26, %v597_v27  ;;  %v601_v30 = vld [vmem:[#allocation8 + $0x1c0] sm:$0xff]  ;;  %v5451_v32 = vcombine.low %v593_v26, %v597_v27  ;;  %v6720_v14 = vpack.c.bf16 %v456_v7, %v454_v6  ;;  %v570_v26 = vld [vmem:[#allocation8 + $0xc8] sm:$0xff]  ;;  %v467_v2 = vld [vmem:[%s6699_s12 + $0x90] sm:$0xff] }
  0x83   : > { %v605_v31 = vld [vmem:[#allocation8 + $0x1e0] sm:$0xff]  ;;  %v574_v27 = vld [vmem:[#allocation8 + $0xe8] sm:$0xff]  ;;  %v472_v6 = vld [vmem:[%s6699_s12 + $0xb8] sm:$0xff] }
  0x84   : > { %v5460_v33 = vcombine.high %v601_v30, %v605_v31  ;;  %v609_v34 = vld [vmem:[#allocation8 + $0x200] sm:$0xff]  ;;  %v5459_v36 = vcombine.low %v601_v30, %v605_v31 }
  0x85   : > { %1362 = vmatpush1.bf16.msra.mxu1 %v5427_v19  ;;  %v613_v35 = vld [vmem:[#allocation8 + $0x220] sm:$0xff]  ;;  %v455_v19 = vld [vmem:[%s6699_s12 + $0x30] sm:$0xff] }
  0x86   : > { %1363 = vmatprep.subr.bf16.mxu1 %v5436_v21  ;;  %v5468_v37 = vcombine.high %v609_v34, %v613_v35  ;;  %v617_v38 = vld [vmem:[#allocation8 + $0x240] sm:$0xff]  ;;  %v5467_v40 = vcombine.low %v609_v34, %v613_v35  ;;  %v458_v21 = vld [vmem:[%s6699_s12 + $0x48] sm:$0xff]  ;;  %v5430_v35 = vcombine.high %v570_v26, %v574_v27 }
  0x87   : > { %v621_v39 = vld [vmem:[#allocation8 + $0x260] sm:$0xff]  ;;  %v6736_v31 = vpack.c.bf16 %v460_v22, %v458_v21  ;;  %v582_v34 = vld [vmem:[#allocation8 + $0x128] sm:$0xff]  ;;  %v471_v21 = vld [vmem:[%s6699_s12 + $0xb0] sm:$0xff] }
  0x88   : > { %v5476_v41 = vcombine.high %v617_v38, %v621_v39  ;;  %v625_v42 = vld [vmem:[#allocation8 + $0x280] sm:$0xff]  ;;  %v5475_v44 = vcombine.low %v617_v38, %v621_v39  ;;  %v462_v38 = vld [vmem:[%s6699_s12 + $0x68] sm:$0xff]  ;;  %v464_v39 = vld [vmem:[%s6699_s12 + $0x78] sm:$0xff] }
  0x89   : > { %1364 = vmatpush1.bf16.msra.mxu1 %v5435_v24  ;;  %v629_v43 = vld [vmem:[#allocation8 + $0x2a0] sm:$0xff]  ;;  %v6729_v24 = vld [vmem:[#allocation8 + $0x30] sm:$0xff] }
  0x8a   : > { %1365 = vmatprep.subr.bf16.mxu1 %v5444_v25  ;;  %v5484_v45 = vcombine.high %v625_v42, %v629_v43  ;;  %v633_v46 = vld [vmem:[#allocation8 + $0x2c0] sm:$0xff]  ;;  %v5483_v48 = vcombine.low %v625_v42, %v629_v43  ;;  %v5413_v25 = vcombine.low %v554_v9, %v558_v10  ;;  %v590_v42 = vld [vmem:[#allocation8 + $0x168] sm:$0xff] }
  0x8b   : > { %v637_v47 = vld [vmem:[#allocation8 + $0x2e0] sm:$0xff]  ;;  %v622_v9 = vld [vmem:[#allocation8 + $0x268] sm:$0xff] }
  0x8c   : > { %v641_v49 = vld [vmem:[#allocation8 + $0x300] sm:$0xff]  ;;  %v5492_v51 = vcombine.high %v633_v46, %v637_v47  ;;  %v5491_v52 = vcombine.low %v633_v46, %v637_v47  ;;  %v594_v47 = vld [vmem:[#allocation8 + $0x188] sm:$0xff] }
  0x8d   : > { %1366 = vmatpush1.bf16.msra.mxu1 %v5443_v28  ;;  %v645_v50 = vld [vmem:[#allocation8 + $0x320] sm:$0xff]  ;;  %v5407_v28 = vcombine.low %v6727_v23, %v6729_v24 }
  0x8e   : > { %1367 = vmatprep.subr.bf16.mxu1 %v5452_v29  ;;  %v649_v53 = vld [vmem:[#allocation8 + $0x340] sm:$0xff]  ;;  %v5500_v55 = vcombine.high %v641_v49, %v645_v50  ;;  %v5499_v56 = vcombine.low %v641_v49, %v645_v50  ;;  %v5422_v29 = vcombine.high %v562_v15, %v566_v16 }
  0x8f   : > { %v653_v54 = vld [vmem:[#allocation8 + $0x360] sm:$0xff] }
  0x90   : > { %v657_v57 = vld [vmem:[#allocation8 + $0x380] sm:$0xff]  ;;  %v5508_v59 = vcombine.high %v649_v53, %v653_v54  ;;  %v5507_v60 = vcombine.low %v649_v53, %v653_v54  ;;  %v468_v53 = vld [vmem:[%s6699_s12 + $0x98] sm:$0xff] }
  0x91   : > { %1368 = vmatpush1.bf16.msra.mxu1 %v5451_v32  ;;  %v661_v58 = vld [vmem:[#allocation8 + $0x3a0] sm:$0xff]  ;;  %v5421_v32 = vcombine.low %v562_v15, %v566_v16  ;;  %v626_v16 = vld [vmem:[#allocation8 + $0x288] sm:$0xff] }
  0x92   : > { %1369 = vmatprep.subr.bf16.mxu1 %v5460_v33  ;;  %v665_v61 = vld [vmem:[#allocation8 + $0x3c0] sm:$0xff]  ;;  %v5516_v63 = vcombine.high %v657_v57, %v661_v58  ;;  %v5515_v0 = vcombine.low %v657_v57, %v661_v58  ;;  %v578_v33 = vld [vmem:[#allocation8 + $0x108] sm:$0xff] }
  0x93   : > { %v669_v62 = vld [vmem:[#allocation8 + $0x3e0] sm:$0xff]  ;;  %v5438_v43 = vcombine.high %v578_v33, %v582_v34  ;;  %v5437_v46 = vcombine.low %v578_v33, %v582_v34  ;;  %v634_v33 = vld [vmem:[#allocation8 + $0x2c8] sm:$0xff] }
  0x94   : > { %v5524_v3 = vcombine.high %v665_v61, %v669_v62  ;;  %v449_v4 = vld [vmem:[%s6699_s12] sm:$0xff]  ;;  %v5523_v8 = vcombine.low %v665_v61, %v669_v62  ;;  %v610_v62 = vld [vmem:[#allocation8 + $0x208] sm:$0xff] }
  0x95   : > { %1370 = vmatpush1.bf16.msra.mxu1 %v5459_v36  ;;  %v6718_v12 = vpack.c.bf16 %v451_v5, %v449_v4  ;;  %v453_v18 = vld [vmem:[%s6699_s12 + $0x20] sm:$0xff]  ;;  %v470_v5 = vld [vmem:[%s6699_s12 + $0xa8] sm:$0xff] }
  0x96   : > { %1371 = vmatprep.subr.bf16.mxu1 %v5468_v37  ;;  %v6734_v30 = vpack.c.bf16 %v455_v19, %v453_v18  ;;  %v457_v36 = vld [vmem:[%s6699_s12 + $0x40] sm:$0xff]  ;;  %v459_v37 = vld [vmem:[%s6699_s12 + $0x50] sm:$0xff]  ;;  %v638_v34 = vld [vmem:[#allocation8 + $0x2e8] sm:$0xff] }
  0x97   : > { %v461_v50 = vld [vmem:[%s6699_s12 + $0x60] sm:$0xff]  ;;  %v5955_v19 = vld [vmem:[#allocation10 + $0x14] ss:$8 sps:$4 sm:$0xff]  }
  0x98   : > { %v465_v1 = vld [vmem:[%s6699_s12 + $0x80] sm:$0xff] }
  0x99   : > { %1372 = vmatpush1.bf16.msra.mxu1 %v5467_v40  ;;  %v5429_v40 = vcombine.low %v570_v26, %v574_v27  ;;  %v5954_v4 = vld [vmem:[#allocation10] ss:$8 sps:$4 sm:$0xff]   ;;  %v6764_v10 = vpack.c.bf16 %v467_v2, %v465_v1  ;;  %v5958_v26 = vld [vmem:[#allocation10 + $0x24] ss:$8 sps:$4 sm:$0xff]   ;;  %v5967_v1 = vld [vmem:[#allocation10 + $0x54] ss:$8 sps:$4 sm:$0xff]  }
  0x9a   : > { %1373 = vmatprep.subr.bf16.mxu1 %v5476_v41  ;;  %v586_v41 = vld [vmem:[#allocation8 + $0x148] sm:$0xff]  ;;  %v469_v18 = vld [vmem:[%s6699_s12 + $0xa0] sm:$0xff]  ;;  %v479_v2 = vld [vmem:[%s6699_s12 + $0xf0] sm:$0xff] }
  0x9b   : > { %v5446_v49 = vcombine.high %v586_v41, %v590_v42  ;;  %v5445_v54 = vcombine.low %v586_v41, %v590_v42  ;;  %v474_v27 = vld [vmem:[%s6699_s12 + $0xc8] sm:$0xff]  ;;  %v473_v42 = vld [vmem:[%s6699_s12 + $0xc0] sm:$0xff] }
  0x9c   : > { %v646_v41 = vld [vmem:[#allocation8 + $0x328] sm:$0xff] }
  0x9d   : > { %1374 = vmatpush1.bf16.msra.mxu1 %v5475_v44  ;;  %v6744_v44 = vpack.c.bf16 %v459_v37, %v457_v36  ;;  %v6774_v36 = vpack.c.bf16 %v471_v21, %v469_v18  ;;  %v481_v21 = vld [vmem:[%s6699_s12 + $0x100] sm:$0xff] }
  0x9e   : > { %1375 = vmatprep.subr.bf16.mxu1 %v5484_v45  ;;  %v6746_v45 = vpack.c.bf16 %v464_v39, %v462_v38  ;;  %v5494_v39 = vcombine.high %v634_v33, %v638_v34 }
  0xa1   : > { %1376 = vmatpush1.bf16.msra.mxu1 %v5483_v48  ;;  %v598_v48 = vld [vmem:[#allocation8 + $0x1a8] sm:$0xff] }
  0xa2   : > { %1377 = vmatprep.subr.bf16.mxu1 %v5492_v51  ;;  %v463_v51 = vld [vmem:[%s6699_s12 + $0x70] sm:$0xff]  ;;  %v5454_v57 = vcombine.high %v594_v47, %v598_v48 }
  0xa3   : > { %v6754_v58 = vpack.c.bf16 %v463_v51, %v461_v50  ;;  %v478_v50 = vld [vmem:[%s6699_s12 + $0xe8] sm:$0xff]  ;;  %v480_v51 = vld [vmem:[%s6699_s12 + $0xf8] sm:$0xff] }
  0xa5   : > { %1378 = vmatpush1.bf16.msra.mxu1 %v5491_v52  ;;  %v466_v52 = vld [vmem:[%s6699_s12 + $0x88] sm:$0xff] }
  0xa6   : > { %1379 = vmatprep.subr.bf16.mxu1 %v5500_v55  ;;  %v602_v55 = vld [vmem:[#allocation8 + $0x1c8] sm:$0xff] }
  0xa9   : > { %1380 = vmatpush1.bf16.msra.mxu1 %v5499_v56  ;;  %v606_v56 = vld [vmem:[#allocation8 + $0x1e8] sm:$0xff] }
  0xaa   : > { %1381 = vmatprep.subr.bf16.mxu1 %v5508_v59  ;;  %v6756_v59 = vpack.c.bf16 %v468_v53, %v466_v52  ;;  %v5462_v61 = vcombine.high %v602_v55, %v606_v56  ;;  %v650_v53 = vld [vmem:[#allocation8 + $0x348] sm:$0xff] }
  0xad   : > { %1382 = vmatpush1.bf16.msra.mxu1 %v5507_v60  ;;  %v5453_v60 = vcombine.low %v594_v47, %v598_v48  ;;  %v5493_v47 = vcombine.low %v634_v33, %v638_v34  ;;  %v5963_v48 = vld [vmem:[#allocation10 + $0x30] ss:$8 sps:$4 sm:$0xff]   ;;  %v5408_v34 = vcombine.high %v6727_v23, %v6729_v24 }
  0xae   : > { %1383 = vmatprep.subr.bf16.mxu1 %v5516_v63  ;;  %v614_v63 = vld [vmem:[#allocation8 + $0x228] sm:$0xff]  ;;  %v488_v33 = vld [vmem:[%s6699_s12 + $0x138] sm:$0xff]  ;;  %v579_v23 = vld [vmem:[#allocation8 + $0x110] sm:$0xff] }
  0xaf   : > { %v5470_v7 = vcombine.high %v610_v62, %v614_v63  ;;  %v583_v24 = vld [vmem:[#allocation8 + $0x130] sm:$0xff] }
  0xb1   : > { %1384 = vmatpush1.bf16.msra.mxu1 %v5515_v0  ;;  %v5952_v0 = vld [vmem:[#allocation10 + $0x4] ss:$8 sps:$4 sm:$0xff]  }
  0xb2   : > { %1385 = vmatprep.subr.bf16.mxu1 %v5524_v3  ;;  %v5461_v3 = vcombine.low %v602_v55, %v606_v56  ;;  %3343 = vmatprep.subr.bf16.mxu0 %v5952_v0  ;;  %v5966_v55 = vld [vmem:[#allocation10 + $0x40] ss:$8 sps:$4 sm:$0xff]  }
  0xb3   : > { %3344 = vmatpush1.bf16.msra.mxu0 %v5954_v4  ;;  %v477_v0 = vld [vmem:[%s6699_s12 + $0xe0] sm:$0xff]  ;;  %v5969_v4 = vld [vmem:[#allocation10 + $0x50] ss:$8 sps:$4 sm:$0xff]  }
  0xb4   : > { %3345 = vmatprep.subr.bf16.mxu0 %v5955_v19 }
  0xb5   : > { %1386 = vmatpush1.bf16.msra.mxu1 %v5523_v8  ;;  %v618_v8 = vld [vmem:[#allocation8 + $0x248] sm:$0xff] }
  0xb6   : > { %1548 = vmatprep.subr.bf16.mxu1 %v5406_v11  ;;  %v6766_v11 = vpack.c.bf16 %v472_v6, %v470_v5  ;;  %v5478_v15 = vcombine.high %v618_v8, %v622_v9  ;;  %v5477_v22 = vcombine.low %v618_v8, %v622_v9  ;;  %v5970_v5 = vld [vmem:[#allocation10 + $0x64] ss:$8 sps:$4 sm:$0xff]  }
  0xb7   : > { %v482_v6 = vld [vmem:[%s6699_s12 + $0x108] sm:$0xff] }
  0xb8   : > { %1388 = vmatmul.mubr.bf16.vlgmr.msra.gmra.mrb[0].mxu1 %v6718_v12  ;;  %v666_v9 = vld [vmem:[#allocation8 + $0x3c8] sm:$0xff] }
  0xb9   : > { %1549 = vmatpush1.bf16.msra.mxu1 %v5405_v13  ;;  %1397 = vmatprep.mubr.bf16.mxu1 %v6720_v14  ;;  %v5469_v13 = vcombine.low %v610_v62, %v614_v63  ;;  %v658_v62 = vld [vmem:[#allocation8 + $0x388] sm:$0xff] }
  0xba   : > { %1550 = vmatprep.subr.bf16.mxu1 %v5414_v17  ;;  %v630_v17 = vld [vmem:[#allocation8 + $0x2a8] sm:$0xff] }
  0xbb   : > { %v5485_v38 = vcombine.low %v626_v16, %v630_v17  ;;  %v662_v63 = vld [vmem:[#allocation8 + $0x3a8] sm:$0xff] }
  0xbc   : > { %v5518_v8 = vcombine.high %v658_v62, %v662_v63  ;;  %v5517_v18 = vcombine.low %v658_v62, %v662_v63  ;;  %v496_v62 = vld [vmem:[%s6699_s12 + $0x178] sm:$0xff]  ;;  %v5990_v63 = vld [vmem:[#allocation10 + $0xc0] ss:$8 sps:$4 sm:$0xff]  }
  0xbd   : > { %1551 = vmatpush1.bf16.msra.mxu1 %v5413_v25  ;;  %v5957_v25 = vld [vmem:[#allocation10 + $0x10] ss:$8 sps:$4 sm:$0xff]  }
  0xbe   : > { %1552 = vmatprep.subr.bf16.mxu1 %v5422_v29  ;;  %v476_v29 = vld [vmem:[%s6699_s12 + $0xd8] sm:$0xff]  ;;  %3346 = vmatpush1.bf16.msra.mxu0 %v5957_v25  ;;  %v483_v25 = vld [vmem:[%s6699_s12 + $0x110] sm:$0xff] }
  0xbf   : > { %3347 = vmatprep.subr.bf16.mxu0 %v5958_v26  ;;  %v6776_v37 = vpack.c.bf16 %v476_v29, %v474_v27  ;;  %v5975_v27 = vld [vmem:[#allocation10 + $0x70] ss:$8 sps:$4 sm:$0xff]   ;;  %v5976_v29 = vld [vmem:[#allocation10 + $0x84] ss:$8 sps:$4 sm:$0xff]  }
  0xc0   : > { %1398 = vmatmul.mubr.bf16.gmra.mrb[4].mxu1 %v6734_v30 }
  0xc1   : > { %1407 = vmatprep.mubr.bf16.mxu1 %v6736_v31  ;;  %1553 = vmatpush1.bf16.msra.mxu1 %v5421_v32  ;;  %v5486_v32 = vcombine.high %v626_v16, %v630_v17  ;;  %v6794_v16 = vpack.c.bf16 %v479_v2, %v477_v0  ;;  %v5991_v2 = vld [vmem:[#allocation10 + $0xd4] ss:$8 sps:$4 sm:$0xff]  }
  0xc2   : > { %1554 = vmatprep.subr.bf16.mxu1 %v5430_v35  ;;  %v5960_v35 = vld [vmem:[#allocation10 + $0x20] ss:$8 sps:$4 sm:$0xff]  }
  0xc3   : > { %3348 = vmatpush1.bf16.msra.mxu0 %v5960_v35  ;;  %v5978_v35 = vld [vmem:[#allocation10 + $0x80] ss:$8 sps:$4 sm:$0xff]  }
  0xc5   : > { %1555 = vmatpush1.bf16.msra.mxu1 %v5429_v40  ;;  %v642_v40 = vld [vmem:[#allocation8 + $0x308] sm:$0xff] }
  0xc6   : > { %1556 = vmatprep.subr.bf16.mxu1 %v5438_v43  ;;  %v5961_v43 = vld [vmem:[#allocation10 + $0x34] ss:$8 sps:$4 sm:$0xff]   ;;  %v5502_v52 = vcombine.high %v642_v40, %v646_v41 }
  0xc7   : > { %3349 = vmatprep.subr.bf16.mxu0 %v5961_v43  ;;  %v5981_v43 = vld [vmem:[#allocation10 + $0x90] ss:$8 sps:$4 sm:$0xff]  }
  0xc8   : > { %1408 = vmatmul.mubr.bf16.gmra.mrb[8].mxu1 %v6744_v44  ;;  %3350 = vmatpush1.bf16.msra.mxu0 %v5963_v48  ;;  %v492_v48 = vld [vmem:[%s6699_s12 + $0x158] sm:$0xff] }
  0xc9   : > { %1417 = vmatprep.mubr.bf16.mxu1 %v6746_v45  ;;  %1557 = vmatpush1.bf16.msra.mxu1 %v5437_v46  ;;  %v475_v46 = vld [vmem:[%s6699_s12 + $0xd0] sm:$0xff] }
  0xca   : > { %1558 = vmatprep.subr.bf16.mxu1 %v5446_v49  ;;  %v5964_v49 = vld [vmem:[#allocation10 + $0x44] ss:$8 sps:$4 sm:$0xff]   ;;  %v6784_v56 = vpack.c.bf16 %v475_v46, %v473_v42  ;;  %v487_v42 = vld [vmem:[%s6699_s12 + $0x130] sm:$0xff] }
  0xcb   : > { %3351 = vmatprep.subr.bf16.mxu0 %v5964_v49  ;;  %v5982_v46 = vld [vmem:[#allocation10 + $0xa4] ss:$8 sps:$4 sm:$0xff]   ;;  %v5984_v49 = vld [vmem:[#allocation10 + $0xa0] ss:$8 sps:$4 sm:$0xff]  }
  0xcc   : > { %3352 = vmatpush1.bf16.msra.mxu0 %v5966_v55  ;;  %v5987_v55 = vld [vmem:[#allocation10 + $0xb0] ss:$8 sps:$4 sm:$0xff]  }
  0xcd   : > { %1559 = vmatpush1.bf16.msra.mxu1 %v5445_v54  ;;  %v654_v54 = vld [vmem:[#allocation8 + $0x368] sm:$0xff]  ;;  %3353 = vmatprep.subr.bf16.mxu0 %v5967_v1 }
  0xce   : > { %1560 = vmatprep.subr.bf16.mxu1 %v5454_v57  ;;  %v6786_v57 = vpack.c.bf16 %v480_v51, %v478_v50 }
  0xd0   : > { %1418 = vmatmul.mubr.bf16.gmra.mrb[12].mxu1 %v6754_v58  ;;  %3354 = vmatpush1.bf16.msra.mxu0 %v5969_v4  ;;  %v495_v4 = vld [vmem:[%s6699_s12 + $0x170] sm:$0xff] }
  0xd1   : > { %1427 = vmatprep.mubr.bf16.mxu1 %v6756_v59  ;;  %1561 = vmatpush1.bf16.msra.mxu1 %v5453_v60  ;;  %v5501_v60 = vcombine.low %v642_v40, %v646_v41  ;;  %v485_v40 = vld [vmem:[%s6699_s12 + $0x120] sm:$0xff]  ;;  %v5979_v41 = vld [vmem:[#allocation10 + $0x94] ss:$8 sps:$4 sm:$0xff]  }
  0xd2   : > { %1562 = vmatprep.subr.bf16.mxu1 %v5462_v61  ;;  %v5510_v61 = vcombine.high %v650_v53, %v654_v54  ;;  %3355 = vmatprep.subr.bf16.mxu0 %v5970_v5  ;;  %v6816_v50 = vpack.c.bf16 %v487_v42, %v485_v40  ;;  %v5993_v5 = vld [vmem:[#allocation10 + $0xd0] ss:$8 sps:$4 sm:$0xff]   ;;  %v6002_v40 = vld [vmem:[#allocation10 + $0x104] ss:$8 sps:$4 sm:$0xff]  }
  0xd5   : > { %1563 = vmatpush1.bf16.msra.mxu1 %v5461_v3  ;;  %v5509_v3 = vcombine.low %v650_v53, %v654_v54  ;;  %v5985_v53 = vld [vmem:[#allocation10 + $0xb4] ss:$8 sps:$4 sm:$0xff]  }
  0xd6   : > { %1564 = vmatprep.subr.bf16.mxu1 %v5470_v7  ;;  %v484_v7 = vld [vmem:[%s6699_s12 + $0x118] sm:$0xff]  ;;  %v491_v54 = vld [vmem:[%s6699_s12 + $0x150] sm:$0xff] }
  0xd7   : > { %v6796_v17 = vpack.c.bf16 %v484_v7, %v482_v6  ;;  %v498_v6 = vld [vmem:[%s6699_s12 + $0x188] sm:$0xff]  ;;  %v500_v7 = vld [vmem:[%s6699_s12 + $0x198] sm:$0xff] }
  0xd8   : > { %1428 = vmatmul.mubr.bf16.gmra.mrb[16].mxu1 %v6764_v10 }
  0xd9   : > { %1437 = vmatprep.mubr.bf16.mxu1 %v6766_v11  ;;  %1565 = vmatpush1.bf16.msra.mxu1 %v5469_v13  ;;  %v670_v13 = vld [vmem:[#allocation8 + $0x3e8] sm:$0xff] }
  0xda   : > { %1566 = vmatprep.subr.bf16.mxu1 %v5478_v15  ;;  %v5972_v15 = vld [vmem:[#allocation10 + $0x60] ss:$8 sps:$4 sm:$0xff]   ;;  %v5526_v19 = vcombine.high %v666_v9, %v670_v13  ;;  %v5525_v26 = vcombine.low %v666_v9, %v670_v13  ;;  %v5994_v9 = vld [vmem:[#allocation10 + $0xe4] ss:$8 sps:$4 sm:$0xff]   ;;  %v6838_v13 = vpack.c.bf16 %v500_v7, %v498_v6  ;;  %v575_v6 = vld [vmem:[#allocation8 + $0xf0] sm:$0xff] }
  0xdb   : > { %3356 = vmatpush1.bf16.msra.mxu0 %v5972_v15  ;;  %v5996_v15 = vld [vmem:[#allocation10 + $0xe0] ss:$8 sps:$4 sm:$0xff]   ;;  %v6883_v7 = vld [vmem:[#allocation8 + $0x18] sm:$0xff] }
  0xdd   : > { %1567 = vmatpush1.bf16.msra.mxu1 %v5477_v22  ;;  %v5973_v22 = vld [vmem:[#allocation10 + $0x74] ss:$8 sps:$4 sm:$0xff]  }
  0xde   : > { %1568 = vmatprep.subr.bf16.mxu1 %v5486_v32  ;;  %v486_v32 = vld [vmem:[%s6699_s12 + $0x128] sm:$0xff]  ;;  %3357 = vmatprep.subr.bf16.mxu0 %v5973_v22  ;;  %v5999_v22 = vld [vmem:[#allocation10 + $0xf0] ss:$8 sps:$4 sm:$0xff]  }
  0xdf   : > { %3358 = vmatpush1.bf16.msra.mxu0 %v5975_v27 }
  0xe0   : > { %1438 = vmatmul.mubr.bf16.gmra.mrb[20].mxu1 %v6774_v36  ;;  %3359 = vmatprep.subr.bf16.mxu0 %v5976_v29 }
  0xe1   : > { %1447 = vmatprep.mubr.bf16.mxu1 %v6776_v37  ;;  %1569 = vmatpush1.bf16.msra.mxu1 %v5485_v38  ;;  %v6806_v38 = vpack.c.bf16 %v483_v25, %v481_v21  ;;  %v499_v21 = vld [vmem:[%s6699_s12 + $0x190] sm:$0xff]  ;;  %v502_v25 = vld [vmem:[%s6699_s12 + $0x1a8] sm:$0xff] }
  0xe2   : > { %1570 = vmatprep.subr.bf16.mxu1 %v5494_v39  ;;  %v6808_v39 = vpack.c.bf16 %v488_v33, %v486_v32  ;;  %v501_v32 = vld [vmem:[%s6699_s12 + $0x1a0] sm:$0xff]  ;;  %v503_v33 = vld [vmem:[%s6699_s12 + $0x1b0] sm:$0xff] }
  0xe3   : > { %3360 = vmatpush1.bf16.msra.mxu0 %v5978_v35  ;;  %v508_v35 = vld [vmem:[%s6699_s12 + $0x1d8] sm:$0xff] }
  0xe4   : > { %3361 = vmatprep.subr.bf16.mxu0 %v5979_v41  ;;  %v6856_v41 = vpack.c.bf16 %v503_v33, %v501_v32  ;;  %v595_v33 = vld [vmem:[#allocation8 + $0x190] sm:$0xff] }
  0xe5   : > { %1571 = vmatpush1.bf16.msra.mxu1 %v5493_v47  ;;  %v490_v47 = vld [vmem:[%s6699_s12 + $0x148] sm:$0xff] }
  0xe6   : > { %1572 = vmatprep.subr.bf16.mxu1 %v5502_v52  ;;  %v6818_v51 = vpack.c.bf16 %v492_v48, %v490_v47  ;;  %v489_v52 = vld [vmem:[%s6699_s12 + $0x140] sm:$0xff]  ;;  %v510_v47 = vld [vmem:[%s6699_s12 + $0x1e8] sm:$0xff]  ;;  %v512_v48 = vld [vmem:[%s6699_s12 + $0x1f8] sm:$0xff] }
  0xe7   : > { %3362 = vmatpush1.bf16.msra.mxu0 %v5981_v43  ;;  %v6826_v0 = vpack.c.bf16 %v491_v54, %v489_v52  ;;  %v505_v43 = vld [vmem:[%s6699_s12 + $0x1c0] sm:$0xff]  ;;  %v6868_v52 = vpack.c.bf16 %v512_v48, %v510_v47  ;;  %v511_v54 = vld [vmem:[%s6699_s12 + $0x1f0] sm:$0xff] }
  0xe8   : > { %1448 = vmatmul.mubr.bf16.gmra.mrb[24].mxu1 %v6784_v56  ;;  %3363 = vmatprep.subr.bf16.mxu0 %v5982_v46  ;;  %v507_v46 = vld [vmem:[%s6699_s12 + $0x1d0] sm:$0xff] }
  0xe9   : > { %1457 = vmatprep.mubr.bf16.mxu1 %v6786_v57  ;;  %1573 = vmatpush1.bf16.msra.mxu1 %v5501_v60  ;;  %v5988_v60 = vld [vmem:[#allocation10 + $0xc4] ss:$8 sps:$4 sm:$0xff]  }
  0xea   : > { %1574 = vmatprep.subr.bf16.mxu1 %v5510_v61  ;;  %v494_v61 = vld [vmem:[%s6699_s12 + $0x168] sm:$0xff] }
  0xeb   : > { %3364 = vmatpush1.bf16.msra.mxu0 %v5984_v49  ;;  %v6828_v1 = vpack.c.bf16 %v496_v62, %v494_v61  ;;  %v6866_v49 = vpack.c.bf16 %v507_v46, %v505_v43  ;;  %v559_v61 = vld [vmem:[#allocation8 + $0x70] sm:$0xff] }
  0xec   : > { %3365 = vmatprep.subr.bf16.mxu0 %v5985_v53  ;;  %v509_v53 = vld [vmem:[%s6699_s12 + $0x1e0] sm:$0xff]  ;;  %v603_v43 = vld [vmem:[#allocation8 + $0x1d0] sm:$0xff] }
  0xed   : > { %1575 = vmatpush1.bf16.msra.mxu1 %v5509_v3  ;;  %v493_v3 = vld [vmem:[%s6699_s12 + $0x160] sm:$0xff]  ;;  %v607_v46 = vld [vmem:[#allocation8 + $0x1f0] sm:$0xff] }
  0xee   : > { %1576 = vmatprep.subr.bf16.mxu1 %v5518_v8  ;;  %v6836_v8 = vpack.c.bf16 %v495_v4, %v493_v3  ;;  %v5464_v48 = vcombine.high %v603_v43, %v607_v46 }
  0xef   : > { %3366 = vmatpush1.bf16.msra.mxu0 %v5987_v55  ;;  %v6874_v55 = vpack.c.bf16 %v511_v54, %v509_v53  ;;  %v611_v53 = vld [vmem:[#allocation8 + $0x210] sm:$0xff] }
  0xf0   : > { %1458 = vmatmul.mubr.bf16.gmra.mrb[28].mxu1 %v6794_v16  ;;  %3367 = vmatprep.subr.bf16.mxu0 %v5988_v60  ;;  %v555_v60 = vld [vmem:[#allocation8 + $0x50] sm:$0xff] }
  0xf1   : > { %1467 = vmatprep.mubr.bf16.mxu1 %v6796_v17  ;;  %1577 = vmatpush1.bf16.msra.mxu1 %v5517_v18  ;;  %v5997_v18 = vld [vmem:[#allocation10 + $0xf4] ss:$8 sps:$4 sm:$0xff]   ;;  %v5416_v62 = vcombine.high %v555_v60, %v559_v61  ;;  %v5415_v3 = vcombine.low %v555_v60, %v559_v61  ;;  %v5463_v60 = vcombine.low %v603_v43, %v607_v46 }
  0xf2   : > { %1578 = vmatprep.subr.bf16.mxu1 %v5526_v19  ;;  %v497_v19 = vld [vmem:[%s6699_s12 + $0x180] sm:$0xff]  ;;  %v615_v54 = vld [vmem:[#allocation8 + $0x230] sm:$0xff] }
  0xf3   : > { %3368 = vmatpush1.bf16.msra.mxu0 %v5990_v63  ;;  %v6846_v27 = vpack.c.bf16 %v499_v21, %v497_v19  ;;  %v563_v63 = vld [vmem:[#allocation8 + $0x90] sm:$0xff]  ;;  %v5440_v21 = vcombine.high %v579_v23, %v583_v24  ;;  %v5472_v61 = vcombine.high %v611_v53, %v615_v54 }
  0xf4   : > { %3369 = vmatprep.subr.bf16.mxu0 %v5991_v2  ;;  %v567_v2 = vld [vmem:[#allocation8 + $0xb0] sm:$0xff] }
  0xf5   : > { %1579 = vmatpush1.bf16.msra.mxu1 %v5525_v26  ;;  %v504_v26 = vld [vmem:[%s6699_s12 + $0x1b8] sm:$0xff]  ;;  %v5424_v4 = vcombine.high %v563_v63, %v567_v2  ;;  %v663_v43 = vld [vmem:[#allocation8 + $0x3b0] sm:$0xff] }
  0xf6   : > { %1741 = vmatprep.subr.bf16.mxu1 %v5408_v34  ;;  %v6848_v29 = vpack.c.bf16 %v504_v26, %v502_v25  ;;  %v506_v34 = vld [vmem:[%s6699_s12 + $0x1c8] sm:$0xff]  ;;  %v591_v25 = vld [vmem:[#allocation8 + $0x170] sm:$0xff]  ;;  %v5439_v26 = vcombine.low %v579_v23, %v583_v24 }
  0xf7   : > { %3370 = vmatpush1.bf16.msra.mxu0 %v5993_v5  ;;  %v6858_v42 = vpack.c.bf16 %v508_v35, %v506_v34  ;;  %v571_v5 = vld [vmem:[#allocation8 + $0xd0] sm:$0xff] }
  0xf8   : > { %1468 = vmatmul.mubr.bf16.gmra.mrb[32].mxu1 %v6806_v38  ;;  %3371 = vmatprep.subr.bf16.mxu0 %v5994_v9  ;;  %v6885_v9 = vld [vmem:[#allocation8 + $0x38] sm:$0xff]  ;;  %v5432_v19 = vcombine.high %v571_v5, %v575_v6  ;;  %v599_v34 = vld [vmem:[#allocation8 + $0x1b0] sm:$0xff] }
  0xf9   : > { %1477 = vmatprep.mubr.bf16.mxu1 %v6808_v39  ;;  %v5455_v47 = vcombine.low %v595_v33, %v599_v34  ;;  %v639_v23 = vld [vmem:[#allocation8 + $0x2f0] sm:$0xff] }
  0xfb   : > { %3372 = vmatpush1.bf16.msra.mxu0 %v5996_v15  ;;  %v5423_v15 = vcombine.low %v563_v63, %v567_v2  ;;  %v623_v63 = vld [vmem:[#allocation8 + $0x270] sm:$0xff]  ;;  %v5471_v2 = vcombine.low %v611_v53, %v615_v54 }
  0xfc   : > { %3373 = vmatprep.subr.bf16.mxu0 %v5997_v18  ;;  %v5409_v18 = vcombine.low %v6883_v7, %v6885_v9  ;;  %v671_v53 = vld [vmem:[#allocation8 + $0x3f0] sm:$0xff] }
  0xff   : > { %3374 = vmatpush1.bf16.msra.mxu0 %v5999_v22  ;;  %v587_v22 = vld [vmem:[#allocation8 + $0x150] sm:$0xff] }
 0x100   : > { %1478 = vmatmul.mubr.bf16.gmra.mrb[36].mxu1 %v6816_v50  ;;  %3536 = vmatprep.subr.bf16.mxu0 %v6002_v40  ;;  %v5448_v32 = vcombine.high %v587_v22, %v591_v25  ;;  %v5447_v35 = vcombine.low %v587_v22, %v591_v25  ;;  %v5456_v40 = vcombine.high %v595_v33, %v599_v34  ;;  %v647_v22 = vld [vmem:[#allocation8 + $0x330] sm:$0xff] }
 0x101   : > { %1487 = vmatprep.mubr.bf16.mxu1 %v6818_v51  ;;  %v655_v33 = vld [vmem:[#allocation8 + $0x370] sm:$0xff] }
 0x108   : > { %1488 = vmatmul.mubr.bf16.gmra.mrb[40].mxu1 %v6826_v0 }
 0x109   : > { %1497 = vmatprep.mubr.bf16.mxu1 %v6828_v1 }
 0x110   : > { %1498 = vmatmul.mubr.bf16.gmra.mrb[44].mxu1 %v6836_v8 }
 0x111   : > { %1507 = vmatprep.mubr.bf16.mxu1 %v6838_v13 }
 0x118   : > { %1508 = vmatmul.mubr.bf16.gmra.mrb[48].mxu1 %v6846_v27 }
 0x119   : > { %1517 = vmatprep.mubr.bf16.mxu1 %v6848_v29 }
 0x120   : > { %1518 = vmatmul.mubr.bf16.gmra.mrb[52].mxu1 %v6856_v41 }
 0x121   : > { %1527 = vmatprep.mubr.bf16.mxu1 %v6858_v42 }
 0x128   : > { %1528 = vmatmul.mubr.bf16.gmra.mrb[56].mxu1 %v6866_v49 }
 0x129   : > { %1537 = vmatprep.mubr.bf16.mxu1 %v6868_v52 }
 0x130   : > { %1538 = vmatmul.mubr.bf16.gmra.mrb[60].mxu1 %v6874_v55 }
 0x131   : > { %1580 = vmatprep.mubr.bf16.mxu1 %v6711_v20 }
 0x138   : > { %1581 = vmatmul.mubr.bf16.vlgmr.msra.gmra.mrb[64].mxu1 %v6718_v12 }
 0x139   : > { %1742 = vmatpush1.bf16.msra.mxu1 %v5407_v28  ;;  %1590 = vmatprep.mubr.bf16.mxu1 %v6720_v14  ;;  %v5431_v28 = vcombine.low %v571_v5, %v575_v6  ;;  %v631_v5 = vld [vmem:[#allocation8 + $0x2b0] sm:$0xff] }
 0x13a   : > { %1743 = vmatprep.subr.bf16.mxu1 %v5416_v62  ;;  %v619_v62 = vld [vmem:[#allocation8 + $0x250] sm:$0xff] }
 0x13b   : > { %v5479_v6 = vcombine.low %v619_v62, %v623_v63 }
 0x13d   : > { %1744 = vmatpush1.bf16.msra.mxu1 %v5415_v3  ;;  %v5480_v3 = vcombine.high %v619_v62, %v623_v63  ;;  %v5410_v62 = vcombine.high %v6883_v7, %v6885_v9  ;;  %v675_v63 = vlaneseq }
 0x13e   : > { %1745 = vmatprep.subr.bf16.mxu1 %v5424_v4  ;;  %v627_v4 = vld [vmem:[#allocation8 + $0x290] sm:$0xff] }
 0x13f   : > { %v5487_v24 = vcombine.low %v627_v4, %v631_v5 }
 0x140   : > { %1591 = vmatmul.mubr.bf16.gmra.mrb[68].mxu1 %v6734_v30 }
 0x141   : > { %1600 = vmatprep.mubr.bf16.mxu1 %v6736_v31  ;;  %1746 = vmatpush1.bf16.msra.mxu1 %v5423_v15  ;;  %v5488_v15 = vcombine.high %v627_v4, %v631_v5  ;;  %v6915_v4 = vld [vmem:[%s8229_s4] sm:$0xff] }
 0x142   : > { %1747 = vmatprep.subr.bf16.mxu1 %v5432_v19  ;;  %v635_v19 = vld [vmem:[#allocation8 + $0x2d0] sm:$0xff] }
 0x143   : > { %v5495_v25 = vcombine.low %v635_v19, %v639_v23 }
 0x145   : > { %1748 = vmatpush1.bf16.msra.mxu1 %v5431_v28  ;;  %v5496_v28 = vcombine.high %v635_v19, %v639_v23 }
 0x146   : > { %1749 = vmatprep.subr.bf16.mxu1 %v5440_v21  ;;  %v643_v21 = vld [vmem:[#allocation8 + $0x310] sm:$0xff] }
 0x147   : > { %v5503_v34 = vcombine.low %v643_v21, %v647_v22 }
 0x148   : > { %1601 = vmatmul.mubr.bf16.gmra.mrb[72].mxu1 %v6744_v44 }
 0x149   : > { %1610 = vmatprep.mubr.bf16.mxu1 %v6746_v45  ;;  %1750 = vmatpush1.bf16.msra.mxu1 %v5439_v26  ;;  %v5504_v26 = vcombine.high %v643_v21, %v647_v22 }
 0x14a   : > { %1751 = vmatprep.subr.bf16.mxu1 %v5448_v32  ;;  %v651_v32 = vld [vmem:[#allocation8 + $0x350] sm:$0xff] }
 0x14b   : > { %v5511_v46 = vcombine.low %v651_v32, %v655_v33 }
 0x14d   : > { %1752 = vmatpush1.bf16.msra.mxu1 %v5447_v35  ;;  %v5512_v35 = vcombine.high %v651_v32, %v655_v33 }
 0x14e   : > { %1753 = vmatprep.subr.bf16.mxu1 %v5456_v40  ;;  %v659_v40 = vld [vmem:[#allocation8 + $0x390] sm:$0xff] }
 0x14f   : > { %v5519_v54 = vcombine.low %v659_v40, %v663_v43 }
 0x150   : > { %1611 = vmatmul.mubr.bf16.gmra.mrb[76].mxu1 %v6754_v58 }
 0x151   : > { %1620 = vmatprep.mubr.bf16.mxu1 %v6756_v59  ;;  %1754 = vmatpush1.bf16.msra.mxu1 %v5455_v47  ;;  %v5520_v47 = vcombine.high %v659_v40, %v663_v43 }
 0x152   : > { %1755 = vmatprep.subr.bf16.mxu1 %v5464_v48  ;;  %v667_v48 = vld [vmem:[#allocation8 + $0x3d0] sm:$0xff] }
 0x155   : > { %1756 = vmatpush1.bf16.msra.mxu1 %v5463_v60  ;;  %v5528_v60 = vcombine.high %v667_v48, %v671_v53 }
 0x156   : > { %1757 = vmatprep.subr.bf16.mxu1 %v5472_v61  ;;  %v5527_v61 = vcombine.low %v667_v48, %v671_v53 }
 0x158   : > { %1621 = vmatmul.mubr.bf16.gmra.mrb[80].mxu1 %v6764_v10 }
 0x159   : > { %1630 = vmatprep.mubr.bf16.mxu1 %v6766_v11  ;;  %1758 = vmatpush1.bf16.msra.mxu1 %v5471_v2  ;;  %v6908_v2 = vshrl.u32 %v675_v63, 7 }
 0x15a   : > { %1759 = vmatprep.subr.bf16.mxu1 %v5480_v3 }
 0x15b   : > { %v677_v3 = vsub.s32 0, %v6908_v2  ;;  %v681_v5 = vsub.s32 1, %v6908_v2 }
 0x15d   : > { %1760 = vmatpush1.bf16.msra.mxu1 %v5479_v6  ;;  %v6922_v6 = vrot.slane %v6915_v4, %v677_v3 }
 0x15e   : > { %1761 = vmatprep.subr.bf16.mxu1 %v5488_v15  ;;  %v6927_v15 = vrot.slane %v6915_v4, %v681_v5 }
 0x160   : > { %1631 = vmatmul.mubr.bf16.gmra.mrb[84].mxu1 %v6774_v36 }
 0x161   : > { %1640 = vmatprep.mubr.bf16.mxu1 %v6776_v37  ;;  %1762 = vmatpush1.bf16.msra.mxu1 %v5487_v24 }
 0x162   : > { %1763 = vmatprep.subr.bf16.mxu1 %v5496_v28 }
 0x165   : > { %1764 = vmatpush1.bf16.msra.mxu1 %v5495_v25 }
 0x166   : > { %1765 = vmatprep.subr.bf16.mxu1 %v5504_v26 }
 0x168   : > { %1641 = vmatmul.mubr.bf16.gmra.mrb[88].mxu1 %v6784_v56 }
 0x169   : > { %1650 = vmatprep.mubr.bf16.mxu1 %v6786_v57  ;;  %1766 = vmatpush1.bf16.msra.mxu1 %v5503_v34 }
 0x16a   : > { %1767 = vmatprep.subr.bf16.mxu1 %v5512_v35 }
 0x16d   : > { %1768 = vmatpush1.bf16.msra.mxu1 %v5511_v46 }
 0x16e   : > { %1769 = vmatprep.subr.bf16.mxu1 %v5520_v47  ;;  %v6000_v47 = vld [vmem:[#allocation10 + $0x100] ss:$8 sps:$4 sm:$0xff]  }
 0x170   : > { %1651 = vmatmul.mubr.bf16.gmra.mrb[92].mxu1 %v6794_v16 }
 0x171   : > { %1660 = vmatprep.mubr.bf16.mxu1 %v6796_v17  ;;  %1770 = vmatpush1.bf16.msra.mxu1 %v5519_v54  ;;  %v6005_v54 = vld [vmem:[#allocation10 + $0x114] ss:$8 sps:$4 sm:$0xff]  }
 0x172   : > { %1771 = vmatprep.subr.bf16.mxu1 %v5528_v60 }
 0x175   : > { %1772 = vmatpush1.bf16.msra.mxu1 %v5527_v61 }
 0x176   : > { %1934 = vmatprep.subr.bf16.mxu1 %v5410_v62 }
 0x178   : > { %1661 = vmatmul.mubr.bf16.gmra.mrb[96].mxu1 %v6806_v38 }
 0x179   : > { %1670 = vmatprep.mubr.bf16.mxu1 %v6808_v39 }
 0x180   : > { %1671 = vmatmul.mubr.bf16.gmra.mrb[100].mxu1 %v6816_v50 }
 0x181   : > { %1680 = vmatprep.mubr.bf16.mxu1 %v6818_v51 }
 0x188   : > { %1681 = vmatmul.mubr.bf16.gmra.mrb[104].mxu1 %v6826_v0 }
 0x189   : > { %1690 = vmatprep.mubr.bf16.mxu1 %v6828_v1 }
 0x18b   : > { %v1389_v19 = vpop.f32.mrb[0].mxu1 }
 0x18c   : > { %v1390_v23 = vadd.f32 %v1389_v19, %v6922_v6  ;;  %v1391_v24 = vpop.f32.mrb[1].mxu1 }
 0x18d   : > { %v1392_v28 = vadd.f32 %v1391_v24, %v6927_v15  ;;  %v1393_v21 = vpop.f32.mrb[2].mxu1 }
 0x18e   : > { %v1394_v22 = vadd.f32 %v1393_v21, %v6922_v6  ;;  %v1395_v25 = vpop.f32.mrb[3].mxu1  ;;  %v2127_v32 = vmax.f32 %v1390_v23, 0.0  ;;  %v6003_v23 = vld [vmem:[#allocation10 + $0x110] ss:$8 sps:$4 sm:$0xff]   ;;  %v6008_v21 = vld [vmem:[#allocation10 + $0x124] ss:$8 sps:$4 sm:$0xff]  }
 0x18f   : > { %v1396_v26 = vadd.f32 %v1395_v25, %v6927_v15  ;;  %v2128_v34 = vmax.f32 %v1392_v28, 0.0 }
 0x190   : > { %v2135_v33 = vmax.f32 %v1394_v22, 0.0  ;;  %1691 = vmatmul.mubr.bf16.gmra.mrb[108].mxu1 %v6836_v8 }
 0x191   : > { %v2136_v35 = vmax.f32 %v1396_v26, 0.0  ;;  %1700 = vmatprep.mubr.bf16.mxu1 %v6838_v13 }
 0x192   : > { %v2447_v40 = vpack.c.bf16 %v2135_v33, %v2127_v32 }
 0x193   : > { %v1399_v43 = vpop.f32.mrb[4].mxu1  ;;  %v2448_v46 = vpack.c.bf16 %v2136_v35, %v2128_v34  ;;  %v6006_v34 = vld [vmem:[#allocation10 + $0x120] ss:$8 sps:$4 sm:$0xff]  }
 0x194   : > { %v1400_v48 = vadd.f32 %v1399_v43, %v6922_v6  ;;  %v1401_v53 = vpop.f32.mrb[5].mxu1  ;;  %v6011_v43 = vld [vmem:[#allocation10 + $0x134] ss:$8 sps:$4 sm:$0xff]  }
 0x195   : > { %v1402_v60 = vadd.f32 %v1401_v53, %v6927_v15  ;;  %v1403_v61 = vpop.f32.mrb[6].mxu1  ;;  %3375 = vmatprep.mubr.bf16.mxu0 %v2448_v46 }
 0x196   : > { %v1404_v62 = vadd.f32 %v1403_v61, %v6922_v6  ;;  %v1405_v63 = vpop.f32.mrb[7].mxu1  ;;  %3376 = vmatmul.mubr.bf16.vlgmr.msra.gmra.mrb[0].mxu0 %v2447_v40  ;;  %v2143_v24 = vmax.f32 %v1400_v48, 0.0 }
 0x197   : > { %v1406_v19 = vadd.f32 %v1405_v63, %v6927_v15  ;;  %3537 = vmatpush1.bf16.msra.mxu0 %v6000_v47  ;;  %v2144_v22 = vmax.f32 %v1402_v60, 0.0  ;;  %v6009_v60 = vld [vmem:[#allocation10 + $0x130] ss:$8 sps:$4 sm:$0xff]   ;;  %v6014_v63 = vld [vmem:[#allocation10 + $0x144] ss:$8 sps:$4 sm:$0xff]  }
 0x198   : > { %v2151_v28 = vmax.f32 %v1404_v62, 0.0  ;;  %1701 = vmatmul.mubr.bf16.gmra.mrb[112].mxu1 %v6846_v27  ;;  %3538 = vmatprep.subr.bf16.mxu0 %v6005_v54 }
 0x199   : > { %v2152_v25 = vmax.f32 %v1406_v19, 0.0  ;;  %1710 = vmatprep.mubr.bf16.mxu1 %v6848_v29 }
 0x19a   : > { %v2455_v26 = vpack.c.bf16 %v2151_v28, %v2143_v24 }
 0x19b   : > { %v2456_v32 = vpack.c.bf16 %v2152_v25, %v2144_v22  ;;  %v1409_v33 = vpop.f32.mrb[8].mxu1  ;;  %3539 = vmatpush1.bf16.msra.mxu0 %v6003_v23  ;;  %v6012_v22 = vld [vmem:[#allocation10 + $0x140] ss:$8 sps:$4 sm:$0xff]  }
 0x19c   : > { %v1410_v35 = vadd.f32 %v1409_v33, %v6922_v6  ;;  %v1411_v40 = vpop.f32.mrb[9].mxu1  ;;  %3540 = vmatprep.subr.bf16.mxu0 %v6008_v21 }
 0x19d   : > { %v1412_v46 = vadd.f32 %v1411_v40, %v6927_v15  ;;  %v1413_v47 = vpop.f32.mrb[10].mxu1  ;;  %3385 = vmatprep.mubr.bf16.mxu0 %v2456_v32  ;;  %v6017_v32 = vld [vmem:[#allocation10 + $0x154] ss:$8 sps:$4 sm:$0xff]  }
 0x19e   : > { %v1414_v48 = vadd.f32 %v1413_v47, %v6922_v6  ;;  %v1415_v53 = vpop.f32.mrb[11].mxu1  ;;  %3386 = vmatmul.mubr.bf16.gmra.mrb[4].mxu0 %v2455_v26  ;;  %v2159_v61 = vmax.f32 %v1410_v35, 0.0 }
 0x19f   : > { %v1416_v54 = vadd.f32 %v1415_v53, %v6927_v15  ;;  %3541 = vmatpush1.bf16.msra.mxu0 %v6006_v34  ;;  %v2160_v19 = vmax.f32 %v1412_v46, 0.0  ;;  %v6015_v46 = vld [vmem:[#allocation10 + $0x150] ss:$8 sps:$4 sm:$0xff]   ;;  %v6020_v53 = vld [vmem:[#allocation10 + $0x164] ss:$8 sps:$4 sm:$0xff]  }
 0x1a0   : > { %v2167_v62 = vmax.f32 %v1414_v48, 0.0  ;;  %1711 = vmatmul.mubr.bf16.gmra.mrb[116].mxu1 %v6856_v41  ;;  %3542 = vmatprep.subr.bf16.mxu0 %v6011_v43 }
 0x1a1   : > { %v2168_v23 = vmax.f32 %v1416_v54, 0.0  ;;  %1720 = vmatprep.mubr.bf16.mxu1 %v6858_v42 }
 0x1a2   : > { %v2463_v24 = vpack.c.bf16 %v2167_v62, %v2159_v61 }
 0x1a3   : > { %v2464_v28 = vpack.c.bf16 %v2168_v23, %v2160_v19  ;;  %v1419_v21 = vpop.f32.mrb[12].mxu1  ;;  %3543 = vmatpush1.bf16.msra.mxu0 %v6009_v60  ;;  %v6018_v19 = vld [vmem:[#allocation10 + $0x160] ss:$8 sps:$4 sm:$0xff]  }
 0x1a4   : > { %v1420_v25 = vadd.f32 %v1419_v21, %v6922_v6  ;;  %v1421_v26 = vpop.f32.mrb[13].mxu1  ;;  %3544 = vmatprep.subr.bf16.mxu0 %v6014_v63 }
 0x1a5   : > { %v1422_v33 = vadd.f32 %v1421_v26, %v6927_v15  ;;  %v1423_v34 = vpop.f32.mrb[14].mxu1  ;;  %3395 = vmatprep.mubr.bf16.mxu0 %v2464_v28  ;;  %v6023_v28 = vld [vmem:[#allocation10 + $0x174] ss:$8 sps:$4 sm:$0xff]  }
 0x1a6   : > { %v1424_v35 = vadd.f32 %v1423_v34, %v6922_v6  ;;  %v1425_v40 = vpop.f32.mrb[15].mxu1  ;;  %3396 = vmatmul.mubr.bf16.gmra.mrb[8].mxu0 %v2463_v24  ;;  %v2175_v47 = vmax.f32 %v1420_v25, 0.0 }
 0x1a7   : > { %v1426_v43 = vadd.f32 %v1425_v40, %v6927_v15  ;;  %3545 = vmatpush1.bf16.msra.mxu0 %v6012_v22  ;;  %v2176_v54 = vmax.f32 %v1422_v33, 0.0  ;;  %v6021_v33 = vld [vmem:[#allocation10 + $0x170] ss:$8 sps:$4 sm:$0xff]   ;;  %v6026_v40 = vld [vmem:[#allocation10 + $0x184] ss:$8 sps:$4 sm:$0xff]  }
 0x1a8   : > { %v2183_v48 = vmax.f32 %v1424_v35, 0.0  ;;  %1721 = vmatmul.mubr.bf16.gmra.mrb[120].mxu1 %v6866_v49  ;;  %3546 = vmatprep.subr.bf16.mxu0 %v6017_v32 }
 0x1a9   : > { %v2184_v60 = vmax.f32 %v1426_v43, 0.0  ;;  %1730 = vmatprep.mubr.bf16.mxu1 %v6868_v52 }
 0x1aa   : > { %v2471_v61 = vpack.c.bf16 %v2183_v48, %v2175_v47 }
 0x1ab   : > { %v2472_v62 = vpack.c.bf16 %v2184_v60, %v2176_v54  ;;  %v1429_v63 = vpop.f32.mrb[16].mxu1  ;;  %3547 = vmatpush1.bf16.msra.mxu0 %v6015_v46  ;;  %v556_v54 = vld [vmem:[#allocation8 + $0x58] sm:$0xff] }
 0x1ac   : > { %v1430_v23 = vadd.f32 %v1429_v63, %v6922_v6  ;;  %v1431_v24 = vpop.f32.mrb[17].mxu1  ;;  %3548 = vmatprep.subr.bf16.mxu0 %v6020_v53  ;;  %v560_v60 = vld [vmem:[#allocation8 + $0x78] sm:$0xff] }
 0x1ad   : > { %v1432_v21 = vadd.f32 %v1431_v24, %v6927_v15  ;;  %v1433_v22 = vpop.f32.mrb[18].mxu1  ;;  %3405 = vmatprep.mubr.bf16.mxu0 %v2472_v62 }
 0x1ae   : > { %v1434_v25 = vadd.f32 %v1433_v22, %v6922_v6  ;;  %v1435_v26 = vpop.f32.mrb[19].mxu1  ;;  %3406 = vmatmul.mubr.bf16.gmra.mrb[12].mxu0 %v2471_v61  ;;  %v2191_v34 = vmax.f32 %v1430_v23, 0.0  ;;  %v6024_v61 = vld [vmem:[#allocation10 + $0x180] ss:$8 sps:$4 sm:$0xff]   ;;  %v5418_v22 = vcombine.high %v556_v54, %v560_v60 }
 0x1af   : > { %v1436_v32 = vadd.f32 %v1435_v26, %v6927_v15  ;;  %3549 = vmatpush1.bf16.msra.mxu0 %v6018_v19  ;;  %v2192_v43 = vmax.f32 %v1432_v21, 0.0  ;;  %v6029_v19 = vld [vmem:[#allocation10 + $0x194] ss:$8 sps:$4 sm:$0xff]  }
 0x1b0   : > { %v2199_v35 = vmax.f32 %v1434_v25, 0.0  ;;  %1731 = vmatmul.mubr.bf16.gmra.mrb[124].mxu1 %v6874_v55  ;;  %3550 = vmatprep.subr.bf16.mxu0 %v6023_v28  ;;  %v564_v26 = vld [vmem:[#allocation8 + $0x98] sm:$0xff] }
 0x1b1   : > { %v2200_v46 = vmax.f32 %v1436_v32, 0.0  ;;  %1773 = vmatprep.mubr.bf16.mxu1 %v6711_v20  ;;  %v568_v32 = vld [vmem:[#allocation8 + $0xb8] sm:$0xff] }
 0x1b2   : > { %v2479_v47 = vpack.c.bf16 %v2199_v35, %v2191_v34 }
 0x1b3   : > { %v2480_v48 = vpack.c.bf16 %v2200_v46, %v2192_v43  ;;  %v1439_v53 = vpop.f32.mrb[20].mxu1  ;;  %3551 = vmatpush1.bf16.msra.mxu0 %v6021_v33  ;;  %v6027_v33 = vld [vmem:[#allocation10 + $0x190] ss:$8 sps:$4 sm:$0xff]  }
 0x1b4   : > { %v1440_v62 = vadd.f32 %v1439_v53, %v6922_v6  ;;  %v1441_v63 = vpop.f32.mrb[21].mxu1  ;;  %3552 = vmatprep.subr.bf16.mxu0 %v6026_v40  ;;  %v6032_v40 = vld [vmem:[#allocation10 + $0x1a4] ss:$8 sps:$4 sm:$0xff]   ;;  %v5426_v53 = vcombine.high %v564_v26, %v568_v32 }
 0x1b5   : > { %v1442_v23 = vadd.f32 %v1441_v63, %v6927_v15  ;;  %v1443_v24 = vpop.f32.mrb[22].mxu1  ;;  %3415 = vmatprep.mubr.bf16.mxu0 %v2480_v48 }
 0x1b6   : > { %v1444_v28 = vadd.f32 %v1443_v24, %v6922_v6  ;;  %v1445_v21 = vpop.f32.mrb[23].mxu1  ;;  %3416 = vmatmul.mubr.bf16.gmra.mrb[16].mxu0 %v2479_v47  ;;  %v2207_v34 = vmax.f32 %v1440_v62, 0.0  ;;  %v5417_v47 = vcombine.low %v556_v54, %v560_v60  ;;  %v572_v62 = vld [vmem:[#allocation8 + $0xd8] sm:$0xff] }
 0x1b7   : > { %v1446_v25 = vadd.f32 %v1445_v21, %v6927_v15  ;;  %3553 = vmatpush1.bf16.msra.mxu0 %v6024_v61  ;;  %v2208_v43 = vmax.f32 %v1442_v23, 0.0  ;;  %v576_v24 = vld [vmem:[#allocation8 + $0xf8] sm:$0xff] }
 0x1b8   : > { %v2215_v35 = vmax.f32 %v1444_v28, 0.0  ;;  %1774 = vmatmul.mubr.bf16.vlgmr.msra.gmra.mrb[128].mxu1 %v6718_v12  ;;  %3554 = vmatprep.subr.bf16.mxu0 %v6029_v19  ;;  %v6030_v28 = vld [vmem:[#allocation10 + $0x1a0] ss:$8 sps:$4 sm:$0xff]   ;;  %v6035_v21 = vld [vmem:[#allocation10 + $0x1b4] ss:$8 sps:$4 sm:$0xff]  }
 0x1b9   : > { %v2216_v46 = vmax.f32 %v1446_v25, 0.0  ;;  %1935 = vmatpush1.bf16.msra.mxu1 %v5409_v18  ;;  %1783 = vmatprep.mubr.bf16.mxu1 %v6720_v14  ;;  %v5425_v18 = vcombine.low %v564_v26, %v568_v32  ;;  %v5433_v32 = vcombine.low %v572_v62, %v576_v24 }
 0x1ba   : > { %v2487_v48 = vpack.c.bf16 %v2215_v35, %v2207_v34  ;;  %1936 = vmatprep.subr.bf16.mxu1 %v5418_v22  ;;  %v5434_v22 = vcombine.high %v572_v62, %v576_v24  ;;  %v584_v34 = vld [vmem:[#allocation8 + $0x138] sm:$0xff] }
 0x1bb   : > { %v2488_v61 = vpack.c.bf16 %v2216_v46, %v2208_v43  ;;  %v1449_v63 = vpop.f32.mrb[24].mxu1  ;;  %3555 = vmatpush1.bf16.msra.mxu0 %v6027_v33  ;;  %v580_v33 = vld [vmem:[#allocation8 + $0x118] sm:$0xff]  ;;  %v6038_v46 = vld [vmem:[#allocation10 + $0x1c4] ss:$8 sps:$4 sm:$0xff]  }
 0x1bc   : > { %v1450_v19 = vadd.f32 %v1449_v63, %v6922_v6  ;;  %v1451_v23 = vpop.f32.mrb[25].mxu1  ;;  %3556 = vmatprep.subr.bf16.mxu0 %v6032_v40  ;;  %v6033_v35 = vld [vmem:[#allocation10 + $0x1b0] ss:$8 sps:$4 sm:$0xff]   ;;  %v5441_v62 = vcombine.low %v580_v33, %v584_v34 }
 0x1bd   : > { %v1452_v7 = vadd.f32 %v1451_v23, %v6927_v15  ;;  %v1453_v9 = vpop.f32.mrb[26].mxu1  ;;  %3425 = vmatprep.mubr.bf16.mxu0 %v2488_v61  ;;  %1937 = vmatpush1.bf16.msra.mxu1 %v5417_v47  ;;  %v588_v23 = vld [vmem:[#allocation8 + $0x158] sm:$0xff] }
 0x1be   : > { %v1454_v54 = vadd.f32 %v1453_v9, %v6922_v6  ;;  %v1455_v60 = vpop.f32.mrb[27].mxu1  ;;  %3426 = vmatmul.mubr.bf16.gmra.mrb[20].mxu0 %v2487_v48  ;;  %1938 = vmatprep.subr.bf16.mxu1 %v5426_v53  ;;  %v2223_v40 = vmax.f32 %v1450_v19, 0.0  ;;  %v5442_v53 = vcombine.high %v580_v33, %v584_v34  ;;  %v6036_v19 = vld [vmem:[#allocation10 + $0x1c0] ss:$8 sps:$4 sm:$0xff]  }
 0x1bf   : > { %v1456_v25 = vadd.f32 %v1455_v60, %v6927_v15  ;;  %3557 = vmatpush1.bf16.msra.mxu0 %v6030_v28  ;;  %v2224_v47 = vmax.f32 %v1452_v7, 0.0  ;;  %v592_v28 = vld [vmem:[#allocation8 + $0x178] sm:$0xff] }
 0x1c0   : > { %v2231_v43 = vmax.f32 %v1454_v54, 0.0  ;;  %1784 = vmatmul.mubr.bf16.gmra.mrb[132].mxu1 %v6734_v30  ;;  %3558 = vmatprep.subr.bf16.mxu0 %v6035_v21  ;;  %v6041_v21 = vld [vmem:[#allocation10 + $0x1d4] ss:$8 sps:$4 sm:$0xff]   ;;  %v5449_v34 = vcombine.low %v588_v23, %v592_v28 }
 0x1c1   : > { %v2232_v26 = vmax.f32 %v1456_v25, 0.0  ;;  %1793 = vmatprep.mubr.bf16.mxu1 %v6736_v31  ;;  %1939 = vmatpush1.bf16.msra.mxu1 %v5425_v18 }
 0x1c2   : > { %v2495_v48 = vpack.c.bf16 %v2231_v43, %v2223_v40  ;;  %1940 = vmatprep.subr.bf16.mxu1 %v5434_v22  ;;  %v5450_v22 = vcombine.high %v588_v23, %v592_v28  ;;  %v600_v40 = vld [vmem:[#allocation8 + $0x1b8] sm:$0xff] }
 0x1c3   : > { %v2496_v61 = vpack.c.bf16 %v2232_v26, %v2224_v47  ;;  %v1459_v63 = vpop.f32.mrb[28].mxu1  ;;  %3559 = vmatpush1.bf16.msra.mxu0 %v6033_v35  ;;  %v596_v35 = vld [vmem:[#allocation8 + $0x198] sm:$0xff]  ;;  %v6044_v26 = vld [vmem:[#allocation10 + $0x1e4] ss:$8 sps:$4 sm:$0xff]  }
 0x1c4   : > { %v1460_v9 = vadd.f32 %v1459_v63, %v6922_v6  ;;  %v1461_v54 = vpop.f32.mrb[29].mxu1  ;;  %3560 = vmatprep.subr.bf16.mxu0 %v6038_v46  ;;  %v6039_v43 = vld [vmem:[#allocation10 + $0x1d0] ss:$8 sps:$4 sm:$0xff]   ;;  %v5457_v23 = vcombine.low %v596_v35, %v600_v40 }
 0x1c5   : > { %v1462_v7 = vadd.f32 %v1461_v54, %v6927_v15  ;;  %v1463_v60 = vpop.f32.mrb[30].mxu1  ;;  %3435 = vmatprep.mubr.bf16.mxu0 %v2496_v61  ;;  %1941 = vmatpush1.bf16.msra.mxu1 %v5433_v32  ;;  %v604_v54 = vld [vmem:[#allocation8 + $0x1d8] sm:$0xff] }
 0x1c6   : > { %v1464_v24 = vadd.f32 %v1463_v60, %v6922_v6  ;;  %v1465_v18 = vpop.f32.mrb[31].mxu1  ;;  %3436 = vmatmul.mubr.bf16.gmra.mrb[24].mxu0 %v2495_v48  ;;  %1942 = vmatprep.subr.bf16.mxu1 %v5442_v53  ;;  %v2239_v46 = vmax.f32 %v1460_v9, 0.0  ;;  %v5458_v53 = vcombine.high %v596_v35, %v600_v40  ;;  %v6042_v9 = vld [vmem:[#allocation10 + $0x1e0] ss:$8 sps:$4 sm:$0xff]  }
 0x1c7   : > { %v1466_v25 = vadd.f32 %v1465_v18, %v6927_v15  ;;  %3561 = vmatpush1.bf16.msra.mxu0 %v6036_v19  ;;  %v2240_v32 = vmax.f32 %v1462_v7, 0.0  ;;  %v608_v19 = vld [vmem:[#allocation8 + $0x1f8] sm:$0xff] }
 0x1c8   : > { %v2247_v47 = vmax.f32 %v1464_v24, 0.0  ;;  %1794 = vmatmul.mubr.bf16.gmra.mrb[136].mxu1 %v6744_v44  ;;  %3562 = vmatprep.subr.bf16.mxu0 %v6041_v21  ;;  %v6047_v21 = vld [vmem:[#allocation10 + $0x1f4] ss:$8 sps:$4 sm:$0xff]   ;;  %v5465_v40 = vcombine.low %v604_v54, %v608_v19 }
 0x1c9   : > { %v2248_v33 = vmax.f32 %v1466_v25, 0.0  ;;  %1803 = vmatprep.mubr.bf16.mxu1 %v6746_v45  ;;  %1943 = vmatpush1.bf16.msra.mxu1 %v5441_v62 }
 0x1ca   : > { %v2503_v48 = vpack.c.bf16 %v2247_v47, %v2239_v46  ;;  %1944 = vmatprep.subr.bf16.mxu1 %v5450_v22  ;;  %v5466_v22 = vcombine.high %v604_v54, %v608_v19  ;;  %v616_v46 = vld [vmem:[#allocation8 + $0x238] sm:$0xff] }
 0x1cb   : > { %v2504_v61 = vpack.c.bf16 %v2248_v33, %v2240_v32  ;;  %v1469_v63 = vpop.f32.mrb[32].mxu1  ;;  %3563 = vmatpush1.bf16.msra.mxu0 %v6039_v43  ;;  %v612_v43 = vld [vmem:[#allocation8 + $0x218] sm:$0xff]  ;;  %v6050_v33 = vld [vmem:[#allocation10 + $0x204] ss:$8 sps:$4 sm:$0xff]  }
 0x1cc   : > { %v1470_v60 = vadd.f32 %v1469_v63, %v6922_v6  ;;  %v1471_v24 = vpop.f32.mrb[33].mxu1  ;;  %3564 = vmatprep.subr.bf16.mxu0 %v6044_v26  ;;  %v6045_v47 = vld [vmem:[#allocation10 + $0x1f0] ss:$8 sps:$4 sm:$0xff]  }
 0x1cd   : > { %v1472_v7 = vadd.f32 %v1471_v24, %v6927_v15  ;;  %v1473_v18 = vpop.f32.mrb[34].mxu1  ;;  %3445 = vmatprep.mubr.bf16.mxu0 %v2504_v61  ;;  %1945 = vmatpush1.bf16.msra.mxu1 %v5449_v34  ;;  %v620_v24 = vld [vmem:[#allocation8 + $0x258] sm:$0xff] }
 0x1ce   : > { %v1474_v28 = vadd.f32 %v1473_v18, %v6922_v6  ;;  %v1475_v62 = vpop.f32.mrb[35].mxu1  ;;  %3446 = vmatmul.mubr.bf16.gmra.mrb[28].mxu0 %v2503_v48  ;;  %1946 = vmatprep.subr.bf16.mxu1 %v5458_v53  ;;  %v2255_v26 = vmax.f32 %v1470_v60, 0.0  ;;  %v5474_v53 = vcombine.high %v612_v43, %v616_v46 }
 0x1cf   : > { %v1476_v25 = vadd.f32 %v1475_v62, %v6927_v15  ;;  %3565 = vmatpush1.bf16.msra.mxu0 %v6042_v9  ;;  %v2256_v34 = vmax.f32 %v1472_v7, 0.0  ;;  %v624_v9 = vld [vmem:[#allocation8 + $0x278] sm:$0xff] }
 0x1d0   : > { %v2263_v32 = vmax.f32 %v1474_v28, 0.0  ;;  %1804 = vmatmul.mubr.bf16.gmra.mrb[140].mxu1 %v6754_v58  ;;  %3566 = vmatprep.subr.bf16.mxu0 %v6047_v21  ;;  %v5473_v28 = vcombine.low %v612_v43, %v616_v46  ;;  %v5481_v43 = vcombine.low %v620_v24, %v624_v9 }
 0x1d1   : > { %v2264_v35 = vmax.f32 %v1476_v25, 0.0  ;;  %1813 = vmatprep.mubr.bf16.mxu1 %v6756_v59  ;;  %1947 = vmatpush1.bf16.msra.mxu1 %v5457_v23  ;;  %v5482_v23 = vcombine.high %v620_v24, %v624_v9  ;;  %v632_v25 = vld [vmem:[#allocation8 + $0x2b8] sm:$0xff] }
 0x1d2   : > { %v2511_v48 = vpack.c.bf16 %v2263_v32, %v2255_v26  ;;  %1948 = vmatprep.subr.bf16.mxu1 %v5466_v22  ;;  %v628_v22 = vld [vmem:[#allocation8 + $0x298] sm:$0xff] }
 0x1d3   : > { %v2512_v61 = vpack.c.bf16 %v2264_v35, %v2256_v34  ;;  %v1479_v63 = vpop.f32.mrb[36].mxu1  ;;  %3567 = vmatpush1.bf16.msra.mxu0 %v6045_v47  ;;  %v5490_v34 = vcombine.high %v628_v22, %v632_v25 }
 0x1d4   : > { %v1480_v60 = vadd.f32 %v1479_v63, %v6922_v6  ;;  %v1481_v18 = vpop.f32.mrb[37].mxu1  ;;  %3729 = vmatprep.subr.bf16.mxu0 %v6050_v33 }
 0x1d5   : > { %v1482_v21 = vadd.f32 %v1481_v18, %v6927_v15  ;;  %v1483_v7 = vpop.f32.mrb[38].mxu1  ;;  %3455 = vmatprep.mubr.bf16.mxu0 %v2512_v61  ;;  %1949 = vmatpush1.bf16.msra.mxu1 %v5465_v40 }
 0x1d6   : > { %v1484_v54 = vadd.f32 %v1483_v7, %v6922_v6  ;;  %v1485_v19 = vpop.f32.mrb[39].mxu1  ;;  %3456 = vmatmul.mubr.bf16.gmra.mrb[32].mxu0 %v2511_v48  ;;  %1950 = vmatprep.subr.bf16.mxu1 %v5474_v53  ;;  %v2271_v47 = vmax.f32 %v1480_v60, 0.0  ;;  %v636_v48 = vld [vmem:[#allocation8 + $0x2d8] sm:$0xff] }
 0x1d7   : > { %v1486_v62 = vadd.f32 %v1485_v19, %v6927_v15  ;;  %v2272_v32 = vmax.f32 %v1482_v21, 0.0  ;;  %v640_v53 = vld [vmem:[#allocation8 + $0x2f8] sm:$0xff]  ;;  %v5489_v21 = vcombine.low %v628_v22, %v632_v25 }
 0x1d8   : > { %v2279_v26 = vmax.f32 %v1484_v54, 0.0  ;;  %1814 = vmatmul.mubr.bf16.gmra.mrb[144].mxu1 %v6764_v10  ;;  %v5498_v24 = vcombine.high %v636_v48, %v640_v53  ;;  %v644_v54 = vld [vmem:[#allocation8 + $0x318] sm:$0xff]  ;;  %v5497_v22 = vcombine.low %v636_v48, %v640_v53 }
 0x1d9   : > { %v2280_v33 = vmax.f32 %v1486_v62, 0.0  ;;  %1823 = vmatprep.mubr.bf16.mxu1 %v6766_v11  ;;  %1951 = vmatpush1.bf16.msra.mxu1 %v5473_v28  ;;  %v648_v19 = vld [vmem:[#allocation8 + $0x338] sm:$0xff] }
 0x1da   : > { %v2519_v46 = vpack.c.bf16 %v2279_v26, %v2271_v47  ;;  %1952 = vmatprep.subr.bf16.mxu1 %v5482_v23 }
 0x1db   : > { %v2520_v35 = vpack.c.bf16 %v2280_v33, %v2272_v32  ;;  %v1489_v40 = vpop.f32.mrb[40].mxu1  ;;  %v5506_v32 = vcombine.high %v644_v54, %v648_v19 }
 0x1dc   : > { %v1490_v61 = vadd.f32 %v1489_v40, %v6922_v6  ;;  %v1491_v63 = vpop.f32.mrb[41].mxu1 }
 0x1dd   : > { %v1492_v60 = vadd.f32 %v1491_v63, %v6927_v15  ;;  %v1493_v18 = vpop.f32.mrb[42].mxu1  ;;  %3465 = vmatprep.mubr.bf16.mxu0 %v2520_v35  ;;  %1953 = vmatpush1.bf16.msra.mxu1 %v5481_v43 }
 0x1de   : > { %v1494_v7 = vadd.f32 %v1493_v18, %v6922_v6  ;;  %v1495_v28 = vpop.f32.mrb[43].mxu1  ;;  %3466 = vmatmul.mubr.bf16.gmra.mrb[36].mxu0 %v2519_v46  ;;  %1954 = vmatprep.subr.bf16.mxu1 %v5490_v34  ;;  %v2287_v23 = vmax.f32 %v1490_v61, 0.0  ;;  %v652_v46 = vld [vmem:[#allocation8 + $0x358] sm:$0xff] }
 0x1df   : > { %v1496_v9 = vadd.f32 %v1495_v28, %v6927_v15  ;;  %v2288_v47 = vmax.f32 %v1492_v60, 0.0  ;;  %v656_v34 = vld [vmem:[#allocation8 + $0x378] sm:$0xff]  ;;  %v5505_v60 = vcombine.low %v644_v54, %v648_v19 }
 0x1e0   : > { %v2295_v62 = vmax.f32 %v1494_v7, 0.0  ;;  %1824 = vmatmul.mubr.bf16.gmra.mrb[148].mxu1 %v6774_v36  ;;  %v5514_v48 = vcombine.high %v652_v46, %v656_v34  ;;  %v660_v7 = vld [vmem:[#allocation8 + $0x398] sm:$0xff]  ;;  %v5513_v54 = vcombine.low %v652_v46, %v656_v34 }
 0x1e1   : > { %v2296_v26 = vmax.f32 %v1496_v9, 0.0  ;;  %1833 = vmatprep.mubr.bf16.mxu1 %v6776_v37  ;;  %1955 = vmatpush1.bf16.msra.mxu1 %v5489_v21  ;;  %v664_v28 = vld [vmem:[#allocation8 + $0x3b8] sm:$0xff] }
 0x1e2   : > { %v2527_v25 = vpack.c.bf16 %v2295_v62, %v2287_v23  ;;  %1956 = vmatprep.subr.bf16.mxu1 %v5498_v24 }
 0x1e3   : > { %v2528_v33 = vpack.c.bf16 %v2296_v26, %v2288_v47  ;;  %v1499_v43 = vpop.f32.mrb[44].mxu1  ;;  %v5522_v47 = vcombine.high %v660_v7, %v664_v28 }
 0x1e4   : > { %v1500_v35 = vadd.f32 %v1499_v43, %v6922_v6  ;;  %v1501_v40 = vpop.f32.mrb[45].mxu1 }
 0x1e5   : > { %v1502_v61 = vadd.f32 %v1501_v40, %v6927_v15  ;;  %v1503_v63 = vpop.f32.mrb[46].mxu1  ;;  %3475 = vmatprep.mubr.bf16.mxu0 %v2528_v33  ;;  %1957 = vmatpush1.bf16.msra.mxu1 %v5497_v22 }
 0x1e6   : > { %v1504_v18 = vadd.f32 %v1503_v63, %v6922_v6  ;;  %v1505_v21 = vpop.f32.mrb[47].mxu1  ;;  %3476 = vmatmul.mubr.bf16.gmra.mrb[40].mxu0 %v2527_v25  ;;  %1958 = vmatprep.subr.bf16.mxu1 %v5506_v32  ;;  %v2303_v24 = vmax.f32 %v1500_v35, 0.0  ;;  %v668_v25 = vld [vmem:[#allocation8 + $0x3d8] sm:$0xff] }
 0x1e7   : > { %v1506_v53 = vadd.f32 %v1505_v21, %v6927_v15  ;;  %v2304_v23 = vmax.f32 %v1502_v61, 0.0  ;;  %v672_v32 = vld [vmem:[#allocation8 + $0x3f8] sm:$0xff]  ;;  %v5521_v61 = vcombine.low %v660_v7, %v664_v28 }
 0x1e8   : > { %v2311_v9 = vmax.f32 %v1504_v18, 0.0  ;;  %1834 = vmatmul.mubr.bf16.gmra.mrb[152].mxu1 %v6784_v56  ;;  %v5530_v46 = vcombine.high %v668_v25, %v672_v32 }
 0x1e9   : > { %v2312_v62 = vmax.f32 %v1506_v53, 0.0  ;;  %1843 = vmatprep.mubr.bf16.mxu1 %v6786_v57  ;;  %1959 = vmatpush1.bf16.msra.mxu1 %v5505_v60 }
 0x1ea   : > { %v2535_v19 = vpack.c.bf16 %v2311_v9, %v2303_v24  ;;  %1960 = vmatprep.subr.bf16.mxu1 %v5514_v48  ;;  %v5529_v24 = vcombine.low %v668_v25, %v672_v32 }
 0x1eb   : > { %v2536_v26 = vpack.c.bf16 %v2312_v62, %v2304_v23  ;;  %v1509_v22 = vpop.f32.mrb[48].mxu1 }
 0x1ec   : > { %v1510_v33 = vadd.f32 %v1509_v22, %v6922_v6  ;;  %v1511_v43 = vpop.f32.mrb[49].mxu1 }
 0x1ed   : > { %v1512_v35 = vadd.f32 %v1511_v43, %v6927_v15  ;;  %v1513_v40 = vpop.f32.mrb[50].mxu1  ;;  %3485 = vmatprep.mubr.bf16.mxu0 %v2536_v26  ;;  %1961 = vmatpush1.bf16.msra.mxu1 %v5513_v54 }
 0x1ee   : > { %v1514_v63 = vadd.f32 %v1513_v40, %v6922_v6  ;;  %v1515_v60 = vpop.f32.mrb[51].mxu1  ;;  %3486 = vmatmul.mubr.bf16.gmra.mrb[44].mxu0 %v2535_v19  ;;  %1962 = vmatprep.subr.bf16.mxu1 %v5522_v47  ;;  %v2319_v18 = vmax.f32 %v1510_v33, 0.0 }
 0x1ef   : > { %v1516_v34 = vadd.f32 %v1515_v60, %v6927_v15  ;;  %v2320_v48 = vmax.f32 %v1512_v35, 0.0 }
 0x1f0   : > { %v2327_v21 = vmax.f32 %v1514_v63, 0.0  ;;  %1844 = vmatmul.mubr.bf16.gmra.mrb[156].mxu1 %v6794_v16 }
 0x1f1   : > { %v2328_v53 = vmax.f32 %v1516_v34, 0.0  ;;  %1853 = vmatprep.mubr.bf16.mxu1 %v6796_v17  ;;  %1963 = vmatpush1.bf16.msra.mxu1 %v5521_v61 }
 0x1f2   : > { %v2543_v9 = vpack.c.bf16 %v2327_v21, %v2319_v18  ;;  %1964 = vmatprep.subr.bf16.mxu1 %v5530_v46 }
 0x1f3   : > { %v2544_v7 = vpack.c.bf16 %v2328_v53, %v2320_v48  ;;  %v1519_v28 = vpop.f32.mrb[52].mxu1 }
 0x1f4   : > { %v1520_v23 = vadd.f32 %v1519_v28, %v6922_v6  ;;  %v1521_v62 = vpop.f32.mrb[53].mxu1 }
 0x1f5   : > { %v1522_v54 = vadd.f32 %v1521_v62, %v6927_v15  ;;  %v1523_v19 = vpop.f32.mrb[54].mxu1  ;;  %3495 = vmatprep.mubr.bf16.mxu0 %v2544_v7  ;;  %1965 = vmatpush1.bf16.msra.mxu1 %v5529_v24 }
 0x1f6   : > { %v1524_v47 = vadd.f32 %v1523_v19, %v6922_v6  ;;  %v1525_v26 = vpop.f32.mrb[55].mxu1  ;;  %3496 = vmatmul.mubr.bf16.gmra.mrb[48].mxu0 %v2543_v9  ;;  %v2335_v33 = vmax.f32 %v1520_v23, 0.0 }
 0x1f7   : > { %v1526_v22 = vadd.f32 %v1525_v26, %v6927_v15  ;;  %v2336_v32 = vmax.f32 %v1522_v54, 0.0 }
 0x1f8   : > { %v2343_v25 = vmax.f32 %v1524_v47, 0.0  ;;  %1854 = vmatmul.mubr.bf16.gmra.mrb[160].mxu1 %v6806_v38  ;;  %v685_v47 = vsub.s32 2, %v6908_v2 }
 0x1f9   : > { %v2344_v43 = vmax.f32 %v1526_v22, 0.0  ;;  %1863 = vmatprep.mubr.bf16.mxu1 %v6808_v39 }
 0x1fa   : > { %v2551_v35 = vpack.c.bf16 %v2343_v25, %v2335_v33  ;;  %v689_v33 = vsub.s32 3, %v6908_v2 }
 0x1fb   : > { %v2552_v40 = vpack.c.bf16 %v2344_v43, %v2336_v32  ;;  %v1529_v61 = vpop.f32.mrb[56].mxu1 }
 0x1fc   : > { %v1530_v63 = vadd.f32 %v1529_v61, %v6922_v6  ;;  %v1531_v60 = vpop.f32.mrb[57].mxu1  ;;  %v7031_v61 = vrot.slane %v6915_v4, %v685_v47 }
 0x1fd   : > { %v1532_v46 = vadd.f32 %v1531_v60, %v6927_v15  ;;  %v1533_v34 = vpop.f32.mrb[58].mxu1  ;;  %3505 = vmatprep.mubr.bf16.mxu0 %v2552_v40 }
 0x1fe   : > { %v1534_v18 = vadd.f32 %v1533_v34, %v6922_v6  ;;  %v1535_v21 = vpop.f32.mrb[59].mxu1  ;;  %3506 = vmatmul.mubr.bf16.gmra.mrb[52].mxu0 %v2551_v35  ;;  %v2351_v53 = vmax.f32 %v1530_v63, 0.0 }
 0x1ff   : > { %v1536_v48 = vadd.f32 %v1535_v21, %v6927_v15  ;;  %v2352_v9 = vmax.f32 %v1532_v46, 0.0  ;;  %v7034_v46 = vrot.slane %v6915_v4, %v689_v33 }
 0x200   : > { %v2359_v24 = vmax.f32 %v1534_v18, 0.0  ;;  %1864 = vmatmul.mubr.bf16.gmra.mrb[164].mxu1 %v6816_v50 }
 0x201   : > { %v2360_v7 = vmax.f32 %v1536_v48, 0.0  ;;  %1873 = vmatprep.mubr.bf16.mxu1 %v6818_v51 }
 0x202   : > { %v2559_v28 = vpack.c.bf16 %v2359_v24, %v2351_v53 }
 0x203   : > { %v2560_v23 = vpack.c.bf16 %v2360_v7, %v2352_v9  ;;  %v1539_v62 = vpop.f32.mrb[60].mxu1 }
 0x204   : > { %v1540_v54 = vadd.f32 %v1539_v62, %v6922_v6  ;;  %v1541_v19 = vpop.f32.mrb[61].mxu1 }
 0x205   : > { %v1542_v26 = vadd.f32 %v1541_v19, %v6927_v15  ;;  %v1543_v22 = vpop.f32.mrb[62].mxu1  ;;  %3515 = vmatprep.mubr.bf16.mxu0 %v2560_v23 }
 0x206   : > { %v1544_v25 = vadd.f32 %v1543_v22, %v6922_v6  ;;  %v1545_v32 = vpop.f32.mrb[63].mxu1  ;;  %3516 = vmatmul.mubr.bf16.gmra.mrb[56].mxu0 %v2559_v28  ;;  %v2367_v35 = vmax.f32 %v1540_v54, 0.0 }
 0x207   : > { %v1546_v43 = vadd.f32 %v1545_v32, %v6927_v15  ;;  %v2368_v63 = vmax.f32 %v1542_v26, 0.0  ;;  %v6048_v26 = vld [vmem:[#allocation10 + $0x200] ss:$8 sps:$4 sm:$0xff]  }
 0x208   : > { %v2375_v40 = vmax.f32 %v1544_v25, 0.0  ;;  %1874 = vmatmul.mubr.bf16.gmra.mrb[168].mxu1 %v6826_v0  ;;  %v6053_v25 = vld [vmem:[#allocation10 + $0x214] ss:$8 sps:$4 sm:$0xff]  }
 0x209   : > { %v2376_v60 = vmax.f32 %v1546_v43, 0.0  ;;  %1883 = vmatprep.mubr.bf16.mxu1 %v6828_v1 }
 0x20a   : > { %v2567_v34 = vpack.c.bf16 %v2375_v40, %v2367_v35 }
 0x20b   : > { %v2568_v6 = vpack.c.bf16 %v2376_v60, %v2368_v63  ;;  %v1582_v18 = vpop.f32.mrb[64].mxu1  ;;  %v6051_v60 = vld [vmem:[#allocation10 + $0x210] ss:$8 sps:$4 sm:$0xff]  }
 0x20c   : > { %v1583_v21 = vadd.f32 %v1582_v18, %v7031_v61  ;;  %v1584_v15 = vpop.f32.mrb[65].mxu1  ;;  %v6056_v18 = vld [vmem:[#allocation10 + $0x224] ss:$8 sps:$4 sm:$0xff]  }
 0x20d   : > { %v1585_v48 = vadd.f32 %v1584_v15, %v7034_v46  ;;  %v1586_v53 = vpop.f32.mrb[66].mxu1  ;;  %3525 = vmatprep.mubr.bf16.mxu0 %v2568_v6 }
 0x20e   : > { %v1587_v24 = vadd.f32 %v1586_v53, %v7031_v61  ;;  %v1588_v9 = vpop.f32.mrb[67].mxu1  ;;  %3526 = vmatmul.mubr.bf16.gmra.mrb[60].mxu0 %v2567_v34  ;;  %v2129_v4 = vmax.f32 %v1583_v21, 0.0 }
 0x20f   : > { %v1589_v7 = vadd.f32 %v1588_v9, %v7034_v46  ;;  %v2130_v23 = vmax.f32 %v1585_v48, 0.0  ;;  %v6054_v9 = vld [vmem:[#allocation10 + $0x220] ss:$8 sps:$4 sm:$0xff]  }
 0x210   : > { %v2137_v28 = vmax.f32 %v1587_v24, 0.0  ;;  %1884 = vmatmul.mubr.bf16.gmra.mrb[172].mxu1 %v6836_v8 }
 0x211   : > { %v2138_v62 = vmax.f32 %v1589_v7, 0.0  ;;  %1893 = vmatprep.mubr.bf16.mxu1 %v6838_v13 }
 0x212   : > { %v2449_v54 = vpack.c.bf16 %v2137_v28, %v2129_v4  ;;  %v6059_v28 = vld [vmem:[#allocation10 + $0x234] ss:$8 sps:$4 sm:$0xff]  }
 0x213   : > { %v2450_v19 = vpack.c.bf16 %v2138_v62, %v2130_v23  ;;  %v1592_v47 = vpop.f32.mrb[68].mxu1 }
 0x214   : > { %v1593_v22 = vadd.f32 %v1592_v47, %v7031_v61  ;;  %v1594_v33 = vpop.f32.mrb[69].mxu1 }
 0x215   : > { %v1595_v32 = vadd.f32 %v1594_v33, %v7034_v46  ;;  %v1596_v43 = vpop.f32.mrb[70].mxu1  ;;  %3568 = vmatprep.mubr.bf16.mxu0 %v2450_v19 }
 0x216   : > { %v1597_v35 = vadd.f32 %v1596_v43, %v7031_v61  ;;  %v1598_v40 = vpop.f32.mrb[71].mxu1  ;;  %3569 = vmatmul.mubr.bf16.vlgmr.msra.gmra.mrb[0].mxu0 %v2449_v54  ;;  %v2145_v34 = vmax.f32 %v1593_v22, 0.0 }
 0x217   : > { %v1599_v63 = vadd.f32 %v1598_v40, %v7034_v46  ;;  %3730 = vmatpush1.bf16.msra.mxu0 %v6048_v26  ;;  %v2146_v21 = vmax.f32 %v1595_v32, 0.0  ;;  %v6057_v26 = vld [vmem:[#allocation10 + $0x230] ss:$8 sps:$4 sm:$0xff]  }
 0x218   : > { %v2153_v6 = vmax.f32 %v1597_v35, 0.0  ;;  %1894 = vmatmul.mubr.bf16.gmra.mrb[176].mxu1 %v6846_v27  ;;  %3731 = vmatprep.subr.bf16.mxu0 %v6053_v25  ;;  %v6062_v25 = vld [vmem:[#allocation10 + $0x244] ss:$8 sps:$4 sm:$0xff]  }
 0x219   : > { %v2154_v15 = vmax.f32 %v1599_v63, 0.0  ;;  %1903 = vmatprep.mubr.bf16.mxu1 %v6848_v29 }
 0x21a   : > { %v2457_v48 = vpack.c.bf16 %v2153_v6, %v2145_v34 }
 0x21b   : > { %v2458_v53 = vpack.c.bf16 %v2154_v15, %v2146_v21  ;;  %v1602_v24 = vpop.f32.mrb[72].mxu1  ;;  %3732 = vmatpush1.bf16.msra.mxu0 %v6051_v60  ;;  %v6060_v60 = vld [vmem:[#allocation10 + $0x240] ss:$8 sps:$4 sm:$0xff]  }
 0x21c   : > { %v1603_v7 = vadd.f32 %v1602_v24, %v7031_v61  ;;  %v1604_v4 = vpop.f32.mrb[73].mxu1  ;;  %3733 = vmatprep.subr.bf16.mxu0 %v6056_v18  ;;  %v6065_v18 = vld [vmem:[#allocation10 + $0x254] ss:$8 sps:$4 sm:$0xff]  }
 0x21d   : > { %v1605_v23 = vadd.f32 %v1604_v4, %v7034_v46  ;;  %v1606_v62 = vpop.f32.mrb[74].mxu1  ;;  %3578 = vmatprep.mubr.bf16.mxu0 %v2458_v53 }
 0x21e   : > { %v1607_v54 = vadd.f32 %v1606_v62, %v7031_v61  ;;  %v1608_v19 = vpop.f32.mrb[75].mxu1  ;;  %3579 = vmatmul.mubr.bf16.gmra.mrb[4].mxu0 %v2457_v48  ;;  %v2161_v22 = vmax.f32 %v1603_v7, 0.0 }
 0x21f   : > { %v1609_v47 = vadd.f32 %v1608_v19, %v7034_v46  ;;  %3734 = vmatpush1.bf16.msra.mxu0 %v6054_v9  ;;  %v2162_v32 = vmax.f32 %v1605_v23, 0.0  ;;  %v6063_v9 = vld [vmem:[#allocation10 + $0x250] ss:$8 sps:$4 sm:$0xff]  }
 0x220   : > { %v2169_v33 = vmax.f32 %v1607_v54, 0.0  ;;  %1904 = vmatmul.mubr.bf16.gmra.mrb[180].mxu1 %v6856_v41  ;;  %3735 = vmatprep.subr.bf16.mxu0 %v6059_v28  ;;  %v6068_v28 = vld [vmem:[#allocation10 + $0x264] ss:$8 sps:$4 sm:$0xff]  }
 0x221   : > { %v2170_v43 = vmax.f32 %v1609_v47, 0.0  ;;  %1913 = vmatprep.mubr.bf16.mxu1 %v6858_v42 }
 0x222   : > { %v2465_v35 = vpack.c.bf16 %v2169_v33, %v2161_v22 }
 0x223   : > { %v2466_v40 = vpack.c.bf16 %v2170_v43, %v2162_v32  ;;  %v1612_v63 = vpop.f32.mrb[76].mxu1  ;;  %3736 = vmatpush1.bf16.msra.mxu0 %v6057_v26  ;;  %v6066_v26 = vld [vmem:[#allocation10 + $0x260] ss:$8 sps:$4 sm:$0xff]  }
 0x224   : > { %v1613_v34 = vadd.f32 %v1612_v63, %v7031_v61  ;;  %v1614_v6 = vpop.f32.mrb[77].mxu1  ;;  %3737 = vmatprep.subr.bf16.mxu0 %v6062_v25  ;;  %v6071_v25 = vld [vmem:[#allocation10 + $0x274] ss:$8 sps:$4 sm:$0xff]  }
 0x225   : > { %v1615_v21 = vadd.f32 %v1614_v6, %v7034_v46  ;;  %v1616_v15 = vpop.f32.mrb[78].mxu1  ;;  %3588 = vmatprep.mubr.bf16.mxu0 %v2466_v40 }
 0x226   : > { %v1617_v48 = vadd.f32 %v1616_v15, %v7031_v61  ;;  %v1618_v53 = vpop.f32.mrb[79].mxu1  ;;  %3589 = vmatmul.mubr.bf16.gmra.mrb[8].mxu0 %v2465_v35  ;;  %v2177_v7 = vmax.f32 %v1613_v34, 0.0 }
 0x227   : > { %v1619_v24 = vadd.f32 %v1618_v53, %v7034_v46  ;;  %3738 = vmatpush1.bf16.msra.mxu0 %v6060_v60  ;;  %v2178_v23 = vmax.f32 %v1615_v21, 0.0  ;;  %v6069_v60 = vld [vmem:[#allocation10 + $0x270] ss:$8 sps:$4 sm:$0xff]  }
 0x228   : > { %v2185_v4 = vmax.f32 %v1617_v48, 0.0  ;;  %1914 = vmatmul.mubr.bf16.gmra.mrb[184].mxu1 %v6866_v49  ;;  %3739 = vmatprep.subr.bf16.mxu0 %v6065_v18  ;;  %v6074_v18 = vld [vmem:[#allocation10 + $0x284] ss:$8 sps:$4 sm:$0xff]  }
 0x229   : > { %v2186_v62 = vmax.f32 %v1619_v24, 0.0  ;;  %1923 = vmatprep.mubr.bf16.mxu1 %v6868_v52 }
 0x22a   : > { %v2473_v54 = vpack.c.bf16 %v2185_v4, %v2177_v7 }
 0x22b   : > { %v2474_v19 = vpack.c.bf16 %v2186_v62, %v2178_v23  ;;  %v1622_v47 = vpop.f32.mrb[80].mxu1  ;;  %3740 = vmatpush1.bf16.msra.mxu0 %v6063_v9  ;;  %v6072_v9 = vld [vmem:[#allocation10 + $0x280] ss:$8 sps:$4 sm:$0xff]  }
 0x22c   : > { %v1623_v22 = vadd.f32 %v1622_v47, %v7031_v61  ;;  %v1624_v33 = vpop.f32.mrb[81].mxu1  ;;  %3741 = vmatprep.subr.bf16.mxu0 %v6068_v28  ;;  %v6077_v28 = vld [vmem:[#allocation10 + $0x294] ss:$8 sps:$4 sm:$0xff]   ;;  %v6075_v47 = vld [vmem:[#allocation10 + $0x290] ss:$8 sps:$4 sm:$0xff]  }
 0x22d   : > { %v1625_v32 = vadd.f32 %v1624_v33, %v7034_v46  ;;  %v1626_v43 = vpop.f32.mrb[82].mxu1  ;;  %3598 = vmatprep.mubr.bf16.mxu0 %v2474_v19  ;;  %v6080_v33 = vld [vmem:[#allocation10 + $0x2a4] ss:$8 sps:$4 sm:$0xff]  }
 0x22e   : > { %v1627_v35 = vadd.f32 %v1626_v43, %v7031_v61  ;;  %v1628_v40 = vpop.f32.mrb[83].mxu1  ;;  %3599 = vmatmul.mubr.bf16.gmra.mrb[12].mxu0 %v2473_v54  ;;  %v2193_v34 = vmax.f32 %v1623_v22, 0.0 }
 0x22f   : > { %v1629_v63 = vadd.f32 %v1628_v40, %v7034_v46  ;;  %3742 = vmatpush1.bf16.msra.mxu0 %v6066_v26  ;;  %v2194_v21 = vmax.f32 %v1625_v32, 0.0 }
 0x230   : > { %v2201_v6 = vmax.f32 %v1627_v35, 0.0  ;;  %1924 = vmatmul.mubr.bf16.gmra.mrb[188].mxu1 %v6874_v55  ;;  %3743 = vmatprep.subr.bf16.mxu0 %v6071_v25 }
 0x231   : > { %v2202_v15 = vmax.f32 %v1629_v63, 0.0  ;;  %1966 = vmatprep.mubr.bf16.mxu1 %v6711_v20  ;;  %v6078_v63 = vld [vmem:[#allocation10 + $0x2a0] ss:$8 sps:$4 sm:$0xff]  }
 0x232   : > { %v2481_v48 = vpack.c.bf16 %v2201_v6, %v2193_v34  ;;  %v6083_v6 = vld [vmem:[#allocation10 + $0x2b4] ss:$8 sps:$4 sm:$0xff]  }
 0x233   : > { %v2482_v53 = vpack.c.bf16 %v2202_v15, %v2194_v21  ;;  %v1632_v24 = vpop.f32.mrb[84].mxu1  ;;  %3744 = vmatpush1.bf16.msra.mxu0 %v6069_v60 }
 0x234   : > { %v1633_v7 = vadd.f32 %v1632_v24, %v7031_v61  ;;  %v1634_v4 = vpop.f32.mrb[85].mxu1  ;;  %3745 = vmatprep.subr.bf16.mxu0 %v6074_v18 }
 0x235   : > { %v1635_v23 = vadd.f32 %v1634_v4, %v7034_v46  ;;  %v1636_v62 = vpop.f32.mrb[86].mxu1  ;;  %3608 = vmatprep.mubr.bf16.mxu0 %v2482_v53 }
 0x236   : > { %v1637_v54 = vadd.f32 %v1636_v62, %v7031_v61  ;;  %v1638_v19 = vpop.f32.mrb[87].mxu1  ;;  %3609 = vmatmul.mubr.bf16.gmra.mrb[16].mxu0 %v2481_v48  ;;  %v2209_v26 = vmax.f32 %v1633_v7, 0.0  ;;  %v6081_v48 = vld [vmem:[#allocation10 + $0x2b0] ss:$8 sps:$4 sm:$0xff]  }
 0x237   : > { %v1639_v20 = vadd.f32 %v1638_v19, %v7034_v46  ;;  %3746 = vmatpush1.bf16.msra.mxu0 %v6072_v9  ;;  %v2210_v25 = vmax.f32 %v1635_v23, 0.0  ;;  %v6086_v9 = vld [vmem:[#allocation10 + $0x2c4] ss:$8 sps:$4 sm:$0xff]  }
 0x238   : > { %v2217_v22 = vmax.f32 %v1637_v54, 0.0  ;;  %1967 = vmatmul.mubr.bf16.vlgmr.msra.gmra.mrb[192].mxu1 %v6718_v12  ;;  %3747 = vmatprep.subr.bf16.mxu0 %v6077_v28  ;;  %v6084_v54 = vld [vmem:[#allocation10 + $0x2c0] ss:$8 sps:$4 sm:$0xff]  }
 0x239   : > { %v2218_v32 = vmax.f32 %v1639_v20, 0.0  ;;  %1976 = vmatprep.mubr.bf16.mxu1 %v6720_v14 }
 0x23a   : > { %v2489_v43 = vpack.c.bf16 %v2217_v22, %v2209_v26 }
 0x23b   : > { %v2490_v35 = vpack.c.bf16 %v2218_v32, %v2210_v25  ;;  %v1642_v40 = vpop.f32.mrb[88].mxu1  ;;  %3748 = vmatpush1.bf16.msra.mxu0 %v6075_v47  ;;  %v6089_v47 = vld [vmem:[#allocation10 + $0x2d4] ss:$8 sps:$4 sm:$0xff]   ;;  %v6087_v25 = vld [vmem:[#allocation10 + $0x2d0] ss:$8 sps:$4 sm:$0xff]  }
 0x23c   : > { %v1643_v60 = vadd.f32 %v1642_v40, %v7031_v61  ;;  %v1644_v34 = vpop.f32.mrb[89].mxu1  ;;  %3749 = vmatprep.subr.bf16.mxu0 %v6080_v33 }
 0x23d   : > { %v1645_v18 = vadd.f32 %v1644_v34, %v7034_v46  ;;  %v1646_v21 = vpop.f32.mrb[90].mxu1  ;;  %3618 = vmatprep.mubr.bf16.mxu0 %v2490_v35  ;;  %v6092_v35 = vld [vmem:[#allocation10 + $0x2e4] ss:$8 sps:$4 sm:$0xff]  }
 0x23e   : > { %v1647_v12 = vadd.f32 %v1646_v21, %v7031_v61  ;;  %v1648_v15 = vpop.f32.mrb[91].mxu1  ;;  %3619 = vmatmul.mubr.bf16.gmra.mrb[20].mxu0 %v2489_v43  ;;  %v2225_v53 = vmax.f32 %v1643_v60, 0.0 }
 0x23f   : > { %v1649_v14 = vadd.f32 %v1648_v15, %v7034_v46  ;;  %3750 = vmatpush1.bf16.msra.mxu0 %v6078_v63  ;;  %v2226_v7 = vmax.f32 %v1645_v18, 0.0  ;;  %v6090_v18 = vld [vmem:[#allocation10 + $0x2e0] ss:$8 sps:$4 sm:$0xff]   ;;  %v6095_v15 = vld [vmem:[#allocation10 + $0x2f4] ss:$8 sps:$4 sm:$0xff]  }
 0x240   : > { %v2233_v24 = vmax.f32 %v1647_v12, 0.0  ;;  %1977 = vmatmul.mubr.bf16.gmra.mrb[196].mxu1 %v6734_v30  ;;  %3751 = vmatprep.subr.bf16.mxu0 %v6083_v6 }
 0x241   : > { %v2234_v4 = vmax.f32 %v1649_v14, 0.0  ;;  %1986 = vmatprep.mubr.bf16.mxu1 %v6736_v31 }
 0x242   : > { %v2497_v28 = vpack.c.bf16 %v2233_v24, %v2225_v53  ;;  %v6093_v24 = vld [vmem:[#allocation10 + $0x2f0] ss:$8 sps:$4 sm:$0xff]  }
 0x243   : > { %v2498_v23 = vpack.c.bf16 %v2234_v4, %v2226_v7  ;;  %v1652_v62 = vpop.f32.mrb[92].mxu1  ;;  %3752 = vmatpush1.bf16.msra.mxu0 %v6081_v48  ;;  %v6098_v4 = vld [vmem:[#allocation10 + $0x304] ss:$8 sps:$4 sm:$0xff]  }
 0x244   : > { %v1653_v19 = vadd.f32 %v1652_v62, %v7031_v61  ;;  %v1654_v20 = vpop.f32.mrb[93].mxu1  ;;  %3753 = vmatprep.subr.bf16.mxu0 %v6086_v9 }
 0x245   : > { %v1655_v26 = vadd.f32 %v1654_v20, %v7034_v46  ;;  %v1656_v22 = vpop.f32.mrb[94].mxu1  ;;  %3628 = vmatprep.mubr.bf16.mxu0 %v2498_v23 }
 0x246   : > { %v1657_v30 = vadd.f32 %v1656_v22, %v7031_v61  ;;  %v1658_v33 = vpop.f32.mrb[95].mxu1  ;;  %3629 = vmatmul.mubr.bf16.gmra.mrb[24].mxu0 %v2497_v28  ;;  %v2241_v32 = vmax.f32 %v1653_v19, 0.0 }
 0x247   : > { %v1659_v31 = vadd.f32 %v1658_v33, %v7034_v46  ;;  %3754 = vmatpush1.bf16.msra.mxu0 %v6084_v54  ;;  %v2242_v40 = vmax.f32 %v1655_v26, 0.0 }
 0x248   : > { %v2249_v43 = vmax.f32 %v1657_v30, 0.0  ;;  %1987 = vmatmul.mubr.bf16.gmra.mrb[200].mxu1 %v6744_v44  ;;  %3755 = vmatprep.subr.bf16.mxu0 %v6089_v47 }
 0x249   : > { %v2250_v63 = vmax.f32 %v1659_v31, 0.0  ;;  %1996 = vmatprep.mubr.bf16.mxu1 %v6746_v45 }
 0x24a   : > { %v2505_v60 = vpack.c.bf16 %v2249_v43, %v2241_v32 }
 0x24b   : > { %v2506_v34 = vpack.c.bf16 %v2250_v63, %v2242_v40  ;;  %v1662_v6 = vpop.f32.mrb[96].mxu1  ;;  %3756 = vmatpush1.bf16.msra.mxu0 %v6087_v25 }
 0x24c   : > { %v1663_v21 = vadd.f32 %v1662_v6, %v7031_v61  ;;  %v1664_v12 = vpop.f32.mrb[97].mxu1  ;;  %3757 = vmatprep.subr.bf16.mxu0 %v6092_v35 }
 0x24d   : > { %v1665_v14 = vadd.f32 %v1664_v12, %v7034_v46  ;;  %v1666_v48 = vpop.f32.mrb[98].mxu1  ;;  %3638 = vmatprep.mubr.bf16.mxu0 %v2506_v34 }
 0x24e   : > { %v1667_v44 = vadd.f32 %v1666_v48, %v7031_v61  ;;  %v1668_v53 = vpop.f32.mrb[99].mxu1  ;;  %3639 = vmatmul.mubr.bf16.gmra.mrb[28].mxu0 %v2505_v60  ;;  %v2257_v9 = vmax.f32 %v1663_v21, 0.0 }
 0x24f   : > { %v1669_v45 = vadd.f32 %v1668_v53, %v7034_v46  ;;  %3758 = vmatpush1.bf16.msra.mxu0 %v6090_v18  ;;  %v2258_v28 = vmax.f32 %v1665_v14, 0.0 }
 0x250   : > { %v2265_v7 = vmax.f32 %v1667_v44, 0.0  ;;  %1997 = vmatmul.mubr.bf16.gmra.mrb[204].mxu1 %v6754_v58  ;;  %3759 = vmatprep.subr.bf16.mxu0 %v6095_v15 }
 0x251   : > { %v2266_v23 = vmax.f32 %v1669_v45, 0.0  ;;  %2006 = vmatprep.mubr.bf16.mxu1 %v6756_v59 }
 0x252   : > { %v2513_v62 = vpack.c.bf16 %v2265_v7, %v2257_v9 }
 0x253   : > { %v2514_v54 = vpack.c.bf16 %v2266_v23, %v2258_v28  ;;  %v1672_v19 = vpop.f32.mrb[100].mxu1  ;;  %3760 = vmatpush1.bf16.msra.mxu0 %v6093_v24 }
 0x254   : > { %v1673_v20 = vadd.f32 %v1672_v19, %v7031_v61  ;;  %v1674_v47 = vpop.f32.mrb[101].mxu1  ;;  %3922 = vmatprep.subr.bf16.mxu0 %v6098_v4 }
 0x255   : > { %v1675_v26 = vadd.f32 %v1674_v47, %v7034_v46  ;;  %v1676_v22 = vpop.f32.mrb[102].mxu1  ;;  %3648 = vmatprep.mubr.bf16.mxu0 %v2514_v54 }
 0x256   : > { %v1677_v58 = vadd.f32 %v1676_v22, %v7031_v61  ;;  %v1678_v30 = vpop.f32.mrb[103].mxu1  ;;  %3649 = vmatmul.mubr.bf16.gmra.mrb[32].mxu0 %v2513_v62  ;;  %v2273_v31 = vmax.f32 %v1673_v20, 0.0 }
 0x257   : > { %v1679_v33 = vadd.f32 %v1678_v30, %v7034_v46  ;;  %v2274_v25 = vmax.f32 %v1675_v26, 0.0 }
 0x258   : > { %v2281_v59 = vmax.f32 %v1677_v58, 0.0  ;;  %2007 = vmatmul.mubr.bf16.gmra.mrb[208].mxu1 %v6764_v10 }
 0x259   : > { %v2282_v32 = vmax.f32 %v1679_v33, 0.0  ;;  %2016 = vmatprep.mubr.bf16.mxu1 %v6766_v11 }
 0x25a   : > { %v2521_v43 = vpack.c.bf16 %v2281_v59, %v2273_v31 }
 0x25b   : > { %v2522_v35 = vpack.c.bf16 %v2282_v32, %v2274_v25  ;;  %v1682_v40 = vpop.f32.mrb[104].mxu1 }
 0x25c   : > { %v1683_v63 = vadd.f32 %v1682_v40, %v7031_v61  ;;  %v1684_v60 = vpop.f32.mrb[105].mxu1 }
 0x25d   : > { %v1685_v34 = vadd.f32 %v1684_v60, %v7034_v46  ;;  %v1686_v6 = vpop.f32.mrb[106].mxu1  ;;  %3658 = vmatprep.mubr.bf16.mxu0 %v2522_v35 }
 0x25e   : > { %v1687_v18 = vadd.f32 %v1686_v6, %v7031_v61  ;;  %v1688_v21 = vpop.f32.mrb[107].mxu1  ;;  %3659 = vmatmul.mubr.bf16.gmra.mrb[36].mxu0 %v2521_v43  ;;  %v2289_v12 = vmax.f32 %v1683_v63, 0.0 }
 0x25f   : > { %v1689_v10 = vadd.f32 %v1688_v21, %v7034_v46  ;;  %v2290_v11 = vmax.f32 %v1685_v34, 0.0 }
 0x260   : > { %v2297_v15 = vmax.f32 %v1687_v18, 0.0  ;;  %2017 = vmatmul.mubr.bf16.gmra.mrb[212].mxu1 %v6774_v36 }
 0x261   : > { %v2298_v14 = vmax.f32 %v1689_v10, 0.0  ;;  %2026 = vmatprep.mubr.bf16.mxu1 %v6776_v37 }
 0x262   : > { %v2529_v48 = vpack.c.bf16 %v2297_v15, %v2289_v12 }
 0x263   : > { %v2530_v44 = vpack.c.bf16 %v2298_v14, %v2290_v11  ;;  %v1692_v53 = vpop.f32.mrb[108].mxu1 }
 0x264   : > { %v1693_v45 = vadd.f32 %v1692_v53, %v7031_v61  ;;  %v1694_v24 = vpop.f32.mrb[109].mxu1 }
 0x265   : > { %v1695_v9 = vadd.f32 %v1694_v24, %v7034_v46  ;;  %v1696_v7 = vpop.f32.mrb[110].mxu1  ;;  %3668 = vmatprep.mubr.bf16.mxu0 %v2530_v44 }
 0x266   : > { %v1697_v4 = vadd.f32 %v1696_v7, %v7031_v61  ;;  %v1698_v28 = vpop.f32.mrb[111].mxu1  ;;  %3669 = vmatmul.mubr.bf16.gmra.mrb[40].mxu0 %v2529_v48  ;;  %v2305_v23 = vmax.f32 %v1693_v45, 0.0 }
 0x267   : > { %v1699_v36 = vadd.f32 %v1698_v28, %v7034_v46  ;;  %v2306_v37 = vmax.f32 %v1695_v9, 0.0 }
 0x268   : > { %v2313_v62 = vmax.f32 %v1697_v4, 0.0  ;;  %2027 = vmatmul.mubr.bf16.gmra.mrb[216].mxu1 %v6784_v56 }
 0x269   : > { %v2314_v54 = vmax.f32 %v1699_v36, 0.0  ;;  %2036 = vmatprep.mubr.bf16.mxu1 %v6786_v57 }
 0x26a   : > { %v2537_v19 = vpack.c.bf16 %v2313_v62, %v2305_v23 }
 0x26b   : > { %v2538_v20 = vpack.c.bf16 %v2314_v54, %v2306_v37  ;;  %v1702_v47 = vpop.f32.mrb[112].mxu1 }
 0x26c   : > { %v1703_v26 = vadd.f32 %v1702_v47, %v7031_v61  ;;  %v1704_v22 = vpop.f32.mrb[113].mxu1 }
 0x26d   : > { %v1705_v58 = vadd.f32 %v1704_v22, %v7034_v46  ;;  %v1706_v30 = vpop.f32.mrb[114].mxu1  ;;  %3678 = vmatprep.mubr.bf16.mxu0 %v2538_v20  ;;  %v693_v20 = vsub.s32 4, %v6908_v2  ;;  %v697_v22 = vsub.s32 5, %v6908_v2 }
 0x26e   : > { %v1707_v33 = vadd.f32 %v1706_v30, %v7031_v61  ;;  %v1708_v31 = vpop.f32.mrb[115].mxu1  ;;  %3679 = vmatmul.mubr.bf16.gmra.mrb[44].mxu0 %v2537_v19  ;;  %v2321_v59 = vmax.f32 %v1703_v26, 0.0 }
 0x26f   : > { %v1709_v56 = vadd.f32 %v1708_v31, %v7034_v46  ;;  %v2322_v57 = vmax.f32 %v1705_v58, 0.0  ;;  %v7137_v31 = vld [vmem:[%s8229_s4] sm:$0xff] }
 0x270   : > { %v2329_v25 = vmax.f32 %v1707_v33, 0.0  ;;  %2037 = vmatmul.mubr.bf16.gmra.mrb[220].mxu1 %v6794_v16 }
 0x271   : > { %v2330_v32 = vmax.f32 %v1709_v56, 0.0  ;;  %2046 = vmatprep.mubr.bf16.mxu1 %v6796_v17  ;;  %v7140_v56 = vrot.slane %v7137_v31, %v693_v20 }
 0x272   : > { %v2545_v43 = vpack.c.bf16 %v2329_v25, %v2321_v59 }
 0x273   : > { %v2546_v35 = vpack.c.bf16 %v2330_v32, %v2322_v57  ;;  %v1712_v40 = vpop.f32.mrb[116].mxu1 }
 0x274   : > { %v1713_v63 = vadd.f32 %v1712_v40, %v7031_v61  ;;  %v1714_v60 = vpop.f32.mrb[117].mxu1 }
 0x275   : > { %v1715_v34 = vadd.f32 %v1714_v60, %v7034_v46  ;;  %v1716_v6 = vpop.f32.mrb[118].mxu1  ;;  %3688 = vmatprep.mubr.bf16.mxu0 %v2546_v35 }
 0x276   : > { %v1717_v18 = vadd.f32 %v1716_v6, %v7031_v61  ;;  %v1718_v21 = vpop.f32.mrb[119].mxu1  ;;  %3689 = vmatmul.mubr.bf16.gmra.mrb[48].mxu0 %v2545_v43  ;;  %v2337_v10 = vmax.f32 %v1713_v63, 0.0 }
 0x277   : > { %v1719_v16 = vadd.f32 %v1718_v21, %v7034_v46  ;;  %v2338_v17 = vmax.f32 %v1715_v34, 0.0 }
 0x278   : > { %v2345_v12 = vmax.f32 %v1717_v18, 0.0  ;;  %2047 = vmatmul.mubr.bf16.gmra.mrb[224].mxu1 %v6806_v38 }
 0x279   : > { %v2346_v15 = vmax.f32 %v1719_v16, 0.0  ;;  %2056 = vmatprep.mubr.bf16.mxu1 %v6808_v39 }
 0x27a   : > { %v2553_v11 = vpack.c.bf16 %v2345_v12, %v2337_v10 }
 0x27b   : > { %v2554_v14 = vpack.c.bf16 %v2346_v15, %v2338_v17  ;;  %v1722_v48 = vpop.f32.mrb[120].mxu1  ;;  %v6096_v17 = vld [vmem:[#allocation10 + $0x300] ss:$8 sps:$4 sm:$0xff]  }
 0x27c   : > { %v1723_v44 = vadd.f32 %v1722_v48, %v7031_v61  ;;  %v1724_v53 = vpop.f32.mrb[121].mxu1 }
 0x27d   : > { %v1725_v45 = vadd.f32 %v1724_v53, %v7034_v46  ;;  %v1726_v24 = vpop.f32.mrb[122].mxu1  ;;  %3698 = vmatprep.mubr.bf16.mxu0 %v2554_v14  ;;  %v6101_v14 = vld [vmem:[#allocation10 + $0x314] ss:$8 sps:$4 sm:$0xff]  }
 0x27e   : > { %v1727_v9 = vadd.f32 %v1726_v24, %v7031_v61  ;;  %v1728_v7 = vpop.f32.mrb[123].mxu1  ;;  %3699 = vmatmul.mubr.bf16.gmra.mrb[52].mxu0 %v2553_v11  ;;  %v2353_v4 = vmax.f32 %v1723_v44, 0.0 }
 0x27f   : > { %v1729_v38 = vadd.f32 %v1728_v7, %v7034_v46  ;;  %v2354_v39 = vmax.f32 %v1725_v45, 0.0  ;;  %v6104_v7 = vld [vmem:[#allocation10 + $0x324] ss:$8 sps:$4 sm:$0xff]  }
 0x280   : > { %v2361_v28 = vmax.f32 %v1727_v9, 0.0  ;;  %2057 = vmatmul.mubr.bf16.gmra.mrb[228].mxu1 %v6816_v50 }
 0x281   : > { %v2362_v36 = vmax.f32 %v1729_v38, 0.0  ;;  %2066 = vmatprep.mubr.bf16.mxu1 %v6818_v51 }
 0x282   : > { %v2561_v23 = vpack.c.bf16 %v2361_v28, %v2353_v4 }
 0x283   : > { %v2562_v62 = vpack.c.bf16 %v2362_v36, %v2354_v39  ;;  %v1732_v37 = vpop.f32.mrb[124].mxu1 }
 0x284   : > { %v1733_v54 = vadd.f32 %v1732_v37, %v7031_v61  ;;  %v1734_v19 = vpop.f32.mrb[125].mxu1 }
 0x285   : > { %v1735_v47 = vadd.f32 %v1734_v19, %v7034_v46  ;;  %v1736_v26 = vpop.f32.mrb[126].mxu1  ;;  %3708 = vmatprep.mubr.bf16.mxu0 %v2562_v62 }
 0x286   : > { %v1737_v50 = vadd.f32 %v1736_v26, %v7031_v61  ;;  %v1738_v58 = vpop.f32.mrb[127].mxu1  ;;  %3709 = vmatmul.mubr.bf16.gmra.mrb[56].mxu0 %v2561_v23  ;;  %v2369_v30 = vmax.f32 %v1733_v54, 0.0  ;;  %v7143_v61 = vrot.slane %v7137_v31, %v697_v22  ;;  %v6102_v23 = vld [vmem:[#allocation10 + $0x320] ss:$8 sps:$4 sm:$0xff]   ;;  %v6107_v54 = vld [vmem:[#allocation10 + $0x334] ss:$8 sps:$4 sm:$0xff]  }
 0x287   : > { %v1739_v51 = vadd.f32 %v1738_v58, %v7034_v46  ;;  %v2370_v59 = vmax.f32 %v1735_v47, 0.0  ;;  %v6105_v26 = vld [vmem:[#allocation10 + $0x330] ss:$8 sps:$4 sm:$0xff]   ;;  %v6110_v58 = vld [vmem:[#allocation10 + $0x344] ss:$8 sps:$4 sm:$0xff]  }
 0x288   : > { %v2377_v33 = vmax.f32 %v1737_v50, 0.0  ;;  %2067 = vmatmul.mubr.bf16.gmra.mrb[232].mxu1 %v6826_v0 }
 0x289   : > { %v2378_v25 = vmax.f32 %v1739_v51, 0.0  ;;  %2076 = vmatprep.mubr.bf16.mxu1 %v6828_v1 }
 0x28a   : > { %v2569_v46 = vpack.c.bf16 %v2377_v33, %v2369_v30 }
 0x28b   : > { %v2570_v57 = vpack.c.bf16 %v2378_v25, %v2370_v59  ;;  %v1775_v32 = vpop.f32.mrb[128].mxu1 }
 0x28c   : > { %v1776_v0 = vadd.f32 %v1775_v32, %v7140_v56  ;;  %v1777_v43 = vpop.f32.mrb[129].mxu1 }
 0x28d   : > { %v1778_v35 = vadd.f32 %v1777_v43, %v7143_v61  ;;  %v1779_v40 = vpop.f32.mrb[130].mxu1  ;;  %3718 = vmatprep.mubr.bf16.mxu0 %v2570_v57 }
 0x28e   : > { %v1780_v63 = vadd.f32 %v1779_v40, %v7140_v56  ;;  %v1781_v60 = vpop.f32.mrb[131].mxu1  ;;  %3719 = vmatmul.mubr.bf16.gmra.mrb[60].mxu0 %v2569_v46  ;;  %v2131_v6 = vmax.f32 %v1776_v0, 0.0  ;;  %v6108_v46 = vld [vmem:[#allocation10 + $0x340] ss:$8 sps:$4 sm:$0xff]   ;;  %v6113_v0 = vld [vmem:[#allocation10 + $0x354] ss:$8 sps:$4 sm:$0xff]  }
 0x28f   : > { %v1782_v34 = vadd.f32 %v1781_v60, %v7143_v61  ;;  %v2132_v1 = vmax.f32 %v1778_v35, 0.0 }
 0x290   : > { %v2139_v18 = vmax.f32 %v1780_v63, 0.0  ;;  %2077 = vmatmul.mubr.bf16.gmra.mrb[236].mxu1 %v6836_v8  ;;  %v6111_v63 = vld [vmem:[#allocation10 + $0x350] ss:$8 sps:$4 sm:$0xff]  }
 0x291   : > { %v2140_v21 = vmax.f32 %v1782_v34, 0.0  ;;  %2086 = vmatprep.mubr.bf16.mxu1 %v6838_v13  ;;  %v6099_v13 = vld [vmem:[#allocation10 + $0x310] ss:$8 sps:$4 sm:$0xff]  }
 0x292   : > { %v2451_v16 = vpack.c.bf16 %v2139_v18, %v2131_v6  ;;  %v6116_v6 = vld [vmem:[#allocation10 + $0x364] ss:$8 sps:$4 sm:$0xff]  }
 0x293   : > { %v2452_v10 = vpack.c.bf16 %v2140_v21, %v2132_v1  ;;  %v1785_v12 = vpop.f32.mrb[132].mxu1 }
 0x294   : > { %v1786_v15 = vadd.f32 %v1785_v12, %v7140_v56  ;;  %v1787_v11 = vpop.f32.mrb[133].mxu1  ;;  %v6114_v12 = vld [vmem:[#allocation10 + $0x360] ss:$8 sps:$4 sm:$0xff]  }
 0x295   : > { %v1788_v48 = vadd.f32 %v1787_v11, %v7143_v61  ;;  %v1789_v44 = vpop.f32.mrb[134].mxu1  ;;  %3761 = vmatprep.mubr.bf16.mxu0 %v2452_v10  ;;  %v6119_v11 = vld [vmem:[#allocation10 + $0x374] ss:$8 sps:$4 sm:$0xff]  }
 0x296   : > { %v1790_v53 = vadd.f32 %v1789_v44, %v7140_v56  ;;  %v1791_v45 = vpop.f32.mrb[135].mxu1  ;;  %3762 = vmatmul.mubr.bf16.vlgmr.msra.gmra.mrb[0].mxu0 %v2451_v16  ;;  %v2147_v24 = vmax.f32 %v1786_v15, 0.0 }
 0x297   : > { %v1792_v8 = vadd.f32 %v1791_v45, %v7143_v61  ;;  %3923 = vmatpush1.bf16.msra.mxu0 %v6096_v17  ;;  %v2148_v38 = vmax.f32 %v1788_v48, 0.0 }
 0x298   : > { %v2155_v9 = vmax.f32 %v1790_v53, 0.0  ;;  %2087 = vmatmul.mubr.bf16.gmra.mrb[240].mxu1 %v6846_v27  ;;  %3924 = vmatprep.subr.bf16.mxu0 %v6101_v14  ;;  %v6117_v53 = vld [vmem:[#allocation10 + $0x370] ss:$8 sps:$4 sm:$0xff]  }
 0x299   : > { %v2156_v4 = vmax.f32 %v1792_v8, 0.0  ;;  %2096 = vmatprep.mubr.bf16.mxu1 %v6848_v29 }
 0x29a   : > { %v2459_v28 = vpack.c.bf16 %v2155_v9, %v2147_v24 }
 0x29b   : > { %v2460_v39 = vpack.c.bf16 %v2156_v4, %v2148_v38  ;;  %v1795_v36 = vpop.f32.mrb[136].mxu1  ;;  %3925 = vmatpush1.bf16.msra.mxu0 %v6099_v13  ;;  %v6122_v13 = vld [vmem:[#allocation10 + $0x384] ss:$8 sps:$4 sm:$0xff]  }
 0x29c   : > { %v1796_v62 = vadd.f32 %v1795_v36, %v7140_v56  ;;  %v1797_v37 = vpop.f32.mrb[137].mxu1  ;;  %3926 = vmatprep.subr.bf16.mxu0 %v6104_v7 }
 0x29d   : > { %v1798_v19 = vadd.f32 %v1797_v37, %v7143_v61  ;;  %v1799_v20 = vpop.f32.mrb[138].mxu1  ;;  %3771 = vmatprep.mubr.bf16.mxu0 %v2460_v39 }
 0x29e   : > { %v1800_v27 = vadd.f32 %v1799_v20, %v7140_v56  ;;  %v1801_v47 = vpop.f32.mrb[139].mxu1  ;;  %3772 = vmatmul.mubr.bf16.gmra.mrb[4].mxu0 %v2459_v28  ;;  %v2163_v22 = vmax.f32 %v1796_v62, 0.0  ;;  %v6120_v28 = vld [vmem:[#allocation10 + $0x380] ss:$8 sps:$4 sm:$0xff]   ;;  %v6123_v20 = vld [vmem:[#allocation10 + $0x390] ss:$8 sps:$4 sm:$0xff]  }
 0x29f   : > { %v1802_v29 = vadd.f32 %v1801_v47, %v7143_v61  ;;  %3927 = vmatpush1.bf16.msra.mxu0 %v6102_v23  ;;  %v2164_v51 = vmax.f32 %v1798_v19, 0.0  ;;  %v6125_v23 = vld [vmem:[#allocation10 + $0x394] ss:$8 sps:$4 sm:$0xff]  }
 0x2a0   : > { %v2171_v50 = vmax.f32 %v1800_v27, 0.0  ;;  %2097 = vmatmul.mubr.bf16.gmra.mrb[244].mxu1 %v6856_v41  ;;  %3928 = vmatprep.subr.bf16.mxu0 %v6107_v54 }
 0x2a1   : > { %v2172_v30 = vmax.f32 %v1802_v29, 0.0  ;;  %2106 = vmatprep.mubr.bf16.mxu1 %v6858_v42  ;;  %v6128_v29 = vld [vmem:[#allocation10 + $0x3a4] ss:$8 sps:$4 sm:$0xff]  }
 0x2a2   : > { %v2467_v33 = vpack.c.bf16 %v2171_v50, %v2163_v22 }
 0x2a3   : > { %v2468_v59 = vpack.c.bf16 %v2172_v30, %v2164_v51  ;;  %v1805_v25 = vpop.f32.mrb[140].mxu1  ;;  %3929 = vmatpush1.bf16.msra.mxu0 %v6105_v26  ;;  %v6126_v30 = vld [vmem:[#allocation10 + $0x3a0] ss:$8 sps:$4 sm:$0xff]  }
 0x2a4   : > { %v1806_v57 = vadd.f32 %v1805_v25, %v7140_v56  ;;  %v1807_v32 = vpop.f32.mrb[141].mxu1  ;;  %3930 = vmatprep.subr.bf16.mxu0 %v6110_v58  ;;  %v6131_v25 = vld [vmem:[#allocation10 + $0x3b4] ss:$8 sps:$4 sm:$0xff]  }
 0x2a5   : > { %v1808_v43 = vadd.f32 %v1807_v32, %v7143_v61  ;;  %v1809_v35 = vpop.f32.mrb[142].mxu1  ;;  %3781 = vmatprep.mubr.bf16.mxu0 %v2468_v59 }
 0x2a6   : > { %v1810_v41 = vadd.f32 %v1809_v35, %v7140_v56  ;;  %v1811_v40 = vpop.f32.mrb[143].mxu1  ;;  %3782 = vmatmul.mubr.bf16.gmra.mrb[8].mxu0 %v2467_v33  ;;  %v2179_v60 = vmax.f32 %v1806_v57, 0.0  ;;  %v6129_v35 = vld [vmem:[#allocation10 + $0x3b0] ss:$8 sps:$4 sm:$0xff]  }
 0x2a7   : > { %v1812_v42 = vadd.f32 %v1811_v40, %v7143_v61  ;;  %3931 = vmatpush1.bf16.msra.mxu0 %v6108_v46  ;;  %v2180_v18 = vmax.f32 %v1808_v43, 0.0 }
 0x2a8   : > { %v2187_v34 = vmax.f32 %v1810_v41, 0.0  ;;  %2107 = vmatmul.mubr.bf16.gmra.mrb[248].mxu1 %v6866_v49  ;;  %3932 = vmatprep.subr.bf16.mxu0 %v6113_v0 }
 0x2a9   : > { %v2188_v1 = vmax.f32 %v1812_v42, 0.0  ;;  %2116 = vmatprep.mubr.bf16.mxu1 %v6868_v52  ;;  %v6134_v42 = vld [vmem:[#allocation10 + $0x3c4] ss:$8 sps:$4 sm:$0xff]  }
 0x2aa   : > { %v2475_v21 = vpack.c.bf16 %v2187_v34, %v2179_v60 }
 0x2ab   : > { %v2476_v16 = vpack.c.bf16 %v2188_v1, %v2180_v18  ;;  %v1815_v10 = vpop.f32.mrb[144].mxu1  ;;  %3933 = vmatpush1.bf16.msra.mxu0 %v6111_v63  ;;  %v6132_v1 = vld [vmem:[#allocation10 + $0x3c0] ss:$8 sps:$4 sm:$0xff]  }
 0x2ac   : > { %v1816_v17 = vadd.f32 %v1815_v10, %v7140_v56  ;;  %v1817_v15 = vpop.f32.mrb[145].mxu1  ;;  %3934 = vmatprep.subr.bf16.mxu0 %v6116_v6  ;;  %v6137_v10 = vld [vmem:[#allocation10 + $0x3d4] ss:$8 sps:$4 sm:$0xff]  }
 0x2ad   : > { %v1818_v14 = vadd.f32 %v1817_v15, %v7143_v61  ;;  %v1819_v48 = vpop.f32.mrb[146].mxu1  ;;  %3791 = vmatprep.mubr.bf16.mxu0 %v2476_v16 }
 0x2ae   : > { %v1820_v49 = vadd.f32 %v1819_v48, %v7140_v56  ;;  %v1821_v44 = vpop.f32.mrb[147].mxu1  ;;  %3792 = vmatmul.mubr.bf16.gmra.mrb[12].mxu0 %v2475_v21  ;;  %v2195_v45 = vmax.f32 %v1816_v17, 0.0  ;;  %v6135_v48 = vld [vmem:[#allocation10 + $0x3d0] ss:$8 sps:$4 sm:$0xff]  }
 0x2af   : > { %v1822_v52 = vadd.f32 %v1821_v44, %v7143_v61  ;;  %3935 = vmatpush1.bf16.msra.mxu0 %v6114_v12  ;;  %v2196_v24 = vmax.f32 %v1818_v14, 0.0 }
 0x2b0   : > { %v2203_v8 = vmax.f32 %v1820_v49, 0.0  ;;  %2117 = vmatmul.mubr.bf16.gmra.mrb[252].mxu1 %v6874_v55  ;;  %3936 = vmatprep.subr.bf16.mxu0 %v6119_v11 }
 0x2b1   : > { %v2204_v9 = vmax.f32 %v1822_v52, 0.0  ;;  %v6140_v52 = vld [vmem:[#allocation10 + $0x3e4] ss:$8 sps:$4 sm:$0xff]  }
 0x2b2   : > { %v2483_v7 = vpack.c.bf16 %v2203_v8, %v2195_v45 }
 0x2b3   : > { %v2484_v38 = vpack.c.bf16 %v2204_v9, %v2196_v24  ;;  %v1825_v4 = vpop.f32.mrb[148].mxu1  ;;  %3937 = vmatpush1.bf16.msra.mxu0 %v6117_v53  ;;  %v6138_v9 = vld [vmem:[#allocation10 + $0x3e0] ss:$8 sps:$4 sm:$0xff]  }
 0x2b4   : > { %v1826_v39 = vadd.f32 %v1825_v4, %v7140_v56  ;;  %v1827_v36 = vpop.f32.mrb[149].mxu1  ;;  %3938 = vmatprep.subr.bf16.mxu0 %v6122_v13  ;;  %v6143_v4 = vld [vmem:[#allocation10 + $0x3f4] ss:$8 sps:$4 sm:$0xff]  }
 0x2b5   : > { %v1828_v62 = vadd.f32 %v1827_v36, %v7143_v61  ;;  %v1829_v37 = vpop.f32.mrb[150].mxu1  ;;  %3801 = vmatprep.mubr.bf16.mxu0 %v2484_v38 }
 0x2b6   : > { %v1830_v55 = vadd.f32 %v1829_v37, %v7140_v56  ;;  %v1831_v54 = vpop.f32.mrb[151].mxu1  ;;  %3802 = vmatmul.mubr.bf16.gmra.mrb[16].mxu0 %v2483_v7  ;;  %v2211_v27 = vmax.f32 %v1826_v39, 0.0  ;;  %v6141_v37 = vld [vmem:[#allocation10 + $0x3f0] ss:$8 sps:$4 sm:$0xff]  }
 0x2b7   : > { %v1832_v19 = vadd.f32 %v1831_v54, %v7143_v61  ;;  %3939 = vmatpush1.bf16.msra.mxu0 %v6120_v28  ;;  %v2212_v26 = vmax.f32 %v1828_v62, 0.0 }
 0x2b8   : > { %v2219_v47 = vmax.f32 %v1830_v55, 0.0  ;;  %3940 = vmatprep.subr.bf16.mxu0 %v6125_v23 }
 0x2b9   : > { %v2220_v22 = vmax.f32 %v1832_v19, 0.0 }
 0x2ba   : > { %v2491_v50 = vpack.c.bf16 %v2219_v47, %v2211_v27 }
 0x2bb   : > { %v2492_v58 = vpack.c.bf16 %v2220_v22, %v2212_v26  ;;  %v1835_v51 = vpop.f32.mrb[152].mxu1  ;;  %3941 = vmatpush1.bf16.msra.mxu0 %v6123_v20 }
 0x2bc   : > { %v1836_v33 = vadd.f32 %v1835_v51, %v7140_v56  ;;  %v1837_v59 = vpop.f32.mrb[153].mxu1  ;;  %3942 = vmatprep.subr.bf16.mxu0 %v6128_v29 }
 0x2bd   : > { %v1838_v46 = vadd.f32 %v1837_v59, %v7143_v61  ;;  %v1839_v57 = vpop.f32.mrb[154].mxu1  ;;  %3811 = vmatprep.mubr.bf16.mxu0 %v2492_v58 }
 0x2be   : > { %v1840_v32 = vadd.f32 %v1839_v57, %v7140_v56  ;;  %v1841_v0 = vpop.f32.mrb[155].mxu1  ;;  %3812 = vmatmul.mubr.bf16.gmra.mrb[20].mxu0 %v2491_v50  ;;  %v2227_v41 = vmax.f32 %v1836_v33, 0.0 }
 0x2bf   : > { %v1842_v43 = vadd.f32 %v1841_v0, %v7143_v61  ;;  %3943 = vmatpush1.bf16.msra.mxu0 %v6126_v30  ;;  %v2228_v63 = vmax.f32 %v1838_v46, 0.0 }
 0x2c0   : > { %v2235_v40 = vmax.f32 %v1840_v32, 0.0  ;;  %3944 = vmatprep.subr.bf16.mxu0 %v6131_v25 }
 0x2c1   : > { %v2236_v60 = vmax.f32 %v1842_v43, 0.0 }
 0x2c2   : > { %v2499_v34 = vpack.c.bf16 %v2235_v40, %v2227_v41 }
 0x2c3   : > { %v2500_v6 = vpack.c.bf16 %v2236_v60, %v2228_v63  ;;  %v1845_v18 = vpop.f32.mrb[156].mxu1  ;;  %3945 = vmatpush1.bf16.msra.mxu0 %v6129_v35 }
 0x2c4   : > { %v1846_v21 = vadd.f32 %v1845_v18, %v7140_v56  ;;  %v1847_v16 = vpop.f32.mrb[157].mxu1  ;;  %3946 = vmatprep.subr.bf16.mxu0 %v6134_v42 }
 0x2c5   : > { %v1848_v12 = vadd.f32 %v1847_v16, %v7143_v61  ;;  %v1849_v17 = vpop.f32.mrb[158].mxu1  ;;  %3821 = vmatprep.mubr.bf16.mxu0 %v2500_v6 }
 0x2c6   : > { %v1850_v15 = vadd.f32 %v1849_v17, %v7140_v56  ;;  %v1851_v11 = vpop.f32.mrb[159].mxu1  ;;  %3822 = vmatmul.mubr.bf16.gmra.mrb[24].mxu0 %v2499_v34  ;;  %v2243_v49 = vmax.f32 %v1846_v21, 0.0 }
 0x2c7   : > { %v1852_v14 = vadd.f32 %v1851_v11, %v7143_v61  ;;  %3947 = vmatpush1.bf16.msra.mxu0 %v6132_v1  ;;  %v2244_v53 = vmax.f32 %v1848_v12, 0.0 }
 0x2c8   : > { %v2251_v44 = vmax.f32 %v1850_v15, 0.0  ;;  %3948 = vmatprep.subr.bf16.mxu0 %v6137_v10 }
 0x2c9   : > { %v2252_v45 = vmax.f32 %v1852_v14, 0.0 }
 0x2ca   : > { %v2507_v8 = vpack.c.bf16 %v2251_v44, %v2243_v49 }
 0x2cb   : > { %v2508_v13 = vpack.c.bf16 %v2252_v45, %v2244_v53  ;;  %v1855_v24 = vpop.f32.mrb[160].mxu1  ;;  %3949 = vmatpush1.bf16.msra.mxu0 %v6135_v48 }
 0x2cc   : > { %v1856_v7 = vadd.f32 %v1855_v24, %v7140_v56  ;;  %v1857_v38 = vpop.f32.mrb[161].mxu1  ;;  %3950 = vmatprep.subr.bf16.mxu0 %v6140_v52 }
 0x2cd   : > { %v1858_v28 = vadd.f32 %v1857_v38, %v7143_v61  ;;  %v1859_v39 = vpop.f32.mrb[162].mxu1  ;;  %3831 = vmatprep.mubr.bf16.mxu0 %v2508_v13 }
 0x2ce   : > { %v1860_v36 = vadd.f32 %v1859_v39, %v7140_v56  ;;  %v1861_v23 = vpop.f32.mrb[163].mxu1  ;;  %3832 = vmatmul.mubr.bf16.gmra.mrb[28].mxu0 %v2507_v8  ;;  %v2259_v55 = vmax.f32 %v1856_v7, 0.0 }
 0x2cf   : > { %v1862_v62 = vadd.f32 %v1861_v23, %v7143_v61  ;;  %3951 = vmatpush1.bf16.msra.mxu0 %v6138_v9  ;;  %v2260_v19 = vmax.f32 %v1858_v28, 0.0 }
 0x2d0   : > { %v2267_v54 = vmax.f32 %v1860_v36, 0.0  ;;  %3952 = vmatprep.subr.bf16.mxu0 %v6143_v4 }
 0x2d1   : > { %v2268_v20 = vmax.f32 %v1862_v62, 0.0 }
 0x2d2   : > { %v2515_v27 = vpack.c.bf16 %v2267_v54, %v2259_v55 }
 0x2d3   : > { %v2516_v47 = vpack.c.bf16 %v2268_v20, %v2260_v19  ;;  %v1865_v29 = vpop.f32.mrb[164].mxu1  ;;  %3953 = vmatpush1.bf16.msra.mxu0 %v6141_v37 }
 0x2d4   : > { %v1866_v26 = vadd.f32 %v1865_v29, %v7140_v56  ;;  %v1867_v22 = vpop.f32.mrb[165].mxu1 }
 0x2d5   : > { %v1868_v50 = vadd.f32 %v1867_v22, %v7143_v61  ;;  %v1869_v58 = vpop.f32.mrb[166].mxu1  ;;  %3841 = vmatprep.mubr.bf16.mxu0 %v2516_v47 }
 0x2d6   : > { %v1870_v51 = vadd.f32 %v1869_v58, %v7140_v56  ;;  %v1871_v30 = vpop.f32.mrb[167].mxu1  ;;  %3842 = vmatmul.mubr.bf16.gmra.mrb[32].mxu0 %v2515_v27  ;;  %v2275_v59 = vmax.f32 %v1866_v26, 0.0 }
 0x2d7   : > { %v1872_v33 = vadd.f32 %v1871_v30, %v7143_v61  ;;  %v2276_v46 = vmax.f32 %v1868_v50, 0.0 }
 0x2d8   : > { %v2283_v25 = vmax.f32 %v1870_v51, 0.0 }
 0x2d9   : > { %v2284_v57 = vmax.f32 %v1872_v33, 0.0 }
 0x2da   : > { %v2523_v32 = vpack.c.bf16 %v2283_v25, %v2275_v59 }
 0x2db   : > { %v2524_v0 = vpack.c.bf16 %v2284_v57, %v2276_v46  ;;  %v1875_v43 = vpop.f32.mrb[168].mxu1 }
 0x2dc   : > { %v1876_v35 = vadd.f32 %v1875_v43, %v7140_v56  ;;  %v1877_v41 = vpop.f32.mrb[169].mxu1 }
 0x2dd   : > { %v1878_v40 = vadd.f32 %v1877_v41, %v7143_v61  ;;  %v1879_v42 = vpop.f32.mrb[170].mxu1  ;;  %3851 = vmatprep.mubr.bf16.mxu0 %v2524_v0 }
 0x2de   : > { %v1880_v63 = vadd.f32 %v1879_v42, %v7140_v56  ;;  %v1881_v60 = vpop.f32.mrb[171].mxu1  ;;  %3852 = vmatmul.mubr.bf16.gmra.mrb[36].mxu0 %v2523_v32  ;;  %v2291_v6 = vmax.f32 %v1876_v35, 0.0 }
 0x2df   : > { %v1882_v34 = vadd.f32 %v1881_v60, %v7143_v61  ;;  %v2292_v1 = vmax.f32 %v1878_v40, 0.0 }
 0x2e0   : > { %v2299_v18 = vmax.f32 %v1880_v63, 0.0 }
 0x2e1   : > { %v2300_v21 = vmax.f32 %v1882_v34, 0.0 }
 0x2e2   : > { %v2531_v16 = vpack.c.bf16 %v2299_v18, %v2291_v6 }
 0x2e3   : > { %v2532_v10 = vpack.c.bf16 %v2300_v21, %v2292_v1  ;;  %v1885_v12 = vpop.f32.mrb[172].mxu1 }
 0x2e4   : > { %v1886_v17 = vadd.f32 %v1885_v12, %v7140_v56  ;;  %v1887_v15 = vpop.f32.mrb[173].mxu1 }
 0x2e5   : > { %v1888_v11 = vadd.f32 %v1887_v15, %v7143_v61  ;;  %v1889_v14 = vpop.f32.mrb[174].mxu1  ;;  %3861 = vmatprep.mubr.bf16.mxu0 %v2532_v10 }
 0x2e6   : > { %v1890_v48 = vadd.f32 %v1889_v14, %v7140_v56  ;;  %v1891_v49 = vpop.f32.mrb[175].mxu1  ;;  %3862 = vmatmul.mubr.bf16.gmra.mrb[40].mxu0 %v2531_v16  ;;  %v2307_v52 = vmax.f32 %v1886_v17, 0.0  ;;  %v701_v17 = vsub.s32 6, %v6908_v2  ;;  %v705_v14 = vsub.s32 7, %v6908_v2 }
 0x2e7   : > { %v1892_v44 = vadd.f32 %v1891_v49, %v7143_v61  ;;  %v2308_v45 = vmax.f32 %v1888_v11, 0.0 }
 0x2e8   : > { %v2315_v53 = vmax.f32 %v1890_v48, 0.0 }
 0x2e9   : > { %v2316_v8 = vmax.f32 %v1892_v44, 0.0 }
 0x2ea   : > { %v2539_v13 = vpack.c.bf16 %v2315_v53, %v2307_v52 }
 0x2eb   : > { %v2540_v24 = vpack.c.bf16 %v2316_v8, %v2308_v45  ;;  %v1895_v9 = vpop.f32.mrb[176].mxu1  ;;  %v7222_v45 = vrot.slane %v7137_v31, %v701_v17 }
 0x2ec   : > { %v1896_v7 = vadd.f32 %v1895_v9, %v7140_v56  ;;  %v1897_v38 = vpop.f32.mrb[177].mxu1 }
 0x2ed   : > { %v1898_v4 = vadd.f32 %v1897_v38, %v7143_v61  ;;  %v1899_v28 = vpop.f32.mrb[178].mxu1  ;;  %3871 = vmatprep.mubr.bf16.mxu0 %v2540_v24  ;;  %v7225_v24 = vrot.slane %v7137_v31, %v705_v14 }
 0x2ee   : > { %v1900_v39 = vadd.f32 %v1899_v28, %v7140_v56  ;;  %v1901_v36 = vpop.f32.mrb[179].mxu1  ;;  %3872 = vmatmul.mubr.bf16.gmra.mrb[44].mxu0 %v2539_v13  ;;  %v2323_v62 = vmax.f32 %v1896_v7, 0.0 }
 0x2ef   : > { %v1902_v23 = vadd.f32 %v1901_v36, %v7143_v61  ;;  %v2324_v55 = vmax.f32 %v1898_v4, 0.0 }
 0x2f0   : > { %v2331_v37 = vmax.f32 %v1900_v39, 0.0 }
 0x2f1   : > { %v2332_v54 = vmax.f32 %v1902_v23, 0.0 }
 0x2f2   : > { %v2547_v19 = vpack.c.bf16 %v2331_v37, %v2323_v62 }
 0x2f3   : > { %v2548_v20 = vpack.c.bf16 %v2332_v54, %v2324_v55  ;;  %v1905_v27 = vpop.f32.mrb[180].mxu1 }
 0x2f4   : > { %v1906_v47 = vadd.f32 %v1905_v27, %v7140_v56  ;;  %v1907_v29 = vpop.f32.mrb[181].mxu1 }
 0x2f5   : > { %v1908_v26 = vadd.f32 %v1907_v29, %v7143_v61  ;;  %v1909_v22 = vpop.f32.mrb[182].mxu1  ;;  %3881 = vmatprep.mubr.bf16.mxu0 %v2548_v20 }
 0x2f6   : > { %v1910_v50 = vadd.f32 %v1909_v22, %v7140_v56  ;;  %v1911_v58 = vpop.f32.mrb[183].mxu1  ;;  %3882 = vmatmul.mubr.bf16.gmra.mrb[48].mxu0 %v2547_v19  ;;  %v2339_v30 = vmax.f32 %v1906_v47, 0.0 }
 0x2f7   : > { %v1912_v51 = vadd.f32 %v1911_v58, %v7143_v61  ;;  %v2340_v59 = vmax.f32 %v1908_v26, 0.0 }
 0x2f8   : > { %v2347_v33 = vmax.f32 %v1910_v50, 0.0 }
 0x2f9   : > { %v2348_v25 = vmax.f32 %v1912_v51, 0.0 }
 0x2fa   : > { %v2555_v46 = vpack.c.bf16 %v2347_v33, %v2339_v30 }
 0x2fb   : > { %v2556_v57 = vpack.c.bf16 %v2348_v25, %v2340_v59  ;;  %v1915_v32 = vpop.f32.mrb[184].mxu1 }
 0x2fc   : > { %v1916_v0 = vadd.f32 %v1915_v32, %v7140_v56  ;;  %v1917_v43 = vpop.f32.mrb[185].mxu1 }
 0x2fd   : > { %v1918_v35 = vadd.f32 %v1917_v43, %v7143_v61  ;;  %v1919_v41 = vpop.f32.mrb[186].mxu1  ;;  %3891 = vmatprep.mubr.bf16.mxu0 %v2556_v57 }
 0x2fe   : > { %v1920_v40 = vadd.f32 %v1919_v41, %v7140_v56  ;;  %v1921_v42 = vpop.f32.mrb[187].mxu1  ;;  %3892 = vmatmul.mubr.bf16.gmra.mrb[52].mxu0 %v2555_v46  ;;  %v2355_v60 = vmax.f32 %v1916_v0, 0.0 }
 0x2ff   : > { %v1922_v63 = vadd.f32 %v1921_v42, %v7143_v61  ;;  %v2356_v6 = vmax.f32 %v1918_v35, 0.0 }
 0x300   : > { %v2363_v34 = vmax.f32 %v1920_v40, 0.0 }
 0x301   : > { %v2364_v18 = vmax.f32 %v1922_v63, 0.0 }
 0x302   : > { %v2563_v1 = vpack.c.bf16 %v2363_v34, %v2355_v60 }
 0x303   : > { %v2564_v21 = vpack.c.bf16 %v2364_v18, %v2356_v6  ;;  %v1925_v16 = vpop.f32.mrb[188].mxu1 }
 0x304   : > { %v1926_v10 = vadd.f32 %v1925_v16, %v7140_v56  ;;  %v1927_v12 = vpop.f32.mrb[189].mxu1 }
 0x305   : > { %v1928_v15 = vadd.f32 %v1927_v12, %v7143_v61  ;;  %v1929_v11 = vpop.f32.mrb[190].mxu1  ;;  %3901 = vmatprep.mubr.bf16.mxu0 %v2564_v21 }
 0x306   : > { %v1930_v48 = vadd.f32 %v1929_v11, %v7140_v56  ;;  %v1931_v49 = vpop.f32.mrb[191].mxu1  ;;  %3902 = vmatmul.mubr.bf16.gmra.mrb[56].mxu0 %v2563_v1  ;;  %v2371_v52 = vmax.f32 %v1926_v10, 0.0 }
 0x307   : > { %v1932_v44 = vadd.f32 %v1931_v49, %v7143_v61  ;;  %v2372_v8 = vmax.f32 %v1928_v15, 0.0 }
 0x308   : > { %v2379_v53 = vmax.f32 %v1930_v48, 0.0 }
 0x309   : > { %v2380_v13 = vmax.f32 %v1932_v44, 0.0 }
 0x30a   : > { %v2571_v9 = vpack.c.bf16 %v2379_v53, %v2371_v52 }
 0x30b   : > { %v2572_v7 = vpack.c.bf16 %v2380_v13, %v2372_v8  ;;  %v1968_v38 = vpop.f32.mrb[192].mxu1 }
 0x30c   : > { %v1969_v4 = vadd.f32 %v1968_v38, %v7222_v45  ;;  %v1970_v56 = vpop.f32.mrb[193].mxu1 }
 0x30d   : > { %v1971_v28 = vadd.f32 %v1970_v56, %v7225_v24  ;;  %v1972_v39 = vpop.f32.mrb[194].mxu1  ;;  %3911 = vmatprep.mubr.bf16.mxu0 %v2572_v7 }
 0x30e   : > { %v1973_v61 = vadd.f32 %v1972_v39, %v7222_v45  ;;  %v1974_v36 = vpop.f32.mrb[195].mxu1  ;;  %3912 = vmatmul.mubr.bf16.gmra.mrb[60].mxu0 %v2571_v9  ;;  %v2133_v62 = vmax.f32 %v1969_v4, 0.0 }
 0x30f   : > { %v1975_v23 = vadd.f32 %v1974_v36, %v7225_v24  ;;  %v2134_v31 = vmax.f32 %v1971_v28, 0.0 }
 0x310   : > { %v2141_v37 = vmax.f32 %v1973_v61, 0.0 }
 0x311   : > { %v2142_v55 = vmax.f32 %v1975_v23, 0.0 }
 0x312   : > { %v2453_v54 = vpack.c.bf16 %v2141_v37, %v2133_v62 }
 0x313   : > { %v2454_v19 = vpack.c.bf16 %v2142_v55, %v2134_v31  ;;  %v1978_v20 = vpop.f32.mrb[196].mxu1 }
 0x314   : > { %v1979_v27 = vadd.f32 %v1978_v20, %v7222_v45  ;;  %v1980_v47 = vpop.f32.mrb[197].mxu1 }
 0x315   : > { %v1981_v29 = vadd.f32 %v1980_v47, %v7225_v24  ;;  %v1982_v26 = vpop.f32.mrb[198].mxu1  ;;  %3954 = vmatprep.mubr.bf16.mxu0 %v2454_v19 }
 0x316   : > { %v1983_v22 = vadd.f32 %v1982_v26, %v7222_v45  ;;  %v1984_v50 = vpop.f32.mrb[199].mxu1  ;;  %3955 = vmatmul.mubr.bf16.vlgmr.msra.gmra.mrb[0].mxu0 %v2453_v54  ;;  %v2149_v51 = vmax.f32 %v1979_v27, 0.0 }
 0x317   : > { %v1985_v58 = vadd.f32 %v1984_v50, %v7225_v24  ;;  %v2150_v33 = vmax.f32 %v1981_v29, 0.0 }
 0x318   : > { %v2157_v30 = vmax.f32 %v1983_v22, 0.0 }
 0x319   : > { %v2158_v59 = vmax.f32 %v1985_v58, 0.0 }
 0x31a   : > { %v2461_v25 = vpack.c.bf16 %v2157_v30, %v2149_v51 }
 0x31b   : > { %v2462_v46 = vpack.c.bf16 %v2158_v59, %v2150_v33  ;;  %v1988_v57 = vpop.f32.mrb[200].mxu1 }
 0x31c   : > { %v1989_v32 = vadd.f32 %v1988_v57, %v7222_v45  ;;  %v1990_v0 = vpop.f32.mrb[201].mxu1 }
 0x31d   : > { %v1991_v43 = vadd.f32 %v1990_v0, %v7225_v24  ;;  %v1992_v35 = vpop.f32.mrb[202].mxu1  ;;  %3964 = vmatprep.mubr.bf16.mxu0 %v2462_v46 }
 0x31e   : > { %v2165_v41 = vmax.f32 %v1989_v32, 0.0  ;;  %v1993_v40 = vadd.f32 %v1992_v35, %v7222_v45  ;;  %v1994_v42 = vpop.f32.mrb[203].mxu1  ;;  %3965 = vmatmul.mubr.bf16.gmra.mrb[4].mxu0 %v2461_v25 }
 0x31f   : > { %v2166_v63 = vmax.f32 %v1991_v43, 0.0  ;;  %v1995_v60 = vadd.f32 %v1994_v42, %v7225_v24 }
 0x320   : > { %v2173_v34 = vmax.f32 %v1993_v40, 0.0 }
 0x321   : > { %v2174_v6 = vmax.f32 %v1995_v60, 0.0 }
 0x322   : > { %v2469_v18 = vpack.c.bf16 %v2173_v34, %v2165_v41 }
 0x323   : > { %v2470_v1 = vpack.c.bf16 %v2174_v6, %v2166_v63  ;;  %v1998_v21 = vpop.f32.mrb[204].mxu1 }
 0x324   : > { %v1999_v16 = vadd.f32 %v1998_v21, %v7222_v45  ;;  %v2000_v10 = vpop.f32.mrb[205].mxu1 }
 0x325   : > { %v2001_v12 = vadd.f32 %v2000_v10, %v7225_v24  ;;  %v2002_v17 = vpop.f32.mrb[206].mxu1  ;;  %3974 = vmatprep.mubr.bf16.mxu0 %v2470_v1 }
 0x326   : > { %v2181_v15 = vmax.f32 %v1999_v16, 0.0  ;;  %v2003_v11 = vadd.f32 %v2002_v17, %v7222_v45  ;;  %v2004_v14 = vpop.f32.mrb[207].mxu1  ;;  %3975 = vmatmul.mubr.bf16.gmra.mrb[8].mxu0 %v2469_v18 }
 0x327   : > { %v2182_v48 = vmax.f32 %v2001_v12, 0.0  ;;  %v2005_v49 = vadd.f32 %v2004_v14, %v7225_v24 }
 0x328   : > { %v2189_v44 = vmax.f32 %v2003_v11, 0.0 }
 0x329   : > { %v2190_v52 = vmax.f32 %v2005_v49, 0.0 }
 0x32a   : > { %v2477_v53 = vpack.c.bf16 %v2189_v44, %v2181_v15 }
 0x32b   : > { %v2478_v8 = vpack.c.bf16 %v2190_v52, %v2182_v48  ;;  %v2008_v13 = vpop.f32.mrb[208].mxu1 }
 0x32c   : > { %v2009_v9 = vadd.f32 %v2008_v13, %v7222_v45  ;;  %v2010_v7 = vpop.f32.mrb[209].mxu1 }
 0x32d   : > { %v2011_v38 = vadd.f32 %v2010_v7, %v7225_v24  ;;  %v2012_v4 = vpop.f32.mrb[210].mxu1  ;;  %3984 = vmatprep.mubr.bf16.mxu0 %v2478_v8 }
 0x32e   : > { %v2197_v56 = vmax.f32 %v2009_v9, 0.0  ;;  %v2013_v28 = vadd.f32 %v2012_v4, %v7222_v45  ;;  %v2014_v39 = vpop.f32.mrb[211].mxu1  ;;  %3985 = vmatmul.mubr.bf16.gmra.mrb[12].mxu0 %v2477_v53 }
 0x32f   : > { %v2198_v61 = vmax.f32 %v2011_v38, 0.0  ;;  %v2015_v36 = vadd.f32 %v2014_v39, %v7225_v24 }
 0x330   : > { %v2205_v23 = vmax.f32 %v2013_v28, 0.0 }
 0x331   : > { %v2206_v62 = vmax.f32 %v2015_v36, 0.0 }
 0x332   : > { %v2485_v37 = vpack.c.bf16 %v2205_v23, %v2197_v56 }
 0x333   : > { %v2486_v31 = vpack.c.bf16 %v2206_v62, %v2198_v61  ;;  %v2018_v55 = vpop.f32.mrb[212].mxu1 }
 0x334   : > { %v2019_v54 = vadd.f32 %v2018_v55, %v7222_v45  ;;  %v2020_v19 = vpop.f32.mrb[213].mxu1 }
 0x335   : > { %v2021_v20 = vadd.f32 %v2020_v19, %v7225_v24  ;;  %v2022_v27 = vpop.f32.mrb[214].mxu1  ;;  %3994 = vmatprep.mubr.bf16.mxu0 %v2486_v31 }
 0x336   : > { %v2213_v47 = vmax.f32 %v2019_v54, 0.0  ;;  %v2023_v29 = vadd.f32 %v2022_v27, %v7222_v45  ;;  %v2024_v26 = vpop.f32.mrb[215].mxu1  ;;  %3995 = vmatmul.mubr.bf16.gmra.mrb[16].mxu0 %v2485_v37 }
 0x337   : > { %v2214_v22 = vmax.f32 %v2021_v20, 0.0  ;;  %v2025_v50 = vadd.f32 %v2024_v26, %v7225_v24 }
 0x338   : > { %v2221_v58 = vmax.f32 %v2023_v29, 0.0 }
 0x339   : > { %v2222_v51 = vmax.f32 %v2025_v50, 0.0 }
 0x33a   : > { %v2493_v30 = vpack.c.bf16 %v2221_v58, %v2213_v47 }
 0x33b   : > { %v2494_v33 = vpack.c.bf16 %v2222_v51, %v2214_v22  ;;  %v2028_v59 = vpop.f32.mrb[216].mxu1 }
 0x33c   : > { %v2029_v25 = vadd.f32 %v2028_v59, %v7222_v45  ;;  %v2030_v46 = vpop.f32.mrb[217].mxu1 }
 0x33d   : > { %v2031_v57 = vadd.f32 %v2030_v46, %v7225_v24  ;;  %v2032_v32 = vpop.f32.mrb[218].mxu1  ;;  %4004 = vmatprep.mubr.bf16.mxu0 %v2494_v33 }
 0x33e   : > { %v2229_v0 = vmax.f32 %v2029_v25, 0.0  ;;  %v2033_v43 = vadd.f32 %v2032_v32, %v7222_v45  ;;  %v2034_v35 = vpop.f32.mrb[219].mxu1  ;;  %4005 = vmatmul.mubr.bf16.gmra.mrb[20].mxu0 %v2493_v30 }
 0x33f   : > { %v2230_v41 = vmax.f32 %v2031_v57, 0.0  ;;  %v2035_v40 = vadd.f32 %v2034_v35, %v7225_v24 }
 0x340   : > { %v2237_v42 = vmax.f32 %v2033_v43, 0.0 }
 0x341   : > { %v2238_v63 = vmax.f32 %v2035_v40, 0.0 }
 0x342   : > { %v2501_v60 = vpack.c.bf16 %v2237_v42, %v2229_v0 }
 0x343   : > { %v2502_v34 = vpack.c.bf16 %v2238_v63, %v2230_v41  ;;  %v2038_v6 = vpop.f32.mrb[220].mxu1 }
 0x344   : > { %v2039_v18 = vadd.f32 %v2038_v6, %v7222_v45  ;;  %v2040_v1 = vpop.f32.mrb[221].mxu1 }
 0x345   : > { %v2041_v21 = vadd.f32 %v2040_v1, %v7225_v24  ;;  %v2042_v16 = vpop.f32.mrb[222].mxu1  ;;  %4014 = vmatprep.mubr.bf16.mxu0 %v2502_v34 }
 0x346   : > { %v2245_v10 = vmax.f32 %v2039_v18, 0.0  ;;  %v2043_v12 = vadd.f32 %v2042_v16, %v7222_v45  ;;  %v2044_v17 = vpop.f32.mrb[223].mxu1  ;;  %4015 = vmatmul.mubr.bf16.gmra.mrb[24].mxu0 %v2501_v60 }
 0x347   : > { %v2246_v15 = vmax.f32 %v2041_v21, 0.0  ;;  %v2045_v11 = vadd.f32 %v2044_v17, %v7225_v24 }
 0x348   : > { %v2253_v14 = vmax.f32 %v2043_v12, 0.0 }
 0x349   : > { %v2254_v48 = vmax.f32 %v2045_v11, 0.0 }
 0x34a   : > { %v2509_v49 = vpack.c.bf16 %v2253_v14, %v2245_v10 }
 0x34b   : > { %v2510_v44 = vpack.c.bf16 %v2254_v48, %v2246_v15  ;;  %v2048_v52 = vpop.f32.mrb[224].mxu1 }
 0x34c   : > { %v2049_v53 = vadd.f32 %v2048_v52, %v7222_v45  ;;  %v2050_v8 = vpop.f32.mrb[225].mxu1 }
 0x34d   : > { %v2051_v13 = vadd.f32 %v2050_v8, %v7225_v24  ;;  %v2052_v9 = vpop.f32.mrb[226].mxu1  ;;  %4024 = vmatprep.mubr.bf16.mxu0 %v2510_v44 }
 0x34e   : > { %v2261_v7 = vmax.f32 %v2049_v53, 0.0  ;;  %v2053_v38 = vadd.f32 %v2052_v9, %v7222_v45  ;;  %v2054_v4 = vpop.f32.mrb[227].mxu1  ;;  %4025 = vmatmul.mubr.bf16.gmra.mrb[28].mxu0 %v2509_v49 }
 0x34f   : > { %v2262_v56 = vmax.f32 %v2051_v13, 0.0  ;;  %v2055_v28 = vadd.f32 %v2054_v4, %v7225_v24 }
 0x350   : > { %v2269_v39 = vmax.f32 %v2053_v38, 0.0 }
 0x351   : > { %v2270_v61 = vmax.f32 %v2055_v28, 0.0 }
 0x352   : > { %v2517_v36 = vpack.c.bf16 %v2269_v39, %v2261_v7 }
 0x353   : > { %v2518_v23 = vpack.c.bf16 %v2270_v61, %v2262_v56  ;;  %v2058_v62 = vpop.f32.mrb[228].mxu1 }
 0x354   : > { %v2059_v37 = vadd.f32 %v2058_v62, %v7222_v45  ;;  %v2060_v31 = vpop.f32.mrb[229].mxu1 }
 0x355   : > { %v2061_v55 = vadd.f32 %v2060_v31, %v7225_v24  ;;  %v2062_v54 = vpop.f32.mrb[230].mxu1  ;;  %4034 = vmatprep.mubr.bf16.mxu0 %v2518_v23 }
 0x356   : > { %v2277_v19 = vmax.f32 %v2059_v37, 0.0  ;;  %v2063_v20 = vadd.f32 %v2062_v54, %v7222_v45  ;;  %v2064_v27 = vpop.f32.mrb[231].mxu1  ;;  %4035 = vmatmul.mubr.bf16.gmra.mrb[32].mxu0 %v2517_v36 }
 0x357   : > { %v2278_v47 = vmax.f32 %v2061_v55, 0.0  ;;  %v2065_v29 = vadd.f32 %v2064_v27, %v7225_v24 }
 0x358   : > { %v2285_v26 = vmax.f32 %v2063_v20, 0.0 }
 0x359   : > { %v2286_v22 = vmax.f32 %v2065_v29, 0.0 }
 0x35a   : > { %v2525_v50 = vpack.c.bf16 %v2285_v26, %v2277_v19 }
 0x35b   : > { %v2526_v58 = vpack.c.bf16 %v2286_v22, %v2278_v47  ;;  %v2068_v51 = vpop.f32.mrb[232].mxu1 }
 0x35c   : > { %v2069_v30 = vadd.f32 %v2068_v51, %v7222_v45  ;;  %v2070_v33 = vpop.f32.mrb[233].mxu1 }
 0x35d   : > { %v2071_v59 = vadd.f32 %v2070_v33, %v7225_v24  ;;  %v2072_v25 = vpop.f32.mrb[234].mxu1  ;;  %4044 = vmatprep.mubr.bf16.mxu0 %v2526_v58 }
 0x35e   : > { %v2293_v46 = vmax.f32 %v2069_v30, 0.0  ;;  %v2073_v57 = vadd.f32 %v2072_v25, %v7222_v45  ;;  %v2074_v32 = vpop.f32.mrb[235].mxu1  ;;  %4045 = vmatmul.mubr.bf16.gmra.mrb[36].mxu0 %v2525_v50 }
 0x35f   : > { %v2294_v0 = vmax.f32 %v2071_v59, 0.0  ;;  %v2075_v43 = vadd.f32 %v2074_v32, %v7225_v24 }
 0x360   : > { %v2301_v35 = vmax.f32 %v2073_v57, 0.0 }
 0x361   : > { %v2302_v41 = vmax.f32 %v2075_v43, 0.0 }
 0x362   : > { %v2533_v40 = vpack.c.bf16 %v2301_v35, %v2293_v46 }
 0x363   : > { %v2534_v42 = vpack.c.bf16 %v2302_v41, %v2294_v0  ;;  %v2078_v63 = vpop.f32.mrb[236].mxu1 }
 0x364   : > { %v2079_v60 = vadd.f32 %v2078_v63, %v7222_v45  ;;  %v2080_v34 = vpop.f32.mrb[237].mxu1 }
 0x365   : > { %v2081_v6 = vadd.f32 %v2080_v34, %v7225_v24  ;;  %v2082_v18 = vpop.f32.mrb[238].mxu1  ;;  %4054 = vmatprep.mubr.bf16.mxu0 %v2534_v42 }
 0x366   : > { %v2309_v1 = vmax.f32 %v2079_v60, 0.0  ;;  %v2083_v21 = vadd.f32 %v2082_v18, %v7222_v45  ;;  %v2084_v16 = vpop.f32.mrb[239].mxu1  ;;  %4055 = vmatmul.mubr.bf16.gmra.mrb[40].mxu0 %v2533_v40 }
 0x367   : > { %v2310_v10 = vmax.f32 %v2081_v6, 0.0  ;;  %v2085_v12 = vadd.f32 %v2084_v16, %v7225_v24 }
 0x368   : > { %v2317_v17 = vmax.f32 %v2083_v21, 0.0 }
 0x369   : > { %v2318_v15 = vmax.f32 %v2085_v12, 0.0 }
 0x36a   : > { %v2541_v11 = vpack.c.bf16 %v2317_v17, %v2309_v1 }
 0x36b   : > { %v2542_v14 = vpack.c.bf16 %v2318_v15, %v2310_v10  ;;  %v2088_v48 = vpop.f32.mrb[240].mxu1  ;;  %v4310_v15 = vld [vmem:[%s8231_s6] sm:$0x3] }
 0x36c   : > { %v2089_v49 = vadd.f32 %v2088_v48, %v7222_v45  ;;  %v2090_v44 = vpop.f32.mrb[241].mxu1 }
 0x36d   : > { %v2091_v52 = vadd.f32 %v2090_v44, %v7225_v24  ;;  %v2092_v53 = vpop.f32.mrb[242].mxu1  ;;  %4064 = vmatprep.mubr.bf16.mxu0 %v2542_v14 }
 0x36e   : > { %v2325_v8 = vmax.f32 %v2089_v49, 0.0  ;;  %v2093_v13 = vadd.f32 %v2092_v53, %v7222_v45  ;;  %v2094_v9 = vpop.f32.mrb[243].mxu1  ;;  %4065 = vmatmul.mubr.bf16.gmra.mrb[44].mxu0 %v2541_v11 }
 0x36f   : > { %v2326_v7 = vmax.f32 %v2091_v52, 0.0  ;;  %v2095_v38 = vadd.f32 %v2094_v9, %v7225_v24  ;;  %v6209_v52 = vld [vmem:[%s6699_s12] sm:$0xff] }
 0x370   : > { %v2333_v4 = vmax.f32 %v2093_v13, 0.0 }
 0x371   : > { %v2334_v56 = vmax.f32 %v2095_v38, 0.0  ;;  %v6212_v38 = vld [vmem:[%s6699_s12 + $0x18] sm:$0xff] }
 0x372   : > { %v2549_v28 = vpack.c.bf16 %v2333_v4, %v2325_v8 }
 0x373   : > { %v2550_v39 = vpack.c.bf16 %v2334_v56, %v2326_v7  ;;  %v2098_v61 = vpop.f32.mrb[244].mxu1 }
 0x374   : > { %v2099_v36 = vadd.f32 %v2098_v61, %v7222_v45  ;;  %v2100_v23 = vpop.f32.mrb[245].mxu1 }
 0x375   : > { %v2101_v62 = vadd.f32 %v2100_v23, %v7225_v24  ;;  %v2102_v37 = vpop.f32.mrb[246].mxu1  ;;  %4074 = vmatprep.mubr.bf16.mxu0 %v2550_v39 }
 0x376   : > { %v2341_v31 = vmax.f32 %v2099_v36, 0.0  ;;  %v2103_v55 = vadd.f32 %v2102_v37, %v7222_v45  ;;  %v2104_v54 = vpop.f32.mrb[247].mxu1  ;;  %4075 = vmatmul.mubr.bf16.gmra.mrb[48].mxu0 %v2549_v28 }
 0x377   : > { %v2342_v19 = vmax.f32 %v2101_v62, 0.0  ;;  %v2105_v20 = vadd.f32 %v2104_v54, %v7225_v24 }
 0x378   : > { %v2349_v27 = vmax.f32 %v2103_v55, 0.0 }
 0x379   : > { %v2350_v47 = vmax.f32 %v2105_v20, 0.0  ;;  %v6213_v20 = vld [vmem:[%s6699_s12 + $0x20] sm:$0xff] }
 0x37a   : > { %v2557_v29 = vpack.c.bf16 %v2349_v27, %v2341_v31 }
 0x37b   : > { %v2558_v26 = vpack.c.bf16 %v2350_v47, %v2342_v19  ;;  %v2108_v22 = vpop.f32.mrb[248].mxu1 }
 0x37c   : > { %v2109_v50 = vadd.f32 %v2108_v22, %v7222_v45  ;;  %v2110_v58 = vpop.f32.mrb[249].mxu1 }
 0x37d   : > { %v2111_v51 = vadd.f32 %v2110_v58, %v7225_v24  ;;  %v2112_v30 = vpop.f32.mrb[250].mxu1  ;;  %4084 = vmatprep.mubr.bf16.mxu0 %v2558_v26  ;;  %v6214_v26 = vld [vmem:[%s6699_s12 + $0x28] sm:$0xff]  ;;  %v6215_v58 = vld [vmem:[%s6699_s12 + $0x30] sm:$0xff] }
 0x37e   : > { %v2357_v33 = vmax.f32 %v2109_v50, 0.0  ;;  %v2113_v59 = vadd.f32 %v2112_v30, %v7222_v45  ;;  %v2114_v25 = vpop.f32.mrb[251].mxu1  ;;  %4085 = vmatmul.mubr.bf16.gmra.mrb[52].mxu0 %v2557_v29 }
 0x37f   : > { %v2358_v46 = vmax.f32 %v2111_v51, 0.0  ;;  %v2115_v57 = vadd.f32 %v2114_v25, %v7225_v24 }
 0x380   : > { %v2365_v32 = vmax.f32 %v2113_v59, 0.0 }
 0x381   : > { %v2366_v0 = vmax.f32 %v2115_v57, 0.0 }
 0x382   : > { %v2565_v43 = vpack.c.bf16 %v2365_v32, %v2357_v33  ;;  %v6216_v33 = vld [vmem:[%s6699_s12 + $0x38] sm:$0xff] }
 0x383   : > { %v2566_v35 = vpack.c.bf16 %v2366_v0, %v2358_v46  ;;  %v2118_v41 = vpop.f32.mrb[252].mxu1 }
 0x384   : > { %v2119_v40 = vadd.f32 %v2118_v41, %v7222_v45  ;;  %v2120_v42 = vpop.f32.mrb[253].mxu1 }
 0x385   : > { %v2121_v63 = vadd.f32 %v2120_v42, %v7225_v24  ;;  %v2122_v60 = vpop.f32.mrb[254].mxu1  ;;  %4094 = vmatprep.mubr.bf16.mxu0 %v2566_v35 }
 0x386   : > { %v2373_v34 = vmax.f32 %v2119_v40, 0.0  ;;  %v2123_v6 = vadd.f32 %v2122_v60, %v7222_v45  ;;  %v2124_v18 = vpop.f32.mrb[255].mxu1  ;;  %4095 = vmatmul.mubr.bf16.gmra.mrb[56].mxu0 %v2565_v43  ;;  %v7296_v45 = vrot.slane %v4310_v15, %v677_v3  ;;  %v6210_v3 = vld [vmem:[%s6699_s12 + $0x8] sm:$0xff] }
 0x387   : > { %v2374_v1 = vmax.f32 %v2121_v63, 0.0  ;;  %v2125_v21 = vadd.f32 %v2124_v18, %v7225_v24  ;;  %v7300_v24 = vrot.slane %v4310_v15, %v681_v5  ;;  %v6211_v5 = vld [vmem:[%s6699_s12 + $0x10] sm:$0xff] }
 0x388   : > { %v2381_v16 = vmax.f32 %v2123_v6, 0.0 }
 0x389   : > { %v2382_v10 = vmax.f32 %v2125_v21, 0.0  ;;  %v6218_v21 = vld [vmem:[%s6699_s12 + $0x48] sm:$0xff] }
 0x38a   : > { %v2573_v12 = vpack.c.bf16 %v2381_v16, %v2373_v34  ;;  %v6217_v34 = vld [vmem:[%s6699_s12 + $0x40] sm:$0xff] }
 0x38b   : > { %v2574_v17 = vpack.c.bf16 %v2382_v10, %v2374_v1 }
 0x38d   : > { %4104 = vmatprep.mubr.bf16.mxu0 %v2574_v17 }
 0x38e   : > { %4105 = vmatmul.mubr.bf16.gmra.mrb[60].mxu0 %v2573_v12  ;;  %v6219_v12 = vld [vmem:[%s6699_s12 + $0x50] sm:$0xff] }
 0x3e9   : > { %v3956_v11 = vpop.f32.mrb[0].mxu0 }
 0x3ea   : > { %v4322_v14 = vadd.f32 %v7296_v45, %v3956_v11  ;;  %v3958_v48 = vpop.f32.mrb[1].mxu0  ;;  %v6220_v11 = vld [vmem:[%s6699_s12 + $0x58] sm:$0xff] }
 0x3eb   : > { %v4323_v49 = vadd.f32 %v7300_v24, %v3958_v48  ;;  %v3960_v44 = vpop.f32.mrb[2].mxu0 }
 0x3ec   : > { %v7305_v53 = vadd.f32 %v6209_v52, %v4322_v14  ;;  %v4324_v8 = vadd.f32 %v7296_v45, %v3960_v44  ;;  %v3962_v13 = vpop.f32.mrb[3].mxu0 }
 0x3ed   : > { %v7309_v9 = vadd.f32 %v6210_v3, %v4323_v49  ;;  %v4325_v2 = vadd.f32 %v7300_v24, %v3962_v13 }
 0x3ee   : > { %v7313_v7 = vadd.f32 %v6211_v5, %v4324_v8  ;;  %v4546_v62 = vmul.f32 %v7305_v53, %v7305_v53 }
 0x3ef   : > { %v7316_v4 = vadd.f32 %v6212_v38, %v4325_v2  ;;  %v4450_v56 = vadd.f32 %v7309_v9, %v7305_v53  ;;  %v4547_v37 = vmul.f32 %v7309_v9, %v7309_v9 }
 0x3f0   : > { %v4548_v28 = vmul.f32 %v7313_v7, %v7313_v7 }
 0x3f1   : > { %4451 = vadd.xlane.f32.xlu0 %v4450_v56  ;;  %v3966_v39 = vpop.f32.mrb[4].mxu0  ;;  %v4549_v61 = vmul.f32 %v7316_v4, %v7316_v4  ;;  %v4453_v19 = vadd.f32 %v7316_v4, %v7313_v7  ;;  %v4610_v30 = vadd.f32 %v4547_v37, %v4546_v62  ;;  %v6222_v62 = vld [vmem:[%s6699_s12 + $0x68] sm:$0xff] }
 0x3f2   : > { %v4326_v36 = vadd.f32 %v7296_v45, %v3966_v39  ;;  %v3968_v23 = vpop.f32.mrb[5].mxu0  ;;  %v6221_v39 = vld [vmem:[%s6699_s12 + $0x60] sm:$0xff] }
 0x3f3   : > { %v4327_v31 = vadd.f32 %v7300_v24, %v3968_v23  ;;  %v3970_v55 = vpop.f32.mrb[6].mxu0  ;;  %v4613_v54 = vadd.f32 %v4549_v61, %v4548_v28 }
 0x3f4   : > { %v7333_v27 = vadd.f32 %v6213_v20, %v4326_v36  ;;  %v4328_v47 = vadd.f32 %v7296_v45, %v3970_v55  ;;  %v3972_v29 = vpop.f32.mrb[7].mxu0  ;;  %v6223_v55 = vld [vmem:[%s6699_s12 + $0x70] sm:$0xff]  ;;  %v6224_v20 = vld [vmem:[%s6699_s12 + $0x78] sm:$0xff] }
 0x3f5   : > { %v7337_v22 = vadd.f32 %v6214_v26, %v4327_v31  ;;  %v4329_v50 = vadd.f32 %v7300_v24, %v3972_v29  ;;  %4614 = vadd.xlane.f32.xlu1 %v4613_v54  ;;  %4454 = vadd.xlane.f32.xlu0 %v4453_v19 }
 0x3f6   : > { %v7341_v51 = vadd.f32 %v6215_v58, %v4328_v47  ;;  %v4550_v46 = vmul.f32 %v7333_v27, %v7333_v27 }
 0x3f7   : > { %v7344_v59 = vadd.f32 %v6216_v33, %v4329_v50  ;;  %v4456_v25 = vadd.f32 %v7337_v22, %v7333_v27  ;;  %v4551_v57 = vmul.f32 %v7337_v22, %v7337_v22 }
 0x3f8   : > { %v4552_v35 = vmul.f32 %v7341_v51, %v7341_v51 }
 0x3f9   : > { %4611 = vadd.xlane.f32.xlu0 %v4610_v30  ;;  %4457 = vadd.xlane.f32.xlu1 %v4456_v25  ;;  %v3976_v32 = vpop.f32.mrb[8].mxu0  ;;  %v4553_v41 = vmul.f32 %v7344_v59, %v7344_v59  ;;  %v4616_v63 = vadd.f32 %v4551_v57, %v4550_v46  ;;  %v4459_v60 = vadd.f32 %v7344_v59, %v7341_v51 }
 0x3fa   : > { %v4330_v0 = vadd.f32 %v7296_v45, %v3976_v32  ;;  %v3978_v43 = vpop.f32.mrb[9].mxu0 }
 0x3fb   : > { %v4331_v40 = vadd.f32 %v7300_v24, %v3978_v43  ;;  %v3980_v42 = vpop.f32.mrb[10].mxu0  ;;  %v4619_v15 = vadd.f32 %v4553_v41, %v4552_v35  ;;  %v6225_v35 = vld [vmem:[%s6699_s12 + $0x80] sm:$0xff] }
 0x3fc   : > { %v7361_v6 = vadd.f32 %v6217_v34, %v4330_v0  ;;  %v4332_v18 = vadd.f32 %v7296_v45, %v3980_v42  ;;  %v3982_v1 = vpop.f32.mrb[11].mxu0 }
 0x3fd   : > { %v7365_v16 = vadd.f32 %v6218_v21, %v4331_v40  ;;  %v4333_v10 = vadd.f32 %v7300_v24, %v3982_v1  ;;  %4617 = vadd.xlane.f32.xlu0 %v4616_v63  ;;  %4460 = vadd.xlane.f32.xlu1 %v4459_v60  ;;  %v6226_v63 = vld [vmem:[%s6699_s12 + $0x88] sm:$0xff] }
 0x3fe   : > { %v7369_v17 = vadd.f32 %v6219_v12, %v4332_v18  ;;  %v4554_v49 = vmul.f32 %v7361_v6, %v7361_v6  ;;  %v6227_v18 = vld [vmem:[%s6699_s12 + $0x90] sm:$0xff] }
 0x3ff   : > { %v7372_v14 = vadd.f32 %v6220_v11, %v4333_v10  ;;  %v4462_v48 = vadd.f32 %v7365_v16, %v7361_v6  ;;  %v4555_v44 = vmul.f32 %v7365_v16, %v7365_v16  ;;  %v6228_v10 = vld [vmem:[%s6699_s12 + $0x98] sm:$0xff] }
 0x400   : > { %v4556_v3 = vmul.f32 %v7369_v17, %v7369_v17 }
 0x401   : > { %4620 = vadd.xlane.f32.xlu1 %v4619_v15  ;;  %4463 = vadd.xlane.f32.xlu0 %v4462_v48  ;;  %v3986_v52 = vpop.f32.mrb[12].mxu0  ;;  %v4557_v2 = vmul.f32 %v7372_v14, %v7372_v14  ;;  %v4622_v56 = vadd.f32 %v4555_v44, %v4554_v49  ;;  %v4465_v28 = vadd.f32 %v7372_v14, %v7369_v17 }
 0x402   : > { %v4334_v8 = vadd.f32 %v7296_v45, %v3986_v52  ;;  %v3988_v13 = vpop.f32.mrb[13].mxu0 }
 0x403   : > { %v4335_v5 = vadd.f32 %v7300_v24, %v3988_v13  ;;  %v3990_v38 = vpop.f32.mrb[14].mxu0  ;;  %v4625_v19 = vadd.f32 %v4557_v2, %v4556_v3 }
 0x404   : > { %v7389_v61 = vadd.f32 %v6221_v39, %v4334_v8  ;;  %v4336_v36 = vadd.f32 %v7296_v45, %v3990_v38  ;;  %v3992_v23 = vpop.f32.mrb[15].mxu0 }
 0x405   : > { %v7393_v37 = vadd.f32 %v6222_v62, %v4335_v5  ;;  %v4337_v31 = vadd.f32 %v7300_v24, %v3992_v23  ;;  %4623 = vadd.xlane.f32.xlu0 %v4622_v56  ;;  %4466 = vadd.xlane.f32.xlu1 %v4465_v28  ;;  %v6229_v56 = vld [vmem:[%s6699_s12 + $0xa0] sm:$0xff]  ;;  %v6230_v23 = vld [vmem:[%s6699_s12 + $0xa8] sm:$0xff] }
 0x406   : > { %v7397_v54 = vadd.f32 %v6223_v55, %v4336_v36  ;;  %v4558_v26 = vmul.f32 %v7389_v61, %v7389_v61  ;;  %v6231_v55 = vld [vmem:[%s6699_s12 + $0xb0] sm:$0xff] }
 0x407   : > { %v7400_v47 = vadd.f32 %v6224_v20, %v4337_v31  ;;  %v4468_v29 = vadd.f32 %v7393_v37, %v7389_v61  ;;  %v4559_v50 = vmul.f32 %v7393_v37, %v7393_v37 }
 0x408   : > { %v4560_v25 = vmul.f32 %v7397_v54, %v7397_v54 }
 0x409   : > { %4626 = vadd.xlane.f32.xlu1 %v4625_v19  ;;  %4469 = vadd.xlane.f32.xlu0 %v4468_v29  ;;  %v3996_v58 = vpop.f32.mrb[16].mxu0  ;;  %v4561_v46 = vmul.f32 %v7400_v47, %v7400_v47  ;;  %v4628_v0 = vadd.f32 %v4559_v50, %v4558_v26  ;;  %v4471_v43 = vadd.f32 %v7400_v47, %v7397_v54  ;;  %v6232_v29 = vld [vmem:[%s6699_s12 + $0xb8] sm:$0xff] }
 0x40a   : > { %v4338_v30 = vadd.f32 %v7296_v45, %v3996_v58  ;;  %v3998_v33 = vpop.f32.mrb[17].mxu0 }
 0x40b   : > { %v4339_v57 = vadd.f32 %v7300_v24, %v3998_v33  ;;  %v4000_v32 = vpop.f32.mrb[18].mxu0  ;;  %v4631_v21 = vadd.f32 %v4561_v46, %v4560_v25 }
 0x40c   : > { %v7417_v41 = vadd.f32 %v6225_v35, %v4338_v30  ;;  %v4340_v40 = vadd.f32 %v7296_v45, %v4000_v32  ;;  %v4002_v42 = vpop.f32.mrb[19].mxu0 }
 0x40d   : > { %v7421_v60 = vadd.f32 %v6226_v63, %v4339_v57  ;;  %v4341_v34 = vadd.f32 %v7300_v24, %v4002_v42  ;;  %4629 = vadd.xlane.f32.xlu0 %v4628_v0  ;;  %4472 = vadd.xlane.f32.xlu1 %v4471_v43  ;;  %v6233_v42 = vld [vmem:[%s6699_s12 + $0xc0] sm:$0xff] }
 0x40e   : > { %v7425_v1 = vadd.f32 %v6227_v18, %v4340_v40  ;;  %v4562_v11 = vmul.f32 %v7417_v41, %v7417_v41 }
 0x40f   : > { %v7428_v12 = vadd.f32 %v6228_v10, %v4341_v34  ;;  %v4474_v15 = vadd.f32 %v7421_v60, %v7417_v41  ;;  %v4563_v48 = vmul.f32 %v7421_v60, %v7421_v60 }
 0x410   : > { %v4564_v8 = vmul.f32 %v7425_v1, %v7425_v1 }
 0x411   : > { %4632 = vadd.xlane.f32.xlu1 %v4631_v21  ;;  %4475 = vadd.xlane.f32.xlu0 %v4474_v15  ;;  %v4006_v49 = vpop.f32.mrb[20].mxu0  ;;  %v4565_v13 = vmul.f32 %v7428_v12, %v7428_v12  ;;  %v4634_v5 = vadd.f32 %v4563_v48, %v4562_v11  ;;  %v4477_v38 = vadd.f32 %v7428_v12, %v7425_v1  ;;  %v6234_v21 = vld [vmem:[%s6699_s12 + $0xc8] sm:$0xff]  ;;  %v6235_v11 = vld [vmem:[%s6699_s12 + $0xd0] sm:$0xff] }
 0x412   : > { %v4342_v44 = vadd.f32 %v7296_v45, %v4006_v49  ;;  %v4008_v52 = vpop.f32.mrb[21].mxu0 }
 0x413   : > { %v4343_v3 = vadd.f32 %v7300_v24, %v4008_v52  ;;  %v4010_v2 = vpop.f32.mrb[22].mxu0  ;;  %v4637_v20 = vadd.f32 %v4565_v13, %v4564_v8 }
 0x414   : > { %v7445_v28 = vadd.f32 %v6229_v56, %v4342_v44  ;;  %v4344_v39 = vadd.f32 %v7296_v45, %v4010_v2  ;;  %v4012_v36 = vpop.f32.mrb[23].mxu0  ;;  %v6236_v44 = vld [vmem:[%s6699_s12 + $0xd8] sm:$0xff] }
 0x415   : > { %v7449_v62 = vadd.f32 %v6230_v23, %v4343_v3  ;;  %v4345_v31 = vadd.f32 %v7300_v24, %v4012_v36  ;;  %4635 = vadd.xlane.f32.xlu0 %v4634_v5  ;;  %4478 = vadd.xlane.f32.xlu1 %v4477_v38 }
 0x416   : > { %v7453_v19 = vadd.f32 %v6231_v55, %v4344_v39  ;;  %v4566_v58 = vmul.f32 %v7445_v28, %v7445_v28 }
 0x417   : > { %v7456_v26 = vadd.f32 %v6232_v29, %v4345_v31  ;;  %v4480_v50 = vadd.f32 %v7449_v62, %v7445_v28  ;;  %v4567_v30 = vmul.f32 %v7449_v62, %v7449_v62 }
 0x418   : > { %v4568_v57 = vmul.f32 %v7453_v19, %v7453_v19 }
 0x419   : > { %4638 = vadd.xlane.f32.xlu1 %v4637_v20  ;;  %4481 = vadd.xlane.f32.xlu0 %v4480_v50  ;;  %v4016_v33 = vpop.f32.mrb[24].mxu0  ;;  %v4569_v32 = vmul.f32 %v7456_v26, %v7456_v26  ;;  %v4640_v35 = vadd.f32 %v4567_v30, %v4566_v58  ;;  %v4483_v40 = vadd.f32 %v7456_v26, %v7453_v19  ;;  %v6237_v20 = vld [vmem:[%s6699_s12 + $0xe0] sm:$0xff]  ;;  %v6238_v30 = vld [vmem:[%s6699_s12 + $0xe8] sm:$0xff] }
 0x41a   : > { %v4346_v25 = vadd.f32 %v7296_v45, %v4016_v33  ;;  %v4018_v46 = vpop.f32.mrb[25].mxu0 }
 0x41b   : > { %v4347_v0 = vadd.f32 %v7300_v24, %v4018_v46  ;;  %v4020_v43 = vpop.f32.mrb[26].mxu0  ;;  %v4643_v49 = vadd.f32 %v4569_v32, %v4568_v57  ;;  %v6239_v46 = vld [vmem:[%s6699_s12 + $0xf0] sm:$0xff] }
 0x41c   : > { %v7473_v63 = vadd.f32 %v6233_v42, %v4346_v25  ;;  %v4348_v34 = vadd.f32 %v7296_v45, %v4020_v43  ;;  %v4022_v18 = vpop.f32.mrb[27].mxu0 }
 0x41d   : > { %v7477_v10 = vadd.f32 %v6234_v21, %v4347_v0  ;;  %v4349_v15 = vadd.f32 %v7300_v24, %v4022_v18  ;;  %4641 = vadd.xlane.f32.xlu0 %v4640_v35  ;;  %4484 = vadd.xlane.f32.xlu1 %v4483_v40  ;;  %v6240_v0 = vld [vmem:[%s6699_s12 + $0xf8] sm:$0xff] }
 0x41e   : > { %v7481_v48 = vadd.f32 %v6235_v11, %v4348_v34  ;;  %v4570_v13 = vmul.f32 %v7473_v63, %v7473_v63 }
 0x41f   : > { %v7484_v52 = vadd.f32 %v6236_v44, %v4349_v15  ;;  %v4486_v8 = vadd.f32 %v7477_v10, %v7473_v63  ;;  %v4571_v3 = vmul.f32 %v7477_v10, %v7477_v10 }
 0x420   : > { %v4572_v56 = vmul.f32 %v7481_v48, %v7481_v48 }
 0x421   : > { %4644 = vadd.xlane.f32.xlu1 %v4643_v49  ;;  %4487 = vadd.xlane.f32.xlu0 %v4486_v8  ;;  %v4026_v2 = vpop.f32.mrb[28].mxu0  ;;  %v4573_v39 = vmul.f32 %v7484_v52, %v7484_v52  ;;  %v4646_v31 = vadd.f32 %v4571_v3, %v4570_v13  ;;  %v4489_v55 = vadd.f32 %v7484_v52, %v7481_v48  ;;  %v6241_v3 = vld [vmem:[%s6699_s12 + $0x100] sm:$0xff] }
 0x422   : > { %v4350_v5 = vadd.f32 %v7296_v45, %v4026_v2  ;;  %v4028_v38 = vpop.f32.mrb[29].mxu0 }
 0x423   : > { %v4351_v36 = vadd.f32 %v7300_v24, %v4028_v38  ;;  %v4030_v23 = vpop.f32.mrb[30].mxu0  ;;  %v4649_v32 = vadd.f32 %v4573_v39, %v4572_v56  ;;  %v6242_v56 = vld [vmem:[%s6699_s12 + $0x108] sm:$0xff] }
 0x424   : > { %v7501_v29 = vadd.f32 %v6237_v20, %v4350_v5  ;;  %v4352_v50 = vadd.f32 %v7296_v45, %v4030_v23  ;;  %v4032_v58 = vpop.f32.mrb[31].mxu0  ;;  %v6243_v23 = vld [vmem:[%s6699_s12 + $0x110] sm:$0xff]  ;;  %v6244_v20 = vld [vmem:[%s6699_s12 + $0x118] sm:$0xff] }
 0x425   : > { %v7505_v33 = vadd.f32 %v6238_v30, %v4351_v36  ;;  %v4353_v25 = vadd.f32 %v7300_v24, %v4032_v58  ;;  %4647 = vadd.xlane.f32.xlu0 %v4646_v31  ;;  %4490 = vadd.xlane.f32.xlu1 %v4489_v55 }
 0x426   : > { %v7509_v57 = vadd.f32 %v6239_v46, %v4352_v50  ;;  %v4574_v40 = vmul.f32 %v7501_v29, %v7501_v29 }
 0x427   : > { %v7512_v43 = vadd.f32 %v6240_v0, %v4353_v25  ;;  %v4492_v35 = vadd.f32 %v7505_v33, %v7501_v29  ;;  %v4575_v42 = vmul.f32 %v7505_v33, %v7505_v33 }
 0x428   : > { %v4576_v15 = vmul.f32 %v7509_v57, %v7509_v57 }
 0x429   : > { %4650 = vadd.xlane.f32.xlu1 %v4649_v32  ;;  %4493 = vadd.xlane.f32.xlu0 %v4492_v35  ;;  %v4036_v34 = vpop.f32.mrb[32].mxu0  ;;  %v4577_v11 = vmul.f32 %v7512_v43, %v7512_v43  ;;  %v4652_v8 = vadd.f32 %v4575_v42, %v4574_v40  ;;  %v4495_v13 = vadd.f32 %v7512_v43, %v7509_v57 }
 0x42a   : > { %v4354_v18 = vadd.f32 %v7296_v45, %v4036_v34  ;;  %v4038_v21 = vpop.f32.mrb[33].mxu0 }
 0x42b   : > { %v4355_v49 = vadd.f32 %v7300_v24, %v4038_v21  ;;  %v4040_v44 = vpop.f32.mrb[34].mxu0  ;;  %v4655_v55 = vadd.f32 %v4577_v11, %v4576_v15  ;;  %v6245_v15 = vld [vmem:[%s6699_s12 + $0x120] sm:$0xff] }
 0x42c   : > { %v7529_v2 = vadd.f32 %v6241_v3, %v4354_v18  ;;  %v4356_v5 = vadd.f32 %v7296_v45, %v4040_v44  ;;  %v4042_v38 = vpop.f32.mrb[35].mxu0 }
 0x42d   : > { %v7533_v39 = vadd.f32 %v6242_v56, %v4355_v49  ;;  %v4357_v36 = vadd.f32 %v7300_v24, %v4042_v38  ;;  %4653 = vadd.xlane.f32.xlu0 %v4652_v8  ;;  %4496 = vadd.xlane.f32.xlu1 %v4495_v13  ;;  %v6246_v8 = vld [vmem:[%s6699_s12 + $0x128] sm:$0xff] }
 0x42e   : > { %v7537_v31 = vadd.f32 %v6243_v23, %v4356_v5  ;;  %v4578_v30 = vmul.f32 %v7529_v2, %v7529_v2  ;;  %v6247_v5 = vld [vmem:[%s6699_s12 + $0x130] sm:$0xff] }
 0x42f   : > { %v7540_v50 = vadd.f32 %v6244_v20, %v4357_v36  ;;  %v4498_v58 = vadd.f32 %v7533_v39, %v7529_v2  ;;  %v4579_v25 = vmul.f32 %v7533_v39, %v7533_v39  ;;  %v6248_v36 = vld [vmem:[%s6699_s12 + $0x138] sm:$0xff] }
 0x430   : > { %v4580_v35 = vmul.f32 %v7537_v31, %v7537_v31 }
 0x431   : > { %4656 = vadd.xlane.f32.xlu1 %v4655_v55  ;;  %4499 = vadd.xlane.f32.xlu0 %v4498_v58  ;;  %v4046_v46 = vpop.f32.mrb[36].mxu0  ;;  %v4581_v40 = vmul.f32 %v7540_v50, %v7540_v50  ;;  %v4658_v18 = vadd.f32 %v4579_v25, %v4578_v30  ;;  %v4501_v21 = vadd.f32 %v7540_v50, %v7537_v31 }
 0x432   : > { %v4358_v32 = vadd.f32 %v7296_v45, %v4046_v46  ;;  %v4048_v0 = vpop.f32.mrb[37].mxu0 }
 0x433   : > { %v4359_v42 = vadd.f32 %v7300_v24, %v4048_v0  ;;  %v4050_v34 = vpop.f32.mrb[38].mxu0  ;;  %v4661_v56 = vadd.f32 %v4581_v40, %v4580_v35 }
 0x434   : > { %v7557_v11 = vadd.f32 %v6245_v15, %v4358_v32  ;;  %v4360_v49 = vadd.f32 %v7296_v45, %v4050_v34  ;;  %v4052_v44 = vpop.f32.mrb[39].mxu0 }
 0x435   : > { %v7561_v13 = vadd.f32 %v6246_v8, %v4359_v42  ;;  %v4361_v3 = vadd.f32 %v7300_v24, %v4052_v44  ;;  %4659 = vadd.xlane.f32.xlu0 %v4658_v18  ;;  %4502 = vadd.xlane.f32.xlu1 %v4501_v21  ;;  %v6249_v18 = vld [vmem:[%s6699_s12 + $0x140] sm:$0xff]  ;;  %v6250_v44 = vld [vmem:[%s6699_s12 + $0x148] sm:$0xff] }
 0x436   : > { %v7565_v38 = vadd.f32 %v6247_v5, %v4360_v49  ;;  %v4582_v20 = vmul.f32 %v7557_v11, %v7557_v11  ;;  %v6251_v5 = vld [vmem:[%s6699_s12 + $0x150] sm:$0xff] }
 0x437   : > { %v7568_v23 = vadd.f32 %v6248_v36, %v4361_v3  ;;  %v4504_v55 = vadd.f32 %v7561_v13, %v7557_v11  ;;  %v4583_v58 = vmul.f32 %v7561_v13, %v7561_v13 }
 0x438   : > { %8273 = vst [vmem:[#allocation15_spill] sm:$0xff] %v7565_v38  ;;  %v4584_v32 = vmul.f32 %v7565_v38, %v7565_v38 }
 0x439   : > { %8274 = vst [vmem:[#allocation16_spill] sm:$0xff] %v7568_v23  ;;  %4662 = vadd.xlane.f32.xlu1 %v4661_v56  ;;  %4505 = vadd.xlane.f32.xlu0 %v4504_v55  ;;  %v4056_v30 = vpop.f32.mrb[40].mxu0  ;;  %v4585_v0 = vmul.f32 %v7568_v23, %v7568_v23  ;;  %v4664_v42 = vadd.f32 %v4583_v58, %v4582_v20  ;;  %v6252_v55 = vld [vmem:[%s6699_s12 + $0x158] sm:$0xff] }
 0x43a   : > { %v4362_v25 = vadd.f32 %v7296_v45, %v4056_v30  ;;  %v4058_v46 = vpop.f32.mrb[41].mxu0  ;;  %v4507_v34 = vadd.f32 %v7568_v23, %v7565_v38 }
 0x43b   : > { %v4363_v35 = vadd.f32 %v7300_v24, %v4058_v46  ;;  %v4060_v40 = vpop.f32.mrb[42].mxu0  ;;  %v4667_v36 = vadd.f32 %v4585_v0, %v4584_v32 }
 0x43c   : > { %v7585_v21 = vadd.f32 %v6249_v18, %v4362_v25  ;;  %v4364_v15 = vadd.f32 %v7296_v45, %v4060_v40  ;;  %v4062_v49 = vpop.f32.mrb[43].mxu0 }
 0x43d   : > { %v7589_v8 = vadd.f32 %v6250_v44, %v4363_v35  ;;  %v4365_v3 = vadd.f32 %v7300_v24, %v4062_v49  ;;  %4665 = vadd.xlane.f32.xlu0 %v4664_v42  ;;  %4508 = vadd.xlane.f32.xlu1 %v4507_v34  ;;  %v6253_v49 = vld [vmem:[%s6699_s12 + $0x160] sm:$0xff] }
 0x43e   : > { %8275 = vst [vmem:[#allocation17_spill] sm:$0xff] %v7585_v21  ;;  %v7593_v56 = vadd.f32 %v6251_v5, %v4364_v15  ;;  %v4586_v30 = vmul.f32 %v7585_v21, %v7585_v21 }
 0x43f   : > { %8276 = vst [vmem:[#allocation18_spill] sm:$0xff] %v7589_v8  ;;  %v7596_v20 = vadd.f32 %v6252_v55, %v4365_v3  ;;  %v4510_v58 = vadd.f32 %v7589_v8, %v7585_v21  ;;  %v4587_v25 = vmul.f32 %v7589_v8, %v7589_v8 }
 0x440   : > { %8277 = vst [vmem:[#allocation19_spill] sm:$0xff] %v7593_v56  ;;  %v4588_v0 = vmul.f32 %v7593_v56, %v7593_v56 }
 0x441   : > { %8278 = vst [vmem:[#allocation20_spill] sm:$0xff] %v7596_v20  ;;  %4668 = vadd.xlane.f32.xlu1 %v4667_v36  ;;  %4511 = vadd.xlane.f32.xlu0 %v4510_v58  ;;  %v4066_v46 = vpop.f32.mrb[44].mxu0  ;;  %v4589_v40 = vmul.f32 %v7596_v20, %v7596_v20  ;;  %v4670_v18 = vadd.f32 %v4587_v25, %v4586_v30  ;;  %v6254_v36 = vld [vmem:[%s6699_s12 + $0x168] sm:$0xff]  ;;  %v6256_v25 = vld [vmem:[%s6699_s12 + $0x178] sm:$0xff] }
 0x442   : > { %v4366_v35 = vadd.f32 %v7296_v45, %v4066_v46  ;;  %v4068_v32 = vpop.f32.mrb[45].mxu0  ;;  %v4513_v15 = vadd.f32 %v7596_v20, %v7593_v56  ;;  %v6255_v46 = vld [vmem:[%s6699_s12 + $0x170] sm:$0xff] }
 0x443   : > { %v4367_v42 = vadd.f32 %v7300_v24, %v4068_v32  ;;  %v4070_v34 = vpop.f32.mrb[46].mxu0  ;;  %v4673_v30 = vadd.f32 %v4589_v40, %v4588_v0 }
 0x444   : > { %v7613_v44 = vadd.f32 %v6253_v49, %v4366_v35  ;;  %v4368_v3 = vadd.f32 %v7296_v45, %v4070_v34  ;;  %v4072_v5 = vpop.f32.mrb[47].mxu0 }
 0x445   : > { %v7617_v55 = vadd.f32 %v6254_v36, %v4367_v42  ;;  %v4369_v58 = vadd.f32 %v7300_v24, %v4072_v5  ;;  %4671 = vadd.xlane.f32.xlu0 %v4670_v18  ;;  %4514 = vadd.xlane.f32.xlu1 %v4513_v15 }
 0x446   : > { %8279 = vst [vmem:[#allocation21_spill] sm:$0xff] %v7613_v44  ;;  %v7621_v32 = vadd.f32 %v6255_v46, %v4368_v3  ;;  %v4590_v34 = vmul.f32 %v7613_v44, %v7613_v44  ;;  %v6257_v46 = vld [vmem:[%s6699_s12 + $0x180] sm:$0xff] }
 0x447   : > { %8280 = vst [vmem:[#allocation22_spill] sm:$0xff] %v7617_v55  ;;  %v7624_v20 = vadd.f32 %v6256_v25, %v4369_v58  ;;  %v4516_v35 = vadd.f32 %v7617_v55, %v7613_v44  ;;  %v4591_v42 = vmul.f32 %v7617_v55, %v7617_v55 }
 0x448   : > { %8281 = vst [vmem:[#allocation23_spill] sm:$0xff] %v7621_v32  ;;  %v4592_v40 = vmul.f32 %v7621_v32, %v7621_v32 }
 0x449   : > { %8282 = vst [vmem:[#allocation24_spill] sm:$0xff] %v7624_v20  ;;  %4674 = vadd.xlane.f32.xlu1 %v4673_v30  ;;  %4517 = vadd.xlane.f32.xlu0 %v4516_v35  ;;  %v4076_v18 = vpop.f32.mrb[48].mxu0  ;;  %v4593_v49 = vmul.f32 %v7624_v20, %v7624_v20  ;;  %v4676_v36 = vadd.f32 %v4591_v42, %v4590_v34  ;;  %v6260_v42 = vld [vmem:[%s6699_s12 + $0x198] sm:$0xff] }
 0x44a   : > { %v4370_v15 = vadd.f32 %v7296_v45, %v4076_v18  ;;  %v4078_v0 = vpop.f32.mrb[49].mxu0  ;;  %v4519_v58 = vadd.f32 %v7624_v20, %v7621_v32  ;;  %v6258_v18 = vld [vmem:[%s6699_s12 + $0x188] sm:$0xff] }
 0x44b   : > { %v4371_v3 = vadd.f32 %v7300_v24, %v4078_v0  ;;  %v4080_v5 = vpop.f32.mrb[50].mxu0  ;;  %v6259_v0 = vld [vmem:[%s6699_s12 + $0x190] sm:$0xff]  ;;  %v4679_v34 = vadd.f32 %v4593_v49, %v4592_v40 }
 0x44c   : > { %v7641_v30 = vadd.f32 %v6257_v46, %v4370_v15  ;;  %v4372_v25 = vadd.f32 %v7296_v45, %v4080_v5  ;;  %v4082_v35 = vpop.f32.mrb[51].mxu0 }
 0x44d   : > { %v7645_v55 = vadd.f32 %v6258_v18, %v4371_v3  ;;  %v4373_v44 = vadd.f32 %v7300_v24, %v4082_v35  ;;  %4677 = vadd.xlane.f32.xlu0 %v4676_v36  ;;  %4520 = vadd.xlane.f32.xlu1 %v4519_v58 }
 0x44e   : > { %8283 = vst [vmem:[#allocation25_spill] sm:$0xff] %v7641_v30  ;;  %v7649_v56 = vadd.f32 %v6259_v0, %v4372_v25  ;;  %v4594_v5 = vmul.f32 %v7641_v30, %v7641_v30  ;;  %v6261_v0 = vld [vmem:[%s6699_s12 + $0x1a0] sm:$0xff] }
 0x44f   : > { %8284 = vst [vmem:[#allocation26_spill] sm:$0xff] %v7645_v55  ;;  %v7652_v20 = vadd.f32 %v6260_v42, %v4373_v44  ;;  %v4522_v15 = vadd.f32 %v7645_v55, %v7641_v30  ;;  %v4595_v3 = vmul.f32 %v7645_v55, %v7645_v55 }
 0x450   : > { %8285 = vst [vmem:[#allocation27_spill] sm:$0xff] %v7649_v56  ;;  %v4596_v44 = vmul.f32 %v7649_v56, %v7649_v56 }
 0x451   : > { %8286 = vst [vmem:[#allocation28_spill] sm:$0xff] %v7652_v20  ;;  %4680 = vadd.xlane.f32.xlu1 %v4679_v34  ;;  %4523 = vadd.xlane.f32.xlu0 %v4522_v15  ;;  %v4086_v36 = vpop.f32.mrb[52].mxu0  ;;  %v4597_v49 = vmul.f32 %v7652_v20, %v7652_v20  ;;  %v4682_v35 = vadd.f32 %v4595_v3, %v4594_v5  ;;  %v6264_v3 = vld [vmem:[%s6699_s12 + $0x1b8] sm:$0xff] }
 0x452   : > { %v4374_v58 = vadd.f32 %v7296_v45, %v4086_v36  ;;  %v4088_v40 = vpop.f32.mrb[53].mxu0  ;;  %v4525_v18 = vadd.f32 %v7652_v20, %v7649_v56  ;;  %v6262_v36 = vld [vmem:[%s6699_s12 + $0x1a8] sm:$0xff] }
 0x453   : > { %v4375_v46 = vadd.f32 %v7300_v24, %v4088_v40  ;;  %v4090_v25 = vpop.f32.mrb[54].mxu0  ;;  %v6263_v40 = vld [vmem:[%s6699_s12 + $0x1b0] sm:$0xff]  ;;  %v4685_v5 = vadd.f32 %v4597_v49, %v4596_v44 }
 0x454   : > { %v7669_v34 = vadd.f32 %v6261_v0, %v4374_v58  ;;  %v4376_v42 = vadd.f32 %v7296_v45, %v4090_v25  ;;  %v4092_v15 = vpop.f32.mrb[55].mxu0 }
 0x455   : > { %v7673_v55 = vadd.f32 %v6262_v36, %v4375_v46  ;;  %v4377_v30 = vadd.f32 %v7300_v24, %v4092_v15  ;;  %4683 = vadd.xlane.f32.xlu0 %v4682_v35  ;;  %4526 = vadd.xlane.f32.xlu1 %v4525_v18 }
 0x456   : > { %8287 = vst [vmem:[#allocation29_spill] sm:$0xff] %v7669_v34  ;;  %v7677_v32 = vadd.f32 %v6263_v40, %v4376_v42  ;;  %v4598_v25 = vmul.f32 %v7669_v34, %v7669_v34  ;;  %v6265_v40 = vld [vmem:[%s6699_s12 + $0x1c0] sm:$0xff] }
 0x457   : > { %8288 = vst [vmem:[#allocation30_spill] sm:$0xff] %v7673_v55  ;;  %v7680_v20 = vadd.f32 %v6264_v3, %v4377_v30  ;;  %v4528_v58 = vadd.f32 %v7673_v55, %v7669_v34  ;;  %v4599_v46 = vmul.f32 %v7673_v55, %v7673_v55 }
 0x458   : > { %8289 = vst [vmem:[#allocation31_spill] sm:$0xff] %v7677_v32  ;;  %v4600_v30 = vmul.f32 %v7677_v32, %v7677_v32 }
 0x459   : > { %8290 = vst [vmem:[#allocation32_spill] sm:$0xff] %v7680_v20  ;;  %4686 = vadd.xlane.f32.xlu1 %v4685_v5  ;;  %4529 = vadd.xlane.f32.xlu0 %v4528_v58  ;;  %v4096_v35 = vpop.f32.mrb[56].mxu0  ;;  %v4601_v49 = vmul.f32 %v7680_v20, %v7680_v20  ;;  %v4688_v15 = vadd.f32 %v4599_v46, %v4598_v25  ;;  %v6268_v46 = vld [vmem:[%s6699_s12 + $0x1d8] sm:$0xff] }
 0x45a   : > { %v4378_v18 = vadd.f32 %v7296_v45, %v4096_v35  ;;  %v4098_v44 = vpop.f32.mrb[57].mxu0  ;;  %v4531_v36 = vadd.f32 %v7680_v20, %v7677_v32  ;;  %v6266_v35 = vld [vmem:[%s6699_s12 + $0x1c8] sm:$0xff] }
 0x45b   : > { %v4379_v0 = vadd.f32 %v7300_v24, %v4098_v44  ;;  %v4100_v42 = vpop.f32.mrb[58].mxu0  ;;  %v6267_v44 = vld [vmem:[%s6699_s12 + $0x1d0] sm:$0xff]  ;;  %v4691_v25 = vadd.f32 %v4601_v49, %v4600_v30 }
 0x45c   : > { %v7697_v5 = vadd.f32 %v6265_v40, %v4378_v18  ;;  %v4380_v3 = vadd.f32 %v7296_v45, %v4100_v42  ;;  %v4102_v58 = vpop.f32.mrb[59].mxu0 }
 0x45d   : > { %v7701_v55 = vadd.f32 %v6266_v35, %v4379_v0  ;;  %v4381_v34 = vadd.f32 %v7300_v24, %v4102_v58  ;;  %4689 = vadd.xlane.f32.xlu0 %v4688_v15  ;;  %4532 = vadd.xlane.f32.xlu1 %v4531_v36 }
 0x45e   : > { %8291 = vst [vmem:[#allocation33_spill] sm:$0xff] %v7697_v5  ;;  %v7705_v56 = vadd.f32 %v6267_v44, %v4380_v3  ;;  %v4602_v42 = vmul.f32 %v7697_v5, %v7697_v5  ;;  %v6269_v44 = vld [vmem:[%s6699_s12 + $0x1e0] sm:$0xff] }
 0x45f   : > { %8292 = vst [vmem:[#allocation34_spill] sm:$0xff] %v7701_v55  ;;  %v7708_v20 = vadd.f32 %v6268_v46, %v4381_v34  ;;  %v4534_v18 = vadd.f32 %v7701_v55, %v7697_v5  ;;  %v4603_v0 = vmul.f32 %v7701_v55, %v7701_v55 }
 0x460   : > { %8293 = vst [vmem:[#allocation35_spill] sm:$0xff] %v7705_v56  ;;  %v4604_v34 = vmul.f32 %v7705_v56, %v7705_v56 }
 0x461   : > { %8294 = vst [vmem:[#allocation36_spill] sm:$0xff] %v7708_v20  ;;  %4692 = vadd.xlane.f32.xlu1 %v4691_v25  ;;  %4535 = vadd.xlane.f32.xlu0 %v4534_v18  ;;  %v4106_v15 = vpop.f32.mrb[60].mxu0  ;;  %v4605_v49 = vmul.f32 %v7708_v20, %v7708_v20  ;;  %v4694_v58 = vadd.f32 %v4603_v0, %v4602_v42  ;;  %v6272_v0 = vld [vmem:[%s6699_s12 + $0x1f8] sm:$0xff] }
 0x462   : > { %v4382_v36 = vadd.f32 %v7296_v45, %v4106_v15  ;;  %v4108_v30 = vpop.f32.mrb[61].mxu0  ;;  %v4537_v35 = vadd.f32 %v7708_v20, %v7705_v56  ;;  %v6270_v15 = vld [vmem:[%s6699_s12 + $0x1e8] sm:$0xff] }
 0x463   : > { %v4383_v40 = vadd.f32 %v7300_v24, %v4108_v30  ;;  %v4110_v3 = vpop.f32.mrb[62].mxu0  ;;  %v6271_v30 = vld [vmem:[%s6699_s12 + $0x1f0] sm:$0xff]  ;;  %v4697_v42 = vadd.f32 %v4605_v49, %v4604_v34  ;;  %s8170_s12 = scalar_lea.hbm %s8232_s7, %s5668_s23 }
 0x464   : > { %v7725_v25 = vadd.f32 %v6269_v44, %v4382_v36  ;;  %v4384_v46 = vadd.f32 %v7296_v45, %v4110_v3  ;;  %v4112_v18 = vpop.f32.mrb[63].mxu0 }
 0x465   : > { %v7729_v55 = vadd.f32 %v6270_v15, %v4383_v40  ;;  %v4385_v5 = vadd.f32 %v7300_v24, %v4112_v18  ;;  %4695 = vadd.xlane.f32.xlu0 %v4694_v58  ;;  %4538 = vadd.xlane.f32.xlu1 %v4537_v35 }
 0x466   : > { %8295 = vst [vmem:[#allocation37_spill] sm:$0xff] %v7725_v25  ;;  %v7733_v32 = vadd.f32 %v6271_v30, %v4384_v46  ;;  %v4606_v45 = vmul.f32 %v7725_v25, %v7725_v25 }
 0x467   : > { %8296 = vst [vmem:[#allocation38_spill] sm:$0xff] %v7729_v55  ;;  %v7736_v8 = vadd.f32 %v6272_v0, %v4385_v5  ;;  %v4540_v36 = vadd.f32 %v7729_v55, %v7725_v25  ;;  %v4607_v40 = vmul.f32 %v7729_v55, %v7729_v55 }
 0x468   : > { %8297 = vst [vmem:[#allocation39_spill] sm:$0xff] %v7733_v32  ;;  %v4608_v34 = vmul.f32 %v7733_v32, %v7733_v32 }
 0x469   : > { %8298 = vst [vmem:[#allocation40_spill] sm:$0xff] %v7736_v8  ;;  %4698 = vadd.xlane.f32.xlu1 %v4697_v42  ;;  %4541 = vadd.xlane.f32.xlu0 %v4540_v36  ;;  %v4700_v24 = vadd.f32 %v4607_v40, %v4606_v45  ;;  %v4543_v3 = vadd.f32 %v7736_v8, %v7733_v32 }
 0x46a   : > { %v4609_v5 = vmul.f32 %v7736_v8, %v7736_v8 }
 0x46c   : > { %v4703_v49 = vadd.f32 %v4609_v5, %v4608_v34 }
 0x46d   : > { %4701 = vadd.xlane.f32.xlu0 %v4700_v24  ;;  %4544 = vadd.xlane.f32.xlu1 %v4543_v3 }
 0x471   : > { %4704 = vadd.xlane.f32.xlu1 %v4703_v49 }
 0x47e   : > { %v4452_v58 = vpop.xlane.xlu0 %4451 }
 0x47f   : > { %v7750_v35 = vmul.f32 0.00390625, %v4452_v58 }
 0x481   : > { %v4739_v15 = vmul.f32 %v7750_v35, %v4452_v58 }
 0x482   : > { %v4615_v44 = vpop.xlane.xlu1 %4614  ;;  %v4455_v46 = vpop.xlane.xlu0 %4454 }
 0x483   : > { %v4708_v18 = vmul.f32 0.00390625, %v4455_v46 }
 0x485   : > { %v4740_v30 = vmul.f32 %v4708_v18, %v4455_v46 }
 0x486   : > { %v4612_v42 = vpop.xlane.xlu0 %4611  ;;  %v4458_v0 = vpop.xlane.xlu1 %4457 }
 0x487   : > { %v4772_v36 = vsub.f32 %v4615_v44, %v4740_v30  ;;  %v4771_v45 = vsub.f32 %v4612_v42, %v4739_v15  ;;  %v7753_v40 = vmul.f32 0.00390625, %v4458_v0 }
 0x489   : > { %v4804_v8 = vmax.f32 %v4772_v36, 0.0  ;;  %v4803_v24 = vmax.f32 %v4771_v45, 0.0  ;;  %v4741_v3 = vmul.f32 %v7753_v40, %v4458_v0  ;;  %v4873_v21 = vsub.f32 %v7337_v22, %v7753_v40 }
 0x48a   : > { %v4618_v34 = vpop.xlane.xlu0 %4617  ;;  %v4461_v5 = vpop.xlane.xlu1 %4460 }
 0x48b   : > { %v4837_v49 = vmul.f32 0.003921569, %v4804_v8  ;;  %v4836_v32 = vmul.f32 0.003921569, %v4803_v24  ;;  %v4773_v55 = vsub.f32 %v4618_v34, %v4741_v3  ;;  %v7756_v25 = vmul.f32 0.00390625, %v4461_v5 }
 0x48d   : > { %v4933_v20 = vadd.f32 1e-08, %v4837_v49  ;;  %v4932_v58 = vadd.f32 1e-08, %v4836_v32  ;;  %v4805_v46 = vmax.f32 %v4773_v55, 0.0  ;;  %v4742_v56 = vmul.f32 %v7756_v25, %v4461_v5 }
 0x48e   : > { %v4621_v44 = vpop.xlane.xlu1 %4620  ;;  %v4464_v15 = vpop.xlane.xlu0 %4463  ;;  %v4874_v22 = vsub.f32 %v7341_v51, %v7756_v25 }
 0x48f   : > { %6144 = vrsqrt.f32 %v4933_v20  ;;  %v4838_v30 = vmul.f32 0.003921569, %v4805_v46  ;;  %v4774_v42 = vsub.f32 %v4621_v44, %v4742_v56  ;;  %v7759_v36 = vmul.f32 0.00390625, %v4464_v15 }
 0x490   : > { %6146 = vrsqrt.f32 %v4932_v58  ;;  %v7765_v56 = vstv %s5060_s21 }
 0x491   : > { %v4934_v8 = vadd.f32 1e-08, %v4838_v30  ;;  %v4806_v0 = vmax.f32 %v4774_v42, 0.0  ;;  %v4743_v45 = vmul.f32 %v7759_v36, %v4464_v15  ;;  %v4868_v15 = vsub.f32 %v7305_v53, %v7750_v35 }
 0x492   : > { %v4624_v24 = vpop.xlane.xlu0 %4623  ;;  %v4467_v3 = vpop.xlane.xlu1 %4466  ;;  %v4872_v53 = vsub.f32 %v7333_v27, %v7753_v40 }
 0x493   : > { %6148 = vrsqrt.f32 %v4934_v8  ;;  %v4839_v55 = vmul.f32 0.003921569, %v4806_v0  ;;  %v4775_v32 = vsub.f32 %v4624_v24, %v4743_v45  ;;  %v7762_v34 = vmul.f32 0.00390625, %v4467_v3 }
 0x494   : > { %v7771_v8 = vstv %s5126_s18  ;;  %v4870_v0 = vsub.f32 %v7313_v7, %v4708_v18  ;;  %v4871_v45 = vsub.f32 %v7316_v4, %v4708_v18 }
 0x495   : > { %v4935_v5 = vadd.f32 1e-08, %v4839_v55  ;;  %v4807_v49 = vmax.f32 %v4775_v32, 0.0  ;;  %v4744_v20 = vmul.f32 %v7762_v34, %v4467_v3  ;;  %v4869_v3 = vsub.f32 %v7309_v9, %v7750_v35 }
 0x496   : > { %v4627_v46 = vpop.xlane.xlu1 %4626  ;;  %v4470_v44 = vpop.xlane.xlu0 %4469 }
 0x497   : > { %6150 = vrsqrt.f32 %v4935_v5  ;;  %v4840_v58 = vmul.f32 0.003921569, %v4807_v49  ;;  %v4776_v30 = vsub.f32 %v4627_v46, %v4744_v20  ;;  %v7767_v42 = vmul.f32 0.00390625, %v4470_v44 }
 0x499   : > { %v6145_v24 = vpop.eup %6144  ;;  %v4936_v55 = vadd.f32 1e-08, %v4840_v58  ;;  %v4808_v32 = vmax.f32 %v4776_v30, 0.0  ;;  %v4745_v5 = vmul.f32 %v7767_v42, %v4470_v44 }
 0x49a   : > { %v6147_v49 = vpop.eup %6146  ;;  %v4998_v20 = vmul.f32 %v6145_v24, %v4870_v0  ;;  %v4999_v46 = vmul.f32 %v6145_v24, %v4871_v45  ;;  %v4630_v7 = vpop.xlane.xlu0 %4629 }
 0x49b   : > { %v4473_v23 = vpop.xlane.xlu1 %4472  ;;  %v4996_v4 = vmul.f32 %v6147_v49, %v4868_v15  ;;  %v4997_v18 = vmul.f32 %v6147_v49, %v4869_v3  ;;  %6152 = vrsqrt.f32 %v4936_v55  ;;  %v4841_v38 = vmul.f32 0.003921569, %v4808_v32 }
 0x49c   : > { %v5064_v9 = vmul.f32 %v7765_v56, %v4998_v20  ;;  %v5065_v35 = vmul.f32 %v7765_v56, %v4999_v46  ;;  %v4777_v44 = vsub.f32 %v4630_v7, %v4745_v5  ;;  %v7784_v58 = vmul.f32 0.00390625, %v4473_v23 }
 0x49d   : > { %v6149_v30 = vpop.eup %6148  ;;  %v5062_v27 = vmul.f32 %v7765_v56, %v4996_v4  ;;  %v5063_v0 = vmul.f32 %v7765_v56, %v4997_v18  ;;  %v4937_v40 = vadd.f32 1e-08, %v4841_v38 }
 0x49e   : > { %v5130_v15 = vadd.f32 %v7771_v8, %v5064_v9  ;;  %v5131_v45 = vadd.f32 %v7771_v8, %v5065_v35  ;;  %v5000_v24 = vmul.f32 %v6149_v30, %v4872_v53  ;;  %v5001_v3 = vmul.f32 %v6149_v30, %v4873_v21  ;;  %v4476_v32 = vpop.xlane.xlu0 %4475 }
 0x49f   : > { %v4633_v55 = vpop.xlane.xlu1 %4632  ;;  %v5128_v5 = vadd.f32 %v7771_v8, %v5062_v27  ;;  %v5129_v49 = vadd.f32 %v7771_v8, %v5063_v0  ;;  %6154 = vrsqrt.f32 %v4937_v40  ;;  %v4809_v20 = vmax.f32 %v4777_v44, 0.0 }
 0x4a0   : > { %5194 = vst [vmem:[%s7796_s20 + $0x10] sm:$0xff] %v5130_v15  ;;  %5195 = vst [vmem:[%s7796_s20 + $0x18] sm:$0xff] %v5131_v45  ;;  %v5066_v51 = vmul.f32 %v7765_v56, %v5000_v24  ;;  %v5067_v38 = vmul.f32 %v7765_v56, %v5001_v3  ;;  %v4875_v21 = vsub.f32 %v7344_v59, %v7756_v25  ;;  %v7807_v4 = vmul.f32 0.00390625, %v4476_v32 }
 0x4a1   : > { %v4746_v46 = vmul.f32 %v7784_v58, %v4473_v23  ;;  %v6151_v53 = vpop.eup %6150  ;;  %5192 = vst [vmem:[%s7796_s20] sm:$0xff] %v5128_v5  ;;  %5193 = vst [vmem:[%s7796_s20 + $0x8] sm:$0xff] %v5129_v49  ;;  %v4842_v7 = vmul.f32 0.003921569, %v4809_v20  ;;  %v4876_v59 = vsub.f32 %v7361_v6, %v7759_v36  ;;  %v4877_v45 = vsub.f32 %v7365_v16, %v7759_v36 }
 0x4a2   : > { %v5132_v18 = vadd.f32 %v7771_v8, %v5066_v51  ;;  %v5133_v9 = vadd.f32 %v7771_v8, %v5067_v38  ;;  %v5002_v35 = vmul.f32 %v6151_v53, %v4874_v22  ;;  %v5003_v44 = vmul.f32 %v6151_v53, %v4875_v21  ;;  %v4636_v30 = vpop.xlane.xlu0 %4635 }
 0x4a3   : > { %v4479_v27 = vpop.xlane.xlu1 %4478  ;;  %v4938_v23 = vadd.f32 1e-08, %v4842_v7  ;;  %v4778_v25 = vsub.f32 %v4633_v55, %v4746_v46  ;;  %v4747_v0 = vmul.f32 %v7807_v4, %v4476_v32  ;;  %v4878_v38 = vsub.f32 %v7369_v17, %v7762_v34 }
 0x4a4   : > { %5196 = vst [vmem:[%s7796_s20 + $0x20] sm:$0xff] %v5132_v18  ;;  %5197 = vst [vmem:[%s7796_s20 + $0x28] sm:$0xff] %v5133_v9  ;;  %v5068_v40 = vmul.f32 %v7765_v56, %v5002_v35  ;;  %v5069_v15 = vmul.f32 %v7765_v56, %v5003_v44  ;;  %v7820_v22 = vmul.f32 0.00390625, %v4479_v27  ;;  %v4879_v7 = vsub.f32 %v7372_v14, %v7762_v34 }
 0x4a5   : > { %v6153_v24 = vpop.eup %6152  ;;  %6156 = vrsqrt.f32 %v4938_v23  ;;  %v4810_v6 = vmax.f32 %v4778_v25, 0.0  ;;  %v4779_v3 = vsub.f32 %v4636_v30, %v4747_v0 }
 0x4a6   : > { %v5134_v55 = vadd.f32 %v7771_v8, %v5068_v40  ;;  %v5135_v32 = vadd.f32 %v7771_v8, %v5069_v15  ;;  %v5004_v5 = vmul.f32 %v6153_v24, %v4876_v59  ;;  %v5005_v49 = vmul.f32 %v6153_v24, %v4877_v45  ;;  %v4482_v51 = vpop.xlane.xlu0 %4481 }
 0x4a7   : > { %v4639_v20 = vpop.xlane.xlu1 %4638  ;;  %v4843_v16 = vmul.f32 0.003921569, %v4810_v6  ;;  %v4811_v36 = vmax.f32 %v4779_v3, 0.0  ;;  %v4748_v21 = vmul.f32 %v7820_v22, %v4479_v27  ;;  %v7833_v18 = vmul.f32 0.00390625, %v4482_v51 }
 0x4a8   : > { %5198 = vst [vmem:[%s7796_s20 + $0x30] sm:$0xff] %v5134_v55  ;;  %5199 = vst [vmem:[%s7796_s20 + $0x38] sm:$0xff] %v5135_v32  ;;  %v5070_v46 = vmul.f32 %v7765_v56, %v5004_v5  ;;  %v5071_v53 = vmul.f32 %v7765_v56, %v5005_v49  ;;  %v4880_v5 = vsub.f32 %v7389_v61, %v7767_v42 }
 0x4a9   : > { %v6155_v9 = vpop.eup %6154  ;;  %v4939_v35 = vadd.f32 1e-08, %v4843_v16  ;;  %v4844_v17 = vmul.f32 0.003921569, %v4811_v36  ;;  %v4780_v44 = vsub.f32 %v4639_v20, %v4748_v21  ;;  %v4749_v14 = vmul.f32 %v7833_v18, %v4482_v51 }
 0x4aa   : > { %v5136_v30 = vadd.f32 %v7771_v8, %v5070_v46  ;;  %v5137_v27 = vadd.f32 %v7771_v8, %v5071_v53  ;;  %v5006_v59 = vmul.f32 %v6155_v9, %v4878_v38  ;;  %v5007_v23 = vmul.f32 %v6155_v9, %v4879_v7  ;;  %v4642_v25 = vpop.xlane.xlu0 %4641 }
 0x4ab   : > { %v4485_v0 = vpop.xlane.xlu1 %4484  ;;  %6158 = vrsqrt.f32 %v4939_v35  ;;  %v4940_v40 = vadd.f32 1e-08, %v4844_v17  ;;  %v4812_v15 = vmax.f32 %v4780_v44, 0.0  ;;  %v4781_v6 = vsub.f32 %v4642_v25, %v4749_v14 }
 0x4ac   : > { %5200 = vst [vmem:[%s7796_s20 + $0x40] sm:$0xff] %v5136_v30  ;;  %5201 = vst [vmem:[%s7796_s20 + $0x48] sm:$0xff] %v5137_v27  ;;  %v5072_v34 = vmul.f32 %v7765_v56, %v5006_v59  ;;  %v5073_v45 = vmul.f32 %v7765_v56, %v5007_v23  ;;  %v7842_v3 = vmul.f32 0.00390625, %v4485_v0  ;;  %v4881_v49 = vsub.f32 %v7393_v37, %v7767_v42 }
 0x4ad   : > { %6160 = vrsqrt.f32 %v4940_v40  ;;  %v4845_v24 = vmul.f32 0.003921569, %v4812_v15  ;;  %v4813_v36 = vmax.f32 %v4781_v6, 0.0  ;;  %v4882_v42 = vsub.f32 %v7397_v54, %v7784_v58 }
 0x4ae   : > { %v5138_v55 = vadd.f32 %v7771_v8, %v5072_v34  ;;  %v5139_v32 = vadd.f32 %v7771_v8, %v5073_v45  ;;  %v4488_v51 = vpop.xlane.xlu0 %4487  ;;  %v4750_v21 = vmul.f32 %v7842_v3, %v4485_v0  ;;  %v4883_v27 = vsub.f32 %v7400_v47, %v7784_v58 }
 0x4af   : > { %v4645_v20 = vpop.xlane.xlu1 %4644  ;;  %v6157_v38 = vpop.eup %6156  ;;  %v4941_v16 = vadd.f32 1e-08, %v4845_v24  ;;  %v7853_v7 = vmul.f32 0.00390625, %v4488_v51  ;;  %v4846_v9 = vmul.f32 0.003921569, %v4813_v36  ;;  %v4884_v54 = vsub.f32 %v7417_v41, %v7807_v4 }
 0x4b0   : > { %5202 = vst [vmem:[%s7796_s20 + $0x50] sm:$0xff] %v5138_v55  ;;  %5203 = vst [vmem:[%s7796_s20 + $0x58] sm:$0xff] %v5139_v32  ;;  %v5008_v46 = vmul.f32 %v6157_v38, %v4880_v5  ;;  %v5009_v53 = vmul.f32 %v6157_v38, %v4881_v49  ;;  %v4782_v35 = vsub.f32 %v4645_v20, %v4750_v21 }
 0x4b1   : > { %6162 = vrsqrt.f32 %v4941_v16  ;;  %v4751_v17 = vmul.f32 %v7853_v7, %v4488_v51  ;;  %v4942_v59 = vadd.f32 1e-08, %v4846_v9  ;;  %v4885_v34 = vsub.f32 %v7421_v60, %v7807_v4 }
 0x4b2   : > { %v5074_v61 = vmul.f32 %v7765_v56, %v5008_v46  ;;  %v5075_v37 = vmul.f32 %v7765_v56, %v5009_v53  ;;  %v4648_v44 = vpop.xlane.xlu0 %4647  ;;  %v4814_v23 = vmax.f32 %v4782_v35, 0.0  ;;  %v4886_v6 = vsub.f32 %v7425_v1, %v7820_v22 }
 0x4b3   : > { %v4491_v30 = vpop.xlane.xlu1 %4490  ;;  %v4783_v15 = vsub.f32 %v4648_v44, %v4751_v17  ;;  %6164 = vrsqrt.f32 %v4942_v59  ;;  %v4887_v49 = vsub.f32 %v7428_v12, %v7820_v22 }
 0x4b4   : > { %v7862_v25 = vmul.f32 0.00390625, %v4491_v30  ;;  %v5140_v0 = vadd.f32 %v7771_v8, %v5074_v61  ;;  %v5141_v40 = vadd.f32 %v7771_v8, %v5075_v37  ;;  %v4847_v45 = vmul.f32 0.003921569, %v4814_v23 }
 0x4b5   : > { %v6159_v14 = vpop.eup %6158  ;;  %v4815_v55 = vmax.f32 %v4783_v15, 0.0 }
 0x4b6   : > { %v4752_v47 = vmul.f32 %v7862_v25, %v4491_v30  ;;  %5204 = vst [vmem:[%s7796_s20 + $0x60] sm:$0xff] %v5140_v0  ;;  %5205 = vst [vmem:[%s7796_s20 + $0x68] sm:$0xff] %v5141_v40  ;;  %v5010_v58 = vmul.f32 %v6159_v14, %v4882_v42  ;;  %v5011_v24 = vmul.f32 %v6159_v14, %v4883_v27  ;;  %v4494_v5 = vpop.xlane.xlu0 %4493  ;;  %v4943_v20 = vadd.f32 1e-08, %v4847_v45 }
 0x4b7   : > { %v4651_v32 = vpop.xlane.xlu1 %4650  ;;  %v6161_v41 = vpop.eup %6160  ;;  %v7877_v4 = vmul.f32 0.00390625, %v4494_v5  ;;  %v4848_v1 = vmul.f32 0.003921569, %v4815_v55  ;;  %v4888_v14 = vsub.f32 %v7445_v28, %v7833_v18 }
 0x4b8   : > { %v4784_v60 = vsub.f32 %v4651_v32, %v4752_v47  ;;  %v5076_v51 = vmul.f32 %v7765_v56, %v5010_v58  ;;  %v5077_v38 = vmul.f32 %v7765_v56, %v5011_v24  ;;  %v5012_v16 = vmul.f32 %v6161_v41, %v4884_v54 }
 0x4b9   : > { %v5013_v36 = vmul.f32 %v6161_v41, %v4885_v34  ;;  %6166 = vrsqrt.f32 %v4943_v20  ;;  %v4753_v46 = vmul.f32 %v7877_v4, %v4494_v5  ;;  %v4944_v42 = vadd.f32 1e-08, %v4848_v1 }
 0x4ba   : > { %v4816_v21 = vmax.f32 %v4784_v60, 0.0  ;;  %v5142_v53 = vadd.f32 %v7771_v8, %v5076_v51  ;;  %v5143_v12 = vadd.f32 %v7771_v8, %v5077_v38  ;;  %v5078_v22 = vmul.f32 %v7765_v56, %v5012_v16  ;;  %v4654_v35 = vpop.xlane.xlu0 %4653 }
 0x4bb   : > { %v5079_v9 = vmul.f32 %v7765_v56, %v5013_v36  ;;  %v4497_v61 = vpop.xlane.xlu1 %4496  ;;  %v6163_v37 = vpop.eup %6162  ;;  %6168 = vrsqrt.f32 %v4944_v42  ;;  %v4785_v0 = vsub.f32 %v4654_v35, %v4753_v46  ;;  %v4889_v34 = vsub.f32 %v7449_v62, %v7833_v18 }
 0x4bc   : > { %v4849_v17 = vmul.f32 0.003921569, %v4816_v21  ;;  %5206 = vst [vmem:[%s7796_s20 + $0x70] sm:$0xff] %v5142_v53  ;;  %5207 = vst [vmem:[%s7796_s20 + $0x78] sm:$0xff] %v5143_v12  ;;  %v5144_v44 = vadd.f32 %v7771_v8, %v5078_v22  ;;  %v5014_v27 = vmul.f32 %v6163_v37, %v4886_v6  ;;  %v5015_v59 = vmul.f32 %v6163_v37, %v4887_v49 }
 0x4bd   : > { %v5145_v30 = vadd.f32 %v7771_v8, %v5079_v9  ;;  %v7890_v40 = vmul.f32 0.00390625, %v4497_v61  ;;  %v6165_v58 = vpop.eup %6164  ;;  %v4817_v24 = vmax.f32 %v4785_v0, 0.0  ;;  %v4890_v60 = vsub.f32 %v7453_v19, %v7842_v3 }
 0x4be   : > { %v4945_v23 = vadd.f32 1e-08, %v4849_v17  ;;  %5208 = vst [vmem:[%s7796_s20 + $0x80] sm:$0xff] %v5144_v44  ;;  %v5080_v54 = vmul.f32 %v7765_v56, %v5014_v27  ;;  %v5081_v15 = vmul.f32 %v7765_v56, %v5015_v59  ;;  %v4500_v47 = vpop.xlane.xlu0 %4499  ;;  %v5016_v5 = vmul.f32 %v6165_v58, %v4888_v14 }
 0x4bf   : > { %5209 = vst [vmem:[%s7796_s20 + $0x88] sm:$0xff] %v5145_v30  ;;  %v4657_v45 = vpop.xlane.xlu1 %4656  ;;  %v4754_v6 = vmul.f32 %v7890_v40, %v4497_v61  ;;  %v5017_v41 = vmul.f32 %v6165_v58, %v4889_v34  ;;  %v4850_v49 = vmul.f32 0.003921569, %v4817_v24  ;;  %v7903_v28 = vmul.f32 0.00390625, %v4500_v47 }
 0x4c0   : > { %6170 = vrsqrt.f32 %v4945_v23  ;;  %v5146_v55 = vadd.f32 %v7771_v8, %v5080_v54  ;;  %v5147_v32 = vadd.f32 %v7771_v8, %v5081_v15  ;;  %v5082_v62 = vmul.f32 %v7765_v56, %v5016_v5 }
 0x4c1   : > { %v4786_v20 = vsub.f32 %v4657_v45, %v4754_v6  ;;  %v5083_v18 = vmul.f32 %v7765_v56, %v5017_v41  ;;  %v4891_v51 = vsub.f32 %v7456_v26, %v7842_v3  ;;  %v4892_v1 = vsub.f32 %v7473_v63, %v7853_v7 }
 0x4c2   : > { %5210 = vst [vmem:[%s7796_s20 + $0x90] sm:$0xff] %v5146_v55  ;;  %5211 = vst [vmem:[%s7796_s20 + $0x98] sm:$0xff] %v5147_v32  ;;  %v4660_v38 = vpop.xlane.xlu0 %4659  ;;  %v4946_v21 = vadd.f32 1e-08, %v4850_v49  ;;  %v4755_v53 = vmul.f32 %v7903_v28, %v4500_v47  ;;  %v5148_v12 = vadd.f32 %v7771_v8, %v5082_v62  ;;  %v4893_v26 = vsub.f32 %v7477_v10, %v7853_v7 }
 0x4c3   : > { %v4503_v16 = vpop.xlane.xlu1 %4502  ;;  %v6167_v36 = vpop.eup %6166  ;;  %v4818_v46 = vmax.f32 %v4786_v20, 0.0  ;;  %v5149_v22 = vadd.f32 %v7771_v8, %v5083_v18  ;;  %v4894_v37 = vsub.f32 %v7481_v48, %v7862_v25  ;;  %v4895_v10 = vsub.f32 %v7484_v52, %v7862_v25 }
 0x4c4   : > { %v5018_v19 = vmul.f32 %v6167_v36, %v4890_v60  ;;  %v5019_v9 = vmul.f32 %v6167_v36, %v4891_v51  ;;  %6172 = vrsqrt.f32 %v4946_v21  ;;  %v4787_v35 = vsub.f32 %v4660_v38, %v4755_v53  ;;  %5212 = vst [vmem:[%s7796_s20 + $0xa0] sm:$0xff] %v5148_v12 }
 0x4c5   : > { %v4851_v3 = vmul.f32 0.003921569, %v4818_v46  ;;  %5213 = vst [vmem:[%s7796_s20 + $0xa8] sm:$0xff] %v5149_v22  ;;  %v7926_v42 = vmul.f32 0.00390625, %v4503_v16  ;;  %v6169_v30 = vpop.eup %6168  ;;  %v4896_v62 = vsub.f32 %v7501_v29, %v7877_v4  ;;  %v4897_v18 = vsub.f32 %v7505_v33, %v7877_v4 }
 0x4c6   : > { %v5084_v63 = vmul.f32 %v7765_v56, %v5018_v19  ;;  %v5085_v61 = vmul.f32 %v7765_v56, %v5019_v9  ;;  %v4506_v44 = vpop.xlane.xlu0 %4505  ;;  %v4819_v27 = vmax.f32 %v4787_v35, 0.0  ;;  %v5020_v54 = vmul.f32 %v6169_v30, %v4892_v1 }
 0x4c7   : > { %v4663_v17 = vpop.xlane.xlu1 %4662  ;;  %v4947_v7 = vadd.f32 1e-08, %v4851_v3  ;;  %v7930_v59 = vmul.f32 0.00390625, %v4506_v44  ;;  %v5021_v48 = vmul.f32 %v6169_v30, %v4893_v26  ;;  %v4756_v34 = vmul.f32 %v7926_v42, %v4503_v16 }
 0x4c8   : > { %v5150_v23 = vadd.f32 %v7771_v8, %v5084_v63  ;;  %v5151_v0 = vadd.f32 %v7771_v8, %v5085_v61  ;;  %v4852_v14 = vmul.f32 0.003921569, %v4819_v27  ;;  %v5086_v45 = vmul.f32 %v7765_v56, %v5020_v54 }
 0x4c9   : > { %6174 = vrsqrt.f32 %v4947_v7  ;;  %v5087_v52 = vmul.f32 %v7765_v56, %v5021_v48  ;;  %v4788_v55 = vsub.f32 %v4663_v17, %v4756_v34  ;;  %v4757_v32 = vmul.f32 %v7930_v59, %v4506_v44 }
 0x4ca   : > { %v6171_v15 = vpop.eup %6170  ;;  %5214 = vst [vmem:[%s7796_s20 + $0xb0] sm:$0xff] %v5150_v23  ;;  %5215 = vst [vmem:[%s7796_s20 + $0xb8] sm:$0xff] %v5151_v0  ;;  %v4666_v58 = vpop.xlane.xlu0 %4665  ;;  %v4948_v6 = vadd.f32 1e-08, %v4852_v14  ;;  %v5152_v5 = vadd.f32 %v7771_v8, %v5086_v45  ;;  %v4898_v19 = vsub.f32 %v7509_v57, %v7890_v40  ;;  %v4899_v9 = vsub.f32 %v7512_v43, %v7890_v40 }
 0x4cb   : > { %v5022_v25 = vmul.f32 %v6171_v15, %v4894_v37  ;;  %v5023_v47 = vmul.f32 %v6171_v15, %v4895_v10  ;;  %v4509_v24 = vpop.xlane.xlu1 %4508  ;;  %v5153_v41 = vadd.f32 %v7771_v8, %v5087_v52  ;;  %v4820_v60 = vmax.f32 %v4788_v55, 0.0 }
 0x4cc   : > { %6176 = vrsqrt.f32 %v4948_v6  ;;  %5216 = vst [vmem:[%s7796_s20 + $0xc0] sm:$0xff] %v5152_v5  ;;  %v4789_v16 = vsub.f32 %v4666_v58, %v4757_v32  ;;  %v7952_v36 = vmul.f32 0.00390625, %v4509_v24  ;;  %v4900_v14 = vsub.f32 %v7529_v2, %v7903_v28 }
 0x4cd   : > { %v5088_v49 = vmul.f32 %v7765_v56, %v5022_v25  ;;  %v5089_v20 = vmul.f32 %v7765_v56, %v5023_v47  ;;  %5217 = vst [vmem:[%s7796_s20 + $0xc8] sm:$0xff] %v5153_v41  ;;  %v4853_v53 = vmul.f32 0.003921569, %v4820_v60  ;;  %v4901_v34 = vsub.f32 %v7533_v39, %v7903_v28 }
 0x4ce   : > { %v4512_v21 = vpop.xlane.xlu0 %4511  ;;  %v6173_v46 = vpop.eup %6172  ;;  %v4821_v12 = vmax.f32 %v4789_v16, 0.0  ;;  %v4758_v22 = vmul.f32 %v7952_v36, %v4509_v24  ;;  %v4902_v60 = vsub.f32 %v7537_v31, %v7926_v42 }
 0x4cf   : > { %v5154_v51 = vadd.f32 %v7771_v8, %v5088_v49  ;;  %v5155_v38 = vadd.f32 %v7771_v8, %v5089_v20  ;;  %v4669_v1 = vpop.xlane.xlu1 %4668  ;;  %v7954_v29 = vmul.f32 0.00390625, %v4512_v21  ;;  %v5024_v33 = vmul.f32 %v6173_v46, %v4896_v62 }
 0x4d0   : > { %v5025_v4 = vmul.f32 %v6173_v46, %v4897_v18  ;;  %v4949_v26 = vadd.f32 1e-08, %v4853_v53  ;;  %v4854_v61 = vmul.f32 0.003921569, %v4821_v12  ;;  %v4790_v37 = vsub.f32 %v4669_v1, %v4758_v22 }
 0x4d1   : > { %5218 = vst [vmem:[%s7796_s20 + $0xd0] sm:$0xff] %v5154_v51  ;;  %5219 = vst [vmem:[%s7796_s20 + $0xd8] sm:$0xff] %v5155_v38  ;;  %v4759_v3 = vmul.f32 %v7954_v29, %v4512_v21  ;;  %v5090_v35 = vmul.f32 %v7765_v56, %v5024_v33  ;;  %v4903_v51 = vsub.f32 %v7540_v50, %v7926_v42 }
 0x4d2   : > { %v5091_v63 = vmul.f32 %v7765_v56, %v5025_v4  ;;  %v4672_v17 = vpop.xlane.xlu0 %4671  ;;  %6178 = vrsqrt.f32 %v4949_v26  ;;  %v4950_v27 = vadd.f32 1e-08, %v4854_v61  ;;  %v4822_v23 = vmax.f32 %v4790_v37, 0.0 }
 0x4d3   : > { %v4515_v44 = vpop.xlane.xlu1 %4514  ;;  %v6175_v30 = vpop.eup %6174  ;;  %v4791_v10 = vsub.f32 %v4672_v17, %v4759_v3  ;;  %v5156_v57 = vadd.f32 %v7771_v8, %v5090_v35  ;;  %v4904_v22 = vsub.f32 %v7557_v11, %v7930_v59  ;;  %v8299_v17 = vld [vmem:[#allocation15_spill] sm:$0xff] }
 0x4d4   : > { %v5157_v43 = vadd.f32 %v7771_v8, %v5091_v63  ;;  %v5026_v40 = vmul.f32 %v6175_v30, %v4898_v19  ;;  %v5027_v7 = vmul.f32 %v6175_v30, %v4899_v9  ;;  %v7968_v54 = vmul.f32 0.00390625, %v4515_v44 }
 0x4d5   : > { %v4823_v0 = vmax.f32 %v4791_v10, 0.0  ;;  %5220 = vst [vmem:[%s7796_s20 + $0xe0] sm:$0xff] %v5156_v57  ;;  %6180 = vrsqrt.f32 %v4950_v27  ;;  %v4855_v47 = vmul.f32 0.003921569, %v4822_v23  ;;  %v4905_v63 = vsub.f32 %v7561_v13, %v7930_v59  ;;  %v8300_v13 = vld [vmem:[#allocation16_spill] sm:$0xff] }
 0x4d6   : > { %5221 = vst [vmem:[%s7796_s20 + $0xe8] sm:$0xff] %v5157_v43  ;;  %v5092_v48 = vmul.f32 %v7765_v56, %v5026_v40  ;;  %v5093_v15 = vmul.f32 %v7765_v56, %v5027_v7  ;;  %v4518_v52 = vpop.xlane.xlu0 %4517  ;;  %v6177_v25 = vpop.eup %6176  ;;  %v4760_v24 = vmul.f32 %v7968_v54, %v4515_v44  ;;  %v4906_v44 = vsub.f32 %v8299_v17, %v7952_v36  ;;  %v8305_v17 = vld [vmem:[#allocation21_spill] sm:$0xff] }
 0x4d7   : > { %v4675_v45 = vpop.xlane.xlu1 %4674  ;;  %v4856_v58 = vmul.f32 0.003921569, %v4823_v0  ;;  %v5028_v32 = vmul.f32 %v6177_v25, %v4900_v14  ;;  %v5029_v5 = vmul.f32 %v6177_v25, %v4901_v34  ;;  %v4951_v41 = vadd.f32 1e-08, %v4855_v47  ;;  %v8301_v25 = vld [vmem:[#allocation17_spill] sm:$0xff] }
 0x4d8   : > { %v5158_v6 = vadd.f32 %v7771_v8, %v5092_v48  ;;  %v5159_v55 = vadd.f32 %v7771_v8, %v5093_v15  ;;  %v4792_v49 = vsub.f32 %v4675_v45, %v4760_v24  ;;  %v7985_v20 = vmul.f32 0.00390625, %v4518_v52 }
 0x4d9   : > { %v4952_v2 = vadd.f32 1e-08, %v4856_v58  ;;  %v5094_v39 = vmul.f32 %v7765_v56, %v5028_v32  ;;  %v5095_v28 = vmul.f32 %v7765_v56, %v5029_v5  ;;  %6182 = vrsqrt.f32 %v4951_v41  ;;  %v8302_v58 = vld [vmem:[#allocation18_spill] sm:$0xff] }
 0x4da   : > { %5222 = vst [vmem:[%s7796_s20 + $0xf0] sm:$0xff] %v5158_v6  ;;  %5223 = vst [vmem:[%s7796_s20 + $0xf8] sm:$0xff] %v5159_v55  ;;  %v4678_v62 = vpop.xlane.xlu0 %4677  ;;  %v4824_v21 = vmax.f32 %v4792_v49, 0.0  ;;  %v4761_v53 = vmul.f32 %v7985_v20, %v4518_v52  ;;  %v4907_v59 = vsub.f32 %v8300_v13, %v7952_v36  ;;  %v4908_v47 = vsub.f32 %v8301_v25, %v7954_v29 }
 0x4db   : > { %v4521_v18 = vpop.xlane.xlu1 %4520  ;;  %v5160_v16 = vadd.f32 %v7771_v8, %v5094_v39  ;;  %v5161_v1 = vadd.f32 %v7771_v8, %v5095_v28  ;;  %6184 = vrsqrt.f32 %v4952_v2  ;;  %v4909_v36 = vsub.f32 %v8302_v58, %v7954_v29 }
 0x4dc   : > { %v7991_v38 = vmul.f32 0.00390625, %v4521_v18  ;;  %v6179_v46 = vpop.eup %6178  ;;  %v4857_v12 = vmul.f32 0.003921569, %v4824_v21  ;;  %v4793_v19 = vsub.f32 %v4678_v62, %v4761_v53 }
 0x4dd   : > { %5224 = vst [vmem:[%s7796_s20 + $0x100] sm:$0xff] %v5160_v16  ;;  %5225 = vst [vmem:[%s7796_s20 + $0x108] sm:$0xff] %v5161_v1  ;;  %v5030_v31 = vmul.f32 %v6179_v46, %v4902_v60  ;;  %v5031_v4 = vmul.f32 %v6179_v46, %v4903_v51 }
 0x4de   : > { %v4762_v33 = vmul.f32 %v7991_v38, %v4521_v18  ;;  %v4524_v42 = vpop.xlane.xlu0 %4523  ;;  %v4953_v61 = vadd.f32 1e-08, %v4857_v12  ;;  %v4825_v30 = vmax.f32 %v4793_v19, 0.0  ;;  %v8303_v19 = vld [vmem:[#allocation19_spill] sm:$0xff] }
 0x4df   : > { %v4681_v50 = vpop.xlane.xlu1 %4680  ;;  %v8001_v26 = vmul.f32 0.00390625, %v4524_v42  ;;  %v5096_v3 = vmul.f32 %v7765_v56, %v5030_v31  ;;  %v5097_v35 = vmul.f32 %v7765_v56, %v5031_v4  ;;  %v6181_v37 = vpop.eup %6180 }
 0x4e0   : > { %v4794_v9 = vsub.f32 %v4681_v50, %v4762_v33  ;;  %v5032_v40 = vmul.f32 %v6181_v37, %v4904_v22  ;;  %v5033_v7 = vmul.f32 %v6181_v37, %v4905_v63  ;;  %6186 = vrsqrt.f32 %v4953_v61 }
 0x4e1   : > { %v4763_v10 = vmul.f32 %v8001_v26, %v4524_v42  ;;  %v5162_v57 = vadd.f32 %v7771_v8, %v5096_v3  ;;  %v5163_v43 = vadd.f32 %v7771_v8, %v5097_v35  ;;  %v4858_v0 = vmul.f32 0.003921569, %v4825_v30  ;;  %v8304_v3 = vld [vmem:[#allocation20_spill] sm:$0xff]  ;;  %v8306_v30 = vld [vmem:[#allocation22_spill] sm:$0xff] }
 0x4e2   : > { %v4826_v11 = vmax.f32 %v4794_v9, 0.0  ;;  %v4684_v27 = vpop.xlane.xlu0 %4683  ;;  %v5098_v15 = vmul.f32 %v7765_v56, %v5032_v40  ;;  %v5099_v14 = vmul.f32 %v7765_v56, %v5033_v7  ;;  %v4910_v9 = vsub.f32 %v8303_v19, %v7968_v54 }
 0x4e3   : > { %v4527_v23 = vpop.xlane.xlu1 %4526  ;;  %5226 = vst [vmem:[%s7796_s20 + $0x110] sm:$0xff] %v5162_v57  ;;  %5227 = vst [vmem:[%s7796_s20 + $0x118] sm:$0xff] %v5163_v43  ;;  %v4795_v34 = vsub.f32 %v4684_v27, %v4763_v10  ;;  %v6183_v52 = vpop.eup %6182  ;;  %v4954_v24 = vadd.f32 1e-08, %v4858_v0  ;;  %v4911_v35 = vsub.f32 %v8304_v3, %v7968_v54 }
 0x4e4   : > { %v4859_v48 = vmul.f32 0.003921569, %v4826_v11  ;;  %v8018_v45 = vmul.f32 0.00390625, %v4527_v23  ;;  %v5164_v32 = vadd.f32 %v7771_v8, %v5098_v15  ;;  %v5165_v5 = vadd.f32 %v7771_v8, %v5099_v14 }
 0x4e5   : > { %v6185_v55 = vpop.eup %6184  ;;  %v5034_v41 = vmul.f32 %v6183_v52, %v4906_v44  ;;  %v5035_v2 = vmul.f32 %v6183_v52, %v4907_v59  ;;  %6188 = vrsqrt.f32 %v4954_v24  ;;  %v4827_v18 = vmax.f32 %v4795_v34, 0.0  ;;  %v8308_v59 = vld [vmem:[#allocation24_spill] sm:$0xff] }
 0x4e6   : > { %v4955_v6 = vadd.f32 1e-08, %v4859_v48  ;;  %v4530_v28 = vpop.xlane.xlu0 %4529  ;;  %v5036_v49 = vmul.f32 %v6185_v55, %v4908_v47  ;;  %v5037_v62 = vmul.f32 %v6185_v55, %v4909_v36  ;;  %5228 = vst [vmem:[%s7796_s20 + $0x120] sm:$0xff] %v5164_v32  ;;  %5229 = vst [vmem:[%s7796_s20 + $0x128] sm:$0xff] %v5165_v5  ;;  %v4764_v51 = vmul.f32 %v8018_v45, %v4527_v23  ;;  %v8307_v23 = vld [vmem:[#allocation23_spill] sm:$0xff]  ;;  %v8309_v47 = vld [vmem:[#allocation25_spill] sm:$0xff] }
 0x4e7   : > { %v4687_v39 = vpop.xlane.xlu1 %4686  ;;  %v5100_v60 = vmul.f32 %v7765_v56, %v5034_v41  ;;  %v5101_v29 = vmul.f32 %v7765_v56, %v5035_v2  ;;  %v4860_v21 = vmul.f32 0.003921569, %v4827_v18  ;;  %v8037_v22 = vmul.f32 0.00390625, %v4530_v28  ;;  %v8310_v36 = vld [vmem:[#allocation26_spill] sm:$0xff] }
 0x4e8   : > { %6190 = vrsqrt.f32 %v4955_v6  ;;  %v5102_v16 = vmul.f32 %v7765_v56, %v5036_v49  ;;  %v5103_v1 = vmul.f32 %v7765_v56, %v5037_v62  ;;  %v4796_v33 = vsub.f32 %v4687_v39, %v4764_v51 }
 0x4e9   : > { %v5166_v46 = vadd.f32 %v7771_v8, %v5100_v60  ;;  %v5167_v53 = vadd.f32 %v7771_v8, %v5101_v29  ;;  %v4956_v42 = vadd.f32 1e-08, %v4860_v21  ;;  %v4912_v44 = vsub.f32 %v8305_v17, %v7985_v20 }
 0x4ea   : > { %v4690_v31 = vpop.xlane.xlu0 %4689  ;;  %v5168_v12 = vadd.f32 %v7771_v8, %v5102_v16  ;;  %v5169_v50 = vadd.f32 %v7771_v8, %v5103_v1  ;;  %v4828_v63 = vmax.f32 %v4796_v33, 0.0  ;;  %v6187_v37 = vpop.eup %6186  ;;  %v4913_v11 = vsub.f32 %v8306_v30, %v7985_v20 }
 0x4eb   : > { %v4533_v4 = vpop.xlane.xlu1 %4532  ;;  %5230 = vst [vmem:[%s7796_s20 + $0x130] sm:$0xff] %v5166_v46  ;;  %5231 = vst [vmem:[%s7796_s20 + $0x138] sm:$0xff] %v5167_v53  ;;  %6192 = vrsqrt.f32 %v4956_v42  ;;  %v4765_v10 = vmul.f32 %v8037_v22, %v4530_v28  ;;  %v5038_v57 = vmul.f32 %v6187_v37, %v4910_v9  ;;  %v5039_v43 = vmul.f32 %v6187_v37, %v4911_v35 }
 0x4ec   : > { %v8045_v61 = vmul.f32 0.00390625, %v4533_v4  ;;  %5232 = vst [vmem:[%s7796_s20 + $0x140] sm:$0xff] %v5168_v12  ;;  %5233 = vst [vmem:[%s7796_s20 + $0x148] sm:$0xff] %v5169_v50  ;;  %v4861_v40 = vmul.f32 0.003921569, %v4828_v63  ;;  %v4914_v13 = vsub.f32 %v8307_v23, %v7991_v38  ;;  %v4915_v0 = vsub.f32 %v8308_v59, %v7991_v38 }
 0x4ed   : > { %v4797_v48 = vsub.f32 %v4690_v31, %v4765_v10  ;;  %v5104_v20 = vmul.f32 %v7765_v56, %v5038_v57  ;;  %v5105_v14 = vmul.f32 %v7765_v56, %v5039_v43  ;;  %v4916_v58 = vsub.f32 %v8309_v47, %v8001_v26 }
 0x4ee   : > { %v4766_v54 = vmul.f32 %v8045_v61, %v4533_v4  ;;  %v4536_v27 = vpop.xlane.xlu0 %4535  ;;  %v4957_v34 = vadd.f32 1e-08, %v4861_v40  ;;  %v4917_v24 = vsub.f32 %v8310_v36, %v8001_v26  ;;  %v8313_v36 = vld [vmem:[#allocation29_spill] sm:$0xff] }
 0x4ef   : > { %v4693_v7 = vpop.xlane.xlu1 %4692  ;;  %v8059_v15 = vmul.f32 0.00390625, %v4536_v27  ;;  %v6189_v25 = vpop.eup %6188  ;;  %v4829_v6 = vmax.f32 %v4797_v48, 0.0  ;;  %v5170_v32 = vadd.f32 %v7771_v8, %v5104_v20  ;;  %v5171_v5 = vadd.f32 %v7771_v8, %v5105_v14 }
 0x4f0   : > { %v4798_v52 = vsub.f32 %v4693_v7, %v4766_v54  ;;  %v5040_v41 = vmul.f32 %v6189_v25, %v4912_v44  ;;  %v5041_v2 = vmul.f32 %v6189_v25, %v4913_v11  ;;  %6194 = vrsqrt.f32 %v4957_v34  ;;  %v8311_v54 = vld [vmem:[#allocation27_spill] sm:$0xff] }
 0x4f1   : > { %v4767_v38 = vmul.f32 %v8059_v15, %v4536_v27  ;;  %v4862_v18 = vmul.f32 0.003921569, %v4829_v6  ;;  %5234 = vst [vmem:[%s7796_s20 + $0x150] sm:$0xff] %v5170_v32  ;;  %5235 = vst [vmem:[%s7796_s20 + $0x158] sm:$0xff] %v5171_v5  ;;  %v4918_v7 = vsub.f32 %v8311_v54, %v8018_v45  ;;  %v8312_v27 = vld [vmem:[#allocation28_spill] sm:$0xff]  ;;  %v8314_v5 = vld [vmem:[#allocation30_spill] sm:$0xff] }
 0x4f2   : > { %v6191_v55 = vpop.eup %6190  ;;  %v4696_v39 = vpop.xlane.xlu0 %4695  ;;  %v5106_v26 = vmul.f32 %v7765_v56, %v5040_v41  ;;  %v5107_v60 = vmul.f32 %v7765_v56, %v5041_v2  ;;  %v4830_v29 = vmax.f32 %v4798_v52, 0.0  ;;  %v4919_v23 = vsub.f32 %v8312_v27, %v8018_v45 }
 0x4f3   : > { %v4539_v28 = vpop.xlane.xlu1 %4538  ;;  %v5042_v49 = vmul.f32 %v6191_v55, %v4914_v13  ;;  %v5043_v62 = vmul.f32 %v6191_v55, %v4915_v0  ;;  %v4799_v51 = vsub.f32 %v4696_v39, %v4767_v38  ;;  %v4958_v21 = vadd.f32 1e-08, %v4862_v18 }
 0x4f4   : > { %v8076_v46 = vmul.f32 0.00390625, %v4539_v28  ;;  %v5172_v53 = vadd.f32 %v7771_v8, %v5106_v26  ;;  %v5173_v33 = vadd.f32 %v7771_v8, %v5107_v60  ;;  %v4863_v31 = vmul.f32 0.003921569, %v4830_v29  ;;  %v8315_v60 = vld [vmem:[#allocation31_spill] sm:$0xff] }
 0x4f5   : > { %v5108_v16 = vmul.f32 %v7765_v56, %v5042_v49  ;;  %v5109_v1 = vmul.f32 %v7765_v56, %v5043_v62  ;;  %v4831_v4 = vmax.f32 %v4799_v51, 0.0  ;;  %v6193_v42 = vpop.eup %6192  ;;  %6196 = vrsqrt.f32 %v4958_v21  ;;  %v8316_v51 = vld [vmem:[#allocation32_spill] sm:$0xff] }
 0x4f6   : > { %v4542_v50 = vpop.xlane.xlu0 %4541  ;;  %v4768_v3 = vmul.f32 %v8076_v46, %v4539_v28  ;;  %5236 = vst [vmem:[%s7796_s20 + $0x160] sm:$0xff] %v5172_v53  ;;  %5237 = vst [vmem:[%s7796_s20 + $0x168] sm:$0xff] %v5173_v33  ;;  %v5044_v35 = vmul.f32 %v6193_v42, %v4916_v58  ;;  %v5045_v63 = vmul.f32 %v6193_v42, %v4917_v24  ;;  %v4959_v37 = vadd.f32 1e-08, %v4863_v31  ;;  %v8317_v31 = vld [vmem:[#allocation33_spill] sm:$0xff] }
 0x4f7   : > { %v4699_v12 = vpop.xlane.xlu1 %4698  ;;  %v5174_v19 = vadd.f32 %v7771_v8, %v5108_v16  ;;  %v5175_v9 = vadd.f32 %v7771_v8, %v5109_v1  ;;  %v4864_v17 = vmul.f32 0.003921569, %v4831_v4  ;;  %v8087_v30 = vmul.f32 0.00390625, %v4542_v50 }
 0x4f8   : > { %v4800_v44 = vsub.f32 %v4699_v12, %v4768_v3  ;;  %v5110_v11 = vmul.f32 %v7765_v56, %v5044_v35  ;;  %v5111_v10 = vmul.f32 %v7765_v56, %v5045_v63  ;;  %6198 = vrsqrt.f32 %v4959_v37  ;;  %v8318_v12 = vld [vmem:[#allocation34_spill] sm:$0xff] }
 0x4f9   : > { %5238 = vst [vmem:[%s7796_s20 + $0x170] sm:$0xff] %v5174_v19  ;;  %5239 = vst [vmem:[%s7796_s20 + $0x178] sm:$0xff] %v5175_v9  ;;  %v4960_v57 = vadd.f32 1e-08, %v4864_v17  ;;  %v4769_v59 = vmul.f32 %v8087_v30, %v4542_v50  ;;  %v4920_v24 = vsub.f32 %v8313_v36, %v8037_v22  ;;  %v4921_v41 = vsub.f32 %v8314_v5, %v8037_v22  ;;  %v8324_v5 = vld [vmem:[#allocation40_spill] sm:$0xff] }
 0x4fa   : > { %v4702_v43 = vpop.xlane.xlu0 %4701  ;;  %v4832_v13 = vmax.f32 %v4800_v44, 0.0  ;;  %v5176_v0 = vadd.f32 %v7771_v8, %v5110_v11  ;;  %v5177_v48 = vadd.f32 %v7771_v8, %v5111_v10  ;;  %v6195_v14 = vpop.eup %6194  ;;  %v4922_v29 = vsub.f32 %v8315_v60, %v8045_v61 }
 0x4fb   : > { %v4545_v40 = vpop.xlane.xlu1 %4544  ;;  %6200 = vrsqrt.f32 %v4960_v57  ;;  %v4801_v52 = vsub.f32 %v4702_v43, %v4769_v59  ;;  %v5046_v25 = vmul.f32 %v6195_v14, %v4918_v7  ;;  %v5047_v47 = vmul.f32 %v6195_v14, %v4919_v23  ;;  %v8320_v7 = vld [vmem:[#allocation36_spill] sm:$0xff] }
 0x4fc   : > { %v8098_v20 = vmul.f32 0.00390625, %v4545_v40  ;;  %v4865_v34 = vmul.f32 0.003921569, %v4832_v13  ;;  %5240 = vst [vmem:[%s7796_s20 + $0x180] sm:$0xff] %v5176_v0  ;;  %5241 = vst [vmem:[%s7796_s20 + $0x188] sm:$0xff] %v5177_v48  ;;  %v4923_v16 = vsub.f32 %v8316_v51, %v8045_v61  ;;  %v4924_v4 = vsub.f32 %v8317_v31, %v8059_v15 }
 0x4fd   : > { %v4833_v38 = vmax.f32 %v4801_v52, 0.0  ;;  %v5112_v55 = vmul.f32 %v7765_v56, %v5046_v25  ;;  %v5113_v32 = vmul.f32 %v7765_v56, %v5047_v47  ;;  %v4925_v50 = vsub.f32 %v8318_v12, %v8059_v15  ;;  %v8322_v25 = vld [vmem:[#allocation38_spill] sm:$0xff] }
 0x4fe   : > { %v4770_v58 = vmul.f32 %v8098_v20, %v4545_v40  ;;  %v4961_v6 = vadd.f32 1e-08, %v4865_v34  ;;  %v8319_v40 = vld [vmem:[#allocation35_spill] sm:$0xff]  ;;  %v4927_v27 = vsub.f32 %v8320_v7, %v8076_v46  ;;  %v4929_v47 = vsub.f32 %v8322_v25, %v8087_v30 }
 0x4ff   : > { %v4705_v45 = vpop.xlane.xlu1 %4704  ;;  %v6197_v39 = vpop.eup %6196  ;;  %v4866_v28 = vmul.f32 0.003921569, %v4833_v38  ;;  %v5178_v49 = vadd.f32 %v7771_v8, %v5112_v55  ;;  %v5179_v62 = vadd.f32 %v7771_v8, %v5113_v32  ;;  %v4926_v54 = vsub.f32 %v8319_v40, %v8076_v46  ;;  %v8321_v46 = vld [vmem:[#allocation37_spill] sm:$0xff]  ;;  %v8323_v32 = vld [vmem:[#allocation39_spill] sm:$0xff] }
 0x500   : > { %v4802_v2 = vsub.f32 %v4705_v45, %v4770_v58  ;;  %6202 = vrsqrt.f32 %v4961_v6  ;;  %v5048_v18 = vmul.f32 %v6197_v39, %v4920_v24  ;;  %v5049_v26 = vmul.f32 %v6197_v39, %v4921_v41 }
 0x501   : > { %v4962_v1 = vadd.f32 1e-08, %v4866_v28  ;;  %5242 = vst [vmem:[%s7796_s20 + $0x190] sm:$0xff] %v5178_v49  ;;  %5243 = vst [vmem:[%s7796_s20 + $0x198] sm:$0xff] %v5179_v62  ;;  %v4928_v52 = vsub.f32 %v8321_v46, %v8087_v30  ;;  %v4930_v30 = vsub.f32 %v8323_v32, %v8098_v20  ;;  %v4931_v41 = vsub.f32 %v8324_v5, %v8098_v20 }
 0x502   : > { %v4834_v21 = vmax.f32 %v4802_v2, 0.0  ;;  %v6199_v53 = vpop.eup %6198  ;;  %v5114_v22 = vmul.f32 %v7765_v56, %v5048_v18  ;;  %v5115_v33 = vmul.f32 %v7765_v56, %v5049_v26 }
 0x503   : > { %v5050_v42 = vmul.f32 %v6199_v53, %v4922_v29  ;;  %v5051_v19 = vmul.f32 %v6199_v53, %v4923_v16  ;;  %6204 = vrsqrt.f32 %v4962_v1 }
 0x504   : > { %v4867_v61 = vmul.f32 0.003921569, %v4834_v21  ;;  %v5180_v3 = vadd.f32 %v7771_v8, %v5114_v22  ;;  %v5181_v35 = vadd.f32 %v7771_v8, %v5115_v33 }
 0x505   : > { %v6201_v9 = vpop.eup %6200  ;;  %v5116_v63 = vmul.f32 %v7765_v56, %v5050_v42  ;;  %v5117_v37 = vmul.f32 %v7765_v56, %v5051_v19 }
 0x506   : > { %v5052_v17 = vmul.f32 %v6201_v9, %v4924_v4  ;;  %v5053_v44 = vmul.f32 %v6201_v9, %v4925_v50  ;;  %5244 = vst [vmem:[%s7796_s20 + $0x1a0] sm:$0xff] %v5180_v3  ;;  %5245 = vst [vmem:[%s7796_s20 + $0x1a8] sm:$0xff] %v5181_v35  ;;  %v4963_v15 = vadd.f32 1e-08, %v4867_v61 }
 0x507   : > { %v5182_v11 = vadd.f32 %v7771_v8, %v5116_v63  ;;  %v5183_v10 = vadd.f32 %v7771_v8, %v5117_v37 }
 0x508   : > { %v5118_v57 = vmul.f32 %v7765_v56, %v5052_v17  ;;  %v5119_v43 = vmul.f32 %v7765_v56, %v5053_v44  ;;  %6206 = vrsqrt.f32 %v4963_v15 }
 0x509   : > { %5246 = vst [vmem:[%s7796_s20 + $0x1b0] sm:$0xff] %v5182_v11  ;;  %5247 = vst [vmem:[%s7796_s20 + $0x1b8] sm:$0xff] %v5183_v10 }
 0x50a   : > { %v6203_v23 = vpop.eup %6202  ;;  %v5184_v13 = vadd.f32 %v7771_v8, %v5118_v57  ;;  %v5185_v59 = vadd.f32 %v7771_v8, %v5119_v43 }
 0x50b   : > { %v5054_v0 = vmul.f32 %v6203_v23, %v4926_v54  ;;  %v5055_v48 = vmul.f32 %v6203_v23, %v4927_v27 }
 0x50c   : > { %5248 = vst [vmem:[%s7796_s20 + $0x1c0] sm:$0xff] %v5184_v13  ;;  %5249 = vst [vmem:[%s7796_s20 + $0x1c8] sm:$0xff] %v5185_v59 }
 0x50d   : > { %v5120_v14 = vmul.f32 %v7765_v56, %v5054_v0  ;;  %v5121_v34 = vmul.f32 %v7765_v56, %v5055_v48  ;;  %v6205_v58 = vpop.eup %6204 }
 0x50e   : > { %v5056_v24 = vmul.f32 %v6205_v58, %v4928_v52  ;;  %v5057_v6 = vmul.f32 %v6205_v58, %v4929_v47 }
 0x50f   : > { %v5186_v45 = vadd.f32 %v7771_v8, %v5120_v14  ;;  %v5187_v36 = vadd.f32 %v7771_v8, %v5121_v34 }
 0x510   : > { %v5122_v38 = vmul.f32 %v7765_v56, %v5056_v24  ;;  %v5123_v55 = vmul.f32 %v7765_v56, %v5057_v6 }
 0x511   : > { %5250 = vst [vmem:[%s7796_s20 + $0x1d0] sm:$0xff] %v5186_v45  ;;  %5251 = vst [vmem:[%s7796_s20 + $0x1d8] sm:$0xff] %v5187_v36 }
 0x512   : > { %v6207_v2 = vpop.eup %6206  ;;  %v5188_v39 = vadd.f32 %v7771_v8, %v5122_v38  ;;  %v5189_v28 = vadd.f32 %v7771_v8, %v5123_v55 }
 0x513   : > { %v5058_v49 = vmul.f32 %v6207_v2, %v4930_v30  ;;  %v5059_v62 = vmul.f32 %v6207_v2, %v4931_v41 }
 0x514   : > { %5252 = vst [vmem:[%s7796_s20 + $0x1e0] sm:$0xff] %v5188_v39  ;;  %5253 = vst [vmem:[%s7796_s20 + $0x1e8] sm:$0xff] %v5189_v28 }
 0x515   : > { %v5124_v18 = vmul.f32 %v7765_v56, %v5058_v49  ;;  %v5125_v26 = vmul.f32 %v7765_v56, %v5059_v62 }
 0x517   : > { %v5190_v20 = vadd.f32 %v7771_v8, %v5124_v18  ;;  %v5191_v60 = vadd.f32 %v7771_v8, %v5125_v26 }
 0x519   : > { %5254 = vst [vmem:[%s7796_s20 + $0x1f0] sm:$0xff] %v5190_v20  ;;  %5255 = vst [vmem:[%s7796_s20 + $0x1f8] sm:$0xff] %v5191_v60 }
 0x51a   : > { %6372 = shalt.err (!%p6369_p11)
}
 0x51b   : > { %s6373_s16 = scalar_lea.hbm %s8170_s12, 8192  ;;  %s6377_s18 = scalar_lea.hbm %s8232_s7, 16384 }
 0x51c   : > { %p6374_p0 = scmp.ne.s32.totalorder %s8170_s12, %s6373_s16  ;;  %p6378_p6 = scmp.lt.u32.totalorder %s8170_s12, %s8232_s7 }
 0x51d   : > { %p6379_p7 = scmp.lt.u32.totalorder %s6377_s18, %s6373_s16  ;;  %p6381_p8 = scmp.lt.u32.totalorder %s6373_s16, %s8170_s12 }
 0x51e   : > { %p6375_p4 = pnand %p6374_p0, %p8325_p12 }
 0x51f   : > { %p6380_p2 = por %p6379_p7, %p6378_p6 }
 0x520   : > { %p6376_p13 = pneg %p6375_p4 }
 0x521   : > { %p6382_p1 = por %p6381_p8, %p6380_p2 }
 0x523   : > { %p6383_p10 = pnand %p6382_p1, %p6376_p13 }
 0x525   : > { %6386 = shalt.err (!%p6383_p10)
}
 0x526   : > { %s6457_s17 = smov 256   ;;  %s6458_s25 = smov 16  }
 0x527   : > { %5871 = dma.vmem_to_hbm [thread:$0]  (%p8325_p12), %s8172_s26, 8192, %s8170_s12, %s5257_s8, %s6457_s17, %s6457_s17, %s6458_s25  }
 0x528 PF: > { %s5286_s11 = sand.u32 1, %s6425_s28   ;;  %p8326_p3 = scmp.ne.s32.totalorder %s8266_s14, 0 }
 0x529   : > { %p8327_p5 = scmp.ge.s32.totalorder %s6445_s0, 2  ;;  %s5287_s13 = scalar_lea.sflag [#allocation7], %s5286_s11 }
 0x52b   : > { %p5885_p9 = pnand %p8327_p5, %p8326_p3 }
 0x52d   : > { %6420 = dma.done.wait (!%p5885_p9), %s5287_s13, 8192  }
 0x52e   : > { %6422 = vsyncadd (!%p5885_p9), %s5287_s13, 4294959104  ;;  %s26_s0 = sadd.s32 1, %s6445_s0   ;;  %s8328_s28 = smov %s6429_s29 }
 0x52f   : > { %p23_p11 = scmp.ge.s32.totalorder %s26_s0, 4   ;;  %s8329_s29 = smov %s6433_s30 }
 0x530   : > { %s8330_s30 = smov %s6647_s27  ;;  %s8331_s8 = smov %s6441_s9 }
 0x531   : > { %s8332_s9 = smov %s8334_s22  ;;  %25 = sbr.rel (!%p23_p11) target bundleno = 10 (0xa), region = 114 }
 0x538   :  { %5292 = vsyncpa [#allocation6], 1 }
 0x539   :  { %5294 = vsyncpa [#allocation6 + $0x1], 1 }
 0x53a   :  { %5295 = vsyncpa [#allocation9], 1 }
 0x53b   :  { %5296 = vsyncpa [#allocation7], 1 }
 0x53c   :  { %5298 = vsyncpa [#allocation7 + $0x1], 1 }

</bundles_post_ra>
